<compile_context>
chip_gen: v5e
topology: v5e:2x2
jax: 0.10.0
libtpu: 0.0.40
codegen_flags: <defaults>
</compile_context>

<pallas_src>
import functools

import jax
import jax.numpy as jnp
from jax.experimental import pallas as pl
from jax.experimental.pallas import tpu as pltpu


_VMEM_LIMIT = 64 * 1024 * 1024   # upper cap only; per-tile usage is far below.


def _round_up(x, m):
    return (x + m - 1) // m * m


# ----------------------------------------------------------------------------
# Kernels
# ----------------------------------------------------------------------------
def _conv1_kernel(x0_ref, x1_ref, mask_ref, w1_ref, wsk_ref, bsk_ref,
                  y1_ref, skip_ref, sum1_ref, sq1_ref,
                  xwin_ref, *, T, Wp8):
    """conv1 (3x3) + 1x1 skip conv + masked BN1 partial sums for one row tile."""
    g = pl.program_id(0)

    @pl.when(g == 0)
    def _init():
        sum1_ref[...] = jnp.zeros_like(sum1_ref)
        sq1_ref[...] = jnp.zeros_like(sq1_ref)

    # Stage the two consecutive input blocks into one contiguous (2T, Cin)
    # window so the nine 3x3 taps become row-shifted slices of a single buffer.
    xwin_ref[0:T, :] = x0_ref[...].astype(xwin_ref.dtype)
    xwin_ref[T:2 * T, :] = x1_ref[...].astype(xwin_ref.dtype)

    cout = y1_ref.shape[1]
    acc = jnp.zeros((T, cout), jnp.float32)
    for dy in range(3):
        for dx in range(3):
            off = dy * Wp8 + dx
            acc = acc + jnp.dot(
                xwin_ref[off:off + T, :].astype(jnp.bfloat16),
                w1_ref[dy * 3 + dx],
                preferred_element_type=jnp.float32)
    # conv1's bias is dropped: it is cancelled exactly by bn1's mean subtraction.

    mask = mask_ref[...]                     # (T, 1) -> one lane broadcast, reused
    accm = acc * mask
    sum1_ref[...] += jnp.sum(accm, axis=0, keepdims=True)
    sq1_ref[...] += jnp.sum(acc * accm, axis=0, keepdims=True)
    y1_ref[...] = acc.astype(y1_ref.dtype)

    # 1x1 skip conv ("skip_other": the module's `conv1.stride == 1` check
    # compares a tuple to an int and is always False).
    ctr = Wp8 + 1
    skip = jnp.dot(xwin_ref[ctr:ctr + T, :].astype(jnp.bfloat16), wsk_ref[...],
                   preferred_element_type=jnp.float32) + bsk_ref[...]
    skip_ref[...] = skip.astype(skip_ref.dtype)


def _conv2_kernel(y1a_ref, y1b_ref, y1c_ref, ma_ref, mb_ref, mc_ref,
                  w2_ref, sc1_ref, sh1_ref,
                  y2_ref, sum2_ref, sq2_ref,
                  hwin_ref, *, T, Wp8):
    """bn1 affine + ReLU applied on the fly, conv2 (3x3), masked BN2 partial sums."""
    i = pl.program_id(0)

    @pl.when(i == 0)
    def _init():
        sum2_ref[...] = jnp.zeros_like(sum2_ref)
        sq2_ref[...] = jnp.zeros_like(sq2_ref)

    sc1 = sc1_ref[...]                       # (1, Cout) folded bn1 scale
    sh1 = sh1_ref[...]                       # (1, Cout) folded bn1 shift

    def _bn1_relu(y_ref, m_ref):
        h = y_ref[...].astype(jnp.float32) * sc1 + sh1
        # mask multiply == zero padding of conv2's input
        return jnp.maximum(h, 0.0) * m_ref[...]

    # Three consecutive blocks -> contiguous (3T, Cout) window around this tile.
    hwin_ref[0:T, :] = _bn1_relu(y1a_ref, ma_ref)
    hwin_ref[T:2 * T, :] = _bn1_relu(y1b_ref, mb_ref)
    hwin_ref[2 * T:3 * T, :] = _bn1_relu(y1c_ref, mc_ref)

    cout = y2_ref.shape[1]
    acc = jnp.zeros((T, cout), jnp.float32)
    for dy in range(3):
        for dx in range(3):
            off = T + (dy - 1) * Wp8 + (dx - 1)
            acc = acc + jnp.dot(
                hwin_ref[off:off + T, :].astype(jnp.bfloat16),
                w2_ref[dy * 3 + dx],
                preferred_element_type=jnp.float32)
    # conv2's bias dropped as well (cancelled by bn2's mean subtraction).

    mask = mb_ref[...]                       # validity mask of this tile's pixels
    accm = acc * mask
    sum2_ref[...] += jnp.sum(accm, axis=0, keepdims=True)
    sq2_ref[...] += jnp.sum(acc * accm, axis=0, keepdims=True)
    y2_ref[...] = acc.astype(y2_ref.dtype)


def _finalize_kernel(y2_ref, skip_ref, sc2_ref, sh2_ref, out_ref):
    """bn2 affine + residual add + final ReLU (pure VPU, 'parallel' grid axis)."""
    h2 = y2_ref[...].astype(jnp.float32) * sc2_ref[...] + sh2_ref[...]
    out_ref[...] = jnp.maximum(h2 + skip_ref[...].astype(jnp.float32), 0.0)


# ----------------------------------------------------------------------------
# Wrapper
# ----------------------------------------------------------------------------
def resblock_forward(x_nchw, params, *, tile_rows=256):
    """ResBlock forward (stride=1 path).  NCHW f32 in / NCHW f32 out."""
    N, Cin, H, W = x_nchw.shape
    Cout = params['w1'].shape[-1]
    eps = 1e-5
    f32, bf16 = jnp.float32, jnp.bfloat16

    Hp = H + 2
    Wp8 = _round_up(W + 2, 8)                # sublane-aligned padded row pitch
    Lp = N * Hp * Wp8                        # flattened padded pixel rows
    # Row tile: must cover the full 3x3 halo (2*Wp8+2 rows) inside two blocks.
    # Re-derive tile_rows per generation when channels are large (v7x: 64 MiB
    # physical VMEM; v5e: raise the 16 MiB default scoped limit, done below).
    T = _round_up(max(2 * Wp8 + 2, tile_rows), 8)
    nt = (Lp + T - 1) // T                   # real output row tiles
    rows_g = (nt + 3) * T                    # guarded arrays: 1 leading zero
                                             # block + data + trailing halo
    n_valid = float(N * H * W)               # pixels entering the BN statistics

    # ---- layout glue (cheap XLA ops) ----
    x_nhwc = jnp.transpose(x_nchw, (0, 2, 3, 1)).astype(f32)
    x_pad = jnp.pad(x_nhwc, ((0, 0), (1, 1), (1, Wp8 - W - 1), (0, 0)))
    xg = jnp.pad(x_pad.reshape(Lp, Cin),
                 ((T, rows_g - T - Lp), (0, 0))).astype(bf16)
    mask = jnp.pad(jnp.ones((N, H, W), f32),
                   ((0, 0), (0, Hp - H), (0, Wp8 - W)))
    mask = jnp.pad(mask.reshape(Lp, 1), ((T, rows_g - T - Lp), (0, 0)))

    w1 = params['w1'].astype(bf16)           # (9, Cin, Cout)
    w2 = params['w2'].astype(bf16)           # (9, Cout, Cout)
    wsk = params['wsk'].astype(bf16)         # (Cin, Cout)
    bsk = params['bsk'].astype(f32)          # (1, Cout)
    g1, be1 = params['g1'].astype(f32), params['be1'].astype(f32)
    g2, be2 = params['g2'].astype(f32), params['be2'].astype(f32)

    # ---- call 1: conv1 + 1x1 skip + masked BN1 partial sums ----------------
    n_g1 = nt + 2                            # leading guard tile + nt + halo tile
    cost1 = pl.CostEstimate(
        flops=2 * n_g1 * T * Cin * Cout * 10, transcendentals=0,
        bytes_accessed=int(2 * n_g1 * T * Cin * 2 + n_g1 * T * 4
                           + 2 * n_g1 * T * Cout * 2))
    y1, skip, s1, q1 = pl.pallas_call(
        functools.partial(_conv1_kernel, T=T, Wp8=Wp8),
        grid=(n_g1,),
        in_specs=[
            pl.BlockSpec((T, Cin), lambda g: (g, 0)),        # xg block g
            pl.BlockSpec((T, Cin), lambda g: (g + 1, 0)),    # xg block g+1 (halo)
            pl.BlockSpec((T, 1), lambda g: (g, 0)),          # validity mask
            pl.BlockSpec((9, Cin, Cout), lambda g: (0, 0, 0)),
            pl.BlockSpec((Cin, Cout), lambda g: (0, 0)),
            pl.BlockSpec((1, Cout), lambda g: (0, 0)),
        ],
        out_specs=(
            pl.BlockSpec((T, Cout), lambda g: (g, 0)),       # conv1 out (bf16)
            pl.BlockSpec((T, Cout), lambda g: (g, 0)),       # skip out  (bf16)
            pl.BlockSpec((1, Cout), lambda g: (0, 0)),       # sum  (resident acc)
            pl.BlockSpec((1, Cout), lambda g: (0, 0)),       # sumsq(resident acc)
        ),
        out_shape=(
            jax.ShapeDtypeStruct((n_g1 * T, Cout), bf16),
            jax.ShapeDtypeStruct((n_g1 * T, Cout), bf16),
            jax.ShapeDtypeStruct((1, Cout), f32),
            jax.ShapeDtypeStruct((1, Cout), f32),
        ),
        scratch_shapes=[pltpu.VMEM((2 * T, Cin), f32)],
        compiler_params=pltpu.CompilerParams(
            dimension_semantics=("arbitrary",),
            vmem_limit_bytes=_VMEM_LIMIT),
        cost_estimate=cost1,
    )(xg, xg, mask, w1, wsk, bsk)

    # ---- fold BN1 into per-channel scale/shift (tiny O(Cout) ops) ----------
    mean1 = s1 / n_valid
    var1 = jnp.maximum(q1 / n_valid - mean1 * mean1, 0.0)   # biased variance
    scale1 = g1 * jax.lax.rsqrt(var1 + eps)
    shift1 = be1 - mean1 * scale1

    # ---- call 2: bn1+ReLU on the fly -> conv2 + masked BN2 partial sums ----
    cost2 = pl.CostEstimate(
        flops=2 * nt * T * Cout * Cout * 9, transcendentals=0,
        bytes_accessed=int(3 * nt * T * Cout * 2 + 3 * nt * T * 4
                           + nt * T * Cout * 2))
    y2, s2, q2 = pl.pallas_call(
        functools.partial(_conv2_kernel, T=T, Wp8=Wp8),
        grid=(nt,),
        in_specs=[
            pl.BlockSpec((T, Cout), lambda i: (i, 0)),       # y1 block i   (halo)
            pl.BlockSpec((T, Cout), lambda i: (i + 1, 0)),   # y1 block i+1 (tile)
            pl.BlockSpec((T, Cout), lambda i: (i + 2, 0)),   # y1 block i+2 (halo)
            pl.BlockSpec((T, 1), lambda i: (i, 0)),
            pl.BlockSpec((T, 1), lambda i: (i + 1, 0)),
            pl.BlockSpec((T, 1), lambda i: (i + 2, 0)),
            pl.BlockSpec((9, Cout, Cout), lambda i: (0, 0, 0)),
            pl.BlockSpec((1, Cout), lambda i: (0, 0)),
            pl.BlockSpec((1, Cout), lambda i: (0, 0)),
        ],
        out_specs=(
            pl.BlockSpec((T, Cout), lambda i: (i, 0)),
            pl.BlockSpec((1, Cout), lambda i: (0, 0)),
            pl.BlockSpec((1, Cout), lambda i: (0, 0)),
        ),
        out_shape=(
            jax.ShapeDtypeStruct((nt * T, Cout), bf16),
            jax.ShapeDtypeStruct((1, Cout), f32),
            jax.ShapeDtypeStruct((1, Cout), f32),
        ),
        scratch_shapes=[pltpu.VMEM((3 * T, Cout), f32)],
        compiler_params=pltpu.CompilerParams(
            dimension_semantics=("arbitrary",),
            vmem_limit_bytes=_VMEM_LIMIT),
        cost_estimate=cost2,
    )(y1, y1, y1, mask, mask, mask, w2, scale1, shift1)

    mean2 = s2 / n_valid
    var2 = jnp.maximum(q2 / n_valid - mean2 * mean2, 0.0)
    scale2 = g2 * jax.lax.rsqrt(var2 + eps)
    shift2 = be2 - mean2 * scale2

    # ---- call 3: bn2 affine + residual add + ReLU (elementwise) ------------
    cost3 = pl.CostEstimate(
        flops=4 * nt * T * Cout, transcendentals=0,
        bytes_accessed=int(nt * T * Cout * (2 + 2 + 4)))
    out_flat = pl.pallas_call(
        _finalize_kernel,
        grid=(nt,),
        in_specs=[
            pl.BlockSpec((T, Cout), lambda i: (i, 0)),       # y2 block i
            pl.BlockSpec((T, Cout), lambda i: (i + 1, 0)),   # skip (guarded layout)
            pl.BlockSpec((1, Cout), lambda i: (0, 0)),
            pl.BlockSpec((1, Cout), lambda i: (0, 0)),
        ],
        out_specs=pl.BlockSpec((T, Cout), lambda i: (i, 0)),
        out_shape=jax.ShapeDtypeStruct((nt * T, Cout), f32),
        compiler_params=pltpu.CompilerParams(
            dimension_semantics=("parallel",),               # megacore on v7x
            vmem_limit_bytes=_VMEM_LIMIT),
        cost_estimate=cost3,
    )(y2, skip, scale2, shift2)

    out = out_flat[:Lp].reshape(N, Hp, Wp8, Cout)[:, :H, :W, :]
    return jnp.transpose(out, (0, 3, 1, 2))                  # back to NCHW


# ----------------------------------------------------------------------------
# Parameters / pure-JAX reference
# ----------------------------------------------------------------------------
def init_params(key, Cin, Cout):
    """Deterministic synthetic parameters (shapes match the nn.Module).

    Conv weights are stored as bf16 (the kernel's MXU dtype); the f32
    reference upcasts them, so both paths consume identical weight values.
    """
    ks = jax.random.split(key, 10)
    s = 0.1
    bf = lambda a: a.astype(jnp.bfloat16)
    return dict(
        w1=bf(jax.random.normal(ks[0], (9, Cin, Cout), jnp.float32) * s),
        b1=jax.random.normal(ks[1], (1, Cout), jnp.float32) * s,   # cancelled by bn1
        g1=1.0 + jax.random.normal(ks[2], (1, Cout), jnp.float32) * s,
        be1=jax.random.normal(ks[3], (1, Cout), jnp.float32) * s,
        w2=bf(jax.random.normal(ks[4], (9, Cout, Cout), jnp.float32) * s),
        b2=jax.random.normal(ks[5], (1, Cout), jnp.float32) * s,   # cancelled by bn2
        g2=1.0 + jax.random.normal(ks[6], (1, Cout), jnp.float32) * s,
        be2=jax.random.normal(ks[7], (1, Cout), jnp.float32) * s,
        wsk=bf(jax.random.normal(ks[8], (Cin, Cout), jnp.float32) * s),
        bsk=jax.random.normal(ks[9], (1, Cout), jnp.float32) * s,
    )


def resblock_ref(x_nchw, p):
    """Pure-JAX f32 reference with the module's semantics (for validation)."""
    x = jnp.transpose(x_nchw, (0, 2, 3, 1)).astype(jnp.float32)

    def conv3(h, w9, b):
        w = w9.astype(jnp.float32).reshape(3, 3, w9.shape[1], w9.shape[2])
        return jax.lax.conv_general_dilated(
            h, w, window_strides=(1, 1), padding=((1, 1), (1, 1)),
            dimension_numbers=('NHWC', 'HWIO', 'NHWC'),
            preferred_element_type=jnp.float32) + b

    def bn(h, g, be):
        mean = jnp.mean(h, axis=(0, 1, 2), keepdims=True)
        var = jnp.mean((h - mean) ** 2, axis=(0, 1, 2), keepdims=True)
        return (h - mean) * jax.lax.rsqrt(var + 1e-5) * g + be

    ident = jnp.einsum('nhwi,io->nhwo', x,
                       p['wsk'].astype(jnp.float32)) + p['bsk']
    h = jax.nn.relu(bn(conv3(x, p['w1'], p['b1']), p['g1'], p['be1']))
    h = bn(conv3(h, p['w2'], p['b2']), p['g2'], p['be2'])
    out = jax.nn.relu(h + ident)
    return jnp.transpose(out, (0, 3, 1, 2))


if __name__ == "__main__":
    key = jax.random.PRNGKey(0)
    kx, kp = jax.random.split(key)
    N, Cin, Cout, H, W = 2, 4, 8, 16, 16

    x = jax.random.normal(kx, (N, Cin, H, W), jnp.float32)
    # Round the test input to bf16-representable values so the bf16 kernel and
    # the f32 reference consume identical inputs.
    x = x.astype(jnp.bfloat16).astype(jnp.float32)
    params = init_params(kp, Cin, Cout)

    out = jax.block_until_ready(jax.jit(resblock_forward)(x, params))
    ref = jax.block_until_ready(resblock_ref(x, params))

    assert out.shape == (N, Cout, H, W), out.shape
    max_err = float(jnp.max(jnp.abs(out - ref)))
    # bf16 activations / MXU operands vs. an f32 reference.
    assert jnp.allclose(out, ref, rtol=2e-2, atol=2e-2), f"max abs err {max_err}"
    print("KERNEL_OK")
</pallas_src>

<mosaic_0001>
module attributes {stable_mosaic.version = 11 : i64} {
  func.func @_conv1_kernel(%arg0: i32, %arg1: memref<256x4xbf16, #tpu.memory_space<vmem>>, %arg2: memref<256x4xbf16, #tpu.memory_space<vmem>>, %arg3: memref<256x1xf32, #tpu.memory_space<vmem>>, %arg4: memref<9x4x8xbf16, #tpu.memory_space<vmem>>, %arg5: memref<4x8xbf16, #tpu.memory_space<vmem>>, %arg6: memref<1x8xf32, #tpu.memory_space<vmem>>, %arg7: memref<256x8xbf16, #tpu.memory_space<vmem>>, %arg8: memref<256x8xbf16, #tpu.memory_space<vmem>>, %arg9: memref<1x8xf32, #tpu.memory_space<vmem>>, %arg10: memref<1x8xf32, #tpu.memory_space<vmem>>, %arg11: memref<512x4xf32, #tpu.memory_space<vmem>>) attributes {dimension_semantics = [#tpu.dimension_semantics<arbitrary>], iteration_bounds = array<i64: 6>, scalar_prefetch = 0 : i64, scratch_operands = 1 : i64, tpu.core_type = #tpu.core_type<tc>, window_params = [{transform_indices = @transform_0, window_bounds = array<i64: 256, 4>}, {transform_indices = @transform_1, window_bounds = array<i64: 256, 4>}, {transform_indices = @transform_2, window_bounds = array<i64: 256, 1>}, {pipeline_mode = #tpu.pipeline_mode<synchronous>, transform_indices = @transform_3, window_bounds = array<i64: 9, 4, 8>}, {pipeline_mode = #tpu.pipeline_mode<synchronous>, transform_indices = @transform_4, window_bounds = array<i64: 4, 8>}, {pipeline_mode = #tpu.pipeline_mode<synchronous>, transform_indices = @transform_5, window_bounds = array<i64: 1, 8>}, {transform_indices = @transform_6, window_bounds = array<i64: 256, 8>}, {transform_indices = @transform_7, window_bounds = array<i64: 256, 8>}, {pipeline_mode = #tpu.pipeline_mode<synchronous>, transform_indices = @transform_8, window_bounds = array<i64: 1, 8>}, {pipeline_mode = #tpu.pipeline_mode<synchronous>, transform_indices = @transform_9, window_bounds = array<i64: 1, 8>}]} {
    %c0_i32 = arith.constant 0 : i32
    %0 = arith.cmpi eq, %arg0, %c0_i32 : i32
    %1 = arith.extui %0 : i1 to i32
    %c0_i32_0 = arith.constant 0 : i32
    %2 = arith.cmpi ne, %1, %c0_i32_0 : i32
    scf.if %2 {
      %cst_70 = arith.constant 0.000000e+00 : f32
      %89 = vector.broadcast %cst_70 : f32 to vector<1x8xf32>
      %c0_71 = arith.constant 0 : index
      %c0_72 = arith.constant 0 : index
      %90 = vector.load %arg9[%c0_71, %c0_72] : memref<1x8xf32, #tpu.memory_space<vmem>>, vector<1x8xf32>
      tpu.vector_store %arg9[%c0_71, %c0_72], %89 {strides = array<i32>} : memref<1x8xf32, #tpu.memory_space<vmem>>, vector<1x8xf32>,
      %cst_73 = arith.constant 0.000000e+00 : f32
      %91 = vector.broadcast %cst_73 : f32 to vector<1x8xf32>
      %c0_74 = arith.constant 0 : index
      %c0_75 = arith.constant 0 : index
      %92 = vector.load %arg10[%c0_74, %c0_75] : memref<1x8xf32, #tpu.memory_space<vmem>>, vector<1x8xf32>
      tpu.vector_store %arg10[%c0_74, %c0_75], %91 {strides = array<i32>} : memref<1x8xf32, #tpu.memory_space<vmem>>, vector<1x8xf32>,
    } else {
    }
    %c0 = arith.constant 0 : index
    %c0_1 = arith.constant 0 : index
    %3 = vector.load %arg1[%c0, %c0_1] : memref<256x4xbf16, #tpu.memory_space<vmem>>, vector<256x4xbf16>
    %4 = arith.extf %3 : vector<256x4xbf16> to vector<256x4xf32>
    %c0_2 = arith.constant 0 : index
    %c0_3 = arith.constant 0 : index
    %5 = vector.load %arg11[%c0_2, %c0_3] : memref<512x4xf32, #tpu.memory_space<vmem>>, vector<256x4xf32>
    tpu.vector_store %arg11[%c0_2, %c0_3], %4 {strides = array<i32>} : memref<512x4xf32, #tpu.memory_space<vmem>>, vector<256x4xf32>,
    %c0_4 = arith.constant 0 : index
    %c0_5 = arith.constant 0 : index
    %6 = vector.load %arg2[%c0_4, %c0_5] : memref<256x4xbf16, #tpu.memory_space<vmem>>, vector<256x4xbf16>
    %7 = arith.extf %6 : vector<256x4xbf16> to vector<256x4xf32>
    %c256 = arith.constant 256 : index
    %c0_6 = arith.constant 0 : index
    %8 = vector.load %arg11[%c256, %c0_6] : memref<512x4xf32, #tpu.memory_space<vmem>>, vector<256x4xf32>
    tpu.vector_store %arg11[%c256, %c0_6], %7 {strides = array<i32>} : memref<512x4xf32, #tpu.memory_space<vmem>>, vector<256x4xf32>,
    %cst = arith.constant 0.000000e+00 : f32
    %9 = vector.broadcast %cst : f32 to vector<256x8xf32>
    %c0_7 = arith.constant 0 : index
    %c0_8 = arith.constant 0 : index
    %10 = vector.load %arg11[%c0_7, %c0_8] : memref<512x4xf32, #tpu.memory_space<vmem>>, vector<256x4xf32>
    %11 = arith.truncf %10 : vector<256x4xf32> to vector<256x4xbf16>
    %c0_9 = arith.constant 0 : index
    %c0_10 = arith.constant 0 : index
    %c0_11 = arith.constant 0 : index
    %12 = vector.load %arg4[%c0_9, %c0_10, %c0_11] : memref<9x4x8xbf16, #tpu.memory_space<vmem>>, vector<1x4x8xbf16>
    %13 = vector.shape_cast %12 : vector<1x4x8xbf16> to vector<4x8xbf16>
    %cst_12 = arith.constant dense<0.000000e+00> : vector<256x8xf32>
    %14 = tpu.matmul %11, %13, %cst_12 {dimension_numbers = #tpu.dot_dimension_numbers<[1], [0], [0], [1], [0, 0, 1, 1], [], []>} : vector<256x4xbf16>, vector<4x8xbf16>, vector<256x8xf32> -> vector<256x8xf32>
    %15 = arith.addf %9, %14 : vector<256x8xf32>
    %c1 = arith.constant 1 : index
    %c0_13 = arith.constant 0 : index
    %16 = vector.load %arg11[%c1, %c0_13] : memref<512x4xf32, #tpu.memory_space<vmem>>, vector<256x4xf32>
    %17 = arith.truncf %16 : vector<256x4xf32> to vector<256x4xbf16>
    %c1_14 = arith.constant 1 : index
    %c0_15 = arith.constant 0 : index
    %c0_16 = arith.constant 0 : index
    %18 = vector.load %arg4[%c1_14, %c0_15, %c0_16] : memref<9x4x8xbf16, #tpu.memory_space<vmem>>, vector<1x4x8xbf16>
    %19 = vector.shape_cast %18 : vector<1x4x8xbf16> to vector<4x8xbf16>
    %cst_17 = arith.constant dense<0.000000e+00> : vector<256x8xf32>
    %20 = tpu.matmul %17, %19, %cst_17 {dimension_numbers = #tpu.dot_dimension_numbers<[1], [0], [0], [1], [0, 0, 1, 1], [], []>} : vector<256x4xbf16>, vector<4x8xbf16>, vector<256x8xf32> -> vector<256x8xf32>
    %21 = arith.addf %15, %20 : vector<256x8xf32>
    %c2 = arith.constant 2 : index
    %c0_18 = arith.constant 0 : index
    %22 = vector.load %arg11[%c2, %c0_18] : memref<512x4xf32, #tpu.memory_space<vmem>>, vector<256x4xf32>
    %23 = arith.truncf %22 : vector<256x4xf32> to vector<256x4xbf16>
    %c2_19 = arith.constant 2 : index
    %c0_20 = arith.constant 0 : index
    %c0_21 = arith.constant 0 : index
    %24 = vector.load %arg4[%c2_19, %c0_20, %c0_21] : memref<9x4x8xbf16, #tpu.memory_space<vmem>>, vector<1x4x8xbf16>
    %25 = vector.shape_cast %24 : vector<1x4x8xbf16> to vector<4x8xbf16>
    %cst_22 = arith.constant dense<0.000000e+00> : vector<256x8xf32>
    %26 = tpu.matmul %23, %25, %cst_22 {dimension_numbers = #tpu.dot_dimension_numbers<[1], [0], [0], [1], [0, 0, 1, 1], [], []>} : vector<256x4xbf16>, vector<4x8xbf16>, vector<256x8xf32> -> vector<256x8xf32>
    %27 = arith.addf %21, %26 : vector<256x8xf32>
    %c24 = arith.constant 24 : index
    %c0_23 = arith.constant 0 : index
    %28 = vector.load %arg11[%c24, %c0_23] : memref<512x4xf32, #tpu.memory_space<vmem>>, vector<256x4xf32>
    %29 = arith.truncf %28 : vector<256x4xf32> to vector<256x4xbf16>
    %c3 = arith.constant 3 : index
    %c0_24 = arith.constant 0 : index
    %c0_25 = arith.constant 0 : index
    %30 = vector.load %arg4[%c3, %c0_24, %c0_25] : memref<9x4x8xbf16, #tpu.memory_space<vmem>>, vector<1x4x8xbf16>
    %31 = vector.shape_cast %30 : vector<1x4x8xbf16> to vector<4x8xbf16>
    %cst_26 = arith.constant dense<0.000000e+00> : vector<256x8xf32>
    %32 = tpu.matmul %29, %31, %cst_26 {dimension_numbers = #tpu.dot_dimension_numbers<[1], [0], [0], [1], [0, 0, 1, 1], [], []>} : vector<256x4xbf16>, vector<4x8xbf16>, vector<256x8xf32> -> vector<256x8xf32>
    %33 = arith.addf %27, %32 : vector<256x8xf32>
    %c25 = arith.constant 25 : index
    %c0_27 = arith.constant 0 : index
    %34 = vector.load %arg11[%c25, %c0_27] : memref<512x4xf32, #tpu.memory_space<vmem>>, vector<256x4xf32>
    %35 = arith.truncf %34 : vector<256x4xf32> to vector<256x4xbf16>
    %c4 = arith.constant 4 : index
    %c0_28 = arith.constant 0 : index
    %c0_29 = arith.constant 0 : index
    %36 = vector.load %arg4[%c4, %c0_28, %c0_29] : memref<9x4x8xbf16, #tpu.memory_space<vmem>>, vector<1x4x8xbf16>
    %37 = vector.shape_cast %36 : vector<1x4x8xbf16> to vector<4x8xbf16>
    %cst_30 = arith.constant dense<0.000000e+00> : vector<256x8xf32>
    %38 = tpu.matmul %35, %37, %cst_30 {dimension_numbers = #tpu.dot_dimension_numbers<[1], [0], [0], [1], [0, 0, 1, 1], [], []>} : vector<256x4xbf16>, vector<4x8xbf16>, vector<256x8xf32> -> vector<256x8xf32>
    %39 = arith.addf %33, %38 : vector<256x8xf32>
    %c26 = arith.constant 26 : index
    %c0_31 = arith.constant 0 : index
    %40 = vector.load %arg11[%c26, %c0_31] : memref<512x4xf32, #tpu.memory_space<vmem>>, vector<256x4xf32>
    %41 = arith.truncf %40 : vector<256x4xf32> to vector<256x4xbf16>
    %c5 = arith.constant 5 : index
    %c0_32 = arith.constant 0 : index
    %c0_33 = arith.constant 0 : index
    %42 = vector.load %arg4[%c5, %c0_32, %c0_33] : memref<9x4x8xbf16, #tpu.memory_space<vmem>>, vector<1x4x8xbf16>
    %43 = vector.shape_cast %42 : vector<1x4x8xbf16> to vector<4x8xbf16>
    %cst_34 = arith.constant dense<0.000000e+00> : vector<256x8xf32>
    %44 = tpu.matmul %41, %43, %cst_34 {dimension_numbers = #tpu.dot_dimension_numbers<[1], [0], [0], [1], [0, 0, 1, 1], [], []>} : vector<256x4xbf16>, vector<4x8xbf16>, vector<256x8xf32> -> vector<256x8xf32>
    %45 = arith.addf %39, %44 : vector<256x8xf32>
    %c48 = arith.constant 48 : index
    %c0_35 = arith.constant 0 : index
    %46 = vector.load %arg11[%c48, %c0_35] : memref<512x4xf32, #tpu.memory_space<vmem>>, vector<256x4xf32>
    %47 = arith.truncf %46 : vector<256x4xf32> to vector<256x4xbf16>
    %c6 = arith.constant 6 : index
    %c0_36 = arith.constant 0 : index
    %c0_37 = arith.constant 0 : index
    %48 = vector.load %arg4[%c6, %c0_36, %c0_37] : memref<9x4x8xbf16, #tpu.memory_space<vmem>>, vector<1x4x8xbf16>
    %49 = vector.shape_cast %48 : vector<1x4x8xbf16> to vector<4x8xbf16>
    %cst_38 = arith.constant dense<0.000000e+00> : vector<256x8xf32>
    %50 = tpu.matmul %47, %49, %cst_38 {dimension_numbers = #tpu.dot_dimension_numbers<[1], [0], [0], [1], [0, 0, 1, 1], [], []>} : vector<256x4xbf16>, vector<4x8xbf16>, vector<256x8xf32> -> vector<256x8xf32>
    %51 = arith.addf %45, %50 : vector<256x8xf32>
    %c49 = arith.constant 49 : index
    %c0_39 = arith.constant 0 : index
    %52 = vector.load %arg11[%c49, %c0_39] : memref<512x4xf32, #tpu.memory_space<vmem>>, vector<256x4xf32>
    %53 = arith.truncf %52 : vector<256x4xf32> to vector<256x4xbf16>
    %c7 = arith.constant 7 : index
    %c0_40 = arith.constant 0 : index
    %c0_41 = arith.constant 0 : index
    %54 = vector.load %arg4[%c7, %c0_40, %c0_41] : memref<9x4x8xbf16, #tpu.memory_space<vmem>>, vector<1x4x8xbf16>
    %55 = vector.shape_cast %54 : vector<1x4x8xbf16> to vector<4x8xbf16>
    %cst_42 = arith.constant dense<0.000000e+00> : vector<256x8xf32>
    %56 = tpu.matmul %53, %55, %cst_42 {dimension_numbers = #tpu.dot_dimension_numbers<[1], [0], [0], [1], [0, 0, 1, 1], [], []>} : vector<256x4xbf16>, vector<4x8xbf16>, vector<256x8xf32> -> vector<256x8xf32>
    %57 = arith.addf %51, %56 : vector<256x8xf32>
    %c50 = arith.constant 50 : index
    %c0_43 = arith.constant 0 : index
    %58 = vector.load %arg11[%c50, %c0_43] : memref<512x4xf32, #tpu.memory_space<vmem>>, vector<256x4xf32>
    %59 = arith.truncf %58 : vector<256x4xf32> to vector<256x4xbf16>
    %c8 = arith.constant 8 : index
    %c0_44 = arith.constant 0 : index
    %c0_45 = arith.constant 0 : index
    %60 = vector.load %arg4[%c8, %c0_44, %c0_45] : memref<9x4x8xbf16, #tpu.memory_space<vmem>>, vector<1x4x8xbf16>
    %61 = vector.shape_cast %60 : vector<1x4x8xbf16> to vector<4x8xbf16>
    %cst_46 = arith.constant dense<0.000000e+00> : vector<256x8xf32>
    %62 = tpu.matmul %59, %61, %cst_46 {dimension_numbers = #tpu.dot_dimension_numbers<[1], [0], [0], [1], [0, 0, 1, 1], [], []>} : vector<256x4xbf16>, vector<4x8xbf16>, vector<256x8xf32> -> vector<256x8xf32>
    %63 = arith.addf %57, %62 : vector<256x8xf32>
    %c0_47 = arith.constant 0 : index
    %c0_48 = arith.constant 0 : index
    %64 = vector.load %arg3[%c0_47, %c0_48] : memref<256x1xf32, #tpu.memory_space<vmem>>, vector<256x1xf32>
    %65 = vector.broadcast %64 : vector<256x1xf32> to vector<256x8xf32>
    %66 = arith.mulf %63, %65 : vector<256x8xf32>
    %c0_49 = arith.constant 0 : index
    %c0_50 = arith.constant 0 : index
    %67 = vector.load %arg9[%c0_49, %c0_50] : memref<1x8xf32, #tpu.memory_space<vmem>>, vector<1x8xf32>
    %cst_51 = arith.constant dense<0.000000e+00> : vector<8xf32>
    %68 = vector.multi_reduction <add>, %66, %cst_51 [0] : vector<256x8xf32> to vector<8xf32>
    %69 = vector.shape_cast %68 : vector<8xf32> to vector<1x8xf32>
    %70 = arith.addf %67, %69 : vector<1x8xf32>
    %c0_52 = arith.constant 0 : index
    %c0_53 = arith.constant 0 : index
    %71 = vector.load %arg9[%c0_52, %c0_53] : memref<1x8xf32, #tpu.memory_space<vmem>>, vector<1x8xf32>
    tpu.vector_store %arg9[%c0_52, %c0_53], %70 {strides = array<i32>} : memref<1x8xf32, #tpu.memory_space<vmem>>, vector<1x8xf32>,
    %c0_54 = arith.constant 0 : index
    %c0_55 = arith.constant 0 : index
    %72 = vector.load %arg10[%c0_54, %c0_55] : memref<1x8xf32, #tpu.memory_space<vmem>>, vector<1x8xf32>
    %73 = arith.mulf %63, %66 : vector<256x8xf32>
    %cst_56 = arith.constant dense<0.000000e+00> : vector<8xf32>
    %74 = vector.multi_reduction <add>, %73, %cst_56 [0] : vector<256x8xf32> to vector<8xf32>
    %75 = vector.shape_cast %74 : vector<8xf32> to vector<1x8xf32>
    %76 = arith.addf %72, %75 : vector<1x8xf32>
    %c0_57 = arith.constant 0 : index
    %c0_58 = arith.constant 0 : index
    %77 = vector.load %arg10[%c0_57, %c0_58] : memref<1x8xf32, #tpu.memory_space<vmem>>, vector<1x8xf32>
    tpu.vector_store %arg10[%c0_57, %c0_58], %76 {strides = array<i32>} : memref<1x8xf32, #tpu.memory_space<vmem>>, vector<1x8xf32>,
    %78 = arith.truncf %63 : vector<256x8xf32> to vector<256x8xbf16>
    %c0_59 = arith.constant 0 : index
    %c0_60 = arith.constant 0 : index
    %79 = vector.load %arg7[%c0_59, %c0_60] : memref<256x8xbf16, #tpu.memory_space<vmem>>, vector<256x8xbf16>
    tpu.vector_store %arg7[%c0_59, %c0_60], %78 {strides = array<i32>} : memref<256x8xbf16, #tpu.memory_space<vmem>>, vector<256x8xbf16>,
    %c25_61 = arith.constant 25 : index
    %c0_62 = arith.constant 0 : index
    %80 = vector.load %arg11[%c25_61, %c0_62] : memref<512x4xf32, #tpu.memory_space<vmem>>, vector<256x4xf32>
    %81 = arith.truncf %80 : vector<256x4xf32> to vector<256x4xbf16>
    %c0_63 = arith.constant 0 : index
    %c0_64 = arith.constant 0 : index
    %82 = vector.load %arg5[%c0_63, %c0_64] : memref<4x8xbf16, #tpu.memory_space<vmem>>, vector<4x8xbf16>
    %cst_65 = arith.constant dense<0.000000e+00> : vector<256x8xf32>
    %83 = tpu.matmul %81, %82, %cst_65 {dimension_numbers = #tpu.dot_dimension_numbers<[1], [0], [0], [1], [0, 0, 1, 1], [], []>} : vector<256x4xbf16>, vector<4x8xbf16>, vector<256x8xf32> -> vector<256x8xf32>
    %c0_66 = arith.constant 0 : index
    %c0_67 = arith.constant 0 : index
    %84 = vector.load %arg6[%c0_66, %c0_67] : memref<1x8xf32, #tpu.memory_space<vmem>>, vector<1x8xf32>
    %85 = vector.broadcast %84 : vector<1x8xf32> to vector<256x8xf32>
    %86 = arith.addf %83, %85 : vector<256x8xf32>
    %87 = arith.truncf %86 : vector<256x8xf32> to vector<256x8xbf16>
    %c0_68 = arith.constant 0 : index
    %c0_69 = arith.constant 0 : index
    %88 = vector.load %arg8[%c0_68, %c0_69] : memref<256x8xbf16, #tpu.memory_space<vmem>>, vector<256x8xbf16>
    tpu.vector_store %arg8[%c0_68, %c0_69], %87 {strides = array<i32>} : memref<256x8xbf16, #tpu.memory_space<vmem>>, vector<256x8xbf16>,
    return
  }
  func.func @transform_0(%arg0: i32) -> (i32, i32) {
    %c0_i32 = arith.constant 0 : i32
    %c0_i32_0 = arith.constant 0 : i32
    return %arg0, %c0_i32 : i32, i32
  }
  func.func @transform_1(%arg0: i32) -> (i32, i32) {
    %c1_i32 = arith.constant 1 : i32
    %0 = arith.addi %arg0, %c1_i32 : i32
    %c0_i32 = arith.constant 0 : i32
    %c0_i32_0 = arith.constant 0 : i32
    return %0, %c0_i32 : i32, i32
  }
  func.func @transform_2(%arg0: i32) -> (i32, i32) {
    %c0_i32 = arith.constant 0 : i32
    %c0_i32_0 = arith.constant 0 : i32
    return %arg0, %c0_i32 : i32, i32
  }
  func.func @transform_3(%arg0: i32) -> (i32, i32, i32) {
    %c0_i32 = arith.constant 0 : i32
    %c0_i32_0 = arith.constant 0 : i32
    %c0_i32_1 = arith.constant 0 : i32
    %c0_i32_2 = arith.constant 0 : i32
    return %c0_i32, %c0_i32_0, %c0_i32_1 : i32, i32, i32
  }
  func.func @transform_4(%arg0: i32) -> (i32, i32) {
    %c0_i32 = arith.constant 0 : i32
    %c0_i32_0 = arith.constant 0 : i32
    %c0_i32_1 = arith.constant 0 : i32
    return %c0_i32, %c0_i32_0 : i32, i32
  }
  func.func @transform_5(%arg0: i32) -> (i32, i32) {
    %c0_i32 = arith.constant 0 : i32
    %c0_i32_0 = arith.constant 0 : i32
    %c0_i32_1 = arith.constant 0 : i32
    return %c0_i32, %c0_i32_0 : i32, i32
  }
  func.func @transform_6(%arg0: i32) -> (i32, i32) {
    %c0_i32 = arith.constant 0 : i32
    %c0_i32_0 = arith.constant 0 : i32
    return %arg0, %c0_i32 : i32, i32
  }
  func.func @transform_7(%arg0: i32) -> (i32, i32) {
    %c0_i32 = arith.constant 0 : i32
    %c0_i32_0 = arith.constant 0 : i32
    return %arg0, %c0_i32 : i32, i32
  }
  func.func @transform_8(%arg0: i32) -> (i32, i32) {
    %c0_i32 = arith.constant 0 : i32
    %c0_i32_0 = arith.constant 0 : i32
    %c0_i32_1 = arith.constant 0 : i32
    return %c0_i32, %c0_i32_0 : i32, i32
  }
  func.func @transform_9(%arg0: i32) -> (i32, i32) {
    %c0_i32 = arith.constant 0 : i32
    %c0_i32_0 = arith.constant 0 : i32
    %c0_i32_1 = arith.constant 0 : i32
    return %c0_i32, %c0_i32_0 : i32, i32
  }
}

module attributes {stable_mosaic.version = 11 : i64} {
  func.func @_conv2_kernel(%arg0: i32, %arg1: memref<256x8xbf16, #tpu.memory_space<vmem>>, %arg2: memref<256x8xbf16, #tpu.memory_space<vmem>>, %arg3: memref<256x8xbf16, #tpu.memory_space<vmem>>, %arg4: memref<256x1xf32, #tpu.memory_space<vmem>>, %arg5: memref<256x1xf32, #tpu.memory_space<vmem>>, %arg6: memref<256x1xf32, #tpu.memory_space<vmem>>, %arg7: memref<9x8x8xbf16, #tpu.memory_space<vmem>>, %arg8: memref<1x8xf32, #tpu.memory_space<vmem>>, %arg9: memref<1x8xf32, #tpu.memory_space<vmem>>, %arg10: memref<256x8xbf16, #tpu.memory_space<vmem>>, %arg11: memref<1x8xf32, #tpu.memory_space<vmem>>, %arg12: memref<1x8xf32, #tpu.memory_space<vmem>>, %arg13: memref<768x8xf32, #tpu.memory_space<vmem>>) attributes {dimension_semantics = [#tpu.dimension_semantics<arbitrary>], iteration_bounds = array<i64: 4>, scalar_prefetch = 0 : i64, scratch_operands = 1 : i64, tpu.core_type = #tpu.core_type<tc>, window_params = [{transform_indices = @transform_0, window_bounds = array<i64: 256, 8>}, {transform_indices = @transform_1, window_bounds = array<i64: 256, 8>}, {transform_indices = @transform_2, window_bounds = array<i64: 256, 8>}, {transform_indices = @transform_3, window_bounds = array<i64: 256, 1>}, {transform_indices = @transform_4, window_bounds = array<i64: 256, 1>}, {transform_indices = @transform_5, window_bounds = array<i64: 256, 1>}, {pipeline_mode = #tpu.pipeline_mode<synchronous>, transform_indices = @transform_6, window_bounds = array<i64: 9, 8, 8>}, {pipeline_mode = #tpu.pipeline_mode<synchronous>, transform_indices = @transform_7, window_bounds = array<i64: 1, 8>}, {pipeline_mode = #tpu.pipeline_mode<synchronous>, transform_indices = @transform_8, window_bounds = array<i64: 1, 8>}, {transform_indices = @transform_9, window_bounds = array<i64: 256, 8>}, {pipeline_mode = #tpu.pipeline_mode<synchronous>, transform_indices = @transform_10, window_bounds = array<i64: 1, 8>}, {pipeline_mode = #tpu.pipeline_mode<synchronous>, transform_indices = @transform_11, window_bounds = array<i64: 1, 8>}]} {
    %c0_i32 = arith.constant 0 : i32
    %0 = arith.cmpi eq, %arg0, %c0_i32 : i32
    %1 = arith.extui %0 : i1 to i32
    %c0_i32_0 = arith.constant 0 : i32
    %2 = arith.cmpi ne, %1, %c0_i32_0 : i32
    scf.if %2 {
      %cst_75 = arith.constant 0.000000e+00 : f32
      %112 = vector.broadcast %cst_75 : f32 to vector<1x8xf32>
      %c0_76 = arith.constant 0 : index
      %c0_77 = arith.constant 0 : index
      %113 = vector.load %arg11[%c0_76, %c0_77] : memref<1x8xf32, #tpu.memory_space<vmem>>, vector<1x8xf32>
      tpu.vector_store %arg11[%c0_76, %c0_77], %112 {strides = array<i32>} : memref<1x8xf32, #tpu.memory_space<vmem>>, vector<1x8xf32>,
      %cst_78 = arith.constant 0.000000e+00 : f32
      %114 = vector.broadcast %cst_78 : f32 to vector<1x8xf32>
      %c0_79 = arith.constant 0 : index
      %c0_80 = arith.constant 0 : index
      %115 = vector.load %arg12[%c0_79, %c0_80] : memref<1x8xf32, #tpu.memory_space<vmem>>, vector<1x8xf32>
      tpu.vector_store %arg12[%c0_79, %c0_80], %114 {strides = array<i32>} : memref<1x8xf32, #tpu.memory_space<vmem>>, vector<1x8xf32>,
    } else {
    }
    %c0 = arith.constant 0 : index
    %c0_1 = arith.constant 0 : index
    %3 = vector.load %arg8[%c0, %c0_1] : memref<1x8xf32, #tpu.memory_space<vmem>>, vector<1x8xf32>
    %c0_2 = arith.constant 0 : index
    %c0_3 = arith.constant 0 : index
    %4 = vector.load %arg9[%c0_2, %c0_3] : memref<1x8xf32, #tpu.memory_space<vmem>>, vector<1x8xf32>
    %c0_4 = arith.constant 0 : index
    %c0_5 = arith.constant 0 : index
    %5 = vector.load %arg1[%c0_4, %c0_5] : memref<256x8xbf16, #tpu.memory_space<vmem>>, vector<256x8xbf16>
    %6 = arith.extf %5 : vector<256x8xbf16> to vector<256x8xf32>
    %7 = vector.broadcast %3 : vector<1x8xf32> to vector<256x8xf32>
    %8 = arith.mulf %6, %7 : vector<256x8xf32>
    %9 = vector.broadcast %4 : vector<1x8xf32> to vector<256x8xf32>
    %10 = arith.addf %8, %9 : vector<256x8xf32>
    %cst = arith.constant 0.000000e+00 : f32
    %11 = vector.broadcast %cst : f32 to vector<256x8xf32>
    %12 = arith.maximumf %10, %11 : vector<256x8xf32>
    %c0_6 = arith.constant 0 : index
    %c0_7 = arith.constant 0 : index
    %13 = vector.load %arg4[%c0_6, %c0_7] : memref<256x1xf32, #tpu.memory_space<vmem>>, vector<256x1xf32>
    %14 = vector.broadcast %13 : vector<256x1xf32> to vector<256x8xf32>
    %15 = arith.mulf %12, %14 : vector<256x8xf32>
    %c0_8 = arith.constant 0 : index
    %c0_9 = arith.constant 0 : index
    %16 = vector.load %arg13[%c0_8, %c0_9] : memref<768x8xf32, #tpu.memory_space<vmem>>, vector<256x8xf32>
    tpu.vector_store %arg13[%c0_8, %c0_9], %15 {strides = array<i32>} : memref<768x8xf32, #tpu.memory_space<vmem>>, vector<256x8xf32>,
    %c0_10 = arith.constant 0 : index
    %c0_11 = arith.constant 0 : index
    %17 = vector.load %arg2[%c0_10, %c0_11] : memref<256x8xbf16, #tpu.memory_space<vmem>>, vector<256x8xbf16>
    %18 = arith.extf %17 : vector<256x8xbf16> to vector<256x8xf32>
    %19 = vector.broadcast %3 : vector<1x8xf32> to vector<256x8xf32>
    %20 = arith.mulf %18, %19 : vector<256x8xf32>
    %21 = vector.broadcast %4 : vector<1x8xf32> to vector<256x8xf32>
    %22 = arith.addf %20, %21 : vector<256x8xf32>
    %cst_12 = arith.constant 0.000000e+00 : f32
    %23 = vector.broadcast %cst_12 : f32 to vector<256x8xf32>
    %24 = arith.maximumf %22, %23 : vector<256x8xf32>
    %c0_13 = arith.constant 0 : index
    %c0_14 = arith.constant 0 : index
    %25 = vector.load %arg5[%c0_13, %c0_14] : memref<256x1xf32, #tpu.memory_space<vmem>>, vector<256x1xf32>
    %26 = vector.broadcast %25 : vector<256x1xf32> to vector<256x8xf32>
    %27 = arith.mulf %24, %26 : vector<256x8xf32>
    %c256 = arith.constant 256 : index
    %c0_15 = arith.constant 0 : index
    %28 = vector.load %arg13[%c256, %c0_15] : memref<768x8xf32, #tpu.memory_space<vmem>>, vector<256x8xf32>
    tpu.vector_store %arg13[%c256, %c0_15], %27 {strides = array<i32>} : memref<768x8xf32, #tpu.memory_space<vmem>>, vector<256x8xf32>,
    %c0_16 = arith.constant 0 : index
    %c0_17 = arith.constant 0 : index
    %29 = vector.load %arg3[%c0_16, %c0_17] : memref<256x8xbf16, #tpu.memory_space<vmem>>, vector<256x8xbf16>
    %30 = arith.extf %29 : vector<256x8xbf16> to vector<256x8xf32>
    %31 = vector.broadcast %3 : vector<1x8xf32> to vector<256x8xf32>
    %32 = arith.mulf %30, %31 : vector<256x8xf32>
    %33 = vector.broadcast %4 : vector<1x8xf32> to vector<256x8xf32>
    %34 = arith.addf %32, %33 : vector<256x8xf32>
    %cst_18 = arith.constant 0.000000e+00 : f32
    %35 = vector.broadcast %cst_18 : f32 to vector<256x8xf32>
    %36 = arith.maximumf %34, %35 : vector<256x8xf32>
    %c0_19 = arith.constant 0 : index
    %c0_20 = arith.constant 0 : index
    %37 = vector.load %arg6[%c0_19, %c0_20] : memref<256x1xf32, #tpu.memory_space<vmem>>, vector<256x1xf32>
    %38 = vector.broadcast %37 : vector<256x1xf32> to vector<256x8xf32>
    %39 = arith.mulf %36, %38 : vector<256x8xf32>
    %c512 = arith.constant 512 : index
    %c0_21 = arith.constant 0 : index
    %40 = vector.load %arg13[%c512, %c0_21] : memref<768x8xf32, #tpu.memory_space<vmem>>, vector<256x8xf32>
    tpu.vector_store %arg13[%c512, %c0_21], %39 {strides = array<i32>} : memref<768x8xf32, #tpu.memory_space<vmem>>, vector<256x8xf32>,
    %cst_22 = arith.constant 0.000000e+00 : f32
    %41 = vector.broadcast %cst_22 : f32 to vector<256x8xf32>
    %c231 = arith.constant 231 : index
    %c0_23 = arith.constant 0 : index
    %42 = vector.load %arg13[%c231, %c0_23] : memref<768x8xf32, #tpu.memory_space<vmem>>, vector<256x8xf32>
    %43 = arith.truncf %42 : vector<256x8xf32> to vector<256x8xbf16>
    %c0_24 = arith.constant 0 : index
    %c0_25 = arith.constant 0 : index
    %c0_26 = arith.constant 0 : index
    %44 = vector.load %arg7[%c0_24, %c0_25, %c0_26] : memref<9x8x8xbf16, #tpu.memory_space<vmem>>, vector<1x8x8xbf16>
    %45 = vector.shape_cast %44 : vector<1x8x8xbf16> to vector<8x8xbf16>
    %cst_27 = arith.constant dense<0.000000e+00> : vector<256x8xf32>
    %46 = tpu.matmul %43, %45, %cst_27 {dimension_numbers = #tpu.dot_dimension_numbers<[1], [0], [0], [1], [0, 0, 1, 1], [], []>} : vector<256x8xbf16>, vector<8x8xbf16>, vector<256x8xf32> -> vector<256x8xf32>
    %47 = arith.addf %41, %46 : vector<256x8xf32>
    %c232 = arith.constant 232 : index
    %c0_28 = arith.constant 0 : index
    %48 = vector.load %arg13[%c232, %c0_28] : memref<768x8xf32, #tpu.memory_space<vmem>>, vector<256x8xf32>
    %49 = arith.truncf %48 : vector<256x8xf32> to vector<256x8xbf16>
    %c1 = arith.constant 1 : index
    %c0_29 = arith.constant 0 : index
    %c0_30 = arith.constant 0 : index
    %50 = vector.load %arg7[%c1, %c0_29, %c0_30] : memref<9x8x8xbf16, #tpu.memory_space<vmem>>, vector<1x8x8xbf16>
    %51 = vector.shape_cast %50 : vector<1x8x8xbf16> to vector<8x8xbf16>
    %cst_31 = arith.constant dense<0.000000e+00> : vector<256x8xf32>
    %52 = tpu.matmul %49, %51, %cst_31 {dimension_numbers = #tpu.dot_dimension_numbers<[1], [0], [0], [1], [0, 0, 1, 1], [], []>} : vector<256x8xbf16>, vector<8x8xbf16>, vector<256x8xf32> -> vector<256x8xf32>
    %53 = arith.addf %47, %52 : vector<256x8xf32>
    %c233 = arith.constant 233 : index
    %c0_32 = arith.constant 0 : index
    %54 = vector.load %arg13[%c233, %c0_32] : memref<768x8xf32, #tpu.memory_space<vmem>>, vector<256x8xf32>
    %55 = arith.truncf %54 : vector<256x8xf32> to vector<256x8xbf16>
    %c2 = arith.constant 2 : index
    %c0_33 = arith.constant 0 : index
    %c0_34 = arith.constant 0 : index
    %56 = vector.load %arg7[%c2, %c0_33, %c0_34] : memref<9x8x8xbf16, #tpu.memory_space<vmem>>, vector<1x8x8xbf16>
    %57 = vector.shape_cast %56 : vector<1x8x8xbf16> to vector<8x8xbf16>
    %cst_35 = arith.constant dense<0.000000e+00> : vector<256x8xf32>
    %58 = tpu.matmul %55, %57, %cst_35 {dimension_numbers = #tpu.dot_dimension_numbers<[1], [0], [0], [1], [0, 0, 1, 1], [], []>} : vector<256x8xbf16>, vector<8x8xbf16>, vector<256x8xf32> -> vector<256x8xf32>
    %59 = arith.addf %53, %58 : vector<256x8xf32>
    %c255 = arith.constant 255 : index
    %c0_36 = arith.constant 0 : index
    %60 = vector.load %arg13[%c255, %c0_36] : memref<768x8xf32, #tpu.memory_space<vmem>>, vector<256x8xf32>
    %61 = arith.truncf %60 : vector<256x8xf32> to vector<256x8xbf16>
    %c3 = arith.constant 3 : index
    %c0_37 = arith.constant 0 : index
    %c0_38 = arith.constant 0 : index
    %62 = vector.load %arg7[%c3, %c0_37, %c0_38] : memref<9x8x8xbf16, #tpu.memory_space<vmem>>, vector<1x8x8xbf16>
    %63 = vector.shape_cast %62 : vector<1x8x8xbf16> to vector<8x8xbf16>
    %cst_39 = arith.constant dense<0.000000e+00> : vector<256x8xf32>
    %64 = tpu.matmul %61, %63, %cst_39 {dimension_numbers = #tpu.dot_dimension_numbers<[1], [0], [0], [1], [0, 0, 1, 1], [], []>} : vector<256x8xbf16>, vector<8x8xbf16>, vector<256x8xf32> -> vector<256x8xf32>
    %65 = arith.addf %59, %64 : vector<256x8xf32>
    %c256_40 = arith.constant 256 : index
    %c0_41 = arith.constant 0 : index
    %66 = vector.load %arg13[%c256_40, %c0_41] : memref<768x8xf32, #tpu.memory_space<vmem>>, vector<256x8xf32>
    %67 = arith.truncf %66 : vector<256x8xf32> to vector<256x8xbf16>
    %c4 = arith.constant 4 : index
    %c0_42 = arith.constant 0 : index
    %c0_43 = arith.constant 0 : index
    %68 = vector.load %arg7[%c4, %c0_42, %c0_43] : memref<9x8x8xbf16, #tpu.memory_space<vmem>>, vector<1x8x8xbf16>
    %69 = vector.shape_cast %68 : vector<1x8x8xbf16> to vector<8x8xbf16>
    %cst_44 = arith.constant dense<0.000000e+00> : vector<256x8xf32>
    %70 = tpu.matmul %67, %69, %cst_44 {dimension_numbers = #tpu.dot_dimension_numbers<[1], [0], [0], [1], [0, 0, 1, 1], [], []>} : vector<256x8xbf16>, vector<8x8xbf16>, vector<256x8xf32> -> vector<256x8xf32>
    %71 = arith.addf %65, %70 : vector<256x8xf32>
    %c257 = arith.constant 257 : index
    %c0_45 = arith.constant 0 : index
    %72 = vector.load %arg13[%c257, %c0_45] : memref<768x8xf32, #tpu.memory_space<vmem>>, vector<256x8xf32>
    %73 = arith.truncf %72 : vector<256x8xf32> to vector<256x8xbf16>
    %c5 = arith.constant 5 : index
    %c0_46 = arith.constant 0 : index
    %c0_47 = arith.constant 0 : index
    %74 = vector.load %arg7[%c5, %c0_46, %c0_47] : memref<9x8x8xbf16, #tpu.memory_space<vmem>>, vector<1x8x8xbf16>
    %75 = vector.shape_cast %74 : vector<1x8x8xbf16> to vector<8x8xbf16>
    %cst_48 = arith.constant dense<0.000000e+00> : vector<256x8xf32>
    %76 = tpu.matmul %73, %75, %cst_48 {dimension_numbers = #tpu.dot_dimension_numbers<[1], [0], [0], [1], [0, 0, 1, 1], [], []>} : vector<256x8xbf16>, vector<8x8xbf16>, vector<256x8xf32> -> vector<256x8xf32>
    %77 = arith.addf %71, %76 : vector<256x8xf32>
    %c279 = arith.constant 279 : index
    %c0_49 = arith.constant 0 : index
    %78 = vector.load %arg13[%c279, %c0_49] : memref<768x8xf32, #tpu.memory_space<vmem>>, vector<256x8xf32>
    %79 = arith.truncf %78 : vector<256x8xf32> to vector<256x8xbf16>
    %c6 = arith.constant 6 : index
    %c0_50 = arith.constant 0 : index
    %c0_51 = arith.constant 0 : index
    %80 = vector.load %arg7[%c6, %c0_50, %c0_51] : memref<9x8x8xbf16, #tpu.memory_space<vmem>>, vector<1x8x8xbf16>
    %81 = vector.shape_cast %80 : vector<1x8x8xbf16> to vector<8x8xbf16>
    %cst_52 = arith.constant dense<0.000000e+00> : vector<256x8xf32>
    %82 = tpu.matmul %79, %81, %cst_52 {dimension_numbers = #tpu.dot_dimension_numbers<[1], [0], [0], [1], [0, 0, 1, 1], [], []>} : vector<256x8xbf16>, vector<8x8xbf16>, vector<256x8xf32> -> vector<256x8xf32>
    %83 = arith.addf %77, %82 : vector<256x8xf32>
    %c280 = arith.constant 280 : index
    %c0_53 = arith.constant 0 : index
    %84 = vector.load %arg13[%c280, %c0_53] : memref<768x8xf32, #tpu.memory_space<vmem>>, vector<256x8xf32>
    %85 = arith.truncf %84 : vector<256x8xf32> to vector<256x8xbf16>
    %c7 = arith.constant 7 : index
    %c0_54 = arith.constant 0 : index
    %c0_55 = arith.constant 0 : index
    %86 = vector.load %arg7[%c7, %c0_54, %c0_55] : memref<9x8x8xbf16, #tpu.memory_space<vmem>>, vector<1x8x8xbf16>
    %87 = vector.shape_cast %86 : vector<1x8x8xbf16> to vector<8x8xbf16>
    %cst_56 = arith.constant dense<0.000000e+00> : vector<256x8xf32>
    %88 = tpu.matmul %85, %87, %cst_56 {dimension_numbers = #tpu.dot_dimension_numbers<[1], [0], [0], [1], [0, 0, 1, 1], [], []>} : vector<256x8xbf16>, vector<8x8xbf16>, vector<256x8xf32> -> vector<256x8xf32>
    %89 = arith.addf %83, %88 : vector<256x8xf32>
    %c281 = arith.constant 281 : index
    %c0_57 = arith.constant 0 : index
    %90 = vector.load %arg13[%c281, %c0_57] : memref<768x8xf32, #tpu.memory_space<vmem>>, vector<256x8xf32>
    %91 = arith.truncf %90 : vector<256x8xf32> to vector<256x8xbf16>
    %c8 = arith.constant 8 : index
    %c0_58 = arith.constant 0 : index
    %c0_59 = arith.constant 0 : index
    %92 = vector.load %arg7[%c8, %c0_58, %c0_59] : memref<9x8x8xbf16, #tpu.memory_space<vmem>>, vector<1x8x8xbf16>
    %93 = vector.shape_cast %92 : vector<1x8x8xbf16> to vector<8x8xbf16>
    %cst_60 = arith.constant dense<0.000000e+00> : vector<256x8xf32>
    %94 = tpu.matmul %91, %93, %cst_60 {dimension_numbers = #tpu.dot_dimension_numbers<[1], [0], [0], [1], [0, 0, 1, 1], [], []>} : vector<256x8xbf16>, vector<8x8xbf16>, vector<256x8xf32> -> vector<256x8xf32>
    %95 = arith.addf %89, %94 : vector<256x8xf32>
    %c0_61 = arith.constant 0 : index
    %c0_62 = arith.constant 0 : index
    %96 = vector.load %arg5[%c0_61, %c0_62] : memref<256x1xf32, #tpu.memory_space<vmem>>, vector<256x1xf32>
    %97 = vector.broadcast %96 : vector<256x1xf32> to vector<256x8xf32>
    %98 = arith.mulf %95, %97 : vector<256x8xf32>
    %c0_63 = arith.constant 0 : index
    %c0_64 = arith.constant 0 : index
    %99 = vector.load %arg11[%c0_63, %c0_64] : memref<1x8xf32, #tpu.memory_space<vmem>>, vector<1x8xf32>
    %cst_65 = arith.constant dense<0.000000e+00> : vector<8xf32>
    %100 = vector.multi_reduction <add>, %98, %cst_65 [0] : vector<256x8xf32> to vector<8xf32>
    %101 = vector.shape_cast %100 : vector<8xf32> to vector<1x8xf32>
    %102 = arith.addf %99, %101 : vector<1x8xf32>
    %c0_66 = arith.constant 0 : index
    %c0_67 = arith.constant 0 : index
    %103 = vector.load %arg11[%c0_66, %c0_67] : memref<1x8xf32, #tpu.memory_space<vmem>>, vector<1x8xf32>
    tpu.vector_store %arg11[%c0_66, %c0_67], %102 {strides = array<i32>} : memref<1x8xf32, #tpu.memory_space<vmem>>, vector<1x8xf32>,
    %c0_68 = arith.constant 0 : index
    %c0_69 = arith.constant 0 : index
    %104 = vector.load %arg12[%c0_68, %c0_69] : memref<1x8xf32, #tpu.memory_space<vmem>>, vector<1x8xf32>
    %105 = arith.mulf %95, %98 : vector<256x8xf32>
    %cst_70 = arith.constant dense<0.000000e+00> : vector<8xf32>
    %106 = vector.multi_reduction <add>, %105, %cst_70 [0] : vector<256x8xf32> to vector<8xf32>
    %107 = vector.shape_cast %106 : vector<8xf32> to vector<1x8xf32>
    %108 = arith.addf %104, %107 : vector<1x8xf32>
    %c0_71 = arith.constant 0 : index
    %c0_72 = arith.constant 0 : index
    %109 = vector.load %arg12[%c0_71, %c0_72] : memref<1x8xf32, #tpu.memory_space<vmem>>, vector<1x8xf32>
    tpu.vector_store %arg12[%c0_71, %c0_72], %108 {strides = array<i32>} : memref<1x8xf32, #tpu.memory_space<vmem>>, vector<1x8xf32>,
    %110 = arith.truncf %95 : vector<256x8xf32> to vector<256x8xbf16>
    %c0_73 = arith.constant 0 : index
    %c0_74 = arith.constant 0 : index
    %111 = vector.load %arg10[%c0_73, %c0_74] : memref<256x8xbf16, #tpu.memory_space<vmem>>, vector<256x8xbf16>
    tpu.vector_store %arg10[%c0_73, %c0_74], %110 {strides = array<i32>} : memref<256x8xbf16, #tpu.memory_space<vmem>>, vector<256x8xbf16>,
    return
  }
  func.func @transform_0(%arg0: i32) -> (i32, i32) {
    %c0_i32 = arith.constant 0 : i32
    %c0_i32_0 = arith.constant 0 : i32
    return %arg0, %c0_i32 : i32, i32
  }
  func.func @transform_1(%arg0: i32) -> (i32, i32) {
    %c1_i32 = arith.constant 1 : i32
    %0 = arith.addi %arg0, %c1_i32 : i32
    %c0_i32 = arith.constant 0 : i32
    %c0_i32_0 = arith.constant 0 : i32
    return %0, %c0_i32 : i32, i32
  }
  func.func @transform_2(%arg0: i32) -> (i32, i32) {
    %c2_i32 = arith.constant 2 : i32
    %0 = arith.addi %arg0, %c2_i32 : i32
    %c0_i32 = arith.constant 0 : i32
    %c0_i32_0 = arith.constant 0 : i32
    return %0, %c0_i32 : i32, i32
  }
  func.func @transform_3(%arg0: i32) -> (i32, i32) {
    %c0_i32 = arith.constant 0 : i32
    %c0_i32_0 = arith.constant 0 : i32
    return %arg0, %c0_i32 : i32, i32
  }
  func.func @transform_4(%arg0: i32) -> (i32, i32) {
    %c1_i32 = arith.constant 1 : i32
    %0 = arith.addi %arg0, %c1_i32 : i32
    %c0_i32 = arith.constant 0 : i32
    %c0_i32_0 = arith.constant 0 : i32
    return %0, %c0_i32 : i32, i32
  }
  func.func @transform_5(%arg0: i32) -> (i32, i32) {
    %c2_i32 = arith.constant 2 : i32
    %0 = arith.addi %arg0, %c2_i32 : i32
    %c0_i32 = arith.constant 0 : i32
    %c0_i32_0 = arith.constant 0 : i32
    return %0, %c0_i32 : i32, i32
  }
  func.func @transform_6(%arg0: i32) -> (i32, i32, i32) {
    %c0_i32 = arith.constant 0 : i32
    %c0_i32_0 = arith.constant 0 : i32
    %c0_i32_1 = arith.constant 0 : i32
    %c0_i32_2 = arith.constant 0 : i32
    return %c0_i32, %c0_i32_0, %c0_i32_1 : i32, i32, i32
  }
  func.func @transform_7(%arg0: i32) -> (i32, i32) {
    %c0_i32 = arith.constant 0 : i32
    %c0_i32_0 = arith.constant 0 : i32
    %c0_i32_1 = arith.constant 0 : i32
    return %c0_i32, %c0_i32_0 : i32, i32
  }
  func.func @transform_8(%arg0: i32) -> (i32, i32) {
    %c0_i32 = arith.constant 0 : i32
    %c0_i32_0 = arith.constant 0 : i32
    %c0_i32_1 = arith.constant 0 : i32
    return %c0_i32, %c0_i32_0 : i32, i32
  }
  func.func @transform_9(%arg0: i32) -> (i32, i32) {
    %c0_i32 = arith.constant 0 : i32
    %c0_i32_0 = arith.constant 0 : i32
    return %arg0, %c0_i32 : i32, i32
  }
  func.func @transform_10(%arg0: i32) -> (i32, i32) {
    %c0_i32 = arith.constant 0 : i32
    %c0_i32_0 = arith.constant 0 : i32
    %c0_i32_1 = arith.constant 0 : i32
    return %c0_i32, %c0_i32_0 : i32, i32
  }
  func.func @transform_11(%arg0: i32) -> (i32, i32) {
    %c0_i32 = arith.constant 0 : i32
    %c0_i32_0 = arith.constant 0 : i32
    %c0_i32_1 = arith.constant 0 : i32
    return %c0_i32, %c0_i32_0 : i32, i32
  }
}

module attributes {stable_mosaic.version = 11 : i64} {
  func.func @_finalize_kernel(%arg0: i32, %arg1: memref<256x8xbf16, #tpu.memory_space<vmem>>, %arg2: memref<256x8xbf16, #tpu.memory_space<vmem>>, %arg3: memref<1x8xf32, #tpu.memory_space<vmem>>, %arg4: memref<1x8xf32, #tpu.memory_space<vmem>>, %arg5: memref<256x8xf32, #tpu.memory_space<vmem>>) attributes {dimension_semantics = [#tpu.dimension_semantics<parallel>], iteration_bounds = array<i64: 4>, scalar_prefetch = 0 : i64, scratch_operands = 0 : i64, tpu.core_type = #tpu.core_type<tc>, window_params = [{transform_indices = @transform_0, window_bounds = array<i64: 256, 8>}, {transform_indices = @transform_1, window_bounds = array<i64: 256, 8>}, {pipeline_mode = #tpu.pipeline_mode<synchronous>, transform_indices = @transform_2, window_bounds = array<i64: 1, 8>}, {pipeline_mode = #tpu.pipeline_mode<synchronous>, transform_indices = @transform_3, window_bounds = array<i64: 1, 8>}, {transform_indices = @transform_4, window_bounds = array<i64: 256, 8>}]} {
    %c0 = arith.constant 0 : index
    %c0_0 = arith.constant 0 : index
    %0 = vector.load %arg1[%c0, %c0_0] : memref<256x8xbf16, #tpu.memory_space<vmem>>, vector<256x8xbf16>
    %1 = arith.extf %0 : vector<256x8xbf16> to vector<256x8xf32>
    %c0_1 = arith.constant 0 : index
    %c0_2 = arith.constant 0 : index
    %2 = vector.load %arg3[%c0_1, %c0_2] : memref<1x8xf32, #tpu.memory_space<vmem>>, vector<1x8xf32>
    %3 = vector.broadcast %2 : vector<1x8xf32> to vector<256x8xf32>
    %4 = arith.mulf %1, %3 : vector<256x8xf32>
    %c0_3 = arith.constant 0 : index
    %c0_4 = arith.constant 0 : index
    %5 = vector.load %arg4[%c0_3, %c0_4] : memref<1x8xf32, #tpu.memory_space<vmem>>, vector<1x8xf32>
    %6 = vector.broadcast %5 : vector<1x8xf32> to vector<256x8xf32>
    %7 = arith.addf %4, %6 : vector<256x8xf32>
    %c0_5 = arith.constant 0 : index
    %c0_6 = arith.constant 0 : index
    %8 = vector.load %arg2[%c0_5, %c0_6] : memref<256x8xbf16, #tpu.memory_space<vmem>>, vector<256x8xbf16>
    %9 = arith.extf %8 : vector<256x8xbf16> to vector<256x8xf32>
    %10 = arith.addf %7, %9 : vector<256x8xf32>
    %cst = arith.constant 0.000000e+00 : f32
    %11 = vector.broadcast %cst : f32 to vector<256x8xf32>
    %12 = arith.maximumf %10, %11 : vector<256x8xf32>
    %c0_7 = arith.constant 0 : index
    %c0_8 = arith.constant 0 : index
    %13 = vector.load %arg5[%c0_7, %c0_8] : memref<256x8xf32, #tpu.memory_space<vmem>>, vector<256x8xf32>
    tpu.vector_store %arg5[%c0_7, %c0_8], %12 {strides = array<i32>} : memref<256x8xf32, #tpu.memory_space<vmem>>, vector<256x8xf32>,
    return
  }
  func.func @transform_0(%arg0: i32) -> (i32, i32) {
    %c0_i32 = arith.constant 0 : i32
    %c0_i32_0 = arith.constant 0 : i32
    return %arg0, %c0_i32 : i32, i32
  }
  func.func @transform_1(%arg0: i32) -> (i32, i32) {
    %c1_i32 = arith.constant 1 : i32
    %0 = arith.addi %arg0, %c1_i32 : i32
    %c0_i32 = arith.constant 0 : i32
    %c0_i32_0 = arith.constant 0 : i32
    return %0, %c0_i32 : i32, i32
  }
  func.func @transform_2(%arg0: i32) -> (i32, i32) {
    %c0_i32 = arith.constant 0 : i32
    %c0_i32_0 = arith.constant 0 : i32
    %c0_i32_1 = arith.constant 0 : i32
    return %c0_i32, %c0_i32_0 : i32, i32
  }
  func.func @transform_3(%arg0: i32) -> (i32, i32) {
    %c0_i32 = arith.constant 0 : i32
    %c0_i32_0 = arith.constant 0 : i32
    %c0_i32_1 = arith.constant 0 : i32
    return %c0_i32, %c0_i32_0 : i32, i32
  }
  func.func @transform_4(%arg0: i32) -> (i32, i32) {
    %c0_i32 = arith.constant 0 : i32
    %c0_i32_0 = arith.constant 0 : i32
    return %arg0, %c0_i32 : i32, i32
  }
}

</mosaic_0001>

<bundles_post_ra>
// kernel: resblock_forward.5
= control target key start
LH: loop header
LB: loop body
LE: loop exit
PB: predicated region body
PF: predicated region fallthrough
CT: control target
= control target key end

     0   :  { %s811_s15 = smov 0   ;;  %s1011_s0 = inlined_call_operand.vmem [shape: bf16[1024,8], index: 0, kind: input, shape index: {}]   ;;  %s1012_s1 = inlined_call_operand.vmem [shape: bf16[1536,8], index: 1, kind: input, shape index: {}]   ;;  %s1013_s2 = inlined_call_operand.vmem [shape: f32[1,8], index: 2, kind: input, shape index: {}]   ;;  %s1014_s3 = inlined_call_operand.vmem [shape: f32[1,8], index: 3, kind: input, shape index: {}]   ;;  %s1015_s4 = inlined_call_operand.vmem [shape: f32[1024,8], index: 4, kind: output, shape index: {}]  }
   0x1 LB: > { %s595_s16 = sadd.s32 4294967295, %s784_s15   ;;  %p599_p0 = scmp.ge.s32.totalorder %s784_s15, 1  ;;  %s784_s15 = sphi %s811_s15, %s14_s15  }
   0x2   : > { %p178_p1 = scmp.lt.s32.totalorder %s784_s15, 5 }
   0x4   : > { %p179_p2 = pnand %p599_p0, %p178_p1 }
   0x5   : > { %s600_s17 = sshll.u32 (!%p179_p2), %s595_s16, 5 }
   0x6   : > { %182 = sbr.rel (%p179_p2) target bundleno = 69 (0x45), region = 36  ;;  %p211_p3 = scmp.lt.s32.totalorder (!%p179_p2), %s600_s17, 127 }
   0x7   : > { %s609_s18 = sadd.s32 (!%p179_p2), 32, %s600_s17 }
   0x8   : > { %p218_p4 = scmp.lt.s32.totalorder (!%p179_p2), %s609_s18, 191 }
   0xb   : > { %s1017_s17 = smov (!%p211_p3, %s600_s17), 127  ;;  %s1019_s18 = smov (!%p218_p4, %s609_s18), 191  ;;  %v830_v0 = vld [vmem:[%s1013_s2] ss:$0 sm:$0xff]  ;;  %vm494_vm0 = vcmask 64512  }
   0xc   : > { %s601_s19 = sshll.u32 %s1017_s17, 2  ;;  %s603_s23 = sshll.u32 %s1019_s18, 2  ;;  %v835_v1 = vld [vmem:[%s1014_s3] ss:$0 sm:$0xff] }
   0xd   : > { %s825_s22 = scalar_lea.vmem %s1011_s0, %s601_s19  ;;  %s840_s30 = scalar_lea.vmem %s1012_s1, %s603_s23 }
   0xe   : > { %v611_v2 = vld [vmem:[%s825_s22] sm:$0xff]   ;;  %v738_v3 = vld [vmem:[%s825_s22 + $0x8] sm:$0xff]   ;;  %v739_v4 = vld [vmem:[%s825_s22 + $0x10] sm:$0xff]   ;;  %s605_s5 = sshll.u32 %s1017_s17, 3 }
   0xf   : > { %v612_v5 = vunpack.c.l.bf16 %v611_v2  ;;  %v675_v6 = vld [vmem:[%s840_s30] sm:$0xff]   ;;  %v613_v7 = vunpack.c.h.bf16 %v611_v2  ;;  %v616_v8 = vunpack.c.l.bf16 %v738_v3  ;;  %v753_v9 = vld [vmem:[%s840_s30 + $0x8] sm:$0xff]   ;;  %v617_v10 = vunpack.c.h.bf16 %v738_v3  ;;  %v754_v11 = vld [vmem:[%s840_s30 + $0x10] sm:$0xff]   ;;  %s864_s8 = scalar_lea.vmem %s1015_s4, %s605_s5 }
  0x10   : > { %v676_v12 = vunpack.c.l.bf16 %v675_v6  ;;  %v677_v13 = vunpack.c.h.bf16 %v675_v6  ;;  %v680_v14 = vunpack.c.l.bf16 %v753_v9  ;;  %v681_v15 = vunpack.c.h.bf16 %v753_v9  ;;  %v740_v20 = vld [vmem:[%s825_s22 + $0x18] sm:$0xff]   ;;  %v741_v42 = vld [vmem:[%s825_s22 + $0x20] sm:$0xff]   ;;  %v742_v52 = vld [vmem:[%s825_s22 + $0x28] sm:$0xff]  }
  0x11   : > { %v298_v16 = vmul.f32 %v830_v0, %v612_v5  ;;  %v299_v17 = vmul.f32 %v830_v0, %v613_v7  ;;  %v300_v18 = vmul.f32 %v830_v0, %v616_v8  ;;  %v301_v19 = vmul.f32 %v830_v0, %v617_v10  ;;  %v755_v21 = vld [vmem:[%s840_s30 + $0x18] sm:$0xff]   ;;  %v756_v43 = vld [vmem:[%s840_s30 + $0x20] sm:$0xff]   ;;  %v757_v57 = vld [vmem:[%s840_s30 + $0x28] sm:$0xff]  }
  0x12   : > { %v620_v22 = vunpack.c.l.bf16 %v739_v4  ;;  %v684_v23 = vunpack.c.l.bf16 %v754_v11  ;;  %v621_v24 = vunpack.c.h.bf16 %v739_v4  ;;  %v685_v25 = vunpack.c.h.bf16 %v754_v11  ;;  %v743_v4 = vld [vmem:[%s825_s22 + $0x30] sm:$0xff]  }
  0x13   : > { %v334_v26 = vadd.f32 %v835_v1, %v298_v16  ;;  %v335_v27 = vadd.f32 %v835_v1, %v299_v17  ;;  %v336_v28 = vadd.f32 %v835_v1, %v300_v18  ;;  %v337_v29 = vadd.f32 %v835_v1, %v301_v19  ;;  %v758_v5 = vld [vmem:[%s840_s30 + $0x30] sm:$0xff]  }
  0x14   : > { %v302_v30 = vmul.f32 %v830_v0, %v620_v22  ;;  %v303_v31 = vmul.f32 %v830_v0, %v621_v24  ;;  %v624_v32 = vunpack.c.l.bf16 %v740_v20  ;;  %v688_v33 = vunpack.c.l.bf16 %v755_v21 }
  0x15   : > { %v430_v34 = vadd.f32 %v676_v12, %v334_v26  ;;  %v431_v35 = vadd.f32 %v677_v13, %v335_v27  ;;  %v432_v36 = vadd.f32 %v680_v14, %v336_v28  ;;  %v433_v37 = vadd.f32 %v681_v15, %v337_v29  ;;  %v744_v14 = vld [vmem:[%s825_s22 + $0x38] sm:$0xff]  }
  0x16   : > { %v338_v38 = vadd.f32 %v835_v1, %v302_v30  ;;  %v339_v39 = vadd.f32 %v835_v1, %v303_v31  ;;  %v304_v40 = vmul.f32 %v830_v0, %v624_v32  ;;  %v625_v41 = vunpack.c.h.bf16 %v740_v20  ;;  %v745_v32 = vld [vmem:[%s825_s22 + $0x40] sm:$0xff]  }
  0x17   : > { %v462_v44 = vmax.f32 %v430_v34, 0.0  ;;  %v463_v45 = vmax.f32 %v431_v35, 0.0  ;;  %v464_v46 = vmax.f32 %v432_v36, 0.0  ;;  %v465_v47 = vmax.f32 %v433_v37, 0.0  ;;  %v760_v37 = vld [vmem:[%s840_s30 + $0x40] sm:$0xff]  }
  0x18   : > { %v434_v48 = vadd.f32 %v684_v23, %v338_v38  ;;  %v435_v49 = vadd.f32 %v685_v25, %v339_v39  ;;  %v340_v50 = vadd.f32 %v835_v1, %v304_v40  ;;  %v305_v51 = vmul.f32 %v830_v0, %v625_v41  ;;  %v759_v23 = vld [vmem:[%s840_s30 + $0x38] sm:$0xff]  }
  0x19   : > { %495 = vst.msk [vmem:[%s864_s8] sm:$0xff] %vm494_vm0, %v462_v44  ;;  %v689_v53 = vunpack.c.h.bf16 %v755_v21  ;;  %v628_v54 = vunpack.c.l.bf16 %v741_v42  ;;  %v692_v55 = vunpack.c.l.bf16 %v756_v43  ;;  %v629_v56 = vunpack.c.h.bf16 %v741_v42 }
  0x1a   : > { %496 = vst.msk [vmem:[%s864_s8 + $0x8] sm:$0xff] %vm494_vm0, %v463_v45  ;;  %v466_v58 = vmax.f32 %v434_v48, 0.0  ;;  %v467_v59 = vmax.f32 %v435_v49, 0.0  ;;  %v436_v60 = vadd.f32 %v688_v33, %v340_v50  ;;  %v341_v61 = vadd.f32 %v835_v1, %v305_v51  ;;  %v761_v51 = vld [vmem:[%s840_s30 + $0x48] sm:$0xff]  }
  0x1b   : > { %497 = vst.msk [vmem:[%s864_s8 + $0x10] sm:$0xff] %vm494_vm0, %v464_v46  ;;  %v306_v62 = vmul.f32 %v830_v0, %v628_v54  ;;  %v307_v63 = vmul.f32 %v830_v0, %v629_v56  ;;  %v693_v2 = vunpack.c.h.bf16 %v756_v43  ;;  %v632_v3 = vunpack.c.l.bf16 %v742_v52  ;;  %v746_v46 = vld [vmem:[%s825_s22 + $0x48] sm:$0xff]  }
  0x1c   : > { %498 = vst.msk [vmem:[%s864_s8 + $0x18] sm:$0xff] %vm494_vm0, %v465_v47  ;;  %v468_v6 = vmax.f32 %v436_v60, 0.0  ;;  %v437_v7 = vadd.f32 %v689_v53, %v341_v61  ;;  %v696_v8 = vunpack.c.l.bf16 %v757_v57  ;;  %v633_v9 = vunpack.c.h.bf16 %v742_v52  ;;  %v747_v60 = vld [vmem:[%s825_s22 + $0x50] sm:$0xff]  }
  0x1d   : > { %499 = vst.msk [vmem:[%s864_s8 + $0x20] sm:$0xff] %vm494_vm0, %v466_v58  ;;  %v342_v10 = vadd.f32 %v835_v1, %v306_v62  ;;  %v343_v11 = vadd.f32 %v835_v1, %v307_v63  ;;  %v308_v12 = vmul.f32 %v830_v0, %v632_v3  ;;  %v697_v13 = vunpack.c.h.bf16 %v757_v57  ;;  %v762_v61 = vld [vmem:[%s840_s30 + $0x50] sm:$0xff]  }
  0x1e   : > { %500 = vst.msk [vmem:[%s864_s8 + $0x28] sm:$0xff] %vm494_vm0, %v467_v59  ;;  %v469_v15 = vmax.f32 %v437_v7, 0.0  ;;  %v309_v16 = vmul.f32 %v830_v0, %v633_v9  ;;  %v636_v17 = vunpack.c.l.bf16 %v743_v4  ;;  %v700_v18 = vunpack.c.l.bf16 %v758_v5 }
  0x1f   : > { %501 = vst.msk [vmem:[%s864_s8 + $0x30] sm:$0xff] %vm494_vm0, %v468_v6  ;;  %v438_v19 = vadd.f32 %v692_v55, %v342_v10  ;;  %v439_v20 = vadd.f32 %v693_v2, %v343_v11  ;;  %v344_v21 = vadd.f32 %v835_v1, %v308_v12  ;;  %v637_v22 = vunpack.c.h.bf16 %v743_v4  ;;  %v748_v12 = vld [vmem:[%s825_s22 + $0x58] sm:$0xff]  }
  0x20   : > { %502 = vst.msk [vmem:[%s864_s8 + $0x38] sm:$0xff] %vm494_vm0, %v469_v15  ;;  %v345_v24 = vadd.f32 %v835_v1, %v309_v16  ;;  %v310_v25 = vmul.f32 %v830_v0, %v636_v17  ;;  %v701_v26 = vunpack.c.h.bf16 %v758_v5  ;;  %v640_v27 = vunpack.c.l.bf16 %v744_v14  ;;  %v763_v17 = vld [vmem:[%s840_s30 + $0x58] sm:$0xff]  }
  0x21   : > { %v470_v28 = vmax.f32 %v438_v19, 0.0  ;;  %v471_v29 = vmax.f32 %v439_v20, 0.0  ;;  %v440_v30 = vadd.f32 %v696_v8, %v344_v21  ;;  %v311_v31 = vmul.f32 %v830_v0, %v637_v22 }
  0x22   : > { %v441_v33 = vadd.f32 %v697_v13, %v345_v24  ;;  %v346_v34 = vadd.f32 %v835_v1, %v310_v25  ;;  %v312_v35 = vmul.f32 %v830_v0, %v640_v27  ;;  %v704_v36 = vunpack.c.l.bf16 %v759_v23 }
  0x23   : > { %503 = vst.msk [vmem:[%s864_s8 + $0x40] sm:$0xff] %vm494_vm0, %v470_v28  ;;  %v472_v38 = vmax.f32 %v440_v30, 0.0  ;;  %v347_v39 = vadd.f32 %v835_v1, %v311_v31  ;;  %v641_v40 = vunpack.c.h.bf16 %v744_v14  ;;  %v705_v41 = vunpack.c.h.bf16 %v759_v23  ;;  %v764_v31 = vld [vmem:[%s840_s30 + $0x60] sm:$0xff]  }
  0x24   : > { %504 = vst.msk [vmem:[%s864_s8 + $0x48] sm:$0xff] %vm494_vm0, %v471_v29  ;;  %v473_v42 = vmax.f32 %v441_v33, 0.0  ;;  %v442_v43 = vadd.f32 %v700_v18, %v346_v34  ;;  %v348_v44 = vadd.f32 %v835_v1, %v312_v35  ;;  %v644_v45 = vunpack.c.l.bf16 %v745_v32 }
  0x25   : > { %505 = vst.msk [vmem:[%s864_s8 + $0x50] sm:$0xff] %vm494_vm0, %v472_v38  ;;  %v443_v47 = vadd.f32 %v701_v26, %v347_v39  ;;  %v313_v48 = vmul.f32 %v830_v0, %v641_v40  ;;  %v708_v49 = vunpack.c.l.bf16 %v760_v37  ;;  %v645_v50 = vunpack.c.h.bf16 %v745_v32  ;;  %v749_v26 = vld [vmem:[%s825_s22 + $0x60] sm:$0xff]   ;;  %v750_v40 = vld [vmem:[%s825_s22 + $0x68] sm:$0xff]  }
  0x26   : > { %506 = vst.msk [vmem:[%s864_s8 + $0x58] sm:$0xff] %vm494_vm0, %v473_v42  ;;  %v474_v52 = vmax.f32 %v442_v43, 0.0  ;;  %v444_v53 = vadd.f32 %v704_v36, %v348_v44  ;;  %v314_v54 = vmul.f32 %v830_v0, %v644_v45  ;;  %v709_v55 = vunpack.c.h.bf16 %v760_v37  ;;  %v765_v45 = vld [vmem:[%s840_s30 + $0x68] sm:$0xff]  }
  0x27   : > { %v475_v56 = vmax.f32 %v443_v47, 0.0  ;;  %v349_v57 = vadd.f32 %v835_v1, %v313_v48  ;;  %v315_v58 = vmul.f32 %v830_v0, %v645_v50  ;;  %v648_v59 = vunpack.c.l.bf16 %v746_v46 }
  0x28   : > { %507 = vst.msk [vmem:[%s864_s8 + $0x60] sm:$0xff] %vm494_vm0, %v474_v52  ;;  %v476_v62 = vmax.f32 %v444_v53, 0.0  ;;  %v350_v63 = vadd.f32 %v835_v1, %v314_v54  ;;  %v712_v2 = vunpack.c.l.bf16 %v761_v51  ;;  %v649_v3 = vunpack.c.h.bf16 %v746_v46  ;;  %v751_v54 = vld [vmem:[%s825_s22 + $0x70] sm:$0xff]  }
  0x29   : > { %508 = vst.msk [vmem:[%s864_s8 + $0x68] sm:$0xff] %vm494_vm0, %v475_v56  ;;  %v445_v4 = vadd.f32 %v705_v41, %v349_v57  ;;  %v351_v5 = vadd.f32 %v835_v1, %v315_v58  ;;  %v316_v6 = vmul.f32 %v830_v0, %v648_v59  ;;  %v713_v7 = vunpack.c.h.bf16 %v761_v51  ;;  %v766_v59 = vld [vmem:[%s840_s30 + $0x70] sm:$0xff]  }
  0x2a   : > { %509 = vst.msk [vmem:[%s864_s8 + $0x70] sm:$0xff] %vm494_vm0, %v476_v62  ;;  %v446_v8 = vadd.f32 %v708_v49, %v350_v63  ;;  %v317_v9 = vmul.f32 %v830_v0, %v649_v3  ;;  %v652_v10 = vunpack.c.l.bf16 %v747_v60  ;;  %v716_v11 = vunpack.c.l.bf16 %v762_v61 }
  0x2b   : > { %v477_v13 = vmax.f32 %v445_v4, 0.0  ;;  %v447_v14 = vadd.f32 %v709_v55, %v351_v5  ;;  %v352_v15 = vadd.f32 %v835_v1, %v316_v6  ;;  %v653_v16 = vunpack.c.h.bf16 %v747_v60  ;;  %v752_v6 = vld [vmem:[%s825_s22 + $0x78] sm:$0xff]  }
  0x2c   : > { %v478_v18 = vmax.f32 %v446_v8, 0.0  ;;  %v353_v19 = vadd.f32 %v835_v1, %v317_v9  ;;  %v318_v20 = vmul.f32 %v830_v0, %v652_v10  ;;  %v717_v21 = vunpack.c.h.bf16 %v762_v61 }
  0x2d   : > { %510 = vst.msk [vmem:[%s864_s8 + $0x78] sm:$0xff] %vm494_vm0, %v477_v13  ;;  %v479_v22 = vmax.f32 %v447_v14, 0.0  ;;  %v448_v23 = vadd.f32 %v712_v2, %v352_v15  ;;  %v319_v24 = vmul.f32 %v830_v0, %v653_v16  ;;  %v656_v25 = vunpack.c.l.bf16 %v748_v12  ;;  %v767_v15 = vld [vmem:[%s840_s30 + $0x78] sm:$0xff]  }
  0x2e   : > { %511 = vst.msk [vmem:[%s864_s8 + $0x80] sm:$0xff] %vm494_vm0, %v478_v18  ;;  %v449_v27 = vadd.f32 %v713_v7, %v353_v19  ;;  %v354_v28 = vadd.f32 %v835_v1, %v318_v20  ;;  %v720_v29 = vunpack.c.l.bf16 %v763_v17  ;;  %v657_v30 = vunpack.c.h.bf16 %v748_v12 }
  0x2f   : > { %512 = vst.msk [vmem:[%s864_s8 + $0x88] sm:$0xff] %vm494_vm0, %v479_v22  ;;  %v480_v32 = vmax.f32 %v448_v23, 0.0  ;;  %v355_v33 = vadd.f32 %v835_v1, %v319_v24  ;;  %v320_v34 = vmul.f32 %v830_v0, %v656_v25  ;;  %v721_v35 = vunpack.c.h.bf16 %v763_v17 }
  0x30   : > { %v481_v36 = vmax.f32 %v449_v27, 0.0  ;;  %v450_v37 = vadd.f32 %v716_v11, %v354_v28  ;;  %v321_v38 = vmul.f32 %v830_v0, %v657_v30  ;;  %v660_v39 = vunpack.c.l.bf16 %v749_v26 }
  0x31   : > { %513 = vst.msk [vmem:[%s864_s8 + $0x90] sm:$0xff] %vm494_vm0, %v480_v32  ;;  %v451_v41 = vadd.f32 %v717_v21, %v355_v33  ;;  %v356_v42 = vadd.f32 %v835_v1, %v320_v34  ;;  %v724_v43 = vunpack.c.l.bf16 %v764_v31  ;;  %v661_v44 = vunpack.c.h.bf16 %v749_v26 }
  0x32   : > { %514 = vst.msk [vmem:[%s864_s8 + $0x98] sm:$0xff] %vm494_vm0, %v481_v36  ;;  %v482_v46 = vmax.f32 %v450_v37, 0.0  ;;  %v357_v47 = vadd.f32 %v835_v1, %v321_v38  ;;  %v322_v48 = vmul.f32 %v830_v0, %v660_v39  ;;  %v725_v49 = vunpack.c.h.bf16 %v764_v31 }
  0x33   : > { %v483_v50 = vmax.f32 %v451_v41, 0.0  ;;  %v452_v51 = vadd.f32 %v720_v29, %v356_v42  ;;  %v323_v52 = vmul.f32 %v830_v0, %v661_v44  ;;  %v664_v53 = vunpack.c.l.bf16 %v750_v40 }
  0x34   : > { %515 = vst.msk [vmem:[%s864_s8 + $0xa0] sm:$0xff] %vm494_vm0, %v482_v46  ;;  %v453_v55 = vadd.f32 %v721_v35, %v357_v47  ;;  %v358_v56 = vadd.f32 %v835_v1, %v322_v48  ;;  %v728_v57 = vunpack.c.l.bf16 %v765_v45  ;;  %v665_v58 = vunpack.c.h.bf16 %v750_v40 }
  0x35   : > { %516 = vst.msk [vmem:[%s864_s8 + $0xa8] sm:$0xff] %vm494_vm0, %v483_v50  ;;  %v484_v60 = vmax.f32 %v452_v51, 0.0  ;;  %v359_v61 = vadd.f32 %v835_v1, %v323_v52  ;;  %v324_v62 = vmul.f32 %v830_v0, %v664_v53  ;;  %v729_v63 = vunpack.c.h.bf16 %v765_v45 }
  0x36   : > { %v485_v2 = vmax.f32 %v453_v55, 0.0  ;;  %v454_v3 = vadd.f32 %v724_v43, %v358_v56  ;;  %v325_v4 = vmul.f32 %v830_v0, %v665_v58  ;;  %v668_v5 = vunpack.c.l.bf16 %v751_v54 }
  0x37   : > { %517 = vst.msk [vmem:[%s864_s8 + $0xb0] sm:$0xff] %vm494_vm0, %v484_v60  ;;  %v455_v7 = vadd.f32 %v725_v49, %v359_v61  ;;  %v360_v8 = vadd.f32 %v835_v1, %v324_v62  ;;  %v732_v9 = vunpack.c.l.bf16 %v766_v59  ;;  %v669_v10 = vunpack.c.h.bf16 %v751_v54 }
  0x38   : > { %518 = vst.msk [vmem:[%s864_s8 + $0xb8] sm:$0xff] %vm494_vm0, %v485_v2  ;;  %v486_v11 = vmax.f32 %v454_v3, 0.0  ;;  %v361_v12 = vadd.f32 %v835_v1, %v325_v4  ;;  %v326_v13 = vmul.f32 %v830_v0, %v668_v5  ;;  %v733_v14 = vunpack.c.h.bf16 %v766_v59 }
  0x39   : > { %v487_v16 = vmax.f32 %v455_v7, 0.0  ;;  %v456_v17 = vadd.f32 %v728_v57, %v360_v8  ;;  %v327_v18 = vmul.f32 %v830_v0, %v669_v10  ;;  %v672_v19 = vunpack.c.l.bf16 %v752_v6 }
  0x3a   : > { %519 = vst.msk [vmem:[%s864_s8 + $0xc0] sm:$0xff] %vm494_vm0, %v486_v11  ;;  %v457_v20 = vadd.f32 %v729_v63, %v361_v12  ;;  %v362_v21 = vadd.f32 %v835_v1, %v326_v13  ;;  %v673_v22 = vunpack.c.h.bf16 %v752_v6  ;;  %v736_v26 = vunpack.c.l.bf16 %v767_v15 }
  0x3b   : > { %520 = vst.msk [vmem:[%s864_s8 + $0xc8] sm:$0xff] %vm494_vm0, %v487_v16  ;;  %v488_v23 = vmax.f32 %v456_v17, 0.0  ;;  %v363_v24 = vadd.f32 %v835_v1, %v327_v18  ;;  %v328_v25 = vmul.f32 %v830_v0, %v672_v19  ;;  %v737_v30 = vunpack.c.h.bf16 %v767_v15 }
  0x3c   : > { %v489_v27 = vmax.f32 %v457_v20, 0.0  ;;  %v458_v28 = vadd.f32 %v732_v9, %v362_v21  ;;  %v329_v29 = vmul.f32 %v830_v0, %v673_v22 }
  0x3d   : > { %521 = vst.msk [vmem:[%s864_s8 + $0xd0] sm:$0xff] %vm494_vm0, %v488_v23  ;;  %v459_v31 = vadd.f32 %v733_v14, %v363_v24  ;;  %v364_v32 = vadd.f32 %v835_v1, %v328_v25 }
  0x3e   : > { %522 = vst.msk [vmem:[%s864_s8 + $0xd8] sm:$0xff] %vm494_vm0, %v489_v27  ;;  %v490_v33 = vmax.f32 %v458_v28, 0.0  ;;  %v365_v34 = vadd.f32 %v835_v1, %v329_v29 }
  0x3f   : > { %v491_v35 = vmax.f32 %v459_v31, 0.0  ;;  %v460_v36 = vadd.f32 %v736_v26, %v364_v32 }
  0x40   : > { %523 = vst.msk [vmem:[%s864_s8 + $0xe0] sm:$0xff] %vm494_vm0, %v490_v33  ;;  %v461_v37 = vadd.f32 %v737_v30, %v365_v34 }
  0x41   : > { %524 = vst.msk [vmem:[%s864_s8 + $0xe8] sm:$0xff] %vm494_vm0, %v491_v35  ;;  %v492_v0 = vmax.f32 %v460_v36, 0.0 }
  0x42   : > { %v493_v38 = vmax.f32 %v461_v37, 0.0 }
  0x43   : > { %525 = vst.msk [vmem:[%s864_s8 + $0xf0] sm:$0xff] %vm494_vm0, %v492_v0 }
  0x44   : > { %526 = vst.msk [vmem:[%s864_s8 + $0xf8] sm:$0xff] %vm494_vm0, %v493_v38 }
  0x45 PF: > { %s14_s15 = sadd.s32 1, %s784_s15  }
  0x46   : > { %p11_p5 = scmp.ge.s32.totalorder %s14_s15, 6  }
  0x48   :  { %13 = sbr.rel (!%p11_p5) target bundleno = 1 (0x1), region = 69 }

// kernel: resblock_forward.3
= control target key start
LH: loop header
LB: loop body
LE: loop exit
PB: predicated region body
PF: predicated region fallthrough
CT: control target
= control target key end

     0   :  { %s3803_s30 = smov 0   ;;  %s4969_s0 = inlined_call_operand.vmem [shape: bf16[1792,4], index: 0, kind: input, shape index: {}, may-alias: {0,1}]   ;;  %s4970_s1 = inlined_call_operand.vmem [shape: bf16[1792,4], index: 1, kind: input, shape index: {}, may-alias: {0,1}]   ;;  %s4971_s2 = inlined_call_operand.vmem [shape: f32[1792,1], index: 2, kind: input, shape index: {}]   ;;  %s4972_s3 = inlined_call_operand.vmem [shape: bf16[9,4,8], index: 3, kind: input, shape index: {}]   ;;  %s4973_s4 = inlined_call_operand.vmem [shape: bf16[4,8], index: 4, kind: input, shape index: {}]   ;;  %s4974_s5 = inlined_call_operand.vmem [shape: f32[1,8], index: 5, kind: input, shape index: {}]   ;;  %s4975_s6 = inlined_call_operand.vmem [shape: bf16[1536,8], index: 6, kind: output, shape index: {0}]   ;;  %s4976_s7 = inlined_call_operand.vmem [shape: bf16[1536,8], index: 7, kind: output, shape index: {1}]   ;;  %s4977_s8 = inlined_call_operand.vmem [shape: f32[1,8], index: 8, kind: output, shape index: {2}]   ;;  %s4978_s9 = inlined_call_operand.vmem [shape: f32[1,8], index: 9, kind: output, shape index: {3}]  }
   0x1 LB: > { %s3380_s10 = sadd.s32 4294967295, %s3749_s30   ;;  %p3384_p0 = scmp.ge.s32.totalorder %s3749_s30, 1  ;;  %s3749_s30 = sphi %s3803_s30, %s20_s30  }
   0x2   : > { %p311_p1 = scmp.lt.s32.totalorder %s3749_s30, 7 }
   0x4   : > { %p312_p2 = pnand %p3384_p0, %p311_p1 }
   0x6   : > { %315 = sbr.rel (%p312_p2) target bundleno = 834 (0x342), region = 44 }
   0xb   : > { %s3385_s11 = sshll.u32 %s3380_s10, 5  ;;  %p3395_p6 = scmp.ne.s32.totalorder %s3380_s10, 0 }
   0xc   : > { %p364_p3 = scmp.lt.s32.totalorder %s3385_s11, 223  ;;  %s3567_s12 = sadd.s32 32, %s3385_s11 }
   0xd   : > { %p371_p4 = scmp.lt.s32.totalorder %s3567_s12, 223  ;;  %p384_p5 = scmp.lt.s32.totalorder %s3385_s11, 191 }
   0xe   : > { %s365_s13 = scalar_select %p364_p3, %s3385_s11, 223 }
   0xf   : > { %s5019_s12 = smov (!%p371_p4, %s3567_s12), 223  ;;  %s5021_s11 = smov (!%p384_p5, %s3385_s11), 191 }
  0x10   : > { %s3386_s14 = sshll.u32 %s365_s13, 2  ;;  %s3390_s15 = sshll.u32 %s365_s13, 3 }
  0x11   : > { %s3814_s18 = scalar_lea.vmem %s4969_s0, %s3386_s14  ;;  %s3388_s19 = sshll.u32 %s5019_s12, 2 }
  0x12   : > { %s3819_s22 = scalar_lea.vmem %s4970_s1, %s3388_s19  ;;  %s3824_s25 = scalar_lea.vmem %s4971_s2, %s3390_s15 }
  0x13   : > { %s3392_s26 = sshll.u32 %s5021_s11, 2  ;;  %399 = sbr.rel (%p3395_p6) target bundleno = 27 (0x1b), region = 48 }
  0x14   : > { %s3829_s29 = scalar_lea.vmem %s4975_s6, %s3392_s26  ;;  %s3834_s12 = scalar_lea.vmem %s4976_s7, %s3392_s26 }
  0x18   : > { %vm400_vm0 = vcmask 57344   ;;  %v3751_v0 = vmov 0.0  }
  0x19   : > { %401 = vst.msk [vmem:[%s4977_s8] sm:$0x1] %vm400_vm0, %v3751_v0 }
  0x1a   : > { %402 = vst.msk [vmem:[%s4978_s9] sm:$0x1] %vm400_vm0, %v3751_v0 }
  0x1b PF: > { %v3396_v1 = vld [vmem:[%s4972_s3 + $0x2] sm:$0x3]  ;;  %vm743_vm1 = vcmask 1041408   ;;  %v644_v2 = vld [vmem:[%s4972_s3] sm:$0x3]  ;;  %v3704_v6 = vld [vmem:[%s3814_s18 + $0x48] sm:$0xff]  }
  0x1c   : > { %v745_v3 = vsel %vm743_vm1, %v3396_v1, 0  ;;  %v885_v4 = vsel %vm743_vm1, %v644_v2, 0  ;;  %v3703_v5 = vld [vmem:[%s3814_s18 + $0x40] sm:$0xff]   ;;  %v3606_v10 = vunpack.c.l.bf16 %v3704_v6  ;;  %vm467_vm2 = vcmask 31744   ;;  %v3463_v14 = vld [vmem:[%s4972_s3 + $0x8] sm:$0x3] }
  0x1d   : > { %3726 = vmatpush.bf16.msra.mxu2 %v745_v3  ;;  %3727 = vmatpush.bf16.msra.mxu3 %v885_v4  ;;  %v3429_v7 = vld [vmem:[%s4972_s3 + $0x4] sm:$0x3]  ;;  %v3602_v8 = vunpack.c.l.bf16 %v3703_v5  ;;  %v3603_v9 = vunpack.c.h.bf16 %v3703_v5  ;;  %v3446_v13 = vld [vmem:[%s4972_s3 + $0x6] sm:$0x3]  ;;  %v1519_v18 = vsel %vm743_vm1, %v3463_v14, 0  ;;  %v3696_v23 = vld [vmem:[%s3814_s18 + $0x8] sm:$0xff]   ;;  %v3607_v30 = vunpack.c.h.bf16 %v3704_v6 }
  0x1e   : > { %754 = vmatpush.bf16.msra.mxu0 %v745_v3  ;;  %894 = vmatpush.bf16.msra.mxu1 %v885_v4  ;;  %v1075_v11 = vsel %vm743_vm1, %v3429_v7, 0  ;;  %486 = vst.msk [vmem:[#allocation2 + $0x90] sm:$0xff] %vm467_vm2, %v3606_v10  ;;  %v1297_v17 = vsel %vm743_vm1, %v3446_v13, 0  ;;  %v3569_v22 = vld [vmem:[%s3814_s18] sm:$0xff]   ;;  %v3480_v25 = vld [vmem:[%s4972_s3 + $0xa] sm:$0x3]  ;;  %v3574_v29 = vunpack.c.l.bf16 %v3696_v23  ;;  %v3575_v33 = vunpack.c.h.bf16 %v3696_v23 }
  0x1f   : > { %484 = vst.msk [vmem:[#allocation2 + $0x80] sm:$0xff] %vm467_vm2, %v3602_v8  ;;  %v3570_v24 = vunpack.c.l.bf16 %v3569_v22  ;;  %v3571_v26 = vunpack.c.h.bf16 %v3569_v22  ;;  %v3705_v27 = vld [vmem:[%s3814_s18 + $0x50] sm:$0xff]   ;;  %v1741_v28 = vsel %vm743_vm1, %v3480_v25, 0  ;;  %v3706_v34 = vld [vmem:[%s3814_s18 + $0x58] sm:$0xff]   ;;  %v3707_v54 = vld [vmem:[%s3814_s18 + $0x60] sm:$0xff]   ;;  %vm2964_vm3 = vcmask 60416  }
  0x20   : > { %485 = vst.msk [vmem:[#allocation2 + $0x88] sm:$0xff] %vm467_vm2, %v3603_v9  ;;  %v3697_v31 = vld [vmem:[%s3814_s18 + $0x10] sm:$0xff]   ;;  %v3610_v32 = vunpack.c.l.bf16 %v3705_v27  ;;  %v3611_v36 = vunpack.c.h.bf16 %v3705_v27  ;;  %v3698_v37 = vld [vmem:[%s3814_s18 + $0x18] sm:$0xff]   ;;  %v3614_v38 = vunpack.c.l.bf16 %v3706_v34  ;;  %v3615_v53 = vunpack.c.h.bf16 %v3706_v34  ;;  %v3699_v57 = vld [vmem:[%s3814_s18 + $0x20] sm:$0xff]  }
  0x21   : > { %1084 = vmatpush.bf16.msrb.mxu2 %v1075_v11  ;;  %1306 = vmatpush.bf16.msrb.mxu3 %v1297_v17  ;;  %468 = vst.msk [vmem:[#allocation2] sm:$0xff] %vm467_vm2, %v3570_v24  ;;  %v3578_v35 = vunpack.c.l.bf16 %v3697_v31  ;;  %v3579_v39 = vunpack.c.h.bf16 %v3697_v31  ;;  %v3582_v40 = vunpack.c.l.bf16 %v3698_v37  ;;  %v3618_v55 = vunpack.c.l.bf16 %v3707_v54  ;;  %v3708_v8 = vld [vmem:[%s3814_s18 + $0x68] sm:$0xff]  }
  0x22   : > { %1528 = vmatpush.bf16.msrb.mxu0 %v1519_v18  ;;  %1750 = vmatpush.bf16.msrb.mxu1 %v1741_v28  ;;  %469 = vst.msk [vmem:[#allocation2 + $0x8] sm:$0xff] %vm467_vm2, %v3571_v26  ;;  %v3583_v56 = vunpack.c.h.bf16 %v3698_v37  ;;  %v3586_v58 = vunpack.c.l.bf16 %v3699_v57  ;;  %v3619_v7 = vunpack.c.h.bf16 %v3707_v54  ;;  %v3622_v9 = vunpack.c.l.bf16 %v3708_v8  ;;  %v3700_v11 = vld [vmem:[%s3814_s18 + $0x28] sm:$0xff]  }
  0x23   : > { %470 = vst.msk [vmem:[#allocation2 + $0x10] sm:$0xff] %vm467_vm2, %v3574_v29  ;;  %v3587_v10 = vunpack.c.h.bf16 %v3699_v57  ;;  %v3590_v13 = vunpack.c.l.bf16 %v3700_v11  ;;  %v3623_v29 = vunpack.c.h.bf16 %v3708_v8  ;;  %vm2755_vm4 = vcmask 64512  }
  0x24   : > { %487 = vst.msk [vmem:[#allocation2 + $0x98] sm:$0xff] %vm467_vm2, %v3607_v30  ;;  %v3709_v30 = vld [vmem:[%s3814_s18 + $0x70] sm:$0xff]   ;;  %vm2826_vm5 = vcmask 57344  }
  0x25   : > { %488 = vst.msk [vmem:[#allocation2 + $0xa0] sm:$0xff] %vm467_vm2, %v3610_v32  ;;  %v3899_v44 = vld [vmem:[#allocation2 + $0x90] sm:$0xff]  ;;  %v3626_v31 = vunpack.c.l.bf16 %v3709_v30  ;;  %v3591_v32 = vunpack.c.h.bf16 %v3700_v11 }
  0x26   : > { %v3859_v12 = vld [vmem:[#allocation2 + $0x80] sm:$0xff]  ;;  %471 = vst.msk [vmem:[#allocation2 + $0x18] sm:$0xff] %vm467_vm2, %v3575_v33  ;;  %v3701_v33 = vld [vmem:[%s3814_s18 + $0x30] sm:$0xff]  }
  0x27   : > { %v3867_v15 = vld [vmem:[#allocation2 + $0x81] sm:$0xff]  ;;  %v3873_v19 = vld [vmem:[#allocation2 + $0x89] sm:$0xff]  ;;  %472 = vst.msk [vmem:[#allocation2 + $0x20] sm:$0xff] %vm467_vm2, %v3578_v35  ;;  %v3594_v34 = vunpack.c.l.bf16 %v3701_v33  ;;  %v3595_v54 = vunpack.c.h.bf16 %v3701_v33 }
  0x28   : > { %v3869_v16 = vld [vmem:[#allocation2 + $0x88] sm:$0xff]  ;;  %v685_v21 = vpack.c.bf16 %v3873_v19, %v3867_v15  ;;  %v596_v41 = vld [vmem:[#allocation2] sm:$0xff]  ;;  %489 = vst.msk [vmem:[#allocation2 + $0xa8] sm:$0xff] %vm467_vm2, %v3611_v36 }
  0x29   : > { %v636_v20 = vpack.c.bf16 %v3869_v16, %v3859_v12  ;;  %v645_v42 = vld [vmem:[#allocation2 + $0x1] sm:$0xff]  ;;  %490 = vst.msk [vmem:[#allocation2 + $0xb0] sm:$0xff] %vm467_vm2, %v3614_v38 }
  0x2a   : > { %3405 = vmatmul.msk.bf16.vlgmr.msra.gmra.mxu2 %vm467_vm2, %v685_v21  ;;  %v597_v43 = vld [vmem:[#allocation2 + $0x8] sm:$0xff]  ;;  %473 = vst.msk [vmem:[#allocation2 + $0x28] sm:$0xff] %vm467_vm2, %v3579_v39  ;;  %v598_v59 = vld [vmem:[#allocation2 + $0x10] sm:$0xff] }
  0x2b   : > { %3421 = vmatmul.msk.bf16.vlgmr.msra.gmra.mxu3 %vm467_vm2, %v636_v20  ;;  %v646_v45 = vld [vmem:[#allocation2 + $0x9] sm:$0xff]  ;;  %v628_v46 = vpack.c.bf16 %v597_v43, %v596_v41  ;;  %v3903_v48 = vld [vmem:[#allocation2 + $0x91] sm:$0xff]  ;;  %474 = vst.msk [vmem:[#allocation2 + $0x30] sm:$0xff] %vm467_vm2, %v3582_v40 }
  0x2c   : > { %v677_v47 = vpack.c.bf16 %v646_v45, %v645_v42  ;;  %v3905_v49 = vld [vmem:[#allocation2 + $0x98] sm:$0xff]  ;;  %491 = vst.msk [vmem:[#allocation2 + $0xb8] sm:$0xff] %vm467_vm2, %v3615_v53  ;;  %v3928_v63 = vld [vmem:[#allocation2 + $0xa0] sm:$0xff] }
  0x2d   : > { %3413 = vmatmul.msk.bf16.vlgmr.msra.gmra.mxu1 %vm467_vm2, %v628_v46  ;;  %v3909_v50 = vld [vmem:[#allocation2 + $0x99] sm:$0xff]  ;;  %v637_v51 = vpack.c.bf16 %v3905_v49, %v3899_v44  ;;  %492 = vst.msk [vmem:[#allocation2 + $0xc0] sm:$0xff] %vm467_vm2, %v3618_v55  ;;  %v647_v61 = vld [vmem:[#allocation2 + $0x11] sm:$0xff] }
  0x2e   : > { %3397 = vmatmul.msk.bf16.vlgmr.msra.gmra.mxu0 %vm467_vm2, %v677_v47  ;;  %v686_v52 = vpack.c.bf16 %v3909_v50, %v3903_v48  ;;  %475 = vst.msk [vmem:[#allocation2 + $0x38] sm:$0xff] %vm467_vm2, %v3583_v56  ;;  %v3924_v60 = vld [vmem:[#allocation2 + $0x18] sm:$0xff]  ;;  %v3952_v14 = vld [vmem:[#allocation2 + $0x20] sm:$0xff] }
  0x2f   : > { %476 = vst.msk [vmem:[#allocation2 + $0x40] sm:$0xff] %vm467_vm2, %v3586_v58  ;;  %v3926_v62 = vld [vmem:[#allocation2 + $0x19] sm:$0xff]  ;;  %v3930_v0 = vld [vmem:[#allocation2 + $0xa8] sm:$0xff]  ;;  %v629_v1 = vpack.c.bf16 %v3924_v60, %v598_v59 }
  0x30   : > { %v3933_v2 = vld [vmem:[#allocation2 + $0xa1] sm:$0xff]  ;;  %v3935_v3 = vld [vmem:[#allocation2 + $0xa9] sm:$0xff]  ;;  %v678_v4 = vpack.c.bf16 %v3926_v62, %v647_v61  ;;  %v638_v5 = vpack.c.bf16 %v3930_v0, %v3928_v63  ;;  %493 = vst.msk [vmem:[#allocation2 + $0xc8] sm:$0xff] %vm467_vm2, %v3619_v7  ;;  %v3702_v55 = vld [vmem:[%s3814_s18 + $0x38] sm:$0xff]  }
  0x31   : > { %v687_v6 = vpack.c.bf16 %v3935_v3, %v3933_v2  ;;  %494 = vst.msk [vmem:[#allocation2 + $0xd0] sm:$0xff] %vm467_vm2, %v3622_v9  ;;  %v3954_v17 = vld [vmem:[#allocation2 + $0x28] sm:$0xff]  ;;  %v3960_v21 = vld [vmem:[#allocation2 + $0xb0] sm:$0xff]  ;;  %v3598_v56 = vunpack.c.l.bf16 %v3702_v55 }
  0x32   : > { %477 = vst.msk [vmem:[#allocation2 + $0x48] sm:$0xff] %vm467_vm2, %v3587_v10  ;;  %v3956_v18 = vld [vmem:[#allocation2 + $0x21] sm:$0xff]  ;;  %v3958_v20 = vld [vmem:[#allocation2 + $0x29] sm:$0xff]  ;;  %v630_v23 = vpack.c.bf16 %v3954_v17, %v3952_v14 }
  0x33   : > { %478 = vst.msk [vmem:[#allocation2 + $0x50] sm:$0xff] %vm467_vm2, %v3590_v13  ;;  %v3962_v22 = vld [vmem:[#allocation2 + $0xb8] sm:$0xff]  ;;  %v679_v26 = vpack.c.bf16 %v3958_v20, %v3956_v18  ;;  %v3986_v35 = vld [vmem:[#allocation2 + $0x30] sm:$0xff]  ;;  %v3633_v13 = vld [vmem:[%s3819_s22] sm:$0xff]  }
  0x34   : > { %v3966_v24 = vld [vmem:[#allocation2 + $0xb1] sm:$0xff]  ;;  %v3968_v25 = vld [vmem:[#allocation2 + $0xb9] sm:$0xff]  ;;  %v639_v27 = vpack.c.bf16 %v3962_v22, %v3960_v21  ;;  %495 = vst.msk [vmem:[#allocation2 + $0xd8] sm:$0xff] %vm467_vm2, %v3623_v29 }
  0x35   : > { %v688_v28 = vpack.c.bf16 %v3968_v25, %v3966_v24  ;;  %496 = vst.msk [vmem:[#allocation2 + $0xe0] sm:$0xff] %vm467_vm2, %v3626_v31  ;;  %v3988_v36 = vld [vmem:[#allocation2 + $0x38] sm:$0xff]  ;;  %v3994_v39 = vld [vmem:[#allocation2 + $0xc0] sm:$0xff] }
  0x36   : > { %479 = vst.msk [vmem:[#allocation2 + $0x58] sm:$0xff] %vm467_vm2, %v3591_v32  ;;  %v3990_v37 = vld [vmem:[#allocation2 + $0x31] sm:$0xff]  ;;  %v3992_v38 = vld [vmem:[#allocation2 + $0x39] sm:$0xff]  ;;  %v631_v41 = vpack.c.bf16 %v3988_v36, %v3986_v35 }
  0x37   : > { %480 = vst.msk [vmem:[#allocation2 + $0x60] sm:$0xff] %vm467_vm2, %v3594_v34  ;;  %v3996_v40 = vld [vmem:[#allocation2 + $0xc8] sm:$0xff]  ;;  %v680_v45 = vpack.c.bf16 %v3992_v38, %v3990_v37  ;;  %v4020_v57 = vld [vmem:[#allocation2 + $0x40] sm:$0xff] }
  0x38   : > { %v4000_v42 = vld [vmem:[#allocation2 + $0xc1] sm:$0xff]  ;;  %v4002_v43 = vld [vmem:[#allocation2 + $0xc9] sm:$0xff]  ;;  %v640_v46 = vpack.c.bf16 %v3996_v40, %v3994_v39  ;;  %481 = vst.msk [vmem:[#allocation2 + $0x68] sm:$0xff] %vm467_vm2, %v3595_v54 }
  0x39   : > { %v689_v47 = vpack.c.bf16 %v4002_v43, %v4000_v42  ;;  %482 = vst.msk [vmem:[#allocation2 + $0x70] sm:$0xff] %vm467_vm2, %v3598_v56  ;;  %v4022_v58 = vld [vmem:[#allocation2 + $0x48] sm:$0xff] }
  0x3a   : > { %3406 = vmatmul.msk.bf16.gmra.mxu2 %vm467_vm2, %v686_v52  ;;  %v3710_v52 = vld [vmem:[%s3814_s18 + $0x78] sm:$0xff]   ;;  %v4024_v59 = vld [vmem:[#allocation2 + $0x41] sm:$0xff]  ;;  %v4026_v61 = vld [vmem:[#allocation2 + $0x49] sm:$0xff] }
  0x3b   : > { %3422 = vmatmul.msk.bf16.gmra.mxu3 %vm467_vm2, %v637_v51  ;;  %v3627_v51 = vunpack.c.h.bf16 %v3709_v30  ;;  %v3630_v53 = vunpack.c.l.bf16 %v3710_v52  ;;  %v681_v8 = vpack.c.bf16 %v4026_v61, %v4024_v59  ;;  %v3631_v11 = vunpack.c.h.bf16 %v3710_v52 }
  0x3c   : > { %v4036_v7 = vld [vmem:[#allocation2 + $0xd9] sm:$0xff] }
  0x3d   : > { %3414 = vmatmul.msk.bf16.gmra.mxu1 %vm467_vm2, %v629_v1  ;;  %497 = vst.msk [vmem:[#allocation2 + $0xe8] sm:$0xff] %vm467_vm2, %v3627_v51  ;;  %v4028_v1 = vld [vmem:[#allocation2 + $0xd0] sm:$0xff]  ;;  %v4055_v29 = vld [vmem:[#allocation2 + $0x58] sm:$0xff]  ;;  %v4061_v32 = vld [vmem:[#allocation2 + $0xe0] sm:$0xff] }
  0x3e   : > { %3398 = vmatmul.msk.bf16.gmra.mxu0 %vm467_vm2, %v678_v4  ;;  %498 = vst.msk [vmem:[#allocation2 + $0xf0] sm:$0xff] %vm467_vm2, %v3630_v53  ;;  %v4030_v4 = vld [vmem:[#allocation2 + $0xd8] sm:$0xff]  ;;  %v4081_v52 = vld [vmem:[#allocation2 + $0x60] sm:$0xff] }
  0x3f   : > { %v641_v9 = vpack.c.bf16 %v4030_v4, %v4028_v1  ;;  %499 = vst.msk [vmem:[#allocation2 + $0xf8] sm:$0xff] %vm467_vm2, %v3631_v11  ;;  %v4057_v30 = vld [vmem:[#allocation2 + $0x51] sm:$0xff]  ;;  %v4059_v31 = vld [vmem:[#allocation2 + $0x59] sm:$0xff]  ;;  %v4083_v53 = vld [vmem:[#allocation2 + $0x68] sm:$0xff] }
  0x40   : > { %v4085_v54 = vld [vmem:[#allocation2 + $0x61] sm:$0xff] }
  0x44   : > { %v4063_v33 = vld [vmem:[#allocation2 + $0xe8] sm:$0xff] }
  0x45   : > { %4986 = vst [vmem:[#allocation3_spill] sm:$0xff] %v4063_v33  ;;  %v4089_v56 = vld [vmem:[#allocation2 + $0xf0] sm:$0xff] }
  0x46   : > { %4989 = vst [vmem:[#allocation6_spill] sm:$0xff] %v4089_v56 }
  0x4a   : > { %3407 = vmatmul.msk.bf16.gmra.mxu2 %vm467_vm2, %v687_v6  ;;  %v4034_v6 = vld [vmem:[#allocation2 + $0xd1] sm:$0xff] }
  0x4b   : > { %3423 = vmatmul.msk.bf16.gmra.mxu3 %vm467_vm2, %v638_v5  ;;  %v632_v5 = vpack.c.bf16 %v4022_v58, %v4020_v57  ;;  %v690_v10 = vpack.c.bf16 %v4036_v7, %v4034_v6 }
  0x4d   : > { %3415 = vmatmul.msk.bf16.gmra.mxu1 %vm467_vm2, %v630_v23  ;;  %v3634_v23 = vunpack.c.l.bf16 %v3633_v13 }
  0x4e   : > { %3399 = vmatmul.msk.bf16.gmra.mxu0 %vm467_vm2, %v679_v26  ;;  %v3635_v26 = vunpack.c.h.bf16 %v3633_v13 }
  0x4f   : > { %564 = vst.msk [vmem:[#allocation2 + $0x100] sm:$0xff] %vm467_vm2, %v3634_v23 }
  0x50   : > { %565 = vst.msk [vmem:[#allocation2 + $0x108] sm:$0xff] %vm467_vm2, %v3635_v26  ;;  %v3497_v26 = vld [vmem:[%s4972_s3 + $0xc] sm:$0x3] }
  0x5a   : > { %3408 = vmatmul.msk.bf16.gmra.mxu2 %vm467_vm2, %v688_v28  ;;  %v4053_v28 = vld [vmem:[#allocation2 + $0x50] sm:$0xff] }
  0x5b   : > { %3424 = vmatmul.msk.bf16.gmra.mxu3 %vm467_vm2, %v639_v27  ;;  %v3599_v27 = vunpack.c.h.bf16 %v3702_v55  ;;  %v633_v34 = vpack.c.bf16 %v4055_v29, %v4053_v28  ;;  %v4087_v55 = vld [vmem:[#allocation2 + $0x69] sm:$0xff] }
  0x5c   : > { %v683_v11 = vpack.c.bf16 %v4087_v55, %v4085_v54 }
  0x5d   : > { %3416 = vmatmul.msk.bf16.gmra.mxu1 %vm467_vm2, %v631_v41  ;;  %483 = vst.msk [vmem:[#allocation2 + $0x78] sm:$0xff] %vm467_vm2, %v3599_v27  ;;  %v4067_v41 = vld [vmem:[#allocation2 + $0xe1] sm:$0xff]  ;;  %v1963_v27 = vsel %vm743_vm1, %v3497_v26, 0 }
  0x5e   : > { %3400 = vmatmul.msk.bf16.gmra.mxu0 %vm467_vm2, %v680_v45  ;;  %4987 = vst [vmem:[#allocation4_spill] sm:$0xff] %v4067_v41  ;;  %v4069_v45 = vld [vmem:[#allocation2 + $0xe9] sm:$0xff]  ;;  %1972 = vmatpush.bf16.msra.mxu2 %v1963_v27 }
  0x5f   : > { %4988 = vst [vmem:[#allocation5_spill] sm:$0xff] %v4069_v45  ;;  %v691_v51 = vpack.c.bf16 %v4069_v45, %v4067_v41 }
  0x64   : > { %v4123_v26 = vld [vmem:[#allocation2 + $0x78] sm:$0xff] }
  0x6a   : > { %3409 = vmatmul.msk.bf16.gmra.mxu2 %vm467_vm2, %v689_v47  ;;  %v642_v47 = vpack.c.bf16 %v4063_v33, %v4061_v32 }
  0x6b   : > { %3425 = vmatmul.msk.bf16.gmra.mxu3 %vm467_vm2, %v640_v46  ;;  %v682_v46 = vpack.c.bf16 %v4059_v31, %v4057_v30 }
  0x6d   : > { %3417 = vmatmul.msk.bf16.gmra.mxu1 %vm467_vm2, %v632_v5  ;;  %v4091_v5 = vld [vmem:[#allocation2 + $0xf8] sm:$0xff] }
  0x6e   : > { %3401 = vmatmul.msk.bf16.gmra.mxu0 %vm467_vm2, %v681_v8  ;;  %4990 = vst [vmem:[#allocation7_spill] sm:$0xff] %v4091_v5  ;;  %v634_v8 = vpack.c.bf16 %v4083_v53, %v4081_v52  ;;  %v643_v13 = vpack.c.bf16 %v4091_v5, %v4089_v56  ;;  %v977_v5 = vld [vmem:[#allocation2 + $0xa] sm:$0xff] }
  0x7a   : > { %3410 = vmatmul.msk.bf16.gmra.mxu2 %vm467_vm2, %v690_v10  ;;  %v4097_v10 = vld [vmem:[#allocation2 + $0xf9] sm:$0xff] }
  0x7b   : > { %3426 = vmatmul.msk.bf16.gmra.mxu3 %vm467_vm2, %v641_v9  ;;  %v4095_v9 = vld [vmem:[#allocation2 + $0xf1] sm:$0xff]  ;;  %4992 = vst [vmem:[#allocation9_spill] sm:$0xff] %v4097_v10 }
  0x7c   : > { %4991 = vst [vmem:[#allocation8_spill] sm:$0xff] %v4095_v9  ;;  %v692_v23 = vpack.c.bf16 %v4097_v10, %v4095_v9  ;;  %v4125_v10 = vld [vmem:[#allocation2 + $0x71] sm:$0xff]  ;;  %v1230_v9 = vpack.c.bf16 %v3952_v14, %v3924_v60 }
  0x7d   : > { %3418 = vmatmul.msk.bf16.gmra.mxu1 %vm467_vm2, %v633_v34  ;;  %v3514_v34 = vld [vmem:[%s4972_s3 + $0xe] sm:$0x3] }
  0x7e   : > { %3402 = vmatmul.msk.bf16.gmra.mxu0 %vm467_vm2, %v682_v46  ;;  %v2185_v46 = vsel %vm743_vm1, %v3514_v34, 0 }
  0x7f   : > { %2194 = vmatpush.bf16.msra.mxu3 %v2185_v46  ;;  %v976_v46 = vld [vmem:[#allocation2 + $0x2] sm:$0xff] }
  0x80   : > { %v1008_v45 = vpack.c.bf16 %v977_v5, %v976_v46  ;;  %v978_v5 = vld [vmem:[#allocation2 + $0x12] sm:$0xff]  ;;  %v1231_v46 = vpack.c.bf16 %v3986_v35, %v3954_v17  ;;  %v1644_v17 = vld [vmem:[#allocation2 + $0x2a] sm:$0xff] }
  0x81   : > { %v1645_v35 = vld [vmem:[#allocation2 + $0x32] sm:$0xff] }
  0x8a   : > { %3411 = vmatmul.msk.bf16.gmra.mxu2 %vm467_vm2, %v691_v51 }
  0x8b   : > { %3427 = vmatmul.msk.bf16.gmra.mxu3 %vm467_vm2, %v642_v47  ;;  %v3531_v47 = vld [vmem:[%s4972_s3 + $0x10] sm:$0x3] }
  0x8d   : > { %3419 = vmatmul.msk.bf16.gmra.mxu1 %vm467_vm2, %v634_v8  ;;  %v2407_v8 = vsel %vm743_vm1, %v3531_v47, 0 }
  0x8e   : > { %3403 = vmatmul.msk.bf16.gmra.mxu0 %vm467_vm2, %v683_v11  ;;  %v4121_v11 = vld [vmem:[#allocation2 + $0x70] sm:$0xff] }
  0x8f   : > { %2416 = vmatpush.bf16.msra.mxu0 %v2407_v8 }
  0x9a   : > { %3412 = vmatmul.msk.bf16.gmra.mxu2 %vm467_vm2, %v692_v23  ;;  %v635_v23 = vpack.c.bf16 %v4123_v26, %v4121_v11 }
  0x9b   : > { %3428 = vmatmul.msk.bf16.gmra.mxu3 %vm467_vm2, %v643_v13  ;;  %v4127_v13 = vld [vmem:[#allocation2 + $0x79] sm:$0xff] }
  0x9c   : > { %v684_v47 = vpack.c.bf16 %v4127_v13, %v4125_v10 }
  0x9d   : > { %3420 = vmatmul.msk.bf16.gmra.mxu1 %vm467_vm2, %v635_v23 }
  0x9e   : > { %3404 = vmatmul.msk.bf16.gmra.mxu0 %vm467_vm2, %v684_v47 }
  0xaa   : > { %3430 = vmatmul.msk.bf16.vlgmr.msrb.gmra.mxu2 %vm467_vm2, %v1008_v45  ;;  %v896_v23 = vpop.f32.mrf.mxu1 }
  0xab   : > { %3447 = vmatmul.msk.bf16.vlgmr.msrb.gmra.mxu3 %vm467_vm2, %v1230_v9  ;;  %v1452_v9 = vpack.c.bf16 %v3956_v18, %v3926_v62  ;;  %v756_v45 = vpop.f32.mrf.mxu0 }
  0xac   : > { %v4153_v47 = vadd.f32 %v896_v23, %v756_v45  ;;  %v1675_v23 = vpack.c.bf16 %v1645_v35, %v1644_v17 }
  0xad   : > { %v796_v27 = vpop.f32.mrf.mxu2 }
  0xae   : > { %v936_v51 = vpop.f32.mrf.mxu3  ;;  %3464 = vmatmul.msk.bf16.vlgmr.msrb.gmra.mxu0 %vm467_vm2, %v1452_v9 }
  0xaf   : > { %v4129_v34 = vadd.f32 %v936_v51, %v796_v27  ;;  %v3045_v51 = vld [vmem:[%s4973_s4] sm:$0x3] }
  0xb0   : > { %v3099_v8 = vsel %vm743_vm1, %v3045_v51, 0  ;;  %v1642_v27 = vld [vmem:[#allocation2 + $0x1a] sm:$0xff] }
  0xb1   : > { %4993 = vst [vmem:[#allocation10_spill] sm:$0xff] %v4129_v34  ;;  %v1643_v34 = vld [vmem:[#allocation2 + $0x22] sm:$0xff]  ;;  %3108 = vmatpush.bf16.msra.mxu1 %v3099_v8  ;;  %v1009_v51 = vpack.c.bf16 %v1642_v27, %v978_v5 }
  0xb2   : > { %v1674_v14 = vpack.c.bf16 %v1643_v34, %v1642_v27  ;;  %v898_v8 = vpop.f32.mrf.mxu1 }
  0xb4   : > { %3481 = vmatmul.msk.bf16.vlgmr.msrb.gmra.mxu1 %vm467_vm2, %v1674_v14  ;;  %v1453_v14 = vpack.c.bf16 %v3990_v37, %v3958_v20 }
  0xb5   : > { %v4147_v60 = vpop.f32.mrf.mxu2 }
  0xb6   : > { %v4145_v56 = vpop.f32.mrf.mxu3  ;;  %4995 = vst [vmem:[#allocation12_spill] sm:$0xff] %v4147_v60  ;;  %v758_v60 = vpop.f32.mrf.mxu0 }
  0xb7   : > { %4994 = vst [vmem:[#allocation11_spill] sm:$0xff] %v4145_v56  ;;  %v4159_v62 = vadd.f32 %v898_v8, %v758_v60  ;;  %v1010_v60 = vpack.c.bf16 %v1644_v17, %v1643_v34  ;;  %v1454_v17 = vpack.c.bf16 %v4024_v59, %v3992_v38 }
  0xba   : > { %3431 = vmatmul.msk.bf16.gmra.mxu2 %vm467_vm2, %v1009_v51  ;;  %v901_v27 = vpop.f32.mrf.mxu1 }
  0xbb   : > { %3448 = vmatmul.msk.bf16.gmra.mxu3 %vm467_vm2, %v1231_v46  ;;  %v1232_v46 = vpack.c.bf16 %v4020_v57, %v3988_v36  ;;  %v1646_v57 = vld [vmem:[#allocation2 + $0x3a] sm:$0xff] }
  0xbd   : > { %v801_v33 = vpop.f32.mrf.mxu2 }
  0xbe   : > { %v941_v56 = vpop.f32.mrf.mxu3  ;;  %v761_v9 = vpop.f32.mrf.mxu0  ;;  %3465 = vmatmul.msk.bf16.gmra.mxu0 %vm467_vm2, %v1453_v14 }
  0xbf   : > { %v4161_v18 = vadd.f32 %v941_v56, %v801_v33  ;;  %v4167_v51 = vadd.f32 %v901_v27, %v761_v9  ;;  %v1647_v27 = vld [vmem:[#allocation2 + $0x42] sm:$0xff] }
  0xc2   : > { %v903_v20 = vpop.f32.mrf.mxu1 }
  0xc4   : > { %3482 = vmatmul.msk.bf16.gmra.mxu1 %vm467_vm2, %v1675_v23 }
  0xc5   : > { %v803_v45 = vpop.f32.mrf.mxu2 }
  0xc6   : > { %v943_v5 = vpop.f32.mrf.mxu3  ;;  %v763_v33 = vpop.f32.mrf.mxu0 }
  0xc7   : > { %v4169_v41 = vadd.f32 %v943_v5, %v803_v45  ;;  %v4175_v8 = vadd.f32 %v903_v20, %v763_v33  ;;  %v1676_v5 = vpack.c.bf16 %v1647_v27, %v1646_v57  ;;  %v1233_v45 = vpack.c.bf16 %v4053_v28, %v4022_v58 }
  0xc8   : > { %v4187_v20 = vpack.c.bf16 %v1646_v57, %v1645_v35  ;;  %v1649_v35 = vld [vmem:[#allocation2 + $0x52] sm:$0xff] }
  0xca   : > { %3432 = vmatmul.msk.bf16.gmra.mxu2 %vm467_vm2, %v1010_v60  ;;  %v906_v34 = vpop.f32.mrf.mxu1 }
  0xcb   : > { %3449 = vmatmul.msk.bf16.gmra.mxu3 %vm467_vm2, %v1232_v46 }
  0xcd   : > { %v806_v56 = vpop.f32.mrf.mxu2 }
  0xce   : > { %v946_v37 = vpop.f32.mrf.mxu3  ;;  %v766_v14 = vpop.f32.mrf.mxu0  ;;  %3466 = vmatmul.msk.bf16.gmra.mxu0 %vm467_vm2, %v1454_v17 }
  0xcf   : > { %v4177_v36 = vadd.f32 %v946_v37, %v806_v56  ;;  %v4183_v46 = vadd.f32 %v906_v34, %v766_v14  ;;  %v1648_v56 = vld [vmem:[#allocation2 + $0x4a] sm:$0xff] }
  0xd0   : > { %v1677_v57 = vpack.c.bf16 %v1649_v35, %v1648_v56 }
  0xd2   : > { %v908_v38 = vpop.f32.mrf.mxu1 }
  0xd4   : > { %3483 = vmatmul.msk.bf16.gmra.mxu1 %vm467_vm2, %v1676_v5  ;;  %v1455_v5 = vpack.c.bf16 %v4057_v30, %v4026_v61 }
  0xd5   : > { %v808_v9 = vpop.f32.mrf.mxu2 }
  0xd6   : > { %v948_v23 = vpop.f32.mrf.mxu3  ;;  %v768_v37 = vpop.f32.mrf.mxu0 }
  0xd7   : > { %v4185_v60 = vadd.f32 %v948_v23, %v808_v9  ;;  %v4194_v58 = vadd.f32 %v908_v38, %v768_v37  ;;  %v1234_v9 = vpack.c.bf16 %v4081_v52, %v4055_v29  ;;  %v4206_v38 = vpack.c.bf16 %v1648_v56, %v1647_v27  ;;  %v1651_v27 = vld [vmem:[#allocation2 + $0x62] sm:$0xff] }
  0xd9   : > { %4996 = vst [vmem:[#allocation13_spill] sm:$0xff] %v4185_v60 }
  0xda   : > { %3433 = vmatmul.msk.bf16.gmra.mxu2 %vm467_vm2, %v4187_v20  ;;  %v911_v34 = vpop.f32.mrf.mxu1 }
  0xdb   : > { %3450 = vmatmul.msk.bf16.gmra.mxu3 %vm467_vm2, %v1233_v45 }
  0xdd   : > { %v811_v33 = vpop.f32.mrf.mxu2 }
  0xde   : > { %v951_v59 = vpop.f32.mrf.mxu3  ;;  %v771_v23 = vpop.f32.mrf.mxu0  ;;  %3467 = vmatmul.msk.bf16.gmra.mxu0 %vm467_vm2, %v1455_v5 }
  0xdf   : > { %v4196_v28 = vadd.f32 %v951_v59, %v811_v33  ;;  %v4202_v45 = vadd.f32 %v911_v34, %v771_v23  ;;  %v1650_v33 = vld [vmem:[#allocation2 + $0x5a] sm:$0xff] }
  0xe0   : > { %v1678_v56 = vpack.c.bf16 %v1651_v27, %v1650_v33 }
  0xe2   : > { %v913_v61 = vpop.f32.mrf.mxu1 }
  0xe4   : > { %3484 = vmatmul.msk.bf16.gmra.mxu1 %vm467_vm2, %v1677_v57  ;;  %v1456_v57 = vpack.c.bf16 %v4085_v54, %v4059_v31 }
  0xe5   : > { %v813_v14 = vpop.f32.mrf.mxu2 }
  0xe6   : > { %v953_v17 = vpop.f32.mrf.mxu3  ;;  %v773_v59 = vpop.f32.mrf.mxu0 }
  0xe7   : > { %v4204_v60 = vadd.f32 %v953_v17, %v813_v14  ;;  %v4213_v29 = vadd.f32 %v913_v61, %v773_v59  ;;  %v1235_v14 = vpack.c.bf16 %v4121_v11, %v4083_v53  ;;  %v4225_v61 = vpack.c.bf16 %v1650_v33, %v1649_v35  ;;  %v1653_v35 = vld [vmem:[#allocation2 + $0x72] sm:$0xff] }
  0xe9   : > { %4997 = vst [vmem:[#allocation14_spill] sm:$0xff] %v4204_v60 }
  0xea   : > { %3434 = vmatmul.msk.bf16.gmra.mxu2 %vm467_vm2, %v4206_v38  ;;  %v916_v34 = vpop.f32.mrf.mxu1 }
  0xeb   : > { %3451 = vmatmul.msk.bf16.gmra.mxu3 %vm467_vm2, %v1234_v9 }
  0xed   : > { %v816_v37 = vpop.f32.mrf.mxu2 }
  0xee   : > { %v956_v30 = vpop.f32.mrf.mxu3  ;;  %v776_v17 = vpop.f32.mrf.mxu0  ;;  %3468 = vmatmul.msk.bf16.gmra.mxu0 %vm467_vm2, %v1456_v57 }
  0xef   : > { %v4215_v52 = vadd.f32 %v956_v30, %v816_v37  ;;  %v4221_v9 = vadd.f32 %v916_v34, %v776_v17  ;;  %v1652_v37 = vld [vmem:[#allocation2 + $0x6a] sm:$0xff] }
  0xf0   : > { %v1679_v33 = vpack.c.bf16 %v1653_v35, %v1652_v37 }
  0xf2   : > { %v918_v31 = vpop.f32.mrf.mxu1 }
  0xf4   : > { %3485 = vmatmul.msk.bf16.gmra.mxu1 %vm467_vm2, %v1678_v56  ;;  %v1457_v56 = vpack.c.bf16 %v4125_v10, %v4087_v55 }
  0xf5   : > { %v818_v23 = vpop.f32.mrf.mxu2 }
  0xf6   : > { %v958_v5 = vpop.f32.mrf.mxu3  ;;  %v778_v30 = vpop.f32.mrf.mxu0 }
  0xf7   : > { %v4223_v60 = vadd.f32 %v958_v5, %v818_v23  ;;  %v4232_v53 = vadd.f32 %v918_v31, %v778_v30  ;;  %v1236_v23 = vpack.c.bf16 %v3859_v12, %v4123_v26  ;;  %v4244_v31 = vpack.c.bf16 %v1652_v37, %v1651_v27  ;;  %v1655_v27 = vld [vmem:[#allocation2 + $0x82] sm:$0xff] }
  0xf9   : > { %4998 = vst [vmem:[#allocation15_spill] sm:$0xff] %v4223_v60 }
  0xfa   : > { %3435 = vmatmul.msk.bf16.gmra.mxu2 %vm467_vm2, %v4225_v61  ;;  %v921_v34 = vpop.f32.mrf.mxu1 }
  0xfb   : > { %3452 = vmatmul.msk.bf16.gmra.mxu3 %vm467_vm2, %v1235_v14 }
  0xfd   : > { %v821_v59 = vpop.f32.mrf.mxu2 }
  0xfe   : > { %v961_v54 = vpop.f32.mrf.mxu3  ;;  %v781_v5 = vpop.f32.mrf.mxu0  ;;  %3469 = vmatmul.msk.bf16.gmra.mxu0 %vm467_vm2, %v1457_v56 }
  0xff   : > { %v4234_v11 = vadd.f32 %v961_v54, %v821_v59  ;;  %v4240_v14 = vadd.f32 %v921_v34, %v781_v5  ;;  %v1654_v59 = vld [vmem:[#allocation2 + $0x7a] sm:$0xff] }
 0x100   : > { %v1680_v37 = vpack.c.bf16 %v1655_v27, %v1654_v59 }
 0x102   : > { %v923_v55 = vpop.f32.mrf.mxu1 }
 0x104   : > { %3486 = vmatmul.msk.bf16.gmra.mxu1 %vm467_vm2, %v1679_v33  ;;  %v1458_v33 = vpack.c.bf16 %v3867_v15, %v4127_v13 }
 0x105   : > { %v823_v17 = vpop.f32.mrf.mxu2 }
 0x106   : > { %v963_v57 = vpop.f32.mrf.mxu3  ;;  %v783_v54 = vpop.f32.mrf.mxu0 }
 0x107   : > { %v4242_v60 = vadd.f32 %v963_v57, %v823_v17  ;;  %v4251_v12 = vadd.f32 %v923_v55, %v783_v54  ;;  %v1237_v17 = vpack.c.bf16 %v3899_v44, %v3869_v16  ;;  %v4263_v55 = vpack.c.bf16 %v1654_v59, %v1653_v35  ;;  %v1657_v35 = vld [vmem:[#allocation2 + $0x92] sm:$0xff] }
 0x109   : > { %4999 = vst [vmem:[#allocation16_spill] sm:$0xff] %v4242_v60 }
 0x10a   : > { %3436 = vmatmul.msk.bf16.gmra.mxu2 %vm467_vm2, %v4244_v31  ;;  %v926_v34 = vpop.f32.mrf.mxu1 }
 0x10b   : > { %3453 = vmatmul.msk.bf16.gmra.mxu3 %vm467_vm2, %v1236_v23 }
 0x10d   : > { %v826_v30 = vpop.f32.mrf.mxu2 }
 0x10e   : > { %v966_v10 = vpop.f32.mrf.mxu3  ;;  %v786_v57 = vpop.f32.mrf.mxu0  ;;  %3470 = vmatmul.msk.bf16.gmra.mxu0 %vm467_vm2, %v1458_v33 }
 0x10f   : > { %v4253_v26 = vadd.f32 %v966_v10, %v826_v30  ;;  %v4259_v23 = vadd.f32 %v926_v34, %v786_v57  ;;  %v1656_v30 = vld [vmem:[#allocation2 + $0x8a] sm:$0xff] }
 0x110   : > { %v1681_v59 = vpack.c.bf16 %v1657_v35, %v1656_v30 }
 0x112   : > { %v928_v15 = vpop.f32.mrf.mxu1 }
 0x114   : > { %3487 = vmatmul.msk.bf16.gmra.mxu1 %vm467_vm2, %v1680_v37  ;;  %v1459_v37 = vpack.c.bf16 %v3903_v48, %v3873_v19 }
 0x115   : > { %v828_v5 = vpop.f32.mrf.mxu2 }
 0x116   : > { %v968_v56 = vpop.f32.mrf.mxu3  ;;  %v788_v10 = vpop.f32.mrf.mxu0 }
 0x117   : > { %v4261_v60 = vadd.f32 %v968_v56, %v828_v5  ;;  %v4270_v16 = vadd.f32 %v928_v15, %v788_v10  ;;  %v1238_v5 = vpack.c.bf16 %v3928_v63, %v3905_v49  ;;  %v4282_v15 = vpack.c.bf16 %v1656_v30, %v1655_v27  ;;  %v1658_v27 = vld [vmem:[#allocation2 + $0x9a] sm:$0xff]  ;;  %v1659_v30 = vld [vmem:[#allocation2 + $0xa2] sm:$0xff] }
 0x119   : > { %5000 = vst [vmem:[#allocation17_spill] sm:$0xff] %v4261_v60 }
 0x11a   : > { %3437 = vmatmul.msk.bf16.gmra.mxu2 %vm467_vm2, %v4263_v55  ;;  %v931_v34 = vpop.f32.mrf.mxu1 }
 0x11b   : > { %3454 = vmatmul.msk.bf16.gmra.mxu3 %vm467_vm2, %v1237_v17 }
 0x11d   : > { %v831_v54 = vpop.f32.mrf.mxu2 }
 0x11e   : > { %v971_v13 = vpop.f32.mrf.mxu3  ;;  %v791_v56 = vpop.f32.mrf.mxu0  ;;  %3471 = vmatmul.msk.bf16.gmra.mxu0 %vm467_vm2, %v1459_v37 }
 0x11f   : > { %v4272_v44 = vadd.f32 %v971_v13, %v831_v54  ;;  %v4278_v17 = vadd.f32 %v931_v34, %v791_v56  ;;  %v1682_v34 = vpack.c.bf16 %v1659_v30, %v1658_v27 }
 0x122   : > { %v933_v19 = vpop.f32.mrf.mxu1 }
 0x124   : > { %3488 = vmatmul.msk.bf16.gmra.mxu1 %vm467_vm2, %v1681_v59  ;;  %v1460_v59 = vpack.c.bf16 %v3933_v2, %v3909_v50 }
 0x125   : > { %v833_v57 = vpop.f32.mrf.mxu2 }
 0x126   : > { %v973_v33 = vpop.f32.mrf.mxu3  ;;  %v793_v13 = vpop.f32.mrf.mxu0 }
 0x127   : > { %v4280_v60 = vadd.f32 %v973_v33, %v833_v57  ;;  %v4289_v49 = vadd.f32 %v933_v19, %v793_v13  ;;  %v4297_v13 = vpack.c.bf16 %v1658_v27, %v1657_v35  ;;  %v1661_v27 = vld [vmem:[#allocation2 + $0xb2] sm:$0xff] }
 0x129   : > { %5001 = vst [vmem:[#allocation18_spill] sm:$0xff] %v4280_v60 }
 0x12a   : > { %3438 = vmatmul.msk.bf16.gmra.mxu2 %vm467_vm2, %v4282_v15 }
 0x12b   : > { %3455 = vmatmul.msk.bf16.gmra.mxu3 %vm467_vm2, %v1238_v5  ;;  %v1239_v5 = vpack.c.bf16 %v3960_v21, %v3930_v0 }
 0x12d   : > { %v1086_v10 = vpop.f32.mrf.mxu2 }
 0x12e   : > { %v1308_v48 = vpop.f32.mrf.mxu3  ;;  %v1166_v63 = vadd.f32 %v1086_v10, %v4153_v47  ;;  %v1530_v56 = vpop.f32.mrf.mxu0  ;;  %3472 = vmatmul.msk.bf16.gmra.mxu0 %vm467_vm2, %v1460_v59 }
 0x130   : > { %v1388_v54 = vadd.f32 %v1308_v48, %v1166_v63 }
 0x131   : > { %v1752_v37 = vpop.f32.mrf.mxu1 }
 0x132   : > { %v1610_v60 = vadd.f32 %v1530_v56, %v1388_v54  ;;  %v1660_v54 = vld [vmem:[#allocation2 + $0xaa] sm:$0xff] }
 0x134   : > { %3489 = vmatmul.msk.bf16.gmra.mxu1 %vm467_vm2, %v1682_v34  ;;  %v4301_v47 = vadd.f32 %v1752_v37, %v1610_v60  ;;  %v1683_v60 = vpack.c.bf16 %v1661_v27, %v1660_v54  ;;  %v1461_v34 = vpack.c.bf16 %v3966_v24, %v3935_v3 }
 0x135   : > { %v1088_v57 = vpop.f32.mrf.mxu2 }
 0x136   : > { %v1310_v33 = vpop.f32.mrf.mxu3  ;;  %v1167_v19 = vadd.f32 %v1088_v57, %v4159_v62  ;;  %v1532_v0 = vpop.f32.mrf.mxu0  ;;  %v1240_v57 = vpack.c.bf16 %v3994_v39, %v3962_v22 }
 0x138   : > { %v1389_v48 = vadd.f32 %v1310_v33, %v1167_v19 }
 0x139   : > { %v1754_v50 = vpop.f32.mrf.mxu1 }
 0x13a   : > { %3439 = vmatmul.msk.bf16.gmra.mxu2 %vm467_vm2, %v4297_v13  ;;  %v1611_v10 = vadd.f32 %v1532_v0, %v1389_v48 }
 0x13b   : > { %3456 = vmatmul.msk.bf16.gmra.mxu3 %vm467_vm2, %v1239_v5 }
 0x13c   : > { %v4307_v35 = vadd.f32 %v1754_v50, %v1611_v10  ;;  %v1663_v10 = vld [vmem:[#allocation2 + $0xc2] sm:$0xff] }
 0x13d   : > { %v1091_v21 = vpop.f32.mrf.mxu2 }
 0x13e   : > { %v1313_v2 = vpop.f32.mrf.mxu3  ;;  %v1168_v62 = vadd.f32 %v1091_v21, %v4167_v51  ;;  %v1535_v33 = vpop.f32.mrf.mxu0  ;;  %v4314_v51 = vpack.c.bf16 %v1660_v54, %v1659_v30  ;;  %3473 = vmatmul.msk.bf16.gmra.mxu0 %vm467_vm2, %v1461_v34  ;;  %v1662_v21 = vld [vmem:[#allocation2 + $0xba] sm:$0xff] }
 0x140   : > { %v1390_v63 = vadd.f32 %v1313_v2, %v1168_v62  ;;  %v1684_v62 = vpack.c.bf16 %v1663_v10, %v1662_v21 }
 0x141   : > { %v1757_v59 = vpop.f32.mrf.mxu1 }
 0x142   : > { %v1612_v5 = vadd.f32 %v1535_v33, %v1390_v63  ;;  %v1462_v63 = vpack.c.bf16 %v4000_v42, %v3968_v25 }
 0x144   : > { %3490 = vmatmul.msk.bf16.gmra.mxu1 %vm467_vm2, %v1683_v60  ;;  %v4318_v48 = vadd.f32 %v1757_v59, %v1612_v5 }
 0x145   : > { %v1093_v56 = vpop.f32.mrf.mxu2 }
 0x146   : > { %v1315_v37 = vpop.f32.mrf.mxu3  ;;  %v1169_v19 = vadd.f32 %v1093_v56, %v4175_v8  ;;  %v1537_v22 = vpop.f32.mrf.mxu0 }
 0x148   : > { %v1391_v50 = vadd.f32 %v1315_v37, %v1169_v19  ;;  %v1241_v37 = vpack.c.bf16 %v4028_v1, %v3996_v40 }
 0x149   : > { %v1759_v3 = vpop.f32.mrf.mxu1 }
 0x14a   : > { %3440 = vmatmul.msk.bf16.gmra.mxu2 %vm467_vm2, %v4314_v51  ;;  %v1613_v2 = vadd.f32 %v1537_v22, %v1391_v50 }
 0x14b   : > { %3457 = vmatmul.msk.bf16.gmra.mxu3 %vm467_vm2, %v1240_v57 }
 0x14c   : > { %v4324_v30 = vadd.f32 %v1759_v3, %v1613_v2  ;;  %v1664_v3 = vld [vmem:[#allocation2 + $0xca] sm:$0xff] }
 0x14d   : > { %v1096_v39 = vpop.f32.mrf.mxu2 }
 0x14e   : > { %v1318_v24 = vpop.f32.mrf.mxu3  ;;  %v1170_v8 = vadd.f32 %v1096_v39, %v4183_v46  ;;  %v1540_v34 = vpop.f32.mrf.mxu0  ;;  %v4331_v46 = vpack.c.bf16 %v1662_v21, %v1661_v27  ;;  %3474 = vmatmul.msk.bf16.gmra.mxu0 %vm467_vm2, %v1462_v63  ;;  %v1463_v39 = vpack.c.bf16 %v4034_v6, %v4002_v43 }
 0x150   : > { %v1392_v0 = vadd.f32 %v1318_v24, %v1170_v8  ;;  %v1665_v24 = vld [vmem:[#allocation2 + $0xd2] sm:$0xff] }
 0x151   : > { %v1762_v54 = vpop.f32.mrf.mxu1  ;;  %v1685_v22 = vpack.c.bf16 %v1665_v24, %v1664_v3 }
 0x152   : > { %v1614_v33 = vadd.f32 %v1540_v34, %v1392_v0 }
 0x154   : > { %3491 = vmatmul.msk.bf16.gmra.mxu1 %vm467_vm2, %v1684_v62  ;;  %v4335_v57 = vadd.f32 %v1762_v54, %v1614_v33  ;;  %v1242_v62 = vpack.c.bf16 %v4061_v32, %v4030_v4  ;;  %v1666_v33 = vld [vmem:[#allocation2 + $0xda] sm:$0xff] }
 0x155   : > { %v1098_v59 = vpop.f32.mrf.mxu2 }
 0x156   : > { %v1320_v60 = vpop.f32.mrf.mxu3  ;;  %v1171_v56 = vadd.f32 %v1098_v59, %v4194_v58  ;;  %v1542_v40 = vpop.f32.mrf.mxu0 }
 0x158   : > { %v1393_v5 = vadd.f32 %v1320_v60, %v1171_v56  ;;  %v1667_v56 = vld [vmem:[#allocation2 + $0xe2] sm:$0xff] }
 0x159   : > { %v1764_v25 = vpop.f32.mrf.mxu1 }
 0x15a   : > { %3441 = vmatmul.msk.bf16.gmra.mxu2 %vm467_vm2, %v4331_v46  ;;  %v1615_v19 = vadd.f32 %v1542_v40, %v1393_v5  ;;  %v1686_v5 = vpack.c.bf16 %v1667_v56, %v1666_v33 }
 0x15b   : > { %3458 = vmatmul.msk.bf16.gmra.mxu3 %vm467_vm2, %v1241_v37 }
 0x15c   : > { %v4341_v27 = vadd.f32 %v1764_v25, %v1615_v19  ;;  %v5002_v25 = vld [vmem:[#allocation4_spill] sm:$0xff] }
 0x15d   : > { %v1101_v1 = vpop.f32.mrf.mxu2 }
 0x15e   : > { %v1323_v42 = vpop.f32.mrf.mxu3  ;;  %v1172_v58 = vadd.f32 %v1101_v1, %v4202_v45  ;;  %v1545_v0 = vpop.f32.mrf.mxu0  ;;  %v4348_v45 = vpack.c.bf16 %v1664_v3, %v1663_v10  ;;  %3475 = vmatmul.msk.bf16.gmra.mxu0 %vm467_vm2, %v1463_v39  ;;  %v5004_v3 = vld [vmem:[#allocation6_spill] sm:$0xff] }
 0x160   : > { %v1394_v50 = vadd.f32 %v1323_v42, %v1172_v58  ;;  %v1464_v42 = vpack.c.bf16 %v5002_v25, %v4036_v7  ;;  %v3711_v7 = vld [vmem:[%s3819_s22 + $0x8] sm:$0xff]  }
 0x161   : > { %v1767_v2 = vpop.f32.mrf.mxu1 }
 0x162   : > { %v1616_v63 = vadd.f32 %v1545_v0, %v1394_v50  ;;  %v5003_v50 = vld [vmem:[#allocation3_spill] sm:$0xff] }
 0x164   : > { %3492 = vmatmul.msk.bf16.gmra.mxu1 %vm467_vm2, %v1685_v22  ;;  %v4352_v60 = vadd.f32 %v1767_v2, %v1616_v63  ;;  %v1243_v22 = vpack.c.bf16 %v5004_v3, %v5003_v50  ;;  %v1021_v2 = vpack.c.bf16 %v1666_v33, %v1665_v24  ;;  %v5005_v33 = vld [vmem:[#allocation5_spill] sm:$0xff] }
 0x165   : > { %v1103_v21 = vpop.f32.mrf.mxu2 }
 0x166   : > { %v1325_v8 = vpop.f32.mrf.mxu3  ;;  %v1173_v54 = vadd.f32 %v1103_v21, %v4213_v29  ;;  %v1547_v4 = vpop.f32.mrf.mxu0  ;;  %v3638_v21 = vunpack.c.l.bf16 %v3711_v7 }
 0x168   : > { %v1395_v34 = vadd.f32 %v1325_v8, %v1173_v54  ;;  %566 = vst.msk [vmem:[#allocation2 + $0x110] sm:$0xff] %vm467_vm2, %v3638_v21  ;;  %v3639_v54 = vunpack.c.h.bf16 %v3711_v7 }
 0x169   : > { %v1769_v43 = vpop.f32.mrf.mxu1 }
 0x16a   : > { %3442 = vmatmul.msk.bf16.gmra.mxu2 %vm467_vm2, %v4348_v45  ;;  %v1617_v59 = vadd.f32 %v1547_v4, %v1395_v34  ;;  %567 = vst.msk [vmem:[#allocation2 + $0x118] sm:$0xff] %vm467_vm2, %v3639_v54  ;;  %v1670_v54 = vld [vmem:[#allocation2 + $0xfa] sm:$0xff] }
 0x16b   : > { %3459 = vmatmul.msk.bf16.gmra.mxu3 %vm467_vm2, %v1242_v62 }
 0x16c   : > { %v4358_v10 = vadd.f32 %v1769_v43, %v1617_v59  ;;  %v1669_v59 = vld [vmem:[#allocation2 + $0xf2] sm:$0xff] }
 0x16d   : > { %v1106_v32 = vpop.f32.mrf.mxu2 }
 0x16e   : > { %v1328_v6 = vpop.f32.mrf.mxu3  ;;  %v1174_v29 = vadd.f32 %v1106_v32, %v4221_v9  ;;  %v1550_v19 = vpop.f32.mrf.mxu0  ;;  %3476 = vmatmul.msk.bf16.gmra.mxu0 %vm467_vm2, %v1464_v42  ;;  %v1668_v32 = vld [vmem:[#allocation2 + $0xea] sm:$0xff] }
 0x170   : > { %v1396_v37 = vadd.f32 %v1328_v6, %v1174_v29  ;;  %v1227_v29 = vld [vmem:[#allocation2 + $0x100] sm:$0xff] }
 0x171   : > { %v1772_v40 = vpop.f32.mrf.mxu1 }
 0x172   : > { %v1618_v39 = vadd.f32 %v1550_v19, %v1396_v37  ;;  %v1687_v37 = vpack.c.bf16 %v1669_v59, %v1668_v32 }
 0x174   : > { %3493 = vmatmul.msk.bf16.gmra.mxu1 %vm467_vm2, %v1686_v5  ;;  %v4367_v8 = vadd.f32 %v1772_v40, %v1618_v39  ;;  %v5006_v5 = vld [vmem:[#allocation8_spill] sm:$0xff] }
 0x175   : > { %v1108_v58 = vpop.f32.mrf.mxu2  ;;  %v1465_v25 = vpack.c.bf16 %v5006_v5, %v5005_v33 }
 0x176   : > { %v1330_v1 = vpop.f32.mrf.mxu3  ;;  %v1175_v9 = vadd.f32 %v1108_v58, %v4232_v53  ;;  %v1552_v53 = vpop.f32.mrf.mxu0  ;;  %v5007_v58 = vld [vmem:[#allocation7_spill] sm:$0xff] }
 0x177   : > { %v1244_v50 = vpack.c.bf16 %v1227_v29, %v5007_v58 }
 0x178   : > { %v1397_v0 = vadd.f32 %v1330_v1, %v1175_v9 }
 0x179   : > { %v1774_v62 = vpop.f32.mrf.mxu1 }
 0x17a   : > { %3443 = vmatmul.msk.bf16.gmra.mxu2 %vm467_vm2, %v1021_v2  ;;  %v1619_v34 = vadd.f32 %v1552_v53, %v1397_v0  ;;  %v1671_v53 = vld [vmem:[#allocation2 + $0x102] sm:$0xff] }
 0x17b   : > { %3460 = vmatmul.msk.bf16.gmra.mxu3 %vm467_vm2, %v1243_v22  ;;  %v1022_v22 = vpack.c.bf16 %v1668_v32, %v1667_v56  ;;  %v5008_v32 = vld [vmem:[#allocation9_spill] sm:$0xff] }
 0x17c   : > { %v4375_v6 = vadd.f32 %v1774_v62, %v1619_v34  ;;  %v1228_v34 = vld [vmem:[#allocation2 + $0x108] sm:$0xff] }
 0x17d   : > { %v1111_v24 = vpop.f32.mrf.mxu2 }
 0x17e   : > { %v1333_v63 = vpop.f32.mrf.mxu3  ;;  %v1176_v43 = vadd.f32 %v1111_v24, %v4240_v14  ;;  %v1555_v1 = vpop.f32.mrf.mxu0  ;;  %3477 = vmatmul.msk.bf16.gmra.mxu0 %vm467_vm2, %v1465_v25  ;;  %v1449_v24 = vld [vmem:[#allocation2 + $0x101] sm:$0xff] }
 0x17f   : > { %v1466_v29 = vpack.c.bf16 %v1449_v24, %v5008_v32  ;;  %v1865_v24 = vld [vmem:[#allocation2 + $0x38] sm:$0xff] }
 0x180   : > { %v1398_v4 = vadd.f32 %v1333_v63, %v1176_v43  ;;  %v1229_v43 = vld [vmem:[#allocation2 + $0x110] sm:$0xff] }
 0x181   : > { %v1777_v42 = vpop.f32.mrf.mxu1 }
 0x182   : > { %v1620_v3 = vadd.f32 %v1555_v1, %v1398_v4  ;;  %v1688_v4 = vpack.c.bf16 %v1671_v53, %v1670_v54  ;;  %v1864_v53 = vld [vmem:[#allocation2 + $0x30] sm:$0xff] }
 0x184   : > { %3494 = vmatmul.msk.bf16.gmra.mxu1 %vm467_vm2, %v1687_v37  ;;  %v4383_v39 = vadd.f32 %v1777_v42, %v1620_v3  ;;  %v1245_v42 = vpack.c.bf16 %v1229_v43, %v1228_v34 }
 0x185   : > { %v1113_v19 = vpop.f32.mrf.mxu2 }
 0x186   : > { %v1335_v40 = vpop.f32.mrf.mxu3  ;;  %v1177_v14 = vadd.f32 %v1113_v19, %v4251_v12  ;;  %v1557_v7 = vpop.f32.mrf.mxu0 }
 0x188   : > { %v1399_v9 = vadd.f32 %v1335_v40, %v1177_v14 }
 0x189   : > { %v1779_v2 = vpop.f32.mrf.mxu1 }
 0x18a   : > { %3444 = vmatmul.msk.bf16.gmra.mxu2 %vm467_vm2, %v1022_v22  ;;  %v1621_v62 = vadd.f32 %v1557_v7, %v1399_v9  ;;  %v1673_v7 = vld [vmem:[#allocation2 + $0x112] sm:$0xff] }
 0x18b   : > { %3461 = vmatmul.msk.bf16.gmra.mxu3 %vm467_vm2, %v1244_v50 }
 0x18c   : > { %v4388_v12 = vadd.f32 %v1779_v2, %v1621_v62  ;;  %v1451_v62 = vld [vmem:[#allocation2 + $0x111] sm:$0xff] }
 0x18d   : > { %v1116_v21 = vpop.f32.mrf.mxu2 }
 0x18e   : > { %v1338_v0 = vpop.f32.mrf.mxu3  ;;  %v1178_v63 = vadd.f32 %v1116_v21, %v4259_v23  ;;  %v1560_v5 = vpop.f32.mrf.mxu0  ;;  %v1023_v23 = vpack.c.bf16 %v1670_v54, %v1669_v59  ;;  %3478 = vmatmul.msk.bf16.gmra.mxu0 %vm467_vm2, %v1466_v29  ;;  %v1450_v21 = vld [vmem:[#allocation2 + $0x109] sm:$0xff] }
 0x18f   : > { %v1467_v34 = vpack.c.bf16 %v1451_v62, %v1450_v21  ;;  %v4419_v21 = vld [vmem:[#allocation2 + $0x41] sm:$0xff]  ;;  %v4421_v62 = vld [vmem:[#allocation2 + $0x49] sm:$0xff] }
 0x190   : > { %v1400_v56 = vadd.f32 %v1338_v0, %v1178_v63  ;;  %v1672_v0 = vld [vmem:[#allocation2 + $0x10a] sm:$0xff] }
 0x191   : > { %v1782_v37 = vpop.f32.mrf.mxu1  ;;  %v4401_v63 = vld [vmem:[#allocation2 + $0x31] sm:$0xff]  ;;  %v1689_v54 = vpack.c.bf16 %v1673_v7, %v1672_v0  ;;  %v2997_v0 = vld [vmem:[#allocation2 + $0x19] sm:$0xff]  ;;  %v2998_v7 = vld [vmem:[#allocation2 + $0x21] sm:$0xff] }
 0x192   : > { %v1622_v40 = vadd.f32 %v1560_v5, %v1400_v56  ;;  %v4403_v56 = vld [vmem:[#allocation2 + $0x39] sm:$0xff]  ;;  %v1896_v5 = vpack.c.bf16 %v1865_v24, %v1864_v53  ;;  %v1867_v53 = vld [vmem:[#allocation2 + $0x48] sm:$0xff]  ;;  %v3029_v24 = vpack.c.bf16 %v2998_v7, %v2997_v0 }
 0x193   : > { %v2118_v29 = vpack.c.bf16 %v4403_v56, %v4401_v63  ;;  %v2999_v7 = vld [vmem:[#allocation2 + $0x29] sm:$0xff] }
 0x194   : > { %3495 = vmatmul.msk.bf16.gmra.mxu1 %vm467_vm2, %v1688_v4  ;;  %v4394_v19 = vadd.f32 %v1782_v37, %v1622_v40  ;;  %v2530_v40 = vld [vmem:[%s3824_s25] sm:$0xff] }
 0x195   : > { %v1118_v25 = vpop.f32.mrf.mxu2 }
 0x196   : > { %v1340_v33 = vpop.f32.mrf.mxu3  ;;  %v1179_v1 = vadd.f32 %v1118_v25, %v4270_v16  ;;  %v1562_v14 = vpop.f32.mrf.mxu0 }
 0x198   : > { %v1401_v58 = vadd.f32 %v1340_v33, %v1179_v1  ;;  %v3752_v1 = vmov 0  }
 0x199   : > { %v1784_v50 = vpop.f32.mrf.mxu1  ;;  %3738 = vset.pattern.permute.xlu0 %v3752_v1  ;;  %3739 = vset.pattern.permute.xlu1 %v3752_v1 }
 0x19a   : > { %3445 = vmatmul.msk.bf16.gmra.mxu2 %vm467_vm2, %v1023_v23  ;;  %v1623_v9 = vadd.f32 %v1562_v14, %v1401_v58  ;;  %2564 = vperm.xlu0 %3738, %v2530_v40   ;;  %v5009_v14 = vld [vmem:[#allocation10_spill] sm:$0xff] }
 0x19b   : > { %3462 = vmatmul.msk.bf16.gmra.mxu3 %vm467_vm2, %v1245_v42  ;;  %3740 = vset.pattern.permute.xlu2 %v3752_v1 }
 0x19c   : > { %v4399_v16 = vadd.f32 %v1784_v50, %v1623_v9  ;;  %v2531_v9 = vld [vmem:[%s3824_s25 + $0x8] sm:$0xff] }
 0x19d   : > { %v1121_v22 = vpop.f32.mrf.mxu2 }
 0x19e   : > { %v1343_v3 = vpop.f32.mrf.mxu3  ;;  %v1180_v2 = vadd.f32 %v1121_v22, %v4278_v17  ;;  %v1565_v32 = vpop.f32.mrf.mxu0  ;;  %3479 = vmatmul.msk.bf16.gmra.mxu0 %vm467_vm2, %v1467_v34  ;;  %v5010_v34 = vld [vmem:[#allocation12_spill] sm:$0xff] }
 0x1a0   : > { %v1402_v59 = vadd.f32 %v1343_v3, %v1180_v2 }
 0x1a1   : > { %v1787_v43 = vpop.f32.mrf.mxu1 }
 0x1a2   : > { %v1624_v37 = vadd.f32 %v1565_v32, %v1402_v59  ;;  %2569 = vperm.xlu0 %3738, %v2531_v9  }
 0x1a4   : > { %3496 = vmatmul.msk.bf16.gmra.mxu1 %vm467_vm2, %v1689_v54  ;;  %v4410_v25 = vadd.f32 %v1787_v43, %v1624_v37  ;;  %v1866_v54 = vld [vmem:[#allocation2 + $0x40] sm:$0xff] }
 0x1a5   : > { %v1123_v17 = vpop.f32.mrf.mxu2  ;;  %v5011_v43 = vld [vmem:[#allocation11_spill] sm:$0xff]  ;;  %v1897_v40 = vpack.c.bf16 %v1867_v53, %v1866_v54  ;;  %v4439_v54 = vld [vmem:[#allocation2 + $0x51] sm:$0xff] }
 0x1a6   : > { %v1345_v4 = vpop.f32.mrf.mxu3  ;;  %v1181_v33 = vadd.f32 %v1123_v17, %v4289_v49  ;;  %v1567_v58 = vpop.f32.mrf.mxu0  ;;  %v4441_v53 = vld [vmem:[#allocation2 + $0x59] sm:$0xff] }
 0x1a8   : > { %v1403_v42 = vadd.f32 %v1345_v4, %v1181_v33  ;;  %v939_v4 = vadd.f32 %v5011_v43, %v5010_v34  ;;  %v2119_v33 = vpack.c.bf16 %v4421_v62, %v4419_v21  ;;  %v1869_v34 = vld [vmem:[#allocation2 + $0x58] sm:$0xff]  ;;  %v3030_v43 = vpack.c.bf16 %v4401_v63, %v2999_v7 }
 0x1a9   : > { %v1789_v49 = vpop.f32.mrf.mxu1 }
 0x1aa   : > { %3498 = vmatmul.msk.bf16.vlgmr.msra.gmra.mxu2 %vm467_vm2, %v1896_v5  ;;  %v1625_v3 = vadd.f32 %v1567_v58, %v1403_v42 }
 0x1ab   : > { %3515 = vmatmul.msk.bf16.vlgmr.msra.gmra.mxu3 %vm467_vm2, %v2118_v29 }
 0x1ac   : > { %v4417_v2 = vadd.f32 %v1789_v49, %v1625_v3 }
 0x1ad   : > { %v1126_v50 = vpop.f32.mrf.mxu2 }
 0x1ae   : > { %v1348_v23 = vpop.f32.mrf.mxu3  ;;  %v1182_v22 = vadd.f32 %v1126_v50, %v5009_v14  ;;  %v1570_v29 = vpop.f32.mrf.mxu0  ;;  %3532 = vmatmul.msk.bf16.vlgmr.msra.gmra.mxu0 %vm467_vm2, %v4187_v20 }
 0x1b0   : > { %v1404_v59 = vadd.f32 %v1348_v23, %v1182_v22  ;;  %v2532_v23 = vld [vmem:[%s3824_s25 + $0x10] sm:$0xff] }
 0x1b1   : > { %v1792_v32 = vpop.f32.mrf.mxu1  ;;  %2574 = vperm.xlu1 %3739, %v2532_v23  }
 0x1b2   : > { %v1626_v5 = vadd.f32 %v1570_v29, %v1404_v59  ;;  %v2533_v59 = vld [vmem:[%s3824_s25 + $0x18] sm:$0xff] }
 0x1b4   : > { %3548 = vmatmul.msk.bf16.vlgmr.msra.gmra.mxu1 %vm467_vm2, %v3029_v24  ;;  %v4430_v1 = vadd.f32 %v1792_v32, %v1626_v5  ;;  %v1868_v24 = vld [vmem:[#allocation2 + $0x50] sm:$0xff] }
 0x1b5   : > { %v1128_v37 = vpop.f32.mrf.mxu2  ;;  %v1898_v5 = vpack.c.bf16 %v1869_v34, %v1868_v24 }
 0x1b6   : > { %v1350_v17 = vpop.f32.mrf.mxu3  ;;  %v1183_v42 = vadd.f32 %v1128_v37, %v939_v4  ;;  %v1572_v3 = vpop.f32.mrf.mxu0 }
 0x1b8   : > { %v1405_v49 = vadd.f32 %v1350_v17, %v1183_v42 }
 0x1b9   : > { %v1794_v58 = vpop.f32.mrf.mxu1  ;;  %2579 = vperm.xlu1 %3739, %v2533_v59   ;;  %v1871_v59 = vld [vmem:[#allocation2 + $0x68] sm:$0xff] }
 0x1ba   : > { %3499 = vmatmul.msk.bf16.gmra.mxu2 %vm467_vm2, %v1897_v40  ;;  %v1627_v22 = vadd.f32 %v1572_v3, %v1405_v49 }
 0x1bb   : > { %3516 = vmatmul.msk.bf16.gmra.mxu3 %vm467_vm2, %v2119_v33 }
 0x1bc   : > { %v4437_v0 = vadd.f32 %v1794_v58, %v1627_v22  ;;  %v4457_v22 = vld [vmem:[#allocation2 + $0x61] sm:$0xff] }
 0x1bd   : > { %v1131_v14 = vpop.f32.mrf.mxu2 }
 0x1be   : > { %v1353_v50 = vpop.f32.mrf.mxu3  ;;  %v1184_v9 = vadd.f32 %v1131_v14, %v4161_v18  ;;  %v1575_v17 = vpop.f32.mrf.mxu0  ;;  %v2120_v18 = vpack.c.bf16 %v4441_v53, %v4439_v54  ;;  %3533 = vmatmul.msk.bf16.gmra.mxu0 %vm467_vm2, %v4206_v38  ;;  %v4459_v38 = vld [vmem:[#allocation2 + $0x69] sm:$0xff] }
 0x1c0   : > { %v1406_v20 = vadd.f32 %v1353_v50, %v1184_v9  ;;  %v1870_v9 = vld [vmem:[#allocation2 + $0x60] sm:$0xff] }
 0x1c1   : > { %v1797_v4 = vpop.f32.mrf.mxu1 }
 0x1c2   : > { %v1628_v37 = vadd.f32 %v1575_v17, %v1406_v20  ;;  %v3031_v20 = vpack.c.bf16 %v4419_v21, %v4403_v56  ;;  %v2536_v21 = vld [vmem:[%s3824_s25 + $0x30] sm:$0xff] }
 0x1c3   : > { %2594 = vperm.xlu0 %3738, %v2536_v21  }
 0x1c4   : > { %3549 = vmatmul.msk.bf16.gmra.mxu1 %vm467_vm2, %v3030_v43  ;;  %v4450_v42 = vadd.f32 %v1797_v4, %v1628_v37 }
 0x1c5   : > { %v1133_v29 = vpop.f32.mrf.mxu2 }
 0x1c6   : > { %v1355_v32 = vpop.f32.mrf.mxu3  ;;  %v1185_v33 = vadd.f32 %v1133_v29, %v4169_v41  ;;  %v1577_v23 = vpop.f32.mrf.mxu0  ;;  %v1899_v29 = vpack.c.bf16 %v1871_v59, %v1870_v9  ;;  %v1872_v9 = vld [vmem:[#allocation2 + $0x70] sm:$0xff]  ;;  %v1873_v59 = vld [vmem:[#allocation2 + $0x78] sm:$0xff] }
 0x1c8   : > { %v1407_v40 = vadd.f32 %v1355_v32, %v1185_v33  ;;  %v5012_v32 = vld [vmem:[#allocation13_spill] sm:$0xff] }
 0x1c9   : > { %v1799_v63 = vpop.f32.mrf.mxu1 }
 0x1ca   : > { %3500 = vmatmul.msk.bf16.gmra.mxu2 %vm467_vm2, %v1898_v5  ;;  %v1629_v50 = vadd.f32 %v1577_v23, %v1407_v40 }
 0x1cb   : > { %3517 = vmatmul.msk.bf16.gmra.mxu3 %vm467_vm2, %v2120_v18 }
 0x1cc   : > { %v4455_v3 = vadd.f32 %v1799_v63, %v1629_v50  ;;  %v2534_v63 = vld [vmem:[%s3824_s25 + $0x20] sm:$0xff] }
 0x1cd   : > { %v1136_v58 = vpop.f32.mrf.mxu2  ;;  %2584 = vperm.xlu2 %3740, %v2534_v63  }
 0x1ce   : > { %v1358_v49 = vpop.f32.mrf.mxu3  ;;  %v1186_v41 = vadd.f32 %v1136_v58, %v4177_v36  ;;  %v1580_v34 = vpop.f32.mrf.mxu0  ;;  %v2121_v36 = vpack.c.bf16 %v4459_v38, %v4457_v22  ;;  %3534 = vmatmul.msk.bf16.gmra.mxu0 %vm467_vm2, %v4225_v61 }
 0x1d0   : > { %v1408_v14 = vadd.f32 %v1358_v49, %v1186_v41  ;;  %v2537_v49 = vld [vmem:[%s3824_s25 + $0x38] sm:$0xff] }
 0x1d1   : > { %v1802_v7 = vpop.f32.mrf.mxu1  ;;  %2599 = vperm.xlu1 %3739, %v2537_v49   ;;  %v4479_v41 = vld [vmem:[#allocation2 + $0x71] sm:$0xff] }
 0x1d2   : > { %v1630_v4 = vadd.f32 %v1580_v34, %v1408_v14  ;;  %v4481_v14 = vld [vmem:[#allocation2 + $0x79] sm:$0xff] }
 0x1d4   : > { %3550 = vmatmul.msk.bf16.gmra.mxu1 %vm467_vm2, %v3031_v20  ;;  %v4469_v18 = vadd.f32 %v1802_v7, %v1630_v4  ;;  %v3032_v20 = vpack.c.bf16 %v4439_v54, %v4421_v62  ;;  %v5013_v4 = vld [vmem:[#allocation14_spill] sm:$0xff]  ;;  %v2535_v54 = vld [vmem:[%s3824_s25 + $0x28] sm:$0xff] }
 0x1d5   : > { %v1138_v43 = vpop.f32.mrf.mxu2  ;;  %2589 = vperm.xlu2 %3740, %v2535_v54  }
 0x1d6   : > { %v1360_v24 = vpop.f32.mrf.mxu3  ;;  %v1187_v17 = vadd.f32 %v1138_v43, %v5012_v32  ;;  %v1582_v5 = vpop.f32.mrf.mxu0 }
 0x1d8   : > { %v1409_v56 = vadd.f32 %v1360_v24, %v1187_v17  ;;  %v1900_v17 = vpack.c.bf16 %v1873_v59, %v1872_v9  ;;  %v1875_v9 = vld [vmem:[#allocation2 + $0x88] sm:$0xff]  ;;  %v3033_v59 = vpack.c.bf16 %v4457_v22, %v4441_v53  ;;  %v2540_v22 = vld [vmem:[%s3824_s25 + $0x50] sm:$0xff] }
 0x1d9   : > { %v1804_v37 = vpop.f32.mrf.mxu1  ;;  %2614 = vperm.xlu1 %3739, %v2540_v22  }
 0x1da   : > { %3501 = vmatmul.msk.bf16.gmra.mxu2 %vm467_vm2, %v1899_v29  ;;  %v1631_v23 = vadd.f32 %v1582_v5, %v1409_v56  ;;  %v2539_v5 = vld [vmem:[%s3824_s25 + $0x48] sm:$0xff] }
 0x1db   : > { %3518 = vmatmul.msk.bf16.gmra.mxu3 %vm467_vm2, %v2121_v36  ;;  %2609 = vperm.xlu0 %3738, %v2539_v5  }
 0x1dc   : > { %v4477_v61 = vadd.f32 %v1804_v37, %v1631_v23  ;;  %v4500_v23 = vld [vmem:[#allocation2 + $0x81] sm:$0xff] }
 0x1dd   : > { %v1141_v40 = vpop.f32.mrf.mxu2 }
 0x1de   : > { %v1363_v33 = vpop.f32.mrf.mxu3  ;;  %v1188_v58 = vadd.f32 %v1141_v40, %v4196_v28  ;;  %v1585_v34 = vpop.f32.mrf.mxu0  ;;  %v2122_v28 = vpack.c.bf16 %v4481_v14, %v4479_v41  ;;  %3535 = vmatmul.msk.bf16.gmra.mxu0 %vm467_vm2, %v4244_v31 }
 0x1e0   : > { %v1410_v50 = vadd.f32 %v1363_v33, %v1188_v58  ;;  %v4502_v58 = vld [vmem:[#allocation2 + $0x89] sm:$0xff] }
 0x1e1   : > { %v1807_v7 = vpop.f32.mrf.mxu1 }
 0x1e2   : > { %v1632_v36 = vadd.f32 %v1585_v34, %v1410_v50  ;;  %v1874_v50 = vld [vmem:[#allocation2 + $0x80] sm:$0xff] }
 0x1e4   : > { %3551 = vmatmul.msk.bf16.gmra.mxu1 %vm467_vm2, %v3032_v20  ;;  %v4491_v29 = vadd.f32 %v1807_v7, %v1632_v36 }
 0x1e5   : > { %v1143_v43 = vpop.f32.mrf.mxu2 }
 0x1e6   : > { %v1365_v24 = vpop.f32.mrf.mxu3  ;;  %v1189_v32 = vadd.f32 %v1143_v43, %v5013_v4  ;;  %v1587_v37 = vpop.f32.mrf.mxu0  ;;  %v1901_v4 = vpack.c.bf16 %v1875_v9, %v1874_v50  ;;  %v1877_v50 = vld [vmem:[#allocation2 + $0x98] sm:$0xff]  ;;  %v3034_v9 = vpack.c.bf16 %v4479_v41, %v4459_v38  ;;  %v2542_v41 = vld [vmem:[%s3824_s25 + $0x60] sm:$0xff] }
 0x1e7   : > { %2624 = vperm.xlu0 %3738, %v2542_v41  }
 0x1e8   : > { %v1411_v62 = vadd.f32 %v1365_v24, %v1189_v32 }
 0x1e9   : > { %v1809_v56 = vpop.f32.mrf.mxu1 }
 0x1ea   : > { %3502 = vmatmul.msk.bf16.gmra.mxu2 %vm467_vm2, %v1900_v17  ;;  %v1633_v40 = vadd.f32 %v1587_v37, %v1411_v62 }
 0x1eb   : > { %3519 = vmatmul.msk.bf16.gmra.mxu3 %vm467_vm2, %v2122_v28  ;;  %v5014_v28 = vld [vmem:[#allocation15_spill] sm:$0xff] }
 0x1ec   : > { %v4498_v49 = vadd.f32 %v1809_v56, %v1633_v40  ;;  %v4521_v40 = vld [vmem:[#allocation2 + $0x91] sm:$0xff] }
 0x1ed   : > { %v1146_v33 = vpop.f32.mrf.mxu2 }
 0x1ee   : > { %v1368_v21 = vpop.f32.mrf.mxu3  ;;  %v1190_v63 = vadd.f32 %v1146_v33, %v4215_v52  ;;  %v1590_v24 = vpop.f32.mrf.mxu0  ;;  %v2123_v52 = vpack.c.bf16 %v4502_v58, %v4500_v23  ;;  %3536 = vmatmul.msk.bf16.gmra.mxu0 %vm467_vm2, %v4263_v55 }
 0x1f0   : > { %v1412_v31 = vadd.f32 %v1368_v21, %v1190_v63  ;;  %v2538_v21 = vld [vmem:[%s3824_s25 + $0x40] sm:$0xff] }
 0x1f1   : > { %v1812_v20 = vpop.f32.mrf.mxu1  ;;  %2604 = vperm.xlu2 %3740, %v2538_v21   ;;  %v4523_v63 = vld [vmem:[#allocation2 + $0x99] sm:$0xff] }
 0x1f2   : > { %v1634_v43 = vadd.f32 %v1590_v24, %v1412_v31  ;;  %v1876_v31 = vld [vmem:[#allocation2 + $0x90] sm:$0xff] }
 0x1f4   : > { %3552 = vmatmul.msk.bf16.gmra.mxu1 %vm467_vm2, %v3033_v59  ;;  %v4512_v32 = vadd.f32 %v1812_v20, %v1634_v43 }
 0x1f5   : > { %v1148_v34 = vpop.f32.mrf.mxu2 }
 0x1f6   : > { %v1370_v7 = vpop.f32.mrf.mxu3  ;;  %v1191_v36 = vadd.f32 %v1148_v34, %v5014_v28  ;;  %v1592_v54 = vpop.f32.mrf.mxu0  ;;  %v1902_v28 = vpack.c.bf16 %v1877_v50, %v1876_v31  ;;  %v1879_v31 = vld [vmem:[#allocation2 + $0xa8] sm:$0xff]  ;;  %v3035_v50 = vpack.c.bf16 %v4500_v23, %v4481_v14  ;;  %v2541_v23 = vld [vmem:[%s3824_s25 + $0x58] sm:$0xff] }
 0x1f8   : > { %v1413_v53 = vadd.f32 %v1370_v7, %v1191_v36 }
 0x1f9   : > { %v1814_v17 = vpop.f32.mrf.mxu1  ;;  %2619 = vperm.xlu2 %3740, %v2541_v23  }
 0x1fa   : > { %3503 = vmatmul.msk.bf16.gmra.mxu2 %vm467_vm2, %v1901_v4  ;;  %v1635_v37 = vadd.f32 %v1592_v54, %v1413_v53 }
 0x1fb   : > { %3520 = vmatmul.msk.bf16.gmra.mxu3 %vm467_vm2, %v2123_v52  ;;  %v5015_v52 = vld [vmem:[#allocation16_spill] sm:$0xff] }
 0x1fc   : > { %v4519_v5 = vadd.f32 %v1814_v17, %v1635_v37  ;;  %v4542_v37 = vld [vmem:[#allocation2 + $0xa1] sm:$0xff] }
 0x1fd   : > { %v1151_v56 = vpop.f32.mrf.mxu2 }
 0x1fe   : > { %v1373_v62 = vpop.f32.mrf.mxu3  ;;  %v1192_v33 = vadd.f32 %v1151_v56, %v4234_v11  ;;  %v1595_v7 = vpop.f32.mrf.mxu0  ;;  %v2124_v11 = vpack.c.bf16 %v4523_v63, %v4521_v40  ;;  %3537 = vmatmul.msk.bf16.gmra.mxu0 %vm467_vm2, %v4282_v15 }
 0x200   : > { %v1414_v55 = vadd.f32 %v1373_v62, %v1192_v33  ;;  %v2543_v62 = vld [vmem:[%s3824_s25 + $0x68] sm:$0xff] }
 0x201   : > { %v1817_v59 = vpop.f32.mrf.mxu1  ;;  %2629 = vperm.xlu1 %3739, %v2543_v62   ;;  %v4544_v33 = vld [vmem:[#allocation2 + $0xa9] sm:$0xff]  ;;  %v4562_v62 = vld [vmem:[#allocation2 + $0xb1] sm:$0xff] }
 0x202   : > { %v1636_v34 = vadd.f32 %v1595_v7, %v1414_v55  ;;  %v1878_v55 = vld [vmem:[#allocation2 + $0xa0] sm:$0xff] }
 0x204   : > { %3553 = vmatmul.msk.bf16.gmra.mxu1 %vm467_vm2, %v3034_v9  ;;  %v4533_v36 = vadd.f32 %v1817_v59, %v1636_v34 }
 0x205   : > { %v1153_v24 = vpop.f32.mrf.mxu2 }
 0x206   : > { %v1375_v20 = vpop.f32.mrf.mxu3  ;;  %v1193_v43 = vadd.f32 %v1153_v24, %v5015_v52  ;;  %v1597_v22 = vpop.f32.mrf.mxu0  ;;  %v1903_v52 = vpack.c.bf16 %v1879_v31, %v1878_v55  ;;  %v1881_v55 = vld [vmem:[#allocation2 + $0xb8] sm:$0xff]  ;;  %v3036_v31 = vpack.c.bf16 %v4521_v40, %v4502_v58  ;;  %v2546_v40 = vld [vmem:[%s3824_s25 + $0x80] sm:$0xff] }
 0x208   : > { %v1415_v38 = vadd.f32 %v1375_v20, %v1193_v43 }
 0x209   : > { %v1819_v4 = vpop.f32.mrf.mxu1  ;;  %2644 = vperm.xlu1 %3739, %v2546_v40  }
 0x20a   : > { %3504 = vmatmul.msk.bf16.gmra.mxu2 %vm467_vm2, %v1902_v28  ;;  %v1637_v54 = vadd.f32 %v1597_v22, %v1415_v38 }
 0x20b   : > { %3521 = vmatmul.msk.bf16.gmra.mxu3 %vm467_vm2, %v2124_v11  ;;  %v5016_v11 = vld [vmem:[#allocation17_spill] sm:$0xff] }
 0x20c   : > { %v4540_v21 = vadd.f32 %v1819_v4, %v1637_v54  ;;  %v4564_v54 = vld [vmem:[#allocation2 + $0xb9] sm:$0xff] }
 0x20d   : > { %v1156_v17 = vpop.f32.mrf.mxu2 }
 0x20e   : > { %v1378_v53 = vpop.f32.mrf.mxu3  ;;  %v1194_v56 = vadd.f32 %v1156_v17, %v4253_v26  ;;  %v1600_v20 = vpop.f32.mrf.mxu0  ;;  %v2125_v26 = vpack.c.bf16 %v4544_v33, %v4542_v37  ;;  %3538 = vmatmul.msk.bf16.gmra.mxu0 %vm467_vm2, %v4297_v13 }
 0x210   : > { %v1416_v15 = vadd.f32 %v1378_v53, %v1194_v56  ;;  %v2545_v56 = vld [vmem:[%s3824_s25 + $0x78] sm:$0xff] }
 0x211   : > { %v1822_v9 = vpop.f32.mrf.mxu1  ;;  %2639 = vperm.xlu0 %3738, %v2545_v56  }
 0x212   : > { %v1638_v24 = vadd.f32 %v1600_v20, %v1416_v15  ;;  %v1880_v15 = vld [vmem:[#allocation2 + $0xb0] sm:$0xff] }
 0x214   : > { %3554 = vmatmul.msk.bf16.gmra.mxu1 %vm467_vm2, %v3035_v50  ;;  %v4554_v43 = vadd.f32 %v1822_v9, %v1638_v24 }
 0x215   : > { %v1158_v7 = vpop.f32.mrf.mxu2 }
 0x216   : > { %v1380_v59 = vpop.f32.mrf.mxu3  ;;  %v1195_v34 = vadd.f32 %v1158_v7, %v5016_v11  ;;  %v1602_v41 = vpop.f32.mrf.mxu0  ;;  %v1904_v11 = vpack.c.bf16 %v1881_v55, %v1880_v15  ;;  %v2548_v15 = vld [vmem:[%s3824_s25 + $0x90] sm:$0xff] }
 0x217   : > { %v2544_v55 = vld [vmem:[%s3824_s25 + $0x70] sm:$0xff] }
 0x218   : > { %v1417_v14 = vadd.f32 %v1380_v59, %v1195_v34  ;;  %2634 = vperm.xlu2 %3740, %v2544_v55  }
 0x219   : > { %v1824_v28 = vpop.f32.mrf.mxu1  ;;  %2654 = vperm.xlu0 %3738, %v2548_v15  }
 0x21a   : > { %3505 = vmatmul.msk.bf16.gmra.mxu2 %vm467_vm2, %v1903_v52  ;;  %v1639_v53 = vadd.f32 %v1602_v41, %v1417_v14 }
 0x21b   : > { %3522 = vmatmul.msk.bf16.gmra.mxu3 %vm467_vm2, %v2125_v26  ;;  %v5017_v26 = vld [vmem:[#allocation18_spill] sm:$0xff] }
 0x21c   : > { %v4560_v17 = vadd.f32 %v1824_v28, %v1639_v53  ;;  %v4583_v53 = vld [vmem:[#allocation2 + $0xc1] sm:$0xff] }
 0x21d   : > { %v1161_v4 = vpop.f32.mrf.mxu2 }
 0x21e   : > { %v1383_v38 = vpop.f32.mrf.mxu3  ;;  %v1196_v22 = vadd.f32 %v1161_v4, %v4272_v44  ;;  %v1605_v59 = vpop.f32.mrf.mxu0  ;;  %v2126_v44 = vpack.c.bf16 %v4564_v54, %v4562_v62  ;;  %3539 = vmatmul.msk.bf16.gmra.mxu0 %vm467_vm2, %v4314_v51 }
 0x21f   : > { %v2565_v4 = vpop.permute.xlu0 %2564 }
 0x220   : > { %v1418_v13 = vadd.f32 %v1383_v38, %v1196_v22  ;;  %v4585_v22 = vld [vmem:[#allocation2 + $0xc9] sm:$0xff] }
 0x221   : > { %v1827_v50 = vpop.f32.mrf.mxu1 }
 0x222   : > { %v1640_v7 = vadd.f32 %v1605_v59, %v1418_v13  ;;  %v4590_v13 = vld [vmem:[%s4974_s5] ss:$0 sm:$0xff] }
 0x224   : > { %3555 = vmatmul.msk.bf16.gmra.mxu1 %vm467_vm2, %v3036_v31  ;;  %v4575_v34 = vadd.f32 %v1827_v50, %v1640_v7  ;;  %v2549_v31 = vld [vmem:[%s3824_s25 + $0x98] sm:$0xff]  ;;  %v1882_v50 = vld [vmem:[#allocation2 + $0xc0] sm:$0xff] }
 0x225   : > { %v1163_v20 = vpop.f32.mrf.mxu2  ;;  %2659 = vperm.xlu1 %3739, %v2549_v31  }
 0x226   : > { %v1385_v9 = vpop.f32.mrf.mxu3  ;;  %v1197_v24 = vadd.f32 %v1163_v20, %v5017_v26  ;;  %v1607_v23 = vpop.f32.mrf.mxu0  ;;  %v2127_v26 = vpack.c.bf16 %v4585_v22, %v4583_v53 }
 0x228   : > { %v1419_v58 = vadd.f32 %v1385_v9, %v1197_v24  ;;  %v1883_v9 = vld [vmem:[#allocation2 + $0xc8] sm:$0xff] }
 0x229   : > { %v1829_v52 = vpop.f32.mrf.mxu1 }
 0x22a   : > { %3506 = vmatmul.msk.bf16.gmra.mxu2 %vm467_vm2, %v1904_v11  ;;  %v1641_v38 = vadd.f32 %v1607_v23, %v1419_v58  ;;  %v2570_v23 = vpop.permute.xlu0 %2569 }
 0x22b   : > { %3523 = vmatmul.msk.bf16.gmra.mxu3 %vm467_vm2, %v2126_v44 }
 0x22c   : > { %v4581_v51 = vadd.f32 %v1829_v52, %v1641_v38 }
 0x22d   : > { %v1974_v28 = vpop.f32.mrf.mxu2 }
 0x22e   : > { %v2196_v14 = vpop.f32.mrf.mxu3  ;;  %v2054_v41 = vadd.f32 %v1974_v28, %v4301_v47  ;;  %v3037_v47 = vpack.c.bf16 %v4542_v37, %v4523_v63  ;;  %v2418_v44 = vpop.f32.mrf.mxu0  ;;  %v1905_v63 = vpack.c.bf16 %v1883_v9, %v1882_v50  ;;  %3540 = vmatmul.msk.bf16.gmra.mxu0 %vm467_vm2, %v4331_v46 }
 0x230   : > { %v2276_v56 = vadd.f32 %v2196_v14, %v2054_v41  ;;  %v2551_v14 = vld [vmem:[%s3824_s25 + $0xa8] sm:$0xff] }
 0x231   : > { %v3110_v20 = vpop.f32.mrf.mxu1  ;;  %2669 = vperm.xlu0 %3738, %v2551_v14  }
 0x232   : > { %v3111_v24 = vadd.f32 %v4590_v13, %v3110_v20  ;;  %v2498_v11 = vadd.f32 %v2418_v44, %v2276_v56  ;;  %v2575_v20 = vpop.permute.xlu1 %2574  ;;  %v4618_v44 = vld [vmem:[#allocation2 + $0xd9] sm:$0xff] }
 0x234   : > { %v3190_v37 = vpack.c.bf16 %v3111_v24, %v3111_v24  ;;  %3556 = vmatmul.msk.bf16.gmra.mxu1 %vm467_vm2, %v3037_v47  ;;  %v2932_v40 = vpack.c.bf16 %v2498_v11, %v2498_v11  ;;  %v2722_v28 = vmul.f32 %v2565_v4, %v2498_v11  ;;  %v4616_v4 = vld [vmem:[#allocation2 + $0xd1] sm:$0xff] }
 0x235   : > { %v1976_v7 = vpop.f32.mrf.mxu2 }
 0x236   : > { %v2198_v59 = vpop.f32.mrf.mxu3  ;;  %v2055_v58 = vadd.f32 %v1976_v7, %v4307_v35  ;;  %3222 = vst.msk [vmem:[%s3834_s12] sm:$0xf] %vm2964_vm3, %v3190_v37  ;;  %v2552_v35 = vld [vmem:[%s3824_s25 + $0xb0] sm:$0xff]  ;;  %v2420_v46 = vpop.f32.mrf.mxu0  ;;  %v2829_v9 = vmul.f32 %v2722_v28, %v2498_v11  ;;  %v2756_v7 = vsel %vm2755_vm4, %v2722_v28, 0.0 }
 0x237   : > { %2965 = vst.msk [vmem:[%s3829_s29] sm:$0xf] %vm2964_vm3, %v2932_v40  ;;  %2674 = vperm.xlu1 %3739, %v2552_v35   ;;  %v1884_v37 = vld [vmem:[#allocation2 + $0xd0] sm:$0xff]  ;;  %v1885_v40 = vld [vmem:[#allocation2 + $0xd8] sm:$0xff] }
 0x238   : > { %v2277_v52 = vadd.f32 %v2198_v59, %v2055_v58  ;;  %v2554_v58 = vld [vmem:[%s3824_s25 + $0xc0] sm:$0xff]  ;;  %v2861_v14 = vsel %vm2755_vm4, %v2829_v9, 0.0 }
 0x239   : > { %v3112_v41 = vpop.f32.mrf.mxu1  ;;  %2684 = vperm.xlu0 %3738, %v2554_v58  }
 0x23a   : > { %3507 = vmatmul.msk.bf16.gmra.mxu2 %vm467_vm2, %v1905_v63  ;;  %v3113_v15 = vadd.f32 %v4590_v13, %v3112_v41  ;;  %v2499_v55 = vadd.f32 %v2420_v46, %v2277_v52  ;;  %v2555_v63 = vld [vmem:[%s3824_s25 + $0xc8] sm:$0xff]  ;;  %v3038_v52 = vpack.c.bf16 %v4562_v62, %v4544_v33  ;;  %v2580_v58 = vpop.permute.xlu1 %2579 }
 0x23b   : > { %3524 = vmatmul.msk.bf16.gmra.mxu3 %vm467_vm2, %v2127_v26 }
 0x23c   : > { %v3191_v50 = vpack.c.bf16 %v3113_v15, %v3113_v15  ;;  %v2933_v47 = vpack.c.bf16 %v2499_v55, %v2499_v55  ;;  %v2723_v59 = vmul.f32 %v2570_v23, %v2499_v55 }
 0x23d   : > { %v1979_v56 = vpop.f32.mrf.mxu2 }
 0x23e   : > { %v2201_v38 = vpop.f32.mrf.mxu3  ;;  %v2056_v31 = vadd.f32 %v1979_v56, %v4318_v48  ;;  %3223 = vst.msk [vmem:[%s3834_s12 + $0x4] sm:$0xf] %vm2964_vm3, %v3191_v50  ;;  %v2757_v26 = vsel %vm2755_vm4, %v2723_v59, 0.0  ;;  %v2830_v48 = vmul.f32 %v2723_v59, %v2499_v55  ;;  %v2423_v41 = vpop.f32.mrf.mxu0  ;;  %v2128_v56 = vpack.c.bf16 %v4618_v44, %v4616_v4  ;;  %3541 = vmatmul.msk.bf16.gmra.mxu0 %vm467_vm2, %v4348_v45 }
 0x23f   : > { %2966 = vst.msk [vmem:[%s3829_s29 + $0x4] sm:$0xf] %vm2964_vm3, %v2933_v47  ;;  %v2758_v11 = vadd.f32 %v2757_v26, %v2756_v7  ;;  %2689 = vperm.xlu1 %3739, %v2555_v63   ;;  %v1906_v55 = vpack.c.bf16 %v1885_v40, %v1884_v37  ;;  %v2557_v7 = vld [vmem:[%s3824_s25 + $0xd8] sm:$0xff]  ;;  %v2547_v26 = vld [vmem:[%s3824_s25 + $0x88] sm:$0xff] }
 0x240   : > { %v2278_v24 = vadd.f32 %v2201_v38, %v2056_v31  ;;  %v2862_v35 = vsel %vm2755_vm4, %v2830_v48, 0.0  ;;  %v2558_v48 = vld [vmem:[%s3824_s25 + $0xe0] sm:$0xff]  ;;  %2649 = vperm.xlu2 %3740, %v2547_v26  }
 0x241   : > { %v3115_v28 = vpop.f32.mrf.mxu1  ;;  %v2863_v38 = vadd.f32 %v2862_v35, %v2861_v14  ;;  %2699 = vperm.xlu0 %3738, %v2557_v7  }
 0x242   : > { %v3116_v15 = vadd.f32 %v4590_v13, %v3115_v28  ;;  %v2500_v33 = vadd.f32 %v2423_v41, %v2278_v24 }
 0x244   : > { %v3192_v31 = vpack.c.bf16 %v3116_v15, %v3116_v15  ;;  %3557 = vmatmul.msk.bf16.gmra.mxu1 %vm467_vm2, %v3038_v52  ;;  %v2934_v50 = vpack.c.bf16 %v2500_v33, %v2500_v33  ;;  %v2724_v9 = vmul.f32 %v2575_v20, %v2500_v33  ;;  %v2585_v15 = vpop.permute.xlu2 %2584 }
 0x245   : > { %v1981_v46 = vpop.f32.mrf.mxu2 }
 0x246   : > { %v2203_v23 = vpop.f32.mrf.mxu3  ;;  %v2057_v62 = vadd.f32 %v1981_v46, %v4324_v30  ;;  %3224 = vst.msk [vmem:[%s3834_s12 + $0x8] sm:$0xf] %vm2964_vm3, %v3192_v31  ;;  %v2759_v47 = vsel %vm2755_vm4, %v2724_v9, 0.0  ;;  %v2831_v59 = vmul.f32 %v2724_v9, %v2500_v33  ;;  %v2425_v37 = vpop.f32.mrf.mxu0  ;;  %v2328_v46 = vld [vmem:[#allocation2 + $0xd2] sm:$0xff]  ;;  %v4652_v33 = vld [vmem:[#allocation2 + $0xe1] sm:$0xff]  ;;  %v4657_v31 = vld [vmem:[#allocation2 + $0xe9] sm:$0xff] }
 0x247   : > { %2967 = vst.msk [vmem:[%s3829_s29 + $0x8] sm:$0xf] %vm2964_vm3, %v2934_v50  ;;  %v2760_v24 = vadd.f32 %v2759_v47, %v2758_v11  ;;  %2704 = vperm.xlu1 %3739, %v2558_v48   ;;  %v2560_v50 = vld [vmem:[%s3824_s25 + $0xf0] sm:$0xff]  ;;  %v1886_v47 = vld [vmem:[#allocation2 + $0xe0] sm:$0xff] }
 0x248   : > { %v2279_v30 = vadd.f32 %v2203_v23, %v2057_v62  ;;  %v2864_v45 = vsel %vm2755_vm4, %v2831_v59, 0.0  ;;  %v1887_v59 = vld [vmem:[#allocation2 + $0xe8] sm:$0xff] }
 0x249   : > { %v3117_v63 = vpop.f32.mrf.mxu1  ;;  %v2865_v40 = vadd.f32 %v2864_v45, %v2863_v38  ;;  %2714 = vperm.xlu0 %3738, %v2560_v50  }
 0x24a   : > { %3508 = vmatmul.msk.bf16.gmra.mxu2 %vm467_vm2, %v1906_v55  ;;  %v3118_v14 = vadd.f32 %v4590_v13, %v3117_v63  ;;  %v2501_v35 = vadd.f32 %v2425_v37, %v2279_v30  ;;  %v3039_v30 = vpack.c.bf16 %v4583_v53, %v4564_v54  ;;  %v1907_v53 = vpack.c.bf16 %v1887_v59, %v1886_v47 }
 0x24b   : > { %3525 = vmatmul.msk.bf16.gmra.mxu3 %vm467_vm2, %v2128_v56  ;;  %v2329_v56 = vld [vmem:[#allocation2 + $0xda] sm:$0xff] }
 0x24c   : > { %v3193_v23 = vpack.c.bf16 %v3118_v14, %v3118_v14  ;;  %v2935_v28 = vpack.c.bf16 %v2501_v35, %v2501_v35  ;;  %v2725_v41 = vmul.f32 %v2580_v58, %v2501_v35  ;;  %v2350_v26 = vpack.c.bf16 %v2329_v56, %v2328_v46  ;;  %v2590_v46 = vpop.permute.xlu2 %2589 }
 0x24d   : > { %v1984_v52 = vpop.f32.mrf.mxu2 }
 0x24e   : > { %v2206_v20 = vpop.f32.mrf.mxu3  ;;  %v2058_v11 = vadd.f32 %v1984_v52, %v4335_v57  ;;  %3225 = vst.msk [vmem:[%s3834_s12 + $0xc] sm:$0xf] %vm2964_vm3, %v3193_v23  ;;  %v2761_v38 = vsel %vm2755_vm4, %v2725_v41, 0.0  ;;  %v2832_v62 = vmul.f32 %v2725_v41, %v2501_v35  ;;  %v2561_v57 = vld [vmem:[%s3824_s25 + $0xf8] sm:$0xff]  ;;  %v2428_v45 = vpop.f32.mrf.mxu0  ;;  %3542 = vmatmul.msk.bf16.gmra.mxu0 %vm467_vm2, %v2350_v26  ;;  %v2550_v23 = vld [vmem:[%s3824_s25 + $0xa0] sm:$0xff] }
 0x24f   : > { %2968 = vst.msk [vmem:[%s3829_s29 + $0xc] sm:$0xf] %vm2964_vm3, %v2935_v28  ;;  %v2762_v9 = vadd.f32 %v2761_v38, %v2760_v24  ;;  %2719 = vperm.xlu1 %3739, %v2561_v57   ;;  %v2129_v24 = vpack.c.bf16 %v4657_v31, %v4652_v33  ;;  %2664 = vperm.xlu2 %3740, %v2550_v23  }
 0x250   : > { %v2280_v55 = vadd.f32 %v2206_v20, %v2058_v11  ;;  %v2866_v7 = vsel %vm2755_vm4, %v2832_v62, 0.0 }
 0x251   : > { %v3120_v58 = vpop.f32.mrf.mxu1  ;;  %v2867_v20 = vadd.f32 %v2866_v7, %v2865_v40 }
 0x252   : > { %v3121_v37 = vadd.f32 %v4590_v13, %v3120_v58  ;;  %v2502_v52 = vadd.f32 %v2428_v45, %v2280_v55  ;;  %v2331_v58 = vld [vmem:[#allocation2 + $0xea] sm:$0xff] }
 0x254   : > { %v3194_v14 = vpack.c.bf16 %v3121_v37, %v3121_v37  ;;  %3558 = vmatmul.msk.bf16.gmra.mxu1 %vm467_vm2, %v3039_v30  ;;  %v2936_v35 = vpack.c.bf16 %v2502_v52, %v2502_v52  ;;  %v2726_v11 = vmul.f32 %v2585_v15, %v2502_v52  ;;  %v2553_v30 = vld [vmem:[%s3824_s25 + $0xb8] sm:$0xff] }
 0x255   : > { %v1986_v63 = vpop.f32.mrf.mxu2  ;;  %v4689_v37 = vld [vmem:[#allocation2 + $0xf9] sm:$0xff] }
 0x256   : > { %v2208_v48 = vpop.f32.mrf.mxu3  ;;  %v2059_v54 = vadd.f32 %v1986_v63, %v4341_v27  ;;  %3226 = vst.msk [vmem:[%s3834_s12 + $0x10] sm:$0xf] %vm2964_vm3, %v3194_v14  ;;  %v2763_v40 = vsel %vm2755_vm4, %v2726_v11, 0.0  ;;  %v2833_v27 = vmul.f32 %v2726_v11, %v2502_v52  ;;  %v2430_v62 = vpop.f32.mrf.mxu0  ;;  %v3040_v14 = vpack.c.bf16 %v4616_v4, %v4585_v22 }
 0x257   : > { %2969 = vst.msk [vmem:[%s3829_s29 + $0x10] sm:$0xf] %vm2964_vm3, %v2936_v35  ;;  %v2764_v41 = vadd.f32 %v2763_v40, %v2762_v9  ;;  %v2330_v9 = vld [vmem:[#allocation2 + $0xe2] sm:$0xff]  ;;  %2679 = vperm.xlu2 %3740, %v2553_v30   ;;  %v2595_v52 = vpop.permute.xlu0 %2594 }
 0x258   : > { %v2281_v28 = vadd.f32 %v2208_v48, %v2059_v54  ;;  %v2868_v56 = vsel %vm2755_vm4, %v2833_v27, 0.0  ;;  %v1888_v54 = vld [vmem:[#allocation2 + $0xf0] sm:$0xff]  ;;  %v2351_v11 = vpack.c.bf16 %v2331_v58, %v2330_v9 }
 0x259   : > { %v3122_v38 = vpop.f32.mrf.mxu1  ;;  %v2869_v55 = vadd.f32 %v2868_v56, %v2867_v20 }
 0x25a   : > { %3509 = vmatmul.msk.bf16.gmra.mxu2 %vm467_vm2, %v1907_v53  ;;  %v3123_v57 = vadd.f32 %v4590_v13, %v3122_v38  ;;  %v2503_v47 = vadd.f32 %v2430_v62, %v2281_v28  ;;  %v1889_v53 = vld [vmem:[#allocation2 + $0xf8] sm:$0xff] }
 0x25b   : > { %3526 = vmatmul.msk.bf16.gmra.mxu3 %vm467_vm2, %v2129_v24  ;;  %v4687_v24 = vld [vmem:[#allocation2 + $0xf1] sm:$0xff]  ;;  %v1908_v4 = vpack.c.bf16 %v1889_v53, %v1888_v54 }
 0x25c   : > { %v3195_v7 = vpack.c.bf16 %v3123_v57, %v3123_v57  ;;  %v2937_v26 = vpack.c.bf16 %v2503_v47, %v2503_v47  ;;  %v2727_v48 = vmul.f32 %v2590_v46, %v2503_v47  ;;  %v4705_v57 = vld [vmem:[%s3819_s22 + $0x10] sm:$0xff]  }
 0x25d   : > { %v1989_v50 = vpop.f32.mrf.mxu2  ;;  %v3642_v30 = vunpack.c.l.bf16 %v4705_v57 }
 0x25e   : > { %v2211_v15 = vpop.f32.mrf.mxu3  ;;  %v2060_v59 = vadd.f32 %v1989_v50, %v4352_v60  ;;  %3227 = vst.msk [vmem:[%s3834_s12 + $0x14] sm:$0xf] %vm2964_vm3, %v3195_v7  ;;  %v2765_v45 = vsel %vm2755_vm4, %v2727_v48, 0.0  ;;  %v2834_v20 = vmul.f32 %v2727_v48, %v2503_v47  ;;  %v2433_v27 = vpop.f32.mrf.mxu0  ;;  %3543 = vmatmul.msk.bf16.gmra.mxu0 %vm467_vm2, %v2351_v11 }
 0x25f   : > { %2970 = vst.msk [vmem:[%s3829_s29 + $0x14] sm:$0xf] %vm2964_vm3, %v2937_v26  ;;  %v2766_v60 = vadd.f32 %v2765_v45, %v2764_v41  ;;  %v2130_v41 = vpack.c.bf16 %v4689_v37, %v4687_v24  ;;  %v2600_v26 = vpop.permute.xlu1 %2599 }
 0x260   : > { %v2282_v63 = vadd.f32 %v2211_v15, %v2060_v59  ;;  %v2870_v35 = vsel %vm2755_vm4, %v2834_v20, 0.0  ;;  %568 = vst.msk [vmem:[#allocation2 + $0x120] sm:$0xff] %vm467_vm2, %v3642_v30 }
 0x261   : > { %v3125_v40 = vpop.f32.mrf.mxu1  ;;  %v2871_v28 = vadd.f32 %v2870_v35, %v2869_v55  ;;  %v2556_v55 = vld [vmem:[%s3824_s25 + $0xd0] sm:$0xff] }
 0x262   : > { %v3126_v56 = vadd.f32 %v4590_v13, %v3125_v40  ;;  %v2504_v15 = vadd.f32 %v2433_v27, %v2282_v63  ;;  %2694 = vperm.xlu2 %3740, %v2556_v55   ;;  %v2333_v40 = vld [vmem:[#allocation2 + $0xfa] sm:$0xff] }
 0x264   : > { %v3196_v38 = vpack.c.bf16 %v3126_v56, %v3126_v56  ;;  %3559 = vmatmul.msk.bf16.gmra.mxu1 %vm467_vm2, %v3040_v14  ;;  %v2938_v62 = vpack.c.bf16 %v2504_v15, %v2504_v15  ;;  %v2728_v50 = vmul.f32 %v2595_v52, %v2504_v15  ;;  %v2559_v14 = vld [vmem:[%s3824_s25 + $0xe8] sm:$0xff] }
 0x265   : > { %v1991_v46 = vpop.f32.mrf.mxu2  ;;  %v4724_v56 = vld [vmem:[#allocation2 + $0x109] sm:$0xff] }
 0x266   : > { %v2213_v23 = vpop.f32.mrf.mxu3  ;;  %v2061_v22 = vadd.f32 %v1991_v46, %v4358_v10  ;;  %3228 = vst.msk [vmem:[%s3834_s12 + $0x18] sm:$0xf] %vm2964_vm3, %v3196_v38  ;;  %v2767_v10 = vsel %vm2755_vm4, %v2728_v50, 0.0  ;;  %v2835_v47 = vmul.f32 %v2728_v50, %v2504_v15  ;;  %v2435_v45 = vpop.f32.mrf.mxu0  ;;  %v3041_v38 = vpack.c.bf16 %v4652_v33, %v4618_v44 }
 0x267   : > { %2971 = vst.msk [vmem:[%s3829_s29 + $0x18] sm:$0xf] %vm2964_vm3, %v2938_v62  ;;  %v2768_v7 = vadd.f32 %v2767_v10, %v2766_v60  ;;  %v2605_v15 = vpop.permute.xlu2 %2604 }
 0x268   : > { %v2283_v59 = vadd.f32 %v2213_v23, %v2061_v22  ;;  %v2872_v48 = vsel %vm2755_vm4, %v2835_v47, 0.0  ;;  %v2332_v23 = vld [vmem:[#allocation2 + $0xf2] sm:$0xff]  ;;  %v1890_v22 = vld [vmem:[#allocation2 + $0x100] sm:$0xff] }
 0x269   : > { %v3127_v58 = vpop.f32.mrf.mxu1  ;;  %v2873_v20 = vadd.f32 %v2872_v48, %v2871_v28  ;;  %v2352_v50 = vpack.c.bf16 %v2333_v40, %v2332_v23 }
 0x26a   : > { %3510 = vmatmul.msk.bf16.gmra.mxu2 %vm467_vm2, %v1908_v4  ;;  %v3128_v52 = vadd.f32 %v4590_v13, %v3127_v58  ;;  %v2505_v54 = vadd.f32 %v2435_v45, %v2283_v59  ;;  %2709 = vperm.xlu2 %3740, %v2559_v14   ;;  %v1891_v4 = vld [vmem:[#allocation2 + $0x108] sm:$0xff] }
 0x26b   : > { %3527 = vmatmul.msk.bf16.gmra.mxu3 %vm467_vm2, %v2130_v41  ;;  %v4722_v41 = vld [vmem:[#allocation2 + $0x101] sm:$0xff]  ;;  %v1909_v44 = vpack.c.bf16 %v1891_v4, %v1890_v22 }
 0x26c   : > { %v3197_v35 = vpack.c.bf16 %v3128_v52, %v3128_v52  ;;  %v2939_v60 = vpack.c.bf16 %v2505_v54, %v2505_v54  ;;  %v2729_v11 = vmul.f32 %v2600_v26, %v2505_v54 }
 0x26d   : > { %v1994_v63 = vpop.f32.mrf.mxu2 }
 0x26e   : > { %v2216_v9 = vpop.f32.mrf.mxu3  ;;  %v2062_v53 = vadd.f32 %v1994_v63, %v4367_v8  ;;  %3229 = vst.msk [vmem:[%s3834_s12 + $0x1c] sm:$0xf] %vm2964_vm3, %v3197_v35  ;;  %v2769_v27 = vsel %vm2755_vm4, %v2729_v11, 0.0  ;;  %v2836_v28 = vmul.f32 %v2729_v11, %v2505_v54  ;;  %v2438_v47 = vpop.f32.mrf.mxu0  ;;  %3544 = vmatmul.msk.bf16.gmra.mxu0 %vm467_vm2, %v2352_v50 }
 0x26f   : > { %2972 = vst.msk [vmem:[%s3829_s29 + $0x1c] sm:$0xf] %vm2964_vm3, %v2939_v60  ;;  %v2770_v8 = vadd.f32 %v2769_v27, %v2768_v7  ;;  %v2131_v7 = vpack.c.bf16 %v4724_v56, %v4722_v41  ;;  %v2610_v35 = vpop.permute.xlu0 %2609 }
 0x270   : > { %v2284_v46 = vadd.f32 %v2216_v9, %v2062_v53  ;;  %v2874_v62 = vsel %vm2755_vm4, %v2836_v28, 0.0 }
 0x271   : > { %v3130_v10 = vpop.f32.mrf.mxu1  ;;  %v2875_v59 = vadd.f32 %v2874_v62, %v2873_v20  ;;  %v3713_v20 = vld [vmem:[%s3819_s22 + $0x18] sm:$0xff]   ;;  %v2335_v62 = vld [vmem:[#allocation2 + $0x10a] sm:$0xff] }
 0x272   : > { %v3131_v26 = vadd.f32 %v4590_v13, %v3130_v10  ;;  %v2506_v48 = vadd.f32 %v2438_v47, %v2284_v46  ;;  %v3646_v53 = vunpack.c.l.bf16 %v3713_v20  ;;  %v4754_v47 = vld [vmem:[#allocation2 + $0x111] sm:$0xff] }
 0x274   : > { %v3198_v33 = vpack.c.bf16 %v3131_v26, %v3131_v26  ;;  %3560 = vmatmul.msk.bf16.gmra.mxu1 %vm467_vm2, %v3041_v38  ;;  %v2940_v58 = vpack.c.bf16 %v2506_v48, %v2506_v48  ;;  %v2730_v45 = vmul.f32 %v2605_v15, %v2506_v48  ;;  %570 = vst.msk [vmem:[#allocation2 + $0x130] sm:$0xff] %vm467_vm2, %v3646_v53  ;;  %v2334_v38 = vld [vmem:[#allocation2 + $0x102] sm:$0xff]  ;;  %v1892_v26 = vld [vmem:[#allocation2 + $0x110] sm:$0xff] }
 0x275   : > { %v1996_v30 = vpop.f32.mrf.mxu2 }
 0x276   : > { %v2218_v55 = vpop.f32.mrf.mxu3  ;;  %v2063_v9 = vadd.f32 %v1996_v30, %v4375_v6  ;;  %3230 = vst.msk [vmem:[%s3834_s12 + $0x20] sm:$0xf] %vm2964_vm3, %v3198_v33  ;;  %v2771_v52 = vsel %vm2755_vm4, %v2730_v45, 0.0  ;;  %v2837_v54 = vmul.f32 %v2730_v45, %v2506_v48  ;;  %v3643_v6 = vunpack.c.h.bf16 %v4705_v57  ;;  %v2440_v40 = vpop.f32.mrf.mxu0 }
 0x277   : > { %2973 = vst.msk [vmem:[%s3829_s29 + $0x20] sm:$0xf] %vm2964_vm3, %v2940_v58  ;;  %v2772_v14 = vadd.f32 %v2771_v52, %v2770_v8  ;;  %v3042_v48 = vpack.c.bf16 %v4687_v24, %v4657_v31 }
 0x278   : > { %v2285_v63 = vadd.f32 %v2218_v55, %v2063_v9  ;;  %v2876_v60 = vsel %vm2755_vm4, %v2837_v54, 0.0  ;;  %569 = vst.msk [vmem:[#allocation2 + $0x128] sm:$0xff] %vm467_vm2, %v3643_v6 }
 0x279   : > { %v3132_v23 = vpop.f32.mrf.mxu1  ;;  %v2877_v27 = vadd.f32 %v2876_v60, %v2875_v59  ;;  %v2115_v59 = vld [vmem:[#allocation2 + $0x119] sm:$0xff] }
 0x27a   : > { %3511 = vmatmul.msk.bf16.gmra.mxu2 %vm467_vm2, %v1909_v44  ;;  %v3133_v46 = vadd.f32 %v4590_v13, %v3132_v23  ;;  %v2507_v15 = vadd.f32 %v2440_v40, %v2285_v63  ;;  %v2353_v44 = vpack.c.bf16 %v2335_v62, %v2334_v38  ;;  %v2132_v52 = vpack.c.bf16 %v2115_v59, %v4754_v47  ;;  %v2620_v40 = vpop.permute.xlu2 %2619  ;;  %v2337_v59 = vld [vmem:[#allocation2 + $0x11a] sm:$0xff] }
 0x27b   : > { %3528 = vmatmul.msk.bf16.gmra.mxu3 %vm467_vm2, %v2131_v7  ;;  %v2615_v7 = vpop.permute.xlu1 %2614 }
 0x27c   : > { %v3199_v8 = vpack.c.bf16 %v3133_v46, %v3133_v46  ;;  %v2941_v22 = vpack.c.bf16 %v2507_v15, %v2507_v15  ;;  %v2731_v4 = vmul.f32 %v2610_v35, %v2507_v15 }
 0x27d   : > { %v1999_v28 = vpop.f32.mrf.mxu2 }
 0x27e   : > { %v2221_v11 = vpop.f32.mrf.mxu3  ;;  %v2064_v57 = vadd.f32 %v1999_v28, %v4383_v39  ;;  %3231 = vst.msk [vmem:[%s3834_s12 + $0x24] sm:$0xf] %vm2964_vm3, %v3199_v8  ;;  %v2773_v50 = vsel %vm2755_vm4, %v2731_v4, 0.0  ;;  %v2838_v55 = vmul.f32 %v2731_v4, %v2507_v15  ;;  %v1893_v39 = vld [vmem:[#allocation2 + $0x118] sm:$0xff]  ;;  %v2443_v45 = vpop.f32.mrf.mxu0  ;;  %3545 = vmatmul.msk.bf16.gmra.mxu0 %vm467_vm2, %v2353_v44 }
 0x27f   : > { %2974 = vst.msk [vmem:[%s3829_s29 + $0x24] sm:$0xf] %vm2964_vm3, %v2941_v22  ;;  %v2774_v30 = vadd.f32 %v2773_v50, %v2772_v14  ;;  %v1910_v14 = vpack.c.bf16 %v1893_v39, %v1892_v26  ;;  %v2116_v39 = vld [vmem:[#allocation2 + $0x121] sm:$0xff]  ;;  %v2625_v44 = vpop.permute.xlu0 %2624 }
 0x280   : > { %v2286_v10 = vadd.f32 %v2221_v11, %v2064_v57  ;;  %v2878_v9 = vsel %vm2755_vm4, %v2838_v55, 0.0 }
 0x281   : > { %v3135_v58 = vpop.f32.mrf.mxu1  ;;  %v2879_v63 = vadd.f32 %v2878_v9, %v2877_v27 }
 0x282   : > { %v3136_v54 = vadd.f32 %v4590_v13, %v3135_v58  ;;  %v2508_v6 = vadd.f32 %v2443_v45, %v2286_v10  ;;  %v2336_v10 = vld [vmem:[#allocation2 + $0x112] sm:$0xff]  ;;  %v1895_v58 = vld [vmem:[#allocation2 + $0x128] sm:$0xff] }
 0x284   : > { %v3200_v35 = vpack.c.bf16 %v3136_v54, %v3136_v54  ;;  %3561 = vmatmul.msk.bf16.gmra.mxu1 %vm467_vm2, %v3042_v48  ;;  %v2942_v31 = vpack.c.bf16 %v2508_v6, %v2508_v6  ;;  %v2732_v24 = vmul.f32 %v2615_v7, %v2508_v6  ;;  %v2117_v48 = vld [vmem:[#allocation2 + $0x129] sm:$0xff] }
 0x285   : > { %v2001_v20 = vpop.f32.mrf.mxu2 }
 0x286   : > { %v2223_v33 = vpop.f32.mrf.mxu3  ;;  %v2065_v53 = vadd.f32 %v2001_v20, %v4388_v12  ;;  %3232 = vst.msk [vmem:[%s3834_s12 + $0x28] sm:$0xf] %vm2964_vm3, %v3200_v35  ;;  %v2775_v60 = vsel %vm2755_vm4, %v2732_v24, 0.0  ;;  %v2839_v11 = vmul.f32 %v2732_v24, %v2508_v6  ;;  %v2445_v15 = vpop.f32.mrf.mxu0 }
 0x287   : > { %2975 = vst.msk [vmem:[%s3829_s29 + $0x28] sm:$0xf] %vm2964_vm3, %v2942_v31  ;;  %v2776_v12 = vadd.f32 %v2775_v60, %v2774_v30 }
 0x288   : > { %v2287_v23 = vadd.f32 %v2223_v33, %v2065_v53  ;;  %v2880_v27 = vsel %vm2755_vm4, %v2839_v11, 0.0  ;;  %v1894_v33 = vld [vmem:[#allocation2 + $0x120] sm:$0xff] }
 0x289   : > { %v3137_v46 = vpop.f32.mrf.mxu1  ;;  %v2881_v57 = vadd.f32 %v2880_v27, %v2879_v63  ;;  %v2354_v63 = vpack.c.bf16 %v2337_v59, %v2336_v10  ;;  %v1911_v60 = vpack.c.bf16 %v1895_v58, %v1894_v33  ;;  %v2630_v27 = vpop.permute.xlu1 %2629  ;;  %v2338_v59 = vld [vmem:[#allocation2 + $0x122] sm:$0xff] }
 0x28a   : > { %3512 = vmatmul.msk.bf16.gmra.mxu2 %vm467_vm2, %v1910_v14  ;;  %v3138_v22 = vadd.f32 %v4590_v13, %v3137_v46  ;;  %v2509_v4 = vadd.f32 %v2445_v15, %v2287_v23  ;;  %v2133_v14 = vpack.c.bf16 %v2117_v48, %v2116_v39 }
 0x28b   : > { %3529 = vmatmul.msk.bf16.gmra.mxu3 %vm467_vm2, %v2132_v52 }
 0x28c   : > { %v3201_v62 = vpack.c.bf16 %v3138_v22, %v3138_v22  ;;  %v2943_v50 = vpack.c.bf16 %v2509_v4, %v2509_v4  ;;  %v2733_v55 = vmul.f32 %v2620_v40, %v2509_v4 }
 0x28d   : > { %v2004_v8 = vpop.f32.mrf.mxu2 }
 0x28e   : > { %v2226_v28 = vpop.f32.mrf.mxu3  ;;  %v2066_v38 = vadd.f32 %v2004_v8, %v4394_v19  ;;  %3233 = vst.msk [vmem:[%s3834_s12 + $0x2c] sm:$0xf] %vm2964_vm3, %v3201_v62  ;;  %v2777_v30 = vsel %vm2755_vm4, %v2733_v55, 0.0  ;;  %v2840_v7 = vmul.f32 %v2733_v55, %v2509_v4  ;;  %v3043_v19 = vpack.c.bf16 %v4722_v41, %v4689_v37  ;;  %v2448_v54 = vpop.f32.mrf.mxu0  ;;  %3546 = vmatmul.msk.bf16.gmra.mxu0 %vm467_vm2, %v2354_v63 }
 0x28f   : > { %2976 = vst.msk [vmem:[%s3829_s29 + $0x2c] sm:$0xf] %vm2964_vm3, %v2943_v50  ;;  %v2778_v9 = vadd.f32 %v2777_v30, %v2776_v12  ;;  %v2339_v30 = vld [vmem:[#allocation2 + $0x12a] sm:$0xff] }
 0x290   : > { %v2288_v26 = vadd.f32 %v2226_v28, %v2066_v38  ;;  %v2882_v45 = vsel %vm2755_vm4, %v2840_v7, 0.0  ;;  %v2355_v33 = vpack.c.bf16 %v2339_v30, %v2338_v59 }
 0x291   : > { %v3140_v52 = vpop.f32.mrf.mxu1  ;;  %v2883_v6 = vadd.f32 %v2882_v45, %v2881_v57 }
 0x292   : > { %v3141_v35 = vadd.f32 %v4590_v13, %v3140_v52  ;;  %v2510_v31 = vadd.f32 %v2448_v54, %v2288_v26 }
 0x294   : > { %v3202_v11 = vpack.c.bf16 %v3141_v35, %v3141_v35  ;;  %3562 = vmatmul.msk.bf16.gmra.mxu1 %vm467_vm2, %v3043_v19  ;;  %v2944_v37 = vpack.c.bf16 %v2510_v31, %v2510_v31  ;;  %v2734_v41 = vmul.f32 %v2625_v44, %v2510_v31  ;;  %v3044_v44 = vpack.c.bf16 %v4754_v47, %v4724_v56 }
 0x295   : > { %v2006_v53 = vpop.f32.mrf.mxu2 }
 0x296   : > { %v2228_v20 = vpop.f32.mrf.mxu3  ;;  %v2067_v24 = vadd.f32 %v2006_v53, %v4399_v16  ;;  %3234 = vst.msk [vmem:[%s3834_s12 + $0x30] sm:$0xf] %vm2964_vm3, %v3202_v11  ;;  %v2779_v23 = vsel %vm2755_vm4, %v2734_v41, 0.0  ;;  %v2841_v12 = vmul.f32 %v2734_v41, %v2510_v31  ;;  %v2450_v57 = vpop.f32.mrf.mxu0 }
 0x297   : > { %2977 = vst.msk [vmem:[%s3829_s29 + $0x30] sm:$0xf] %vm2964_vm3, %v2944_v37  ;;  %v2780_v16 = vadd.f32 %v2779_v23, %v2778_v9  ;;  %v2635_v9 = vpop.permute.xlu2 %2634 }
 0x298   : > { %v2289_v40 = vadd.f32 %v2228_v20, %v2067_v24  ;;  %v2884_v28 = vsel %vm2755_vm4, %v2841_v12, 0.0 }
 0x299   : > { %v3142_v15 = vpop.f32.mrf.mxu1  ;;  %v2885_v8 = vadd.f32 %v2884_v28, %v2883_v6 }
 0x29a   : > { %3513 = vmatmul.msk.bf16.gmra.mxu2 %vm467_vm2, %v1911_v60  ;;  %v3143_v4 = vadd.f32 %v4590_v13, %v3142_v15  ;;  %v2511_v38 = vadd.f32 %v2450_v57, %v2289_v40  ;;  %v2640_v60 = vpop.permute.xlu0 %2639 }
 0x29b   : > { %3530 = vmatmul.msk.bf16.gmra.mxu3 %vm467_vm2, %v2133_v14 }
 0x29c   : > { %v3203_v50 = vpack.c.bf16 %v3143_v4, %v3143_v4  ;;  %v2945_v55 = vpack.c.bf16 %v2511_v38, %v2511_v38  ;;  %v2735_v10 = vmul.f32 %v2630_v27, %v2511_v38 }
 0x29d   : > { %v2009_v22 = vpop.f32.mrf.mxu2 }
 0x29e   : > { %v2231_v46 = vpop.f32.mrf.mxu3  ;;  %v2068_v62 = vadd.f32 %v2009_v22, %v4410_v25  ;;  %3235 = vst.msk [vmem:[%s3834_s12 + $0x34] sm:$0xf] %vm2964_vm3, %v3203_v50  ;;  %v2781_v7 = vsel %vm2755_vm4, %v2735_v10, 0.0  ;;  %v2842_v26 = vmul.f32 %v2735_v10, %v2511_v38  ;;  %v2453_v45 = vpop.f32.mrf.mxu0  ;;  %3547 = vmatmul.msk.bf16.gmra.mxu0 %vm467_vm2, %v2355_v33 }
 0x29f   : > { %2978 = vst.msk [vmem:[%s3829_s29 + $0x34] sm:$0xf] %vm2964_vm3, %v2945_v55  ;;  %v2782_v48 = vadd.f32 %v2781_v7, %v2780_v16  ;;  %v2645_v38 = vpop.permute.xlu1 %2644 }
 0x2a0   : > { %v2290_v39 = vadd.f32 %v2231_v46, %v2068_v62  ;;  %v2886_v25 = vsel %vm2755_vm4, %v2842_v26, 0.0 }
 0x2a1   : > { %v3145_v19 = vpop.f32.mrf.mxu1  ;;  %v2887_v63 = vadd.f32 %v2886_v25, %v2885_v8 }
 0x2a2   : > { %v3146_v52 = vadd.f32 %v4590_v13, %v3145_v19  ;;  %v2512_v54 = vadd.f32 %v2453_v45, %v2290_v39  ;;  %v2650_v19 = vpop.permute.xlu2 %2649 }
 0x2a4   : > { %v3204_v53 = vpack.c.bf16 %v3146_v52, %v3146_v52  ;;  %3563 = vmatmul.msk.bf16.gmra.mxu1 %vm467_vm2, %v3044_v44  ;;  %v2946_v56 = vpack.c.bf16 %v2512_v54, %v2512_v54  ;;  %v2736_v47 = vmul.f32 %v2635_v9, %v2512_v54 }
 0x2a5   : > { %v2011_v20 = vpop.f32.mrf.mxu2 }
 0x2a6   : > { %v2233_v58 = vpop.f32.mrf.mxu3  ;;  %v2069_v6 = vadd.f32 %v2011_v20, %v4417_v2  ;;  %3236 = vst.msk [vmem:[%s3834_s12 + $0x38] sm:$0xf] %vm2964_vm3, %v3204_v53  ;;  %v2783_v14 = vsel %vm2755_vm4, %v2736_v47, 0.0  ;;  %v2843_v35 = vmul.f32 %v2736_v47, %v2512_v54  ;;  %v2455_v41 = vpop.f32.mrf.mxu0 }
 0x2a7   : > { %2979 = vst.msk [vmem:[%s3829_s29 + $0x38] sm:$0xf] %vm2964_vm3, %v2946_v56  ;;  %v2784_v24 = vadd.f32 %v2783_v14, %v2782_v48 }
 0x2a8   : > { %v2291_v31 = vadd.f32 %v2233_v58, %v2069_v6  ;;  %v2888_v2 = vsel %vm2755_vm4, %v2843_v35, 0.0 }
 0x2a9   : > { %v3147_v37 = vpop.f32.mrf.mxu1  ;;  %v2889_v23 = vadd.f32 %v2888_v2, %v2887_v63 }
 0x2aa   : > { %v3148_v40 = vadd.f32 %v4590_v13, %v3147_v37  ;;  %v2513_v16 = vadd.f32 %v2455_v41, %v2291_v31 }
 0x2ac   : > { %v3205_v28 = vpack.c.bf16 %v3148_v40, %v3148_v40  ;;  %v2947_v46 = vpack.c.bf16 %v2513_v16, %v2513_v16  ;;  %v2737_v15 = vmul.f32 %v2640_v60, %v2513_v16 }
 0x2ad   : > { %v2014_v12 = vpop.f32.mrf.mxu2 }
 0x2ae   : > { %v2236_v11 = vpop.f32.mrf.mxu3  ;;  %v2070_v27 = vadd.f32 %v2014_v12, %v4430_v1  ;;  %3237 = vst.msk [vmem:[%s3834_s12 + $0x3c] sm:$0xf] %vm2964_vm3, %v3205_v28  ;;  %v2785_v57 = vsel %vm2755_vm4, %v2737_v15, 0.0  ;;  %v2844_v8 = vmul.f32 %v2737_v15, %v2513_v16  ;;  %v2458_v1 = vpop.f32.mrf.mxu0 }
 0x2af   : > { %2980 = vst.msk [vmem:[%s3829_s29 + $0x3c] sm:$0xf] %vm2964_vm3, %v2947_v46  ;;  %v2786_v4 = vadd.f32 %v2785_v57, %v2784_v24  ;;  %v2655_v28 = vpop.permute.xlu0 %2654 }
 0x2b0   : > { %v2292_v22 = vadd.f32 %v2236_v11, %v2070_v27  ;;  %v2890_v62 = vsel %vm2755_vm4, %v2844_v8, 0.0 }
 0x2b1   : > { %v3150_v55 = vpop.f32.mrf.mxu1  ;;  %v2891_v10 = vadd.f32 %v2890_v62, %v2889_v23 }
 0x2b2   : > { %v3151_v30 = vadd.f32 %v4590_v13, %v3150_v55  ;;  %v2514_v7 = vadd.f32 %v2458_v1, %v2292_v22 }
 0x2b4   : > { %v3206_v39 = vpack.c.bf16 %v3151_v30, %v3151_v30  ;;  %v2948_v48 = vpack.c.bf16 %v2514_v7, %v2514_v7  ;;  %v2738_v9 = vmul.f32 %v2645_v38, %v2514_v7 }
 0x2b5   : > { %v2016_v59 = vpop.f32.mrf.mxu2 }
 0x2b6   : > { %v2238_v50 = vpop.f32.mrf.mxu3  ;;  %v2071_v26 = vadd.f32 %v2016_v59, %v4437_v0  ;;  %3238 = vst.msk [vmem:[%s3834_s12 + $0x40] sm:$0xf] %vm2964_vm3, %v3206_v39  ;;  %v2787_v44 = vsel %vm2755_vm4, %v2738_v9, 0.0  ;;  %v2845_v25 = vmul.f32 %v2738_v9, %v2514_v7  ;;  %v2460_v0 = vpop.f32.mrf.mxu0 }
 0x2b7   : > { %2981 = vst.msk [vmem:[%s3829_s29 + $0x40] sm:$0xf] %vm2964_vm3, %v2948_v48  ;;  %v2788_v58 = vadd.f32 %v2787_v44, %v2786_v4 }
 0x2b8   : > { %v2293_v33 = vadd.f32 %v2238_v50, %v2071_v26  ;;  %v2892_v45 = vsel %vm2755_vm4, %v2845_v25, 0.0  ;;  %v2660_v26 = vpop.permute.xlu1 %2659 }
 0x2b9   : > { %v3152_v20 = vpop.f32.mrf.mxu1  ;;  %v2893_v52 = vadd.f32 %v2892_v45, %v2891_v10 }
 0x2ba   : > { %v3153_v6 = vadd.f32 %v4590_v13, %v3152_v20  ;;  %v2515_v53 = vadd.f32 %v2460_v0, %v2293_v33  ;;  %v4857_v0 = vld [vmem:[%s4974_s5] ss:$0 sm:$0xff] }
 0x2bc   : > { %v3207_v47 = vpack.c.bf16 %v3153_v6, %v3153_v6  ;;  %v2949_v14 = vpack.c.bf16 %v2515_v53, %v2515_v53  ;;  %v2739_v35 = vmul.f32 %v2650_v19, %v2515_v53 }
 0x2bd   : > { %v2019_v54 = vpop.f32.mrf.mxu2 }
 0x2be   : > { %v2241_v63 = vpop.f32.mrf.mxu3  ;;  %v2072_v56 = vadd.f32 %v2019_v54, %v4450_v42  ;;  %3239 = vst.msk [vmem:[%s3834_s12 + $0x44] sm:$0xf] %vm2964_vm3, %v3207_v47  ;;  %v2789_v31 = vsel %vm2755_vm4, %v2739_v35, 0.0  ;;  %v2846_v24 = vmul.f32 %v2739_v35, %v2515_v53  ;;  %v2463_v23 = vpop.f32.mrf.mxu0 }
 0x2bf   : > { %2982 = vst.msk [vmem:[%s3829_s29 + $0x44] sm:$0xf] %vm2964_vm3, %v2949_v14  ;;  %v2790_v2 = vadd.f32 %v2789_v31, %v2788_v58  ;;  %v2665_v53 = vpop.permute.xlu2 %2664 }
 0x2c0   : > { %v2294_v60 = vadd.f32 %v2241_v63, %v2072_v56  ;;  %v2894_v11 = vsel %vm2755_vm4, %v2846_v24, 0.0 }
 0x2c1   : > { %v3155_v41 = vpop.f32.mrf.mxu1  ;;  %v2895_v42 = vadd.f32 %v2894_v11, %v2893_v52 }
 0x2c2   : > { %v3156_v40 = vadd.f32 %v4590_v13, %v3155_v41  ;;  %v2516_v16 = vadd.f32 %v2463_v23, %v2294_v60 }
 0x2c4   : > { %v3208_v46 = vpack.c.bf16 %v3156_v40, %v3156_v40  ;;  %v2740_v15 = vmul.f32 %v2655_v28, %v2516_v16  ;;  %v2950_v57 = vpack.c.bf16 %v2516_v16, %v2516_v16 }
 0x2c5   : > { %v2021_v12 = vpop.f32.mrf.mxu2 }
 0x2c6   : > { %v2243_v37 = vpop.f32.mrf.mxu3  ;;  %v2073_v27 = vadd.f32 %v2021_v12, %v4455_v3  ;;  %3240 = vst.msk [vmem:[%s3834_s12 + $0x48] sm:$0xf] %vm2964_vm3, %v3208_v46  ;;  %v2791_v8 = vsel %vm2755_vm4, %v2740_v15, 0.0  ;;  %v2847_v22 = vmul.f32 %v2740_v15, %v2516_v16  ;;  %v2465_v1 = vpop.f32.mrf.mxu0 }
 0x2c7   : > { %2983 = vst.msk [vmem:[%s3829_s29 + $0x48] sm:$0xf] %vm2964_vm3, %v2950_v57  ;;  %v2792_v38 = vadd.f32 %v2791_v8, %v2790_v2  ;;  %v2670_v16 = vpop.permute.xlu0 %2669 }
 0x2c8   : > { %v2295_v4 = vadd.f32 %v2243_v37, %v2073_v27  ;;  %v2896_v62 = vsel %vm2755_vm4, %v2847_v22, 0.0 }
 0x2c9   : > { %v3157_v55 = vpop.f32.mrf.mxu1  ;;  %v2897_v3 = vadd.f32 %v2896_v62, %v2895_v42 }
 0x2ca   : > { %v3158_v59 = vadd.f32 %v4590_v13, %v3157_v55  ;;  %v2517_v30 = vadd.f32 %v2465_v1, %v2295_v4 }
 0x2cc   : > { %v3209_v39 = vpack.c.bf16 %v3158_v59, %v3158_v59  ;;  %v2741_v48 = vmul.f32 %v2660_v26, %v2517_v30  ;;  %v2951_v9 = vpack.c.bf16 %v2517_v30, %v2517_v30  ;;  %v2675_v59 = vpop.permute.xlu1 %2674 }
 0x2cd   : > { %v2024_v10 = vpop.f32.mrf.mxu2 }
 0x2ce   : > { %v2246_v50 = vpop.f32.mrf.mxu3  ;;  %v2074_v7 = vadd.f32 %v2024_v10, %v4469_v18  ;;  %3241 = vst.msk [vmem:[%s3834_s12 + $0x4c] sm:$0xf] %vm2964_vm3, %v3209_v39  ;;  %v2793_v44 = vsel %vm2755_vm4, %v2741_v48, 0.0  ;;  %v2848_v25 = vmul.f32 %v2741_v48, %v2517_v30  ;;  %v2468_v63 = vpop.f32.mrf.mxu0 }
 0x2cf   : > { %2984 = vst.msk [vmem:[%s3829_s29 + $0x4c] sm:$0xf] %vm2964_vm3, %v2951_v9  ;;  %v2794_v58 = vadd.f32 %v2793_v44, %v2792_v38 }
 0x2d0   : > { %v2296_v33 = vadd.f32 %v2246_v50, %v2074_v7  ;;  %v2898_v19 = vsel %vm2755_vm4, %v2848_v25, 0.0 }
 0x2d1   : > { %v3160_v45 = vpop.f32.mrf.mxu1  ;;  %v2899_v18 = vadd.f32 %v2898_v19, %v2897_v3 }
 0x2d2   : > { %v3161_v52 = vadd.f32 %v4857_v0, %v3160_v45  ;;  %v2518_v54 = vadd.f32 %v2468_v63, %v2296_v33 }
 0x2d4   : > { %v3210_v56 = vpack.c.bf16 %v3161_v52, %v3161_v52  ;;  %v2742_v47 = vmul.f32 %v2665_v53, %v2518_v54  ;;  %v2952_v14 = vpack.c.bf16 %v2518_v54, %v2518_v54 }
 0x2d5   : > { %v2026_v20 = vpop.f32.mrf.mxu2 }
 0x2d6   : > { %v2248_v13 = vpop.f32.mrf.mxu3  ;;  %v2075_v6 = vadd.f32 %v2026_v20, %v4477_v61  ;;  %3242 = vst.msk [vmem:[%s3834_s12 + $0x50] sm:$0xf] %vm2964_vm3, %v3210_v56  ;;  %v2795_v35 = vsel %vm2755_vm4, %v2742_v47, 0.0  ;;  %v2849_v31 = vmul.f32 %v2742_v47, %v2518_v54  ;;  %v2470_v41 = vpop.f32.mrf.mxu0 }
 0x2d7   : > { %2985 = vst.msk [vmem:[%s3829_s29 + $0x50] sm:$0xf] %vm2964_vm3, %v2952_v14  ;;  %v2796_v60 = vadd.f32 %v2795_v35, %v2794_v58  ;;  %v2680_v20 = vpop.permute.xlu2 %2679 }
 0x2d8   : > { %v2297_v24 = vadd.f32 %v2248_v13, %v2075_v6  ;;  %v2900_v2 = vsel %vm2755_vm4, %v2849_v31, 0.0 }
 0x2d9   : > { %v3162_v37 = vpop.f32.mrf.mxu1  ;;  %v2901_v61 = vadd.f32 %v2900_v2, %v2899_v18 }
 0x2da   : > { %v3163_v42 = vadd.f32 %v4857_v0, %v3162_v37  ;;  %v2519_v12 = vadd.f32 %v2470_v41, %v2297_v24  ;;  %v2685_v41 = vpop.permute.xlu0 %2684 }
 0x2dc   : > { %v3211_v27 = vpack.c.bf16 %v3163_v42, %v3163_v42  ;;  %v2743_v28 = vmul.f32 %v2670_v16, %v2519_v12  ;;  %v2953_v46 = vpack.c.bf16 %v2519_v12, %v2519_v12 }
 0x2dd   : > { %v2029_v23 = vpop.f32.mrf.mxu2 }
 0x2de   : > { %v2251_v11 = vpop.f32.mrf.mxu3  ;;  %v2076_v40 = vadd.f32 %v2029_v23, %v4491_v29  ;;  %3243 = vst.msk [vmem:[%s3834_s12 + $0x54] sm:$0xf] %vm2964_vm3, %v3211_v27  ;;  %v2797_v15 = vsel %vm2755_vm4, %v2743_v28, 0.0  ;;  %v2850_v57 = vmul.f32 %v2743_v28, %v2519_v12  ;;  %v2473_v50 = vpop.f32.mrf.mxu0 }
 0x2df   : > { %2986 = vst.msk [vmem:[%s3829_s29 + $0x54] sm:$0xf] %vm2964_vm3, %v2953_v46  ;;  %v2798_v22 = vadd.f32 %v2797_v15, %v2796_v60 }
 0x2e0   : > { %v2298_v8 = vadd.f32 %v2251_v11, %v2076_v40  ;;  %v2902_v4 = vsel %vm2755_vm4, %v2850_v57, 0.0 }
 0x2e1   : > { %v3165_v62 = vpop.f32.mrf.mxu1  ;;  %v2903_v29 = vadd.f32 %v2902_v4, %v2901_v61 }
 0x2e2   : > { %v3166_v3 = vadd.f32 %v4857_v0, %v3165_v62  ;;  %v2520_v1 = vadd.f32 %v2473_v50, %v2298_v8 }
 0x2e4   : > { %v3212_v30 = vpack.c.bf16 %v3166_v3, %v3166_v3  ;;  %v2744_v7 = vmul.f32 %v2675_v59, %v2520_v1  ;;  %v2954_v26 = vpack.c.bf16 %v2520_v1, %v2520_v1 }
 0x2e5   : > { %v2031_v55 = vpop.f32.mrf.mxu2 }
 0x2e6   : > { %v2253_v38 = vpop.f32.mrf.mxu3  ;;  %v2077_v10 = vadd.f32 %v2031_v55, %v4498_v49  ;;  %3244 = vst.msk [vmem:[%s3834_s12 + $0x58] sm:$0xf] %vm2964_vm3, %v3212_v30  ;;  %v2799_v39 = vsel %vm2755_vm4, %v2744_v7, 0.0  ;;  %v2851_v48 = vmul.f32 %v2744_v7, %v2520_v1  ;;  %v2475_v19 = vpop.f32.mrf.mxu0 }
 0x2e7   : > { %2987 = vst.msk [vmem:[%s3829_s29 + $0x58] sm:$0xf] %vm2964_vm3, %v2954_v26  ;;  %v2800_v44 = vadd.f32 %v2799_v39, %v2798_v22 }
 0x2e8   : > { %v2299_v9 = vadd.f32 %v2253_v38, %v2077_v10  ;;  %v2904_v25 = vsel %vm2755_vm4, %v2851_v48, 0.0 }
 0x2e9   : > { %v3167_v58 = vpop.f32.mrf.mxu1  ;;  %v2905_v49 = vadd.f32 %v2904_v25, %v2903_v29  ;;  %v2690_v29 = vpop.permute.xlu1 %2689 }
 0x2ea   : > { %v3168_v45 = vadd.f32 %v4857_v0, %v3167_v58  ;;  %v2521_v18 = vadd.f32 %v2475_v19, %v2299_v9  ;;  %v2695_v58 = vpop.permute.xlu2 %2694 }
 0x2ec   : > { %v3213_v52 = vpack.c.bf16 %v3168_v45, %v3168_v45  ;;  %v2745_v54 = vmul.f32 %v2680_v20, %v2521_v18  ;;  %v2955_v6 = vpack.c.bf16 %v2521_v18, %v2521_v18 }
 0x2ed   : > { %v2034_v13 = vpop.f32.mrf.mxu2 }
 0x2ee   : > { %v2256_v33 = vpop.f32.mrf.mxu3  ;;  %v2078_v63 = vadd.f32 %v2034_v13, %v4512_v32  ;;  %3245 = vst.msk [vmem:[%s3834_s12 + $0x5c] sm:$0xf] %vm2964_vm3, %v3213_v52  ;;  %v2801_v53 = vsel %vm2755_vm4, %v2745_v54, 0.0  ;;  %v2852_v56 = vmul.f32 %v2745_v54, %v2521_v18  ;;  %v2478_v60 = vpop.f32.mrf.mxu0 }
 0x2ef   : > { %2988 = vst.msk [vmem:[%s3829_s29 + $0x5c] sm:$0xf] %vm2964_vm3, %v2955_v6  ;;  %v2802_v14 = vadd.f32 %v2801_v53, %v2800_v44 }
 0x2f0   : > { %v2300_v47 = vadd.f32 %v2256_v33, %v2078_v63  ;;  %v2906_v35 = vsel %vm2755_vm4, %v2852_v56, 0.0 }
 0x2f1   : > { %v3170_v24 = vpop.f32.mrf.mxu1  ;;  %v2907_v32 = vadd.f32 %v2906_v35, %v2905_v49 }
 0x2f2   : > { %v3171_v11 = vadd.f32 %v4857_v0, %v3170_v24  ;;  %v2522_v37 = vadd.f32 %v2478_v60, %v2300_v47 }
 0x2f4   : > { %v3214_v23 = vpack.c.bf16 %v3171_v11, %v3171_v11  ;;  %v2746_v42 = vmul.f32 %v2685_v41, %v2522_v37  ;;  %v2956_v12 = vpack.c.bf16 %v2522_v37, %v2522_v37 }
 0x2f5   : > { %v2036_v2 = vpop.f32.mrf.mxu2 }
 0x2f6   : > { %v2258_v31 = vpop.f32.mrf.mxu3  ;;  %v2079_v61 = vadd.f32 %v2036_v2, %v4519_v5  ;;  %3246 = vst.msk [vmem:[%s3834_s12 + $0x60] sm:$0xf] %vm2964_vm3, %v3214_v23  ;;  %v2803_v40 = vsel %vm2755_vm4, %v2746_v42, 0.0  ;;  %v2853_v16 = vmul.f32 %v2746_v42, %v2522_v37  ;;  %v2480_v8 = vpop.f32.mrf.mxu0 }
 0x2f7   : > { %2989 = vst.msk [vmem:[%s3829_s29 + $0x60] sm:$0xf] %vm2964_vm3, %v2956_v12  ;;  %v2804_v28 = vadd.f32 %v2803_v40, %v2802_v14 }
 0x2f8   : > { %v2301_v27 = vadd.f32 %v2258_v31, %v2079_v61  ;;  %v2908_v46 = vsel %vm2755_vm4, %v2853_v16, 0.0  ;;  %v2700_v31 = vpop.permute.xlu0 %2699 }
 0x2f9   : > { %v3172_v57 = vpop.f32.mrf.mxu1  ;;  %v2909_v5 = vadd.f32 %v2908_v46, %v2907_v32  ;;  %v2705_v46 = vpop.permute.xlu1 %2704 }
 0x2fa   : > { %v3173_v4 = vadd.f32 %v4857_v0, %v3172_v57  ;;  %v2523_v38 = vadd.f32 %v2480_v8, %v2301_v27 }
 0x2fc   : > { %v3215_v50 = vpack.c.bf16 %v3173_v4, %v3173_v4  ;;  %v2747_v55 = vmul.f32 %v2690_v29, %v2523_v38  ;;  %v2957_v3 = vpack.c.bf16 %v2523_v38, %v2523_v38 }
 0x2fd   : > { %v2039_v22 = vpop.f32.mrf.mxu2 }
 0x2fe   : > { %v2261_v15 = vpop.f32.mrf.mxu3  ;;  %v2080_v62 = vadd.f32 %v2039_v22, %v4533_v36  ;;  %3247 = vst.msk [vmem:[%s3834_s12 + $0x64] sm:$0xf] %vm2964_vm3, %v3215_v50  ;;  %v2805_v1 = vsel %vm2755_vm4, %v2747_v55, 0.0  ;;  %v2854_v10 = vmul.f32 %v2747_v55, %v2523_v38  ;;  %v2483_v48 = vpop.f32.mrf.mxu0 }
 0x2ff   : > { %2990 = vst.msk [vmem:[%s3829_s29 + $0x64] sm:$0xf] %vm2964_vm3, %v2957_v3  ;;  %v2806_v30 = vadd.f32 %v2805_v1, %v2804_v28 }
 0x300   : > { %v2302_v59 = vadd.f32 %v2261_v15, %v2080_v62  ;;  %v2910_v7 = vsel %vm2755_vm4, %v2854_v10, 0.0 }
 0x301   : > { %v3175_v39 = vpop.f32.mrf.mxu1  ;;  %v2911_v36 = vadd.f32 %v2910_v7, %v2909_v5 }
 0x302   : > { %v3176_v44 = vadd.f32 %v4857_v0, %v3175_v39  ;;  %v2524_v25 = vadd.f32 %v2483_v48, %v2302_v59  ;;  %v2710_v59 = vpop.permute.xlu2 %2709 }
 0x304   : > { %v3216_v49 = vpack.c.bf16 %v3176_v44, %v3176_v44  ;;  %v2748_v19 = vmul.f32 %v2695_v58, %v2524_v25  ;;  %v2958_v13 = vpack.c.bf16 %v2524_v25, %v2524_v25 }
 0x305   : > { %v2041_v9 = vpop.f32.mrf.mxu2 }
 0x306   : > { %v2263_v26 = vpop.f32.mrf.mxu3  ;;  %v2081_v33 = vadd.f32 %v2041_v9, %v4540_v21  ;;  %3248 = vst.msk [vmem:[%s3834_s12 + $0x68] sm:$0xf] %vm2964_vm3, %v3216_v49  ;;  %v2807_v45 = vsel %vm2755_vm4, %v2748_v19, 0.0  ;;  %v2855_v18 = vmul.f32 %v2748_v19, %v2524_v25  ;;  %v2485_v53 = vpop.f32.mrf.mxu0 }
 0x307   : > { %2991 = vst.msk [vmem:[%s3829_s29 + $0x68] sm:$0xf] %vm2964_vm3, %v2958_v13  ;;  %v2808_v20 = vadd.f32 %v2807_v45, %v2806_v30 }
 0x308   : > { %v2303_v63 = vadd.f32 %v2263_v26, %v2081_v33  ;;  %v2912_v52 = vsel %vm2755_vm4, %v2855_v18, 0.0  ;;  %v2715_v18 = vpop.permute.xlu0 %2714 }
 0x309   : > { %v3177_v6 = vpop.f32.mrf.mxu1  ;;  %v2913_v21 = vadd.f32 %v2912_v52, %v2911_v36 }
 0x30a   : > { %v3178_v47 = vadd.f32 %v4857_v0, %v3177_v6  ;;  %v2525_v14 = vadd.f32 %v2485_v53, %v2303_v63 }
 0x30c   : > { %v3217_v24 = vpack.c.bf16 %v3178_v47, %v3178_v47  ;;  %v2749_v32 = vmul.f32 %v2700_v31, %v2525_v14  ;;  %v2959_v60 = vpack.c.bf16 %v2525_v14, %v2525_v14 }
 0x30d   : > { %v2044_v56 = vpop.f32.mrf.mxu2 }
 0x30e   : > { %v2266_v54 = vpop.f32.mrf.mxu3  ;;  %v2082_v35 = vadd.f32 %v2044_v56, %v4554_v43  ;;  %3249 = vst.msk [vmem:[%s3834_s12 + $0x6c] sm:$0xf] %vm2964_vm3, %v3217_v24  ;;  %v2809_v2 = vsel %vm2755_vm4, %v2749_v32, 0.0  ;;  %v2856_v11 = vmul.f32 %v2749_v32, %v2525_v14  ;;  %v2488_v12 = vpop.f32.mrf.mxu0 }
 0x30f   : > { %2992 = vst.msk [vmem:[%s3829_s29 + $0x6c] sm:$0xf] %vm2964_vm3, %v2959_v60  ;;  %v2810_v61 = vadd.f32 %v2809_v2, %v2808_v20  ;;  %v2720_v32 = vpop.permute.xlu1 %2719 }
 0x310   : > { %v2304_v37 = vadd.f32 %v2266_v54, %v2082_v35  ;;  %v2914_v41 = vsel %vm2755_vm4, %v2856_v11, 0.0 }
 0x311   : > { %v3180_v42 = vpop.f32.mrf.mxu1  ;;  %v2915_v43 = vadd.f32 %v2914_v41, %v2913_v21 }
 0x312   : > { %v3181_v16 = vadd.f32 %v4857_v0, %v3180_v42  ;;  %v2526_v27 = vadd.f32 %v2488_v12, %v2304_v37 }
 0x314   : > { %v3218_v15 = vpack.c.bf16 %v3181_v16, %v3181_v16  ;;  %v2750_v57 = vmul.f32 %v2705_v46, %v2526_v27  ;;  %v2960_v5 = vpack.c.bf16 %v2526_v27, %v2526_v27 }
 0x315   : > { %v2046_v40 = vpop.f32.mrf.mxu2 }
 0x316   : > { %v2268_v23 = vpop.f32.mrf.mxu3  ;;  %v2083_v28 = vadd.f32 %v2046_v40, %v4560_v17  ;;  %3250 = vst.msk [vmem:[%s3834_s12 + $0x70] sm:$0xf] %vm2964_vm3, %v3218_v15  ;;  %v2811_v8 = vsel %vm2755_vm4, %v2750_v57, 0.0  ;;  %v2857_v22 = vmul.f32 %v2750_v57, %v2526_v27  ;;  %v2490_v17 = vpop.f32.mrf.mxu0  ;;  %v2754_v57 = vld [vmem:[%s4977_s8] sm:$0x1] }
 0x317   : > { %2993 = vst.msk [vmem:[%s3829_s29 + $0x70] sm:$0xf] %vm2964_vm3, %v2960_v5  ;;  %v2812_v38 = vadd.f32 %v2811_v8, %v2810_v61 }
 0x318   : > { %v2305_v4 = vadd.f32 %v2268_v23, %v2083_v28  ;;  %v2916_v62 = vsel %vm2755_vm4, %v2857_v22, 0.0  ;;  %v2828_v22 = vld [vmem:[%s4978_s9] sm:$0x1] }
 0x319   : > { %v3182_v29 = vpop.f32.mrf.mxu1  ;;  %v2917_v50 = vadd.f32 %v2916_v62, %v2915_v43 }
 0x31a   : > { %v3183_v3 = vadd.f32 %v4857_v0, %v3182_v29  ;;  %v2527_v1 = vadd.f32 %v2490_v17, %v2305_v4 }
 0x31c   : > { %v3219_v7 = vpack.c.bf16 %v3183_v3, %v3183_v3  ;;  %v2751_v26 = vmul.f32 %v2710_v59, %v2527_v1  ;;  %v2961_v39 = vpack.c.bf16 %v2527_v1, %v2527_v1 }
 0x31d   : > { %v2049_v55 = vpop.f32.mrf.mxu2 }
 0x31e   : > { %v2084_v10 = vadd.f32 %v2049_v55, %v4575_v34  ;;  %v2271_v30 = vpop.f32.mrf.mxu3  ;;  %3251 = vst.msk [vmem:[%s3834_s12 + $0x74] sm:$0xf] %vm2964_vm3, %v3219_v7  ;;  %v2813_v36 = vsel %vm2755_vm4, %v2751_v26, 0.0  ;;  %v2858_v48 = vmul.f32 %v2751_v26, %v2527_v1  ;;  %v2493_v58 = vpop.f32.mrf.mxu0 }
 0x31f   : > { %2994 = vst.msk [vmem:[%s3829_s29 + $0x74] sm:$0xf] %vm2964_vm3, %v2961_v39  ;;  %v2814_v44 = vadd.f32 %v2813_v36, %v2812_v38 }
 0x320   : > { %v2306_v9 = vadd.f32 %v2271_v30, %v2084_v10  ;;  %v2918_v25 = vsel %vm2755_vm4, %v2858_v48, 0.0 }
 0x321   : > { %v3185_v33 = vpop.f32.mrf.mxu1  ;;  %v2919_v34 = vadd.f32 %v2918_v25, %v2917_v50 }
 0x322   : > { %v3186_v19 = vadd.f32 %v4857_v0, %v3185_v33  ;;  %v2528_v13 = vadd.f32 %v2493_v58, %v2306_v9 }
 0x324   : > { %v3220_v63 = vpack.c.bf16 %v3186_v19, %v3186_v19  ;;  %v2752_v20 = vmul.f32 %v2715_v18, %v2528_v13  ;;  %v2962_v52 = vpack.c.bf16 %v2528_v13, %v2528_v13 }
 0x325   : > { %v2051_v49 = vpop.f32.mrf.mxu2 }
 0x326   : > { %v2085_v45 = vadd.f32 %v2051_v49, %v4581_v51  ;;  %v2273_v54 = vpop.f32.mrf.mxu3  ;;  %3252 = vst.msk [vmem:[%s3834_s12 + $0x78] sm:$0xf] %vm2964_vm3, %v3220_v63  ;;  %v2815_v6 = vsel %vm2755_vm4, %v2752_v20, 0.0  ;;  %v2859_v21 = vmul.f32 %v2752_v20, %v2528_v13  ;;  %v2495_v35 = vpop.f32.mrf.mxu0 }
 0x327   : > { %2995 = vst.msk [vmem:[%s3829_s29 + $0x78] sm:$0xf] %vm2964_vm3, %v2962_v52  ;;  %v2816_v56 = vadd.f32 %v2815_v6, %v2814_v44 }
 0x328   : > { %v2307_v53 = vadd.f32 %v2273_v54, %v2085_v45  ;;  %v2920_v47 = vsel %vm2755_vm4, %v2859_v21, 0.0 }
 0x329   : > { %v3187_v14 = vpop.f32.mrf.mxu1  ;;  %v2921_v51 = vadd.f32 %v2920_v47, %v2919_v34 }
 0x32a   : > { %v3188_v31 = vadd.f32 %v4857_v0, %v3187_v14  ;;  %v2529_v24 = vadd.f32 %v2495_v35, %v2307_v53 }
 0x32c   : > { %v3221_v60 = vpack.c.bf16 %v3188_v31, %v3188_v31  ;;  %v2753_v2 = vmul.f32 %v2720_v32, %v2529_v24  ;;  %v2963_v11 = vpack.c.bf16 %v2529_v24, %v2529_v24 }
 0x32e   : > { %3253 = vst.msk [vmem:[%s3834_s12 + $0x7c] sm:$0xf] %vm2964_vm3, %v3221_v60  ;;  %v2817_v37 = vsel %vm2755_vm4, %v2753_v2, 0.0  ;;  %v2860_v61 = vmul.f32 %v2753_v2, %v2529_v24 }
 0x32f   : > { %2996 = vst.msk [vmem:[%s3829_s29 + $0x7c] sm:$0xf] %vm2964_vm3, %v2963_v11  ;;  %v2818_v41 = vadd.f32 %v2817_v37, %v2816_v56 }
 0x330   : > { %v2922_v23 = vsel %vm2755_vm4, %v2860_v61, 0.0 }
 0x331   : > { %v2819_v42 = vrot.slane %v2818_v41, 4  ;;  %v2923_v43 = vadd.f32 %v2922_v23, %v2921_v51 }
 0x333   : > { %v2820_v12 = vadd.f32 %v2819_v42, %v2818_v41  ;;  %v2924_v40 = vrot.slane %v2923_v43, 4 }
 0x335   : > { %v2821_v0 = vrot.slane %v2820_v12, 2  ;;  %v2925_v16 = vadd.f32 %v2924_v40, %v2923_v43 }
 0x337   : > { %v2822_v27 = vadd.f32 %v2821_v0, %v2820_v12  ;;  %v2926_v28 = vrot.slane %v2925_v16, 2 }
 0x339   : > { %v2823_v46 = vrot.slane %v2822_v27, 1  ;;  %v2927_v15 = vadd.f32 %v2926_v28, %v2925_v16 }
 0x33b   : > { %v2824_v5 = vadd.f32 %v2823_v46, %v2822_v27  ;;  %v2928_v8 = vrot.slane %v2927_v15, 1 }
 0x33d   : > { %v2825_v4 = vadd.f32 %v2824_v5, %v2754_v57  ;;  %v2929_v38 = vadd.f32 %v2928_v8, %v2927_v15 }
 0x33f   : > { %2827 = vst.msk [vmem:[%s4977_s8] sm:$0x1] %vm2826_vm5, %v2825_v4  ;;  %v2930_v62 = vadd.f32 %v2929_v38, %v2828_v22 }
 0x341   : > { %2931 = vst.msk [vmem:[%s4978_s9] sm:$0x1] %vm2826_vm5, %v2930_v62 }
 0x342 PF: > { %s20_s30 = sadd.s32 1, %s3749_s30  }
 0x343   : > { %p17_p7 = scmp.ge.s32.totalorder %s20_s30, 8  }
 0x345   :  { %19 = sbr.rel (!%p17_p7) target bundleno = 1 (0x1), region = 120 }

// kernel: resblock_forward.4
= control target key start
LH: loop header
LB: loop body
LE: loop exit
PB: predicated region body
PF: predicated region fallthrough
CT: control target
= control target key end

     0   :  { %s4833_s17 = smov 0   ;;  %s5967_s0 = inlined_call_operand.vmem [shape: bf16[1536,8], index: 0, kind: input, shape index: {}, may-alias: {0,1,2}]   ;;  %s5968_s1 = inlined_call_operand.vmem [shape: bf16[1536,8], index: 1, kind: input, shape index: {}, may-alias: {0,1,2}]   ;;  %s5969_s2 = inlined_call_operand.vmem [shape: bf16[1536,8], index: 2, kind: input, shape index: {}, may-alias: {0,1,2}]   ;;  %s5970_s3 = inlined_call_operand.vmem [shape: f32[1792,1], index: 3, kind: input, shape index: {}, may-alias: {3,4,5}]   ;;  %s5971_s4 = inlined_call_operand.vmem [shape: f32[1792,1], index: 4, kind: input, shape index: {}, may-alias: {3,4,5}]   ;;  %s5972_s5 = inlined_call_operand.vmem [shape: f32[1792,1], index: 5, kind: input, shape index: {}, may-alias: {3,4,5}]   ;;  %s5973_s6 = inlined_call_operand.vmem [shape: bf16[9,8,8], index: 6, kind: input, shape index: {}]   ;;  %s5974_s7 = inlined_call_operand.vmem [shape: f32[1,8], index: 7, kind: input, shape index: {}]   ;;  %s5975_s8 = inlined_call_operand.vmem [shape: f32[1,8], index: 8, kind: input, shape index: {}]   ;;  %s5976_s9 = inlined_call_operand.vmem [shape: bf16[1024,8], index: 9, kind: output, shape index: {0}]   ;;  %s5977_s10 = inlined_call_operand.vmem [shape: f32[1,8], index: 10, kind: output, shape index: {1}]   ;;  %s5978_s11 = inlined_call_operand.vmem [shape: f32[1,8], index: 11, kind: output, shape index: {2}]  }
   0x1   :  { %5985 = sst [smem:[#allocation18_spill]] %s5973_s6 }
   0x2 LB: > { %s5979_s18 = sadd.s32 4294967295, %s4769_s17   ;;  %p4320_p0 = scmp.ge.s32.totalorder %s4769_s17, 1  ;;  %s4769_s17 = sphi %s4833_s17, %s22_s17  }
   0x3   : > { %p404_p1 = scmp.lt.s32.totalorder %s4769_s17, 5 }
   0x5   : > { %p405_p2 = pnand %p4320_p0, %p404_p1 }
   0x7   : > { %408 = sbr.rel (%p405_p2) target bundleno = 922 (0x39a), region = 56 }
   0xc   : > { %s4321_s19 = sshll.u32 %s5979_s18, 5 }
   0xd   : > { %p474_p3 = scmp.lt.s32.totalorder %s4321_s19, 191  ;;  %s4491_s20 = sadd.s32 32, %s4321_s19 }
   0xe   : > { %p481_p4 = scmp.lt.s32.totalorder %s4491_s20, 191  ;;  %s4493_s21 = sadd.s32 64, %s4321_s19 }
   0xf   : > { %s475_s22 = scalar_select %p474_p3, %s4321_s19, 191 }
  0x10   : > { %s482_s23 = scalar_select %p481_p4, %s4491_s20, 191 }
  0x11   : > { %s4322_s24 = sshll.u32 %s475_s22, 2  ;;  %p489_p5 = scmp.lt.s32.totalorder %s4493_s21, 191 }
  0x12   : > { %s4846_s27 = scalar_lea.vmem %s5967_s0, %s4322_s24  ;;  %s4324_s28 = sshll.u32 %s482_s23, 2 }
  0x13   : > { %s4851_s12 = scalar_lea.vmem %s5968_s1, %s4324_s28  ;;  %p496_p6 = scmp.lt.s32.totalorder %s4321_s19, 223 }
  0x14   : > { %s490_s13 = scalar_select %p489_p5, %s4493_s21, 191 }
  0x15   : > { %s497_s14 = scalar_select %p496_p6, %s4321_s19, 223 }
  0x16   : > { %s4326_s15 = sshll.u32 %s490_s13, 2  ;;  %p503_p7 = scmp.lt.s32.totalorder %s4491_s20, 223 }
  0x17   : > { %s4856_s22 = scalar_lea.vmem %s5969_s2, %s4326_s15  ;;  %s4328_s6 = sshll.u32 %s497_s14, 3 }
  0x18   : > { %s4861_s23 = scalar_lea.vmem %s5970_s3, %s4328_s6  ;;  %p511_p8 = scmp.lt.s32.totalorder %s4493_s21, 223 }
  0x19   : > { %s6022_s20 = smov (!%p503_p7, %s4491_s20), 223  ;;  %p518_p9 = scmp.lt.s32.totalorder %s4321_s19, 127 }
  0x1a   : > { %s6024_s21 = smov (!%p511_p8, %s4493_s21), 223  ;;  %s4330_s26 = sshll.u32 %s6022_s20, 3 }
  0x1b   : > { %s4866_s30 = scalar_lea.vmem %s5971_s4, %s4330_s26  ;;  %s4332_s13 = sshll.u32 %s6024_s21, 3 }
  0x1c   : > { %s4871_s14 = scalar_lea.vmem %s5972_s5, %s4332_s13  ;;  %s6026_s19 = smov (!%p518_p9, %s4321_s19), 127 }
  0x1d   : > { %s4334_s16 = sshll.u32 %s6026_s19, 2  ;;  %s5986_s20 = sadd.s32 4294967295, %s4769_s17  }
  0x1e   : > { %s4876_s24 = scalar_lea.vmem %s5976_s9, %s4334_s16  ;;  %p4335_p10 = scmp.ne.s32.totalorder %s5986_s20, 0 }
  0x20   : > { %527 = sbr.rel (%p4335_p10) target bundleno = 40 (0x28), region = 60 }
  0x25   : > { %vm528_vm0 = vcmask 57344   ;;  %v4771_v0 = vmov 0.0  }
  0x26   : > { %529 = vst.msk [vmem:[%s5977_s10] sm:$0x1] %vm528_vm0, %v4771_v0 }
  0x27   : > { %530 = vst.msk [vmem:[%s5978_s11] sm:$0x1] %vm528_vm0, %v4771_v0 }
  0x28 PF: > { %v1121_v1 = vld [vmem:[%s4866_s30 + $0x28] sm:$0xff]  ;;  %v4772_v4 = vmov 0   ;;  %v1122_v5 = vld [vmem:[%s4866_s30 + $0x30] sm:$0xff]  ;;  %v1131_v8 = vld [vmem:[%s4866_s30 + $0x78] sm:$0xff]  ;;  %s5987_s25 = sld [smem:[#allocation18_spill]]  ;;  %vm1935_vm1 = vcmask 1043456  }
  0x29   : > { %v1137_v2 = vld [vmem:[%s4866_s30 + $0xa8] sm:$0xff]  ;;  %4750 = vset.pattern.permute.xlu2 %v4772_v4  ;;  %4749 = vset.pattern.permute.xlu1 %v4772_v4  ;;  %v1138_v6 = vld [vmem:[%s4866_s30 + $0xb0] sm:$0xff]  ;;  %v1140_v11 = vld [vmem:[%s4866_s30 + $0xc0] sm:$0xff]  ;;  %vm923_vm2 = vcmask 64512   ;;  %vm4155_vm3 = vcmask 60416   ;;  %vm4017_vm4 = vcmask 57344  }
  0x2a   : > { %v1129_v3 = vld [vmem:[%s4866_s30 + $0x68] sm:$0xff]  ;;  %4748 = vset.pattern.permute.xlu0 %v4772_v4  ;;  %1175 = vperm.xlu2 %4750, %v1121_v1   ;;  %v1130_v7 = vld [vmem:[%s4866_s30 + $0x70] sm:$0xff]  ;;  %v1139_v12 = vld [vmem:[%s4866_s30 + $0xb8] sm:$0xff] }
  0x2b   : > { %1255 = vperm.xlu1 %4749, %v1137_v2   ;;  %1215 = vperm.xlu0 %4748, %v1129_v3   ;;  %v729_v9 = vld [vmem:[%s4861_s23 + $0xf0] sm:$0xff]  ;;  %v728_v10 = vld [vmem:[%s4861_s23 + $0xe8] sm:$0xff]  ;;  %v1132_v13 = vld [vmem:[%s4866_s30 + $0x80] sm:$0xff] }
  0x2c   : > { %v730_v14 = vld [vmem:[%s4861_s23 + $0xf8] sm:$0xff]  ;;  %v1124_v15 = vld [vmem:[%s4866_s30 + $0x40] sm:$0xff]  ;;  %v1134_v17 = vld [vmem:[%s4866_s30 + $0x90] sm:$0xff] }
  0x2d   : > { %v1123_v16 = vld [vmem:[%s4866_s30 + $0x38] sm:$0xff]  ;;  %v1133_v18 = vld [vmem:[%s4866_s30 + $0x88] sm:$0xff]  ;;  %v1116_v19 = vld [vmem:[%s4866_s30] sm:$0xff] }
  0x2e   : > { %v1125_v20 = vld [vmem:[%s4866_s30 + $0x48] sm:$0xff]  ;;  %v1142_v21 = vld [vmem:[%s4866_s30 + $0xd0] sm:$0xff]  ;;  %v1143_v26 = vld [vmem:[%s4866_s30 + $0xd8] sm:$0xff] }
  0x2f   : > { %v1141_v22 = vld [vmem:[%s4866_s30 + $0xc8] sm:$0xff]  ;;  %v1118_v23 = vld [vmem:[%s4866_s30 + $0x10] sm:$0xff]  ;;  %v1136_v27 = vld [vmem:[%s4866_s30 + $0xa0] sm:$0xff] }
  0x30   : > { %v1117_v24 = vld [vmem:[%s4866_s30 + $0x8] sm:$0xff]  ;;  %v1126_v25 = vld [vmem:[%s4866_s30 + $0x50] sm:$0xff]  ;;  %v1135_v28 = vld [vmem:[%s4866_s30 + $0x98] sm:$0xff] }
  0x31   : > { %v1128_v29 = vld [vmem:[%s4866_s30 + $0x60] sm:$0xff]  ;;  %v1127_v30 = vld [vmem:[%s4866_s30 + $0x58] sm:$0xff]  ;;  %v4917_v32 = vld [vmem:[%s4851_s12 + $0x10] sm:$0xff]  }
  0x32   : > { %1180 = vperm.xlu2 %4750, %v1122_v5   ;;  %v1144_v31 = vld [vmem:[%s4866_s30 + $0xe0] sm:$0xff]  ;;  %v4573_v33 = vunpack.c.h.bf16 %v4917_v32  ;;  %v1119_v37 = vld [vmem:[%s4866_s30 + $0x18] sm:$0xff]  ;;  %v701_v43 = vld [vmem:[%s4861_s23 + $0x10] sm:$0xff] }
  0x33   : > { %1260 = vperm.xlu1 %4749, %v1138_v6   ;;  %1220 = vperm.xlu0 %4748, %v1130_v7   ;;  %v4923_v34 = vld [vmem:[%s5974_s7] ss:$0 sm:$0xff]  ;;  %v4935_v40 = vld [vmem:[%s4851_s12 + $0x18] sm:$0xff]   ;;  %v700_v44 = vld [vmem:[%s4861_s23 + $0x8] sm:$0xff] }
  0x34   : > { %v727_v35 = vld [vmem:[%s4861_s23 + $0xe0] sm:$0xff]  ;;  %v1025_v39 = vmul.f32 %v4923_v34, %v4573_v33  ;;  %v4576_v42 = vunpack.c.l.bf16 %v4935_v40  ;;  %v4948_v50 = vld [vmem:[%s4851_s12 + $0x38] sm:$0xff]   ;;  %v704_v55 = vld [vmem:[%s4861_s23 + $0x28] sm:$0xff] }
  0x35   : > { %v1120_v36 = vld [vmem:[%s4866_s30 + $0x20] sm:$0xff]  ;;  %v4593_v54 = vunpack.c.h.bf16 %v4948_v50  ;;  %v702_v57 = vld [vmem:[%s4861_s23 + $0x18] sm:$0xff]  ;;  %v4961_v61 = vld [vmem:[%s4851_s12 + $0x50] sm:$0xff]  }
  0x36   : > { %v4931_v38 = vld [vmem:[%s5975_s8] ss:$0 sm:$0xff]  ;;  %v4336_v46 = vld [vmem:[%s5987_s25 + $0x4] sm:$0xf]  ;;  %v1026_v48 = vmul.f32 %v4923_v34, %v4576_v42  ;;  %v4964_v62 = vld [vmem:[%s4851_s12 + $0x30] sm:$0xff]   ;;  %v4605_v3 = vunpack.c.h.bf16 %v4961_v61 }
  0x37   : > { %v1057_v41 = vadd.f32 %v4931_v38, %v1025_v39  ;;  %v699_v45 = vld [vmem:[%s4861_s23] sm:$0xff]  ;;  %v1937_v49 = vsel %vm1935_vm1, %v4336_v46, 0  ;;  %v1035_v59 = vmul.f32 %v4923_v34, %v4593_v54  ;;  %v4589_v4 = vunpack.c.h.bf16 %v4964_v62  ;;  %v706_v6 = vld [vmem:[%s4861_s23 + $0x38] sm:$0xff]  ;;  %v705_v7 = vld [vmem:[%s4861_s23 + $0x30] sm:$0xff] }
  0x38   : > { %4735 = vmatpush.bf16.msra.mxu1 %v1937_v49  ;;  %4736 = vmatpush.bf16.msra.mxu2 %v1937_v49  ;;  %v1058_v53 = vadd.f32 %v4931_v38, %v1026_v48  ;;  %v703_v56 = vld [vmem:[%s4861_s23 + $0x20] sm:$0xff] }
  0x39   : > { %v1089_v47 = vmax.f32 %v1057_v41, 0.0  ;;  %4737 = vmatpush.bf16.msra.mxu3 %v1937_v49  ;;  %1946 = vmatpush.bf16.msra.mxu0 %v1937_v49  ;;  %v4958_v60 = vld [vmem:[%s4851_s12 + $0x60] sm:$0xff]   ;;  %v1067_v1 = vadd.f32 %v4931_v38, %v1035_v59  ;;  %v4369_v59 = vld [vmem:[%s5987_s25 + $0x8] sm:$0xf] }
  0x3a   : > { %1225 = vperm.xlu2 %4750, %v1131_v8   ;;  %v1090_v58 = vmax.f32 %v1058_v53, 0.0  ;;  %v4612_v2 = vunpack.c.l.bf16 %v4958_v60  ;;  %v707_v5 = vld [vmem:[%s4861_s23 + $0x40] sm:$0xff]  ;;  %v712_v53 = vld [vmem:[%s4861_s23 + $0x68] sm:$0xff] }
  0x3b   : > { %883 = vperm.xlu1 %4749, %v729_v9   ;;  %878 = vperm.xlu0 %4748, %v728_v10   ;;  %v1099_v8 = vmax.f32 %v1067_v1, 0.0  ;;  %v1041_v10 = vmul.f32 %v4923_v34, %v4605_v3  ;;  %v711_v54 = vld [vmem:[%s4861_s23 + $0x60] sm:$0xff] }
  0x3c   : > { %v1044_v9 = vmul.f32 %v4923_v34, %v4612_v2  ;;  %v2267_v2 = vsel %vm1935_vm1, %v4369_v59, 0  ;;  %v5022_v3 = vld [vmem:[%s4851_s12 + $0x40] sm:$0xff]  }
  0x3d   : > { %2276 = vmatpush.bf16.msrb.mxu2 %v2267_v2 }
  0x42   : > { %1270 = vperm.xlu2 %4750, %v1140_v11   ;;  %v1033_v11 = vmul.f32 %v4923_v34, %v4589_v4  ;;  %v4386_v4 = vld [vmem:[%s5987_s25 + $0xc] sm:$0xf] }
  0x43   : > { %1265 = vperm.xlu1 %4749, %v1139_v12   ;;  %1230 = vperm.xlu0 %4748, %v1132_v13   ;;  %v4978_v12 = vld [vmem:[%s4851_s12 + $0x58] sm:$0xff]  }
  0x44   : > { %v4704_v13 = vld [vmem:[%s4846_s27 + $0x78] sm:$0xff]  }
  0x4a   : > { %888 = vperm.xlu2 %4750, %v730_v14  }
  0x4b   : > { %1190 = vperm.xlu1 %4749, %v1124_v15   ;;  %1185 = vperm.xlu0 %4748, %v1123_v16  }
  0x52   : > { %1240 = vperm.xlu2 %4750, %v1134_v17   ;;  %v1076_v17 = vadd.f32 %v4931_v38, %v1044_v9  ;;  %v1836_v9 = vld [vmem:[%s5987_s25] sm:$0xf] }
  0x53   : > { %1235 = vperm.xlu1 %4749, %v1133_v18   ;;  %1150 = vperm.xlu0 %4748, %v1116_v19   ;;  %v4608_v18 = vunpack.c.l.bf16 %v4978_v12  ;;  %v4561_v19 = vunpack.c.h.bf16 %v4704_v13 }
  0x5a   : > { %1195 = vperm.xlu2 %4750, %v1125_v20   ;;  %v1073_v20 = vadd.f32 %v4931_v38, %v1041_v10 }
  0x5b   : > { %1280 = vperm.xlu1 %4749, %v1142_v21   ;;  %1275 = vperm.xlu0 %4748, %v1141_v22   ;;  %v1065_v21 = vadd.f32 %v4931_v38, %v1033_v11 }
  0x5c   : > { %v1105_v33 = vmax.f32 %v1073_v20, 0.0  ;;  %v4596_v20 = vunpack.c.l.bf16 %v5022_v3 }
  0x62   : > { %1160 = vperm.xlu2 %4750, %v1118_v23   ;;  %v4592_v23 = vunpack.c.l.bf16 %v4948_v50 }
  0x63   : > { %1155 = vperm.xlu1 %4749, %v1117_v24   ;;  %1200 = vperm.xlu0 %4748, %v1126_v25   ;;  %v710_v24 = vld [vmem:[%s4861_s23 + $0x58] sm:$0xff] }
  0x6a   : > { %1285 = vperm.xlu2 %4750, %v1143_v26   ;;  %v709_v26 = vld [vmem:[%s4861_s23 + $0x50] sm:$0xff] }
  0x6b   : > { %1250 = vperm.xlu1 %4749, %v1136_v27   ;;  %1245 = vperm.xlu0 %4748, %v1135_v28   ;;  %v708_v27 = vld [vmem:[%s4861_s23 + $0x48] sm:$0xff]  ;;  %v1108_v28 = vmax.f32 %v1076_v17, 0.0 }
  0x72   : > { %1210 = vperm.xlu2 %4750, %v1128_v29   ;;  %v1042_v29 = vmul.f32 %v4923_v34, %v4608_v18 }
  0x73   : > { %1205 = vperm.xlu1 %4749, %v1127_v30   ;;  %1290 = vperm.xlu0 %4748, %v1144_v31   ;;  %v631_v30 = vmul.f32 %v4923_v34, %v4561_v19  ;;  %v4994_v31 = vld [vmem:[%s4851_s12 + $0x48] sm:$0xff]  }
  0x74   : > { %v4600_v41 = vunpack.c.l.bf16 %v4994_v31 }
  0x75   : > { %v666_v46 = vadd.f32 %v4931_v38, %v631_v30  ;;  %v4403_v30 = vld [vmem:[%s5987_s25 + $0x10] sm:$0xf] }
  0x7a   : > { %873 = vperm.xlu2 %4750, %v727_v35   ;;  %v1097_v35 = vmax.f32 %v1065_v21, 0.0  ;;  %v1146_v21 = vld [vmem:[%s4866_s30 + $0xf0] sm:$0xff] }
  0x7b   : > { %1170 = vperm.xlu1 %4749, %v1120_v36   ;;  %1165 = vperm.xlu0 %4748, %v1119_v37   ;;  %v1034_v36 = vmul.f32 %v4923_v34, %v4592_v23  ;;  %v4998_v37 = vld [vmem:[%s4846_s27 + $0x70] sm:$0xff]  }
  0x7c   : > { %v713_v23 = vld [vmem:[%s4861_s23 + $0x70] sm:$0xff] }
  0x7d   : > { %v1066_v50 = vadd.f32 %v4931_v38, %v1034_v36  ;;  %v2711_v36 = vsel %vm1935_vm1, %v4403_v30, 0 }
  0x7e   : > { %2720 = vmatpush.bf16.msrb.mxu0 %v2711_v36 }
  0x82   : > { %743 = vperm.xlu2 %4750, %v701_v43  }
  0x83   : > { %738 = vperm.xlu1 %4749, %v700_v44   ;;  %733 = vperm.xlu0 %4748, %v699_v45   ;;  %v1074_v45 = vadd.f32 %v4931_v38, %v1042_v29  ;;  %v5048_v29 = vld [vmem:[%s4851_s12 + $0x8] sm:$0xff]  }
  0x84   : > { %v1176_v51 = vpop.permute.xlu2 %1175 }
  0x85   : > { %v1313_v52 = vmul.f32 %v1176_v51, %v1089_v47  ;;  %v4560_v47 = vunpack.c.l.bf16 %v4704_v13  ;;  %v4557_v51 = vunpack.c.h.bf16 %v4998_v37 }
  0x87   : > { %1345 = vst.msk [vmem:[#allocation2 + $0x128] sm:$0xff] %vm923_vm2, %v1313_v52  ;;  %v1145_v52 = vld [vmem:[%s4866_s30 + $0xe8] sm:$0xff]  ;;  %v629_v1 = vmul.f32 %v4923_v34, %v4557_v51 }
  0x89   : > { %v664_v19 = vadd.f32 %v4931_v38, %v629_v1 }
  0x8a   : > { %758 = vperm.xlu2 %4750, %v704_v55   ;;  %v1038_v55 = vmul.f32 %v4923_v34, %v4600_v41 }
  0x8b   : > { %753 = vperm.xlu1 %4749, %v703_v56   ;;  %748 = vperm.xlu0 %4748, %v702_v57   ;;  %v698_v56 = vmax.f32 %v666_v46, 0.0  ;;  %v630_v57 = vmul.f32 %v4923_v34, %v4560_v47 }
  0x8c   : > { %v1181_v63 = vpop.permute.xlu2 %1180 }
  0x8d   : > { %v1314_v0 = vmul.f32 %v1181_v63, %v1090_v58  ;;  %v5014_v58 = vld [vmem:[%s4851_s12 + $0x20] sm:$0xff]   ;;  %v1106_v63 = vmax.f32 %v1074_v45, 0.0 }
  0x8e   : > { %v1845_v15 = vld [vmem:[#allocation2 + $0x128] sm:$0xff]  ;;  %v4580_v45 = vunpack.c.l.bf16 %v5014_v58 }
  0x8f   : > { %1346 = vst.msk [vmem:[#allocation2 + $0x130] sm:$0xff] %vm923_vm2, %v1314_v0  ;;  %v1098_v0 = vmax.f32 %v1066_v50, 0.0 }
  0x92   : > { %773 = vperm.xlu2 %4750, %v707_v5  }
  0x93   : > { %768 = vperm.xlu1 %4749, %v706_v6   ;;  %763 = vperm.xlu0 %4748, %v705_v7   ;;  %v1070_v6 = vadd.f32 %v4931_v38, %v1038_v55  ;;  %v4581_v7 = vunpack.c.h.bf16 %v5014_v58  ;;  %v1147_v58 = vld [vmem:[%s4866_s30 + $0xf8] sm:$0xff] }
  0x94   : > { %v1226_v14 = vpop.permute.xlu2 %1225 }
  0x95   : > { %v1323_v16 = vmul.f32 %v1226_v14, %v1099_v8  ;;  %v2489_v8 = vsel %vm1935_vm1, %v4386_v4, 0  ;;  %v665_v14 = vadd.f32 %v4931_v38, %v630_v57 }
  0x96   : > { %v1846_v22 = vld [vmem:[#allocation2 + $0x130] sm:$0xff]  ;;  %2498 = vmatpush.bf16.msrb.mxu3 %v2489_v8 }
  0x97   : > { %1355 = vst.msk [vmem:[#allocation2 + $0x178] sm:$0xff] %vm923_vm2, %v1323_v16  ;;  %v1873_v25 = vpack.c.bf16 %v1846_v22, %v1845_v15  ;;  %v4609_v15 = vunpack.c.h.bf16 %v4978_v12  ;;  %v2077_v16 = vsel %vm1935_vm1, %v1836_v9, 0  ;;  %v714_v22 = vld [vmem:[%s4861_s23 + $0x78] sm:$0xff]  ;;  %v1029_v12 = vmul.f32 %v4923_v34, %v4581_v7 }
  0x98   : > { %2086 = vmatpush.bf16.msrb.mxu1 %v2077_v16 }
  0x99   : > { %4341 = vmatmul.msk.bf16.vlgmr.msra.gmra.mxu1 %vm923_vm2, %v1873_v25  ;;  %v1043_v25 = vmul.f32 %v4923_v34, %v4609_v15 }
  0x9a   : > { %788 = vperm.xlu2 %4750, %v710_v24   ;;  %v1102_v24 = vmax.f32 %v1070_v6, 0.0  ;;  %v5077_v6 = vld [vmem:[%s4851_s12] sm:$0xff]  }
  0x9b   : > { %783 = vperm.xlu1 %4749, %v709_v26   ;;  %778 = vperm.xlu0 %4748, %v708_v27   ;;  %v697_v26 = vmax.f32 %v665_v14, 0.0  ;;  %v696_v27 = vmax.f32 %v664_v19, 0.0 }
  0x9c   : > { %v1271_v39 = vpop.permute.xlu2 %1270 }
  0x9d   : > { %v1332_v42 = vmul.f32 %v1271_v39, %v1108_v28  ;;  %v1256_v43 = vpop.permute.xlu1 %1255  ;;  %v1216_v44 = vpop.permute.xlu0 %1215  ;;  %v1036_v28 = vmul.f32 %v4923_v34, %v4596_v20 }
  0x9e   : > { %v1329_v48 = vmul.f32 %v1256_v43, %v1105_v33  ;;  %v1321_v49 = vmul.f32 %v1216_v44, %v1097_v35  ;;  %v1061_v35 = vadd.f32 %v4931_v38, %v1029_v12  ;;  %v1075_v43 = vadd.f32 %v4931_v38, %v1043_v25 }
  0x9f   : > { %1364 = vst.msk [vmem:[#allocation2 + $0x1c0] sm:$0xff] %vm923_vm2, %v1332_v42  ;;  %v4568_v44 = vunpack.c.l.bf16 %v5048_v29 }
  0xa0   : > { %1361 = vst.msk [vmem:[#allocation2 + $0x1a8] sm:$0xff] %vm923_vm2, %v1329_v48  ;;  %v1068_v48 = vadd.f32 %v4931_v38, %v1036_v28  ;;  %v1093_v59 = vmax.f32 %v1061_v35, 0.0  ;;  %v1107_v1 = vmax.f32 %v1075_v43, 0.0 }
  0xa1   : > { %1353 = vst.msk [vmem:[#allocation2 + $0x168] sm:$0xff] %vm923_vm2, %v1321_v49  ;;  %v4577_v49 = vunpack.c.h.bf16 %v4935_v40  ;;  %v1022_v40 = vmul.f32 %v4923_v34, %v4568_v44 }
  0xa2   : > { %1295 = vperm.xlu2 %4750, %v1145_v52   ;;  %v716_v52 = vld [vmem:[%s4861_s23 + $0x88] sm:$0xff]  ;;  %v1100_v2 = vmax.f32 %v1068_v48, 0.0 }
  0xa3   : > { %798 = vperm.xlu1 %4749, %v712_v53   ;;  %793 = vperm.xlu0 %4748, %v711_v54   ;;  %v1027_v4 = vmul.f32 %v4923_v34, %v4577_v49  ;;  %v1054_v15 = vadd.f32 %v4931_v38, %v1022_v40 }
  0xa4   : > { %v889_v5 = vpop.permute.xlu2 %888 }
  0xa5   : > { %v1261_v10 = vpop.permute.xlu1 %1260  ;;  %v1221_v11 = vpop.permute.xlu0 %1220  ;;  %v922_v13 = vmul.f32 %v889_v5, %v698_v56  ;;  %v715_v56 = vld [vmem:[%s4861_s23 + $0x80] sm:$0xff]  ;;  %v1059_v20 = vadd.f32 %v4931_v38, %v1027_v4  ;;  %v5119_v4 = vld [vmem:[%s4851_s12 + $0x28] sm:$0xff]  }
  0xa6   : > { %v1330_v17 = vmul.f32 %v1261_v10, %v1106_v63  ;;  %v1322_v18 = vmul.f32 %v1221_v11, %v1098_v0  ;;  %v1028_v63 = vmul.f32 %v4923_v34, %v4580_v45  ;;  %v5069_v0 = vld [vmem:[%s4851_s12 + $0x68] sm:$0xff]   ;;  %v4588_v45 = vunpack.c.l.bf16 %v4964_v62  ;;  %v721_v62 = vld [vmem:[%s4861_s23 + $0xb0] sm:$0xff] }
  0xa7   : > { %955 = vst.msk [vmem:[#allocation2 + $0xf8] sm:$0xff] %vm923_vm2, %v922_v13  ;;  %v1861_v50 = vld [vmem:[#allocation2 + $0x1a8] sm:$0xff]  ;;  %v4617_v9 = vunpack.c.h.bf16 %v5069_v0 }
  0xa8   : > { %1362 = vst.msk [vmem:[#allocation2 + $0x1b0] sm:$0xff] %vm923_vm2, %v1330_v17  ;;  %v1853_v53 = vld [vmem:[#allocation2 + $0x168] sm:$0xff]  ;;  %v1060_v16 = vadd.f32 %v4931_v38, %v1028_v63  ;;  %v4597_v17 = vunpack.c.h.bf16 %v5022_v3  ;;  %v717_v3 = vld [vmem:[%s4861_s23 + $0x90] sm:$0xff]  ;;  %v1032_v40 = vmul.f32 %v4923_v34, %v4588_v45  ;;  %v4604_v45 = vunpack.c.l.bf16 %v4961_v61 }
  0xa9   : > { %1354 = vst.msk [vmem:[#allocation2 + $0x170] sm:$0xff] %vm923_vm2, %v1322_v18  ;;  %v5079_v7 = vld [vmem:[#allocation2 + $0x1a8] sm:$0xff]  ;;  %v1047_v25 = vmul.f32 %v4923_v34, %v4617_v9 }
  0xaa   : > { %1300 = vperm.xlu2 %4750, %v1146_v21   ;;  %v4564_v21 = vunpack.c.l.bf16 %v5077_v6  ;;  %v1037_v28 = vmul.f32 %v4923_v34, %v4597_v17  ;;  %v1092_v30 = vmax.f32 %v1060_v16, 0.0  ;;  %v1064_v17 = vadd.f32 %v4931_v38, %v1032_v40 }
  0xab   : > { %808 = vperm.xlu1 %4749, %v714_v22   ;;  %803 = vperm.xlu0 %4748, %v713_v23   ;;  %v719_v23 = vld [vmem:[%s4861_s23 + $0xa0] sm:$0xff] }
  0xac   : > { %v1241_v33 = vpop.permute.xlu2 %1240  ;;  %v1020_v35 = vmul.f32 %v4923_v34, %v4564_v21  ;;  %v1069_v44 = vadd.f32 %v4931_v38, %v1037_v28 }
  0xad   : > { %v1326_v39 = vmul.f32 %v1241_v33, %v1102_v24  ;;  %v884_v41 = vpop.permute.xlu1 %883  ;;  %v879_v42 = vpop.permute.xlu0 %878  ;;  %v718_v24 = vld [vmem:[%s4861_s23 + $0x98] sm:$0xff]  ;;  %v1091_v33 = vmax.f32 %v1059_v20, 0.0 }
  0xae   : > { %v921_v46 = vmul.f32 %v884_v41, %v697_v26  ;;  %v920_v47 = vmul.f32 %v879_v42, %v696_v27  ;;  %v1086_v27 = vmax.f32 %v1054_v15, 0.0  ;;  %v1052_v49 = vadd.f32 %v4931_v38, %v1020_v35 }
  0xaf   : > { %1358 = vst.msk [vmem:[#allocation2 + $0x190] sm:$0xff] %vm923_vm2, %v1326_v39  ;;  %v1862_v51 = vld [vmem:[#allocation2 + $0x1b0] sm:$0xff]  ;;  %v1079_v39 = vadd.f32 %v4931_v38, %v1047_v25  ;;  %v724_v25 = vld [vmem:[%s4861_s23 + $0xc8] sm:$0xff] }
  0xb0   : > { %954 = vst.msk [vmem:[#allocation2 + $0xf0] sm:$0xff] %vm923_vm2, %v921_v46  ;;  %v1854_v54 = vld [vmem:[#allocation2 + $0x170] sm:$0xff]  ;;  %v1881_v55 = vpack.c.bf16 %v1862_v51, %v1861_v50  ;;  %v4616_v46 = vunpack.c.l.bf16 %v5069_v0  ;;  %v4613_v50 = vunpack.c.h.bf16 %v4958_v60  ;;  %v1101_v0 = vmax.f32 %v1069_v44, 0.0 }
  0xb1   : > { %953 = vst.msk [vmem:[#allocation2 + $0xe8] sm:$0xff] %vm923_vm2, %v920_v47  ;;  %v1877_v57 = vpack.c.bf16 %v1854_v54, %v1853_v53  ;;  %v5073_v5 = vld [vmem:[#allocation2 + $0x1b0] sm:$0xff]  ;;  %v722_v53 = vld [vmem:[%s4861_s23 + $0xb8] sm:$0xff] }
  0xb2   : > { %4349 = vmatmul.msk.bf16.vlgmr.msra.gmra.mxu3 %vm923_vm2, %v1881_v55  ;;  %818 = vperm.xlu2 %4750, %v716_v52   ;;  %v1864_v52 = vld [vmem:[#allocation2 + $0x1c0] sm:$0xff]  ;;  %v1855_v54 = vld [vmem:[#allocation2 + $0x178] sm:$0xff]  ;;  %v1046_v60 = vmul.f32 %v4923_v34, %v4616_v46 }
  0xb3   : > { %4345 = vmatmul.msk.bf16.vlgmr.msra.gmra.mxu2 %vm923_vm2, %v1877_v57  ;;  %813 = vperm.xlu1 %4749, %v715_v56  }
  0xb4   : > { %1305 = vperm.xlu0 %4748, %v1147_v58   ;;  %v1196_v8 = vpop.permute.xlu2 %1195  ;;  %v720_v58 = vld [vmem:[%s4861_s23 + $0xa8] sm:$0xff] }
  0xb5   : > { %v1317_v11 = vmul.f32 %v1196_v8, %v1093_v59  ;;  %v1266_v13 = vpop.permute.xlu1 %1265  ;;  %v1231_v14 = vpop.permute.xlu0 %1230  ;;  %v1111_v59 = vmax.f32 %v1079_v39, 0.0  ;;  %v5121_v8 = vld [vmem:[#allocation2 + $0x1c0] sm:$0xff] }
  0xb6   : > { %v1331_v18 = vmul.f32 %v1266_v13, %v1107_v1  ;;  %v1324_v19 = vmul.f32 %v1231_v14, %v1100_v2  ;;  %v1084_v1 = vmax.f32 %v1052_v49, 0.0  ;;  %v1045_v2 = vmul.f32 %v4923_v34, %v4613_v50  ;;  %5989 = vst [vmem:[#allocation4_spill] sm:$0xff] %v5121_v8 }
  0xb7   : > { %1349 = vst.msk [vmem:[#allocation2 + $0x148] sm:$0xff] %vm923_vm2, %v1317_v11  ;;  %v1838_v22 = vld [vmem:[#allocation2 + $0xf0] sm:$0xff]  ;;  %v4565_v11 = vunpack.c.h.bf16 %v5077_v6  ;;  %v4584_v6 = vunpack.c.l.bf16 %v5119_v4  ;;  %v4601_v49 = vunpack.c.h.bf16 %v4994_v31  ;;  %v1040_v31 = vmul.f32 %v4923_v34, %v4604_v45 }
  0xb8   : > { %1363 = vst.msk [vmem:[#allocation2 + $0x1b8] sm:$0xff] %vm923_vm2, %v1331_v18  ;;  %v1837_v12 = vld [vmem:[#allocation2 + $0xe8] sm:$0xff]  ;;  %v1078_v18 = vadd.f32 %v4931_v38, %v1046_v60  ;;  %v5160_v60 = vld [vmem:[%s4851_s12 + $0x70] sm:$0xff]  }
  0xb9   : > { %1356 = vst.msk [vmem:[#allocation2 + $0x180] sm:$0xff] %vm923_vm2, %v1324_v19  ;;  %v1869_v26 = vpack.c.bf16 %v1838_v22, %v1837_v12  ;;  %v4556_v19 = vunpack.c.l.bf16 %v4998_v37  ;;  %v1077_v22 = vadd.f32 %v4931_v38, %v1045_v2  ;;  %v725_v12 = vld [vmem:[%s4861_s23 + $0xd0] sm:$0xff]  ;;  %v723_v37 = vld [vmem:[%s4861_s23 + $0xc0] sm:$0xff]  ;;  %v1030_v35 = vmul.f32 %v4923_v34, %v4584_v6  ;;  %v1535_v6 = vld [vmem:[%s4871_s14 + $0x18] sm:$0xff] }
  0xba   : > { %833 = vperm.xlu2 %4750, %v719_v23   ;;  %v1039_v40 = vmul.f32 %v4923_v34, %v4601_v49 }
  0xbb   : > { %4337 = vmatmul.msk.bf16.vlgmr.msra.gmra.mxu0 %vm923_vm2, %v1869_v26  ;;  %828 = vperm.xlu1 %4749, %v718_v24   ;;  %v1021_v26 = vmul.f32 %v4923_v34, %v4565_v11  ;;  %v628_v28 = vmul.f32 %v4923_v34, %v4556_v19 }
  0xbc   : > { %823 = vperm.xlu0 %4748, %v717_v3   ;;  %v1161_v36 = vpop.permute.xlu2 %1160 }
  0xbd   : > { %v1310_v41 = vmul.f32 %v1161_v36, %v1086_v27  ;;  %v1191_v42 = vpop.permute.xlu1 %1190  ;;  %v1186_v43 = vpop.permute.xlu0 %1185  ;;  %v1096_v27 = vmax.f32 %v1064_v17, 0.0  ;;  %v1053_v39 = vadd.f32 %v4931_v38, %v1021_v26  ;;  %v663_v44 = vadd.f32 %v4931_v38, %v628_v28 }
  0xbe   : > { %v1316_v47 = vmul.f32 %v1191_v42, %v1092_v30  ;;  %v1315_v48 = vmul.f32 %v1186_v43, %v1091_v33  ;;  %v1110_v30 = vmax.f32 %v1078_v18, 0.0  ;;  %v1109_v33 = vmax.f32 %v1077_v22, 0.0 }
  0xbf   : > { %1342 = vst.msk [vmem:[#allocation2 + $0x110] sm:$0xff] %vm923_vm2, %v1310_v41  ;;  %v1863_v51 = vld [vmem:[#allocation2 + $0x1b8] sm:$0xff]  ;;  %v1071_v17 = vadd.f32 %v4931_v38, %v1039_v40  ;;  %v4620_v18 = vunpack.c.l.bf16 %v5160_v60  ;;  %v4572_v28 = vunpack.c.l.bf16 %v4917_v32  ;;  %v1538_v32 = vld [vmem:[%s4871_s14 + $0x30] sm:$0xff] }
  0xc0   : > { %1348 = vst.msk [vmem:[#allocation2 + $0x140] sm:$0xff] %vm923_vm2, %v1316_v47  ;;  %v1856_v55 = vld [vmem:[#allocation2 + $0x180] sm:$0xff]  ;;  %v1882_v56 = vpack.c.bf16 %v1864_v52, %v1863_v51  ;;  %v5113_v63 = vld [vmem:[#allocation2 + $0x1b8] sm:$0xff]  ;;  %v1858_v51 = vld [vmem:[#allocation2 + $0x190] sm:$0xff] }
  0xc1   : > { %1347 = vst.msk [vmem:[#allocation2 + $0x138] sm:$0xff] %vm923_vm2, %v1315_v48  ;;  %v1878_v57 = vpack.c.bf16 %v1856_v55, %v1855_v54  ;;  %v1062_v48 = vadd.f32 %v4931_v38, %v1030_v35  ;;  %v1533_v52 = vld [vmem:[%s4871_s14 + $0x8] sm:$0xff] }
  0xc2   : > { %5988 = vst [vmem:[#allocation3_spill] sm:$0xff] %v5113_v63  ;;  %4350 = vmatmul.msk.bf16.gmra.mxu3 %vm923_vm2, %v1882_v56  ;;  %848 = vperm.xlu2 %4750, %v722_v53   ;;  %v1839_v53 = vld [vmem:[#allocation2 + $0xf8] sm:$0xff]  ;;  %v1532_v56 = vld [vmem:[%s4871_s14] sm:$0xff]  ;;  %v5177_v35 = vld [vmem:[#allocation2 + $0x148] sm:$0xff] }
  0xc3   : > { %4346 = vmatmul.msk.bf16.gmra.mxu2 %vm923_vm2, %v1878_v57  ;;  %843 = vperm.xlu1 %4749, %v721_v62   ;;  %v726_v62 = vld [vmem:[%s4861_s23 + $0xd8] sm:$0xff]  ;;  %v695_v57 = vmax.f32 %v663_v44, 0.0 }
  0xc4   : > { %838 = vperm.xlu0 %4748, %v720_v58   ;;  %v1286_v9 = vpop.permute.xlu2 %1285  ;;  %v1085_v58 = vmax.f32 %v1053_v39, 0.0  ;;  %v4569_v39 = vunpack.c.h.bf16 %v5048_v29  ;;  %v4437_v29 = vld [vmem:[%s5987_s25 + $0x18] sm:$0xf] }
  0xc5   : > { %v1335_v14 = vmul.f32 %v1286_v9, %v1111_v59  ;;  %v1236_v15 = vpop.permute.xlu1 %1235  ;;  %v1151_v16 = vpop.permute.xlu0 %1150  ;;  %v1094_v59 = vmax.f32 %v1062_v48, 0.0  ;;  %v1024_v48 = vmul.f32 %v4923_v34, %v4572_v28 }
  0xc6   : > { %v1325_v20 = vmul.f32 %v1236_v15, %v1101_v0  ;;  %v1308_v21 = vmul.f32 %v1151_v16, %v1084_v1  ;;  %v4585_v1 = vunpack.c.h.bf16 %v5119_v4 }
  0xc7   : > { %1367 = vst.msk [vmem:[#allocation2 + $0x1d8] sm:$0xff] %vm923_vm2, %v1335_v14  ;;  %v1848_v23 = vld [vmem:[#allocation2 + $0x140] sm:$0xff]  ;;  %v1072_v14 = vadd.f32 %v4931_v38, %v1040_v31  ;;  %v1056_v31 = vadd.f32 %v4931_v38, %v1024_v48  ;;  %v2168_v48 = vld [vmem:[#allocation2 + $0xe9] sm:$0xff] }
  0xc8   : > { %1357 = vst.msk [vmem:[#allocation2 + $0x188] sm:$0xff] %vm923_vm2, %v1325_v20  ;;  %v1847_v24 = vld [vmem:[#allocation2 + $0x138] sm:$0xff]  ;;  %v1536_v20 = vld [vmem:[%s4871_s14 + $0x20] sm:$0xff] }
  0xc9   : > { %1340 = vst.msk [vmem:[#allocation2 + $0x100] sm:$0xff] %vm923_vm2, %v1308_v21  ;;  %v1874_v3 = vpack.c.bf16 %v1848_v23, %v1847_v24  ;;  %v1031_v21 = vmul.f32 %v4923_v34, %v4585_v1  ;;  %v1534_v23 = vld [vmem:[%s4871_s14 + $0x10] sm:$0xff]  ;;  %v1103_v24 = vmax.f32 %v1071_v17, 0.0 }
  0xca   : > { %863 = vperm.xlu2 %4750, %v725_v12   ;;  %v1104_v12 = vmax.f32 %v1072_v14, 0.0  ;;  %v1541_v14 = vld [vmem:[%s4871_s14 + $0x48] sm:$0xff] }
  0xcb   : > { %4342 = vmatmul.msk.bf16.gmra.mxu1 %vm923_vm2, %v1874_v3  ;;  %858 = vperm.xlu1 %4749, %v724_v25   ;;  %v1048_v25 = vmul.f32 %v4923_v34, %v4620_v18  ;;  %v1063_v3 = vadd.f32 %v4931_v38, %v1031_v21 }
  0xcc   : > { %853 = vperm.xlu0 %4748, %v723_v37   ;;  %v1211_v36 = vpop.permute.xlu2 %1210 }
  0xcd   : > { %v1320_v41 = vmul.f32 %v1211_v36, %v1096_v27  ;;  %v1281_v42 = vpop.permute.xlu1 %1280  ;;  %v1276_v43 = vpop.permute.xlu0 %1275  ;;  %v1080_v36 = vadd.f32 %v4931_v38, %v1048_v25  ;;  %v1095_v49 = vmax.f32 %v1063_v3, 0.0 }
  0xce   : > { %v1334_v46 = vmul.f32 %v1281_v42, %v1110_v30  ;;  %v1333_v47 = vmul.f32 %v1276_v43, %v1109_v33  ;;  %v5183_v42 = vld [vmem:[#allocation2 + $0x110] sm:$0xff]  ;;  %v1539_v43 = vld [vmem:[%s4871_s14 + $0x38] sm:$0xff] }
  0xcf   : > { %1352 = vst.msk [vmem:[#allocation2 + $0x160] sm:$0xff] %vm923_vm2, %v1320_v41  ;;  %v1857_v50 = vld [vmem:[#allocation2 + $0x188] sm:$0xff]  ;;  %v1867_v28 = vld [vmem:[#allocation2 + $0x1d8] sm:$0xff] }
  0xd0   : > { %1366 = vst.msk [vmem:[#allocation2 + $0x1d0] sm:$0xff] %vm923_vm2, %v1334_v46  ;;  %v5149_v54 = vld [vmem:[#allocation2 + $0x100] sm:$0xff]  ;;  %v1879_v55 = vpack.c.bf16 %v1858_v51, %v1857_v50  ;;  %v1537_v46 = vld [vmem:[%s4871_s14 + $0x28] sm:$0xff]  ;;  %v1112_v50 = vmax.f32 %v1080_v36, 0.0  ;;  %v1023_v51 = vmul.f32 %v4923_v34, %v4569_v39  ;;  %v1543_v36 = vld [vmem:[%s4871_s14 + $0x58] sm:$0xff] }
  0xd1   : > { %1365 = vst.msk [vmem:[#allocation2 + $0x1c8] sm:$0xff] %vm923_vm2, %v1333_v47  ;;  %v1870_v61 = vpack.c.bf16 %v5149_v54, %v1839_v53  ;;  %v4454_v53 = vld [vmem:[%s5987_s25 + $0x1c] sm:$0xf] }
  0xd2   : > { %1571 = vperm.xlu2 %4750, %v1533_v52   ;;  %v3155_v52 = vsel %vm1935_vm1, %v4437_v29, 0  ;;  %v2169_v29 = vld [vmem:[#allocation2 + $0xf1] sm:$0xff] }
  0xd3   : > { %4338 = vmatmul.msk.bf16.gmra.mxu0 %vm923_vm2, %v1870_v61  ;;  %4347 = vmatmul.msk.bf16.gmra.mxu2 %vm923_vm2, %v1879_v55  ;;  %v3377_v61 = vsel %vm1935_vm1, %v4454_v53, 0 }
  0xd4   : > { %1566 = vperm.xlu1 %4749, %v1532_v56   ;;  %868 = vperm.xlu0 %4748, %v726_v62   ;;  %v874_v0 = vpop.permute.xlu2 %873  ;;  %v4420_v56 = vld [vmem:[%s5987_s25 + $0x14] sm:$0xf] }
  0xd5   : > { %v1156_v2 = vpop.permute.xlu1 %1155  ;;  %v1201_v9 = vpop.permute.xlu0 %1200  ;;  %v919_v11 = vmul.f32 %v874_v0, %v695_v57  ;;  %3164 = vmatpush.bf16.msra.mxu2 %v3155_v52  ;;  %3386 = vmatpush.bf16.msra.mxu3 %v3377_v61  ;;  %v1055_v0 = vadd.f32 %v4931_v38, %v1023_v51  ;;  %v1547_v61 = vld [vmem:[%s4871_s14 + $0x78] sm:$0xff] }
  0xd6   : > { %v1309_v15 = vmul.f32 %v1156_v2, %v1085_v58  ;;  %v1318_v16 = vmul.f32 %v1201_v9, %v1094_v59  ;;  %v2933_v58 = vsel %vm1935_vm1, %v4420_v56, 0  ;;  %v1542_v2 = vld [vmem:[%s4871_s14 + $0x50] sm:$0xff]  ;;  %v1852_v3 = vld [vmem:[#allocation2 + $0x160] sm:$0xff] }
  0xd7   : > { %952 = vst.msk [vmem:[#allocation2 + $0xe0] sm:$0xff] %vm923_vm2, %v919_v11  ;;  %v1866_v19 = vld [vmem:[#allocation2 + $0x1d0] sm:$0xff]  ;;  %2942 = vmatpush.bf16.msra.mxu1 %v2933_v58  ;;  %v1087_v17 = vmax.f32 %v1055_v0, 0.0 }
  0xd8   : > { %1341 = vst.msk [vmem:[#allocation2 + $0x108] sm:$0xff] %vm923_vm2, %v1309_v15  ;;  %v1865_v4 = vld [vmem:[#allocation2 + $0x1c8] sm:$0xff]  ;;  %v1540_v15 = vld [vmem:[%s4871_s14 + $0x40] sm:$0xff]  ;;  %v1546_v56 = vld [vmem:[%s4871_s14 + $0x70] sm:$0xff] }
  0xd9   : > { %1350 = vst.msk [vmem:[#allocation2 + $0x150] sm:$0xff] %vm923_vm2, %v1318_v16  ;;  %v1883_v22 = vpack.c.bf16 %v1866_v19, %v1865_v4  ;;  %v1088_v16 = vmax.f32 %v1056_v31, 0.0 }
  0xda   : > { %1586 = vperm.xlu2 %4750, %v1536_v20   ;;  %v4471_v20 = vld [vmem:[%s5987_s25 + $0x20] sm:$0xf] }
  0xdb   : > { %4351 = vmatmul.msk.bf16.gmra.mxu3 %vm923_vm2, %v1883_v22  ;;  %v3599_v21 = vsel %vm1935_vm1, %v4471_v20, 0 }
  0xdc   : > { %1581 = vperm.xlu1 %4749, %v1535_v6   ;;  %1576 = vperm.xlu0 %4748, %v1534_v23   ;;  %v744_v26 = vpop.permute.xlu2 %743  ;;  %v4621_v23 = vunpack.c.h.bf16 %v5160_v60 }
  0xdd   : > { %v1251_v37 = vpop.permute.xlu1 %1250  ;;  %v1246_v27 = vpop.permute.xlu0 %1245  ;;  %3608 = vmatpush.bf16.msra.mxu0 %v3599_v21 }
  0xde   : > { %v1328_v30 = vmul.f32 %v1251_v37, %v1104_v12  ;;  %v1327_v33 = vmul.f32 %v1246_v27, %v1103_v24  ;;  %v1545_v37 = vld [vmem:[%s4871_s14 + $0x68] sm:$0xff]  ;;  %v1049_v39 = vmul.f32 %v4923_v34, %v4621_v23 }
  0xdf   : > { %v5181_v41 = vld [vmem:[#allocation2 + $0x108] sm:$0xff] }
  0xe0   : > { %1360 = vst.msk [vmem:[#allocation2 + $0x1a0] sm:$0xff] %vm923_vm2, %v1328_v30  ;;  %v1871_v44 = vpack.c.bf16 %v5183_v42, %v5181_v41  ;;  %v1850_v45 = vld [vmem:[#allocation2 + $0x150] sm:$0xff]  ;;  %v1788_v0 = vld [vmem:[#allocation2 + $0xe7] sm:$0xff] }
  0xe1   : > { %1359 = vst.msk [vmem:[#allocation2 + $0x198] sm:$0xff] %vm923_vm2, %v1327_v33  ;;  %v1875_v47 = vpack.c.bf16 %v1850_v45, %v5177_v35  ;;  %v1544_v33 = vld [vmem:[%s4871_s14 + $0x60] sm:$0xff] }
  0xe2   : > { %1601 = vperm.xlu2 %4750, %v1539_v43   ;;  %v5238_v43 = vld [vmem:[%s4851_s12 + $0x78] sm:$0xff]   ;;  %v2171_v23 = vld [vmem:[#allocation2 + $0x101] sm:$0xff] }
  0xe3   : > { %4339 = vmatmul.msk.bf16.gmra.mxu0 %vm923_vm2, %v1871_v44  ;;  %4343 = vmatmul.msk.bf16.gmra.mxu1 %vm923_vm2, %v1875_v47  ;;  %v4624_v45 = vunpack.c.l.bf16 %v5238_v43  ;;  %v1081_v47 = vadd.f32 %v4931_v38, %v1049_v39  ;;  %v5257_v38 = vld [vmem:[%s5974_s7] ss:$0 sm:$0xff]  ;;  %v1790_v39 = vld [vmem:[#allocation2 + $0xf7] sm:$0xff] }
  0xe4   : > { %1596 = vperm.xlu1 %4749, %v1538_v32   ;;  %1591 = vperm.xlu0 %4748, %v1537_v46   ;;  %v759_v55 = vpop.permute.xlu2 %758 }
  0xe5   : > { %v1206_v62 = vpop.permute.xlu1 %1205  ;;  %v1291_v57 = vpop.permute.xlu0 %1290  ;;  %v1050_v52 = vmul.f32 %v4923_v34, %v4624_v45  ;;  %v2200_v55 = vpack.c.bf16 %v2169_v29, %v2168_v48 }
  0xe6   : > { %v1319_v59 = vmul.f32 %v1206_v62, %v1095_v49  ;;  %v1336_v40 = vmul.f32 %v1291_v57, %v1112_v50  ;;  %v1548_v50 = vld [vmem:[%s4871_s14 + $0x80] sm:$0xff]  ;;  %v1113_v62 = vmax.f32 %v1081_v47, 0.0 }
  0xe7   : > { %v1860_v1 = vld [vmem:[#allocation2 + $0x1a0] sm:$0xff] }
  0xe8   : > { %1351 = vst.msk [vmem:[#allocation2 + $0x158] sm:$0xff] %vm923_vm2, %v1319_v59  ;;  %v1859_v9 = vld [vmem:[#allocation2 + $0x198] sm:$0xff]  ;;  %v5218_v19 = vld [vmem:[#allocation2 + $0x1a0] sm:$0xff] }
  0xe9   : > { %1368 = vst.msk [vmem:[#allocation2 + $0x1e0] sm:$0xff] %vm923_vm2, %v1336_v40  ;;  %v1880_v11 = vpack.c.bf16 %v1860_v1, %v1859_v9  ;;  %v5216_v18 = vld [vmem:[#allocation2 + $0x198] sm:$0xff]  ;;  %v5264_v57 = vld [vmem:[%s5975_s8] ss:$0 sm:$0xff]  ;;  %v5267_v1 = vld [vmem:[#allocation2 + $0x107] sm:$0xff] }
  0xea   : > { %1616 = vperm.xlu2 %4750, %v1542_v2   ;;  %v1082_v31 = vadd.f32 %v5264_v57, %v1050_v52  ;;  %v1789_v2 = vld [vmem:[#allocation2 + $0xef] sm:$0xff]  ;;  %v1551_v9 = vld [vmem:[%s4871_s14 + $0x98] sm:$0xff]  ;;  %v1560_v52 = vld [vmem:[%s4871_s14 + $0xe0] sm:$0xff] }
  0xeb   : > { %4348 = vmatmul.msk.bf16.gmra.mxu2 %vm923_vm2, %v1880_v11  ;;  %v1820_v11 = vpack.c.bf16 %v1789_v2, %v1788_v0  ;;  %v1563_v2 = vld [vmem:[%s4871_s14 + $0xf8] sm:$0xff] }
  0xec   : > { %1611 = vperm.xlu1 %4749, %v1541_v14   ;;  %1606 = vperm.xlu0 %4748, %v1540_v15   ;;  %v774_v4 = vpop.permute.xlu2 %773  ;;  %v2390_v14 = vld [vmem:[#allocation2 + $0xff] sm:$0xff]  ;;  %v1114_v20 = vmax.f32 %v1082_v31, 0.0 }
  0xed   : > { %v1171_v22 = vpop.permute.xlu1 %1170  ;;  %v1166_v6 = vpop.permute.xlu0 %1165  ;;  %v2422_v15 = vpack.c.bf16 %v5267_v1, %v2390_v14  ;;  %v5299_v31 = vld [vmem:[%s4856_s22] sm:$0xff]  }
  0xee   : > { %v1312_v24 = vmul.f32 %v1171_v22, %v1088_v16  ;;  %v1311_v25 = vmul.f32 %v1166_v6, %v1087_v17  ;;  %v1550_v16 = vld [vmem:[%s4871_s14 + $0x90] sm:$0xff]  ;;  %v1549_v17 = vld [vmem:[%s4871_s14 + $0x88] sm:$0xff] }
  0xef   : > { %v5228_v26 = vld [vmem:[#allocation2 + $0x158] sm:$0xff] }
  0xf0   : > { %1344 = vst.msk [vmem:[#allocation2 + $0x120] sm:$0xff] %vm923_vm2, %v1312_v24  ;;  %v1876_v27 = vpack.c.bf16 %v1852_v3, %v5228_v26  ;;  %v1868_v30 = vld [vmem:[#allocation2 + $0x1e0] sm:$0xff]  ;;  %v1554_v24 = vld [vmem:[%s4871_s14 + $0xb0] sm:$0xff] }
  0xf1   : > { %1343 = vst.msk [vmem:[#allocation2 + $0x118] sm:$0xff] %vm923_vm2, %v1311_v25  ;;  %v1884_v60 = vpack.c.bf16 %v1868_v30, %v1867_v28  ;;  %v2170_v25 = vld [vmem:[#allocation2 + $0xf9] sm:$0xff] }
  0xf2   : > { %1631 = vperm.xlu2 %4750, %v1545_v37   ;;  %v2201_v3 = vpack.c.bf16 %v2171_v23, %v2170_v25  ;;  %v2644_v37 = vpack.c.bf16 %v5181_v41, %v5149_v54  ;;  %v1552_v28 = vld [vmem:[%s4871_s14 + $0xa0] sm:$0xff]  ;;  %v1821_v54 = vpack.c.bf16 %v2390_v14, %v1790_v39  ;;  %v2392_v41 = vld [vmem:[#allocation2 + $0x10f] sm:$0xff] }
  0xf3   : > { %4344 = vmatmul.msk.bf16.gmra.mxu1 %vm923_vm2, %v1876_v27  ;;  %4352 = vmatmul.msk.bf16.gmra.mxu3 %vm923_vm2, %v1884_v60  ;;  %v1553_v27 = vld [vmem:[%s4871_s14 + $0xa8] sm:$0xff]  ;;  %v3724_v25 = vld [vmem:[%s4866_s30 + $0x10] sm:$0xff] }
  0xf4   : > { %1626 = vperm.xlu1 %4749, %v1544_v33   ;;  %1621 = vperm.xlu0 %4748, %v1543_v36   ;;  %v789_v44 = vpop.permute.xlu2 %788 }
  0xf5   : > { %v739_v32 = vpop.permute.xlu1 %738  ;;  %v734_v46 = vpop.permute.xlu0 %733  ;;  %v1557_v44 = vld [vmem:[%s4871_s14 + $0xc8] sm:$0xff] }
  0xf6   : > { %v1556_v32 = vld [vmem:[%s4871_s14 + $0xc0] sm:$0xff]  ;;  %v1555_v46 = vld [vmem:[%s4871_s14 + $0xb8] sm:$0xff] }
  0xf7   : > { %v5244_v49 = vld [vmem:[#allocation2 + $0x120] sm:$0xff] }
  0xf8   : > { %v5247_v51 = vld [vmem:[#allocation2 + $0x118] sm:$0xff]  ;;  %v5305_v0 = vld [vmem:[#allocation2 + $0x127] sm:$0xff] }
  0xf9   : > { %v1872_v53 = vpack.c.bf16 %v5244_v49, %v5247_v51  ;;  %v5284_v36 = vld [vmem:[#allocation2 + $0x117] sm:$0xff]  ;;  %v2175_v23 = vld [vmem:[#allocation2 + $0x121] sm:$0xff] }
  0xfa   : > { %1646 = vperm.xlu2 %4750, %v1548_v50   ;;  %v2423_v45 = vpack.c.bf16 %v5284_v36, %v2392_v41  ;;  %v2173_v50 = vld [vmem:[#allocation2 + $0x111] sm:$0xff] }
  0xfb   : > { %4340 = vmatmul.msk.bf16.gmra.mxu0 %vm923_vm2, %v1872_v53  ;;  %4370 = vmatmul.msk.bf16.vlgmr.msrb.gmra.mxu2 %vm923_vm2, %v2200_v55  ;;  %v4625_v53 = vunpack.c.h.bf16 %v5238_v43  ;;  %v2172_v55 = vld [vmem:[#allocation2 + $0x109] sm:$0xff] }
  0xfc   : > { %1641 = vperm.xlu1 %4749, %v1547_v61   ;;  %1636 = vperm.xlu0 %4748, %v1546_v56   ;;  %v1296_v34 = vpop.permute.xlu2 %1295  ;;  %v2202_v61 = vpack.c.bf16 %v2173_v50, %v2172_v55  ;;  %v2645_v56 = vpack.c.bf16 %v5247_v51, %v5183_v42  ;;  %v4629_v42 = vunpack.c.h.bf16 %v5299_v31  ;;  %v2394_v51 = vld [vmem:[#allocation2 + $0x11f] sm:$0xff] }
  0xfd   : > { %v1337_v58 = vmul.f32 %v1296_v34, %v1113_v62  ;;  %v754_v59 = vpop.permute.xlu1 %753  ;;  %v749_v40 = vpop.permute.xlu0 %748  ;;  %v1559_v62 = vld [vmem:[%s4871_s14 + $0xd8] sm:$0xff]  ;;  %v1558_v34 = vld [vmem:[%s4871_s14 + $0xd0] sm:$0xff]  ;;  %v2424_v14 = vpack.c.bf16 %v5305_v0, %v2394_v51 }
  0xfe   : > { %v2619_v55 = vld [vmem:[#allocation2 + $0x138] sm:$0xff] }
  0xff   : > { %1369 = vst.msk [vmem:[#allocation2 + $0x1e8] sm:$0xff] %vm923_vm2, %v1337_v58  ;;  %v1051_v58 = vmul.f32 %v5257_v38, %v4625_v53 }
 0x102   : > { %1661 = vperm.xlu2 %4750, %v1551_v9   ;;  %v1083_v9 = vadd.f32 %v5264_v57, %v1051_v58 }
 0x103   : > { %4353 = vmatmul.msk.bf16.vlgmr.msrb.gmra.mxu1 %vm923_vm2, %v1820_v11  ;;  %4387 = vmatmul.msk.bf16.vlgmr.msrb.gmra.mxu3 %vm923_vm2, %v2422_v15  ;;  %v1822_v11 = vpack.c.bf16 %v2392_v41, %v5267_v1  ;;  %v1562_v15 = vld [vmem:[%s4871_s14 + $0xf0] sm:$0xff] }
 0x104   : > { %1656 = vperm.xlu1 %4749, %v1550_v16   ;;  %1651 = vperm.xlu0 %4748, %v1549_v17   ;;  %v1301_v4 = vpop.permute.xlu2 %1300  ;;  %v1561_v16 = vld [vmem:[%s4871_s14 + $0xe8] sm:$0xff]  ;;  %v1437_v17 = vmul.f32 %v5257_v38, %v4629_v42  ;;  %v5324_v41 = vld [vmem:[#allocation2 + $0x137] sm:$0xff] }
 0x105   : > { %v1338_v21 = vmul.f32 %v1301_v4, %v1114_v20  ;;  %v769_v22 = vpop.permute.xlu1 %768  ;;  %v764_v6 = vpop.permute.xlu0 %763  ;;  %v1115_v20 = vmax.f32 %v1083_v9, 0.0 }
 0x106   : > { %v1469_v1 = vadd.f32 %v5264_v57, %v1437_v17  ;;  %v2174_v6 = vld [vmem:[#allocation2 + $0x119] sm:$0xff] }
 0x107   : > { %1370 = vst.msk [vmem:[#allocation2 + $0x1f0] sm:$0xff] %vm923_vm2, %v1338_v21 }
 0x10a   : > { %1676 = vperm.xlu2 %4750, %v1554_v24  }
 0x10b   : > { %4371 = vmatmul.msk.bf16.gmra.mxu2 %vm923_vm2, %v2201_v3  ;;  %4404 = vmatmul.msk.bf16.vlgmr.msrb.gmra.mxu0 %vm923_vm2, %v2644_v37  ;;  %v2617_v3 = vld [vmem:[#allocation2 + $0x128] sm:$0xff]  ;;  %v2203_v37 = vpack.c.bf16 %v2175_v23, %v2174_v6 }
 0x10c   : > { %1671 = vperm.xlu1 %4749, %v1553_v27   ;;  %1666 = vperm.xlu0 %4748, %v1552_v28   ;;  %v819_v30 = vpop.permute.xlu2 %818  ;;  %v2646_v27 = vpack.c.bf16 %v2617_v3, %v5244_v49  ;;  %v3723_v28 = vld [vmem:[%s4866_s30 + $0x8] sm:$0xff] }
 0x10d   : > { %v784_v60 = vpop.permute.xlu1 %783  ;;  %v779_v33 = vpop.permute.xlu0 %778  ;;  %v3722_v30 = vld [vmem:[%s4866_s30] sm:$0xff]  ;;  %v3727_v49 = vld [vmem:[%s4866_s30 + $0x28] sm:$0xff] }
 0x10e   : > { %v1501_v60 = vmax.f32 %v1469_v1, 0.0  ;;  %v3733_v1 = vld [vmem:[%s4866_s30 + $0x58] sm:$0xff] }
 0x112   : > { %1691 = vperm.xlu2 %4750, %v1557_v44  }
 0x113   : > { %4354 = vmatmul.msk.bf16.gmra.mxu1 %vm923_vm2, %v1821_v54  ;;  %4388 = vmatmul.msk.bf16.gmra.mxu3 %vm923_vm2, %v2423_v45  ;;  %v2396_v45 = vld [vmem:[#allocation2 + $0x12f] sm:$0xff] }
 0x114   : > { %1686 = vperm.xlu1 %4749, %v1556_v32   ;;  %1681 = vperm.xlu0 %4748, %v1555_v46   ;;  %v834_v47 = vpop.permute.xlu2 %833  ;;  %v1823_v32 = vpack.c.bf16 %v2394_v51, %v5284_v36  ;;  %v2425_v46 = vpack.c.bf16 %v5324_v41, %v2396_v45  ;;  %v2177_v36 = vld [vmem:[#allocation2 + $0x131] sm:$0xff]  ;;  %v1824_v6 = vpack.c.bf16 %v2396_v45, %v5305_v0 }
 0x115   : > { %v799_v48 = vpop.permute.xlu1 %798  ;;  %v794_v29 = vpop.permute.xlu0 %793  ;;  %v3726_v47 = vld [vmem:[%s4866_s30 + $0x20] sm:$0xff]  ;;  %v3736_v45 = vld [vmem:[%s4866_s30 + $0x70] sm:$0xff] }
 0x116   : > { %v3725_v48 = vld [vmem:[%s4866_s30 + $0x18] sm:$0xff]  ;;  %v5340_v42 = vpop.f32.mrf.mxu1 }
 0x11a   : > { %1706 = vperm.xlu2 %4750, %v1560_v52  }
 0x11b   : > { %4372 = vmatmul.msk.bf16.gmra.mxu2 %vm923_vm2, %v2202_v61  ;;  %4405 = vmatmul.msk.bf16.gmra.mxu0 %vm923_vm2, %v2645_v56  ;;  %v3730_v61 = vld [vmem:[%s4866_s30 + $0x40] sm:$0xff]  ;;  %v4628_v56 = vunpack.c.l.bf16 %v5299_v31 }
 0x11c   : > { %1701 = vperm.xlu1 %4749, %v1559_v62   ;;  %1696 = vperm.xlu0 %4748, %v1558_v34   ;;  %v849_v43 = vpop.permute.xlu2 %848  ;;  %v2176_v62 = vld [vmem:[#allocation2 + $0x129] sm:$0xff] }
 0x11d   : > { %v809_v59 = vpop.permute.xlu1 %808  ;;  %v804_v40 = vpop.permute.xlu0 %803  ;;  %v2618_v34 = vld [vmem:[#allocation2 + $0x130] sm:$0xff]  ;;  %v2204_v58 = vpack.c.bf16 %v2177_v36, %v2176_v62  ;;  %v1436_v51 = vmul.f32 %v5257_v38, %v4628_v56 }
 0x11e   : > { %v2647_v43 = vpack.c.bf16 %v2619_v55, %v2618_v34  ;;  %v3729_v59 = vld [vmem:[%s4866_s30 + $0x38] sm:$0xff]  ;;  %v3728_v40 = vld [vmem:[%s4866_s30 + $0x30] sm:$0xff]  ;;  %v5367_v0 = vpop.f32.mrf.mxu1 }
 0x122   : > { %1721 = vperm.xlu2 %4750, %v1563_v2   ;;  %v4720_v2 = vld [vmem:[%s4856_s22 + $0x8] sm:$0xff]  }
 0x123   : > { %4355 = vmatmul.msk.bf16.gmra.mxu1 %vm923_vm2, %v1822_v11  ;;  %4389 = vmatmul.msk.bf16.gmra.mxu3 %vm923_vm2, %v2424_v14  ;;  %v4633_v17 = vunpack.c.h.bf16 %v4720_v2 }
 0x124   : > { %1716 = vperm.xlu1 %4749, %v1562_v15   ;;  %1711 = vperm.xlu0 %4748, %v1561_v16   ;;  %v864_v4 = vpop.permute.xlu2 %863  ;;  %v5348_v15 = vld [vmem:[#allocation2 + $0x13f] sm:$0xff]  ;;  %v5350_v16 = vld [vmem:[#allocation2 + $0x147] sm:$0xff] }
 0x125   : > { %v814_v21 = vpop.permute.xlu1 %813  ;;  %v2426_v23 = vpack.c.bf16 %v5350_v16, %v5348_v15  ;;  %v1439_v3 = vmul.f32 %v5257_v38, %v4633_v17 }
 0x126   : > { %v1306_v22 = vpop.permute.xlu0 %1305 }
 0x127   : > { %v1339_v24 = vmul.f32 %v1306_v22, %v1115_v20  ;;  %v4632_v20 = vunpack.c.l.bf16 %v4720_v2  ;;  %v1468_v22 = vadd.f32 %v5264_v57, %v1436_v51  ;;  %v1825_v51 = vpack.c.bf16 %v5348_v15, %v5324_v41 }
 0x129   : > { %1371 = vst.msk [vmem:[#allocation2 + $0x1f8] sm:$0xff] %vm923_vm2, %v1339_v24  ;;  %v3732_v24 = vld [vmem:[%s4866_s30 + $0x50] sm:$0xff] }
 0x12a   : > { %3766 = vperm.xlu2 %4750, %v3724_v25   ;;  %v3731_v25 = vld [vmem:[%s4866_s30 + $0x48] sm:$0xff] }
 0x12b   : > { %4373 = vmatmul.msk.bf16.gmra.mxu2 %vm923_vm2, %v2203_v37  ;;  %4406 = vmatmul.msk.bf16.gmra.mxu0 %vm923_vm2, %v2646_v27  ;;  %v1438_v37 = vmul.f32 %v5257_v38, %v4632_v20  ;;  %v1500_v27 = vmax.f32 %v1468_v22, 0.0  ;;  %v1471_v38 = vadd.f32 %v5264_v57, %v1439_v3  ;;  %v3742_v22 = vld [vmem:[%s4866_s30 + $0xa0] sm:$0xff] }
 0x12c   : > { %3761 = vperm.xlu1 %4749, %v3723_v28   ;;  %3756 = vperm.xlu0 %4748, %v3722_v30   ;;  %v1572_v33 = vpop.permute.xlu2 %1571 }
 0x12d   : > { %v1725_v39 = vmul.f32 %v1572_v33, %v1501_v60  ;;  %v829_v44 = vpop.permute.xlu1 %828  ;;  %v2178_v33 = vld [vmem:[#allocation2 + $0x139] sm:$0xff] }
 0x12e   : > { %v824_v54 = vpop.permute.xlu0 %823  ;;  %v2620_v44 = vld [vmem:[#allocation2 + $0x140] sm:$0xff] }
 0x12f   : > { %1757 = vst.msk [vmem:[#allocation2 + $0x208] sm:$0xff] %vm923_vm2, %v1725_v39  ;;  %v2179_v39 = vld [vmem:[#allocation2 + $0x141] sm:$0xff]  ;;  %v1470_v54 = vadd.f32 %v5264_v57, %v1438_v37  ;;  %v1503_v57 = vmax.f32 %v1471_v38, 0.0  ;;  %v3741_v37 = vld [vmem:[%s4866_s30 + $0x98] sm:$0xff] }
 0x130   : > { %v3745_v38 = vld [vmem:[%s4866_s30 + $0xb8] sm:$0xff] }
 0x131   : > { %v1502_v36 = vmax.f32 %v1470_v54, 0.0 }
 0x132   : > { %3781 = vperm.xlu2 %4750, %v3727_v49  }
 0x133   : > { %4356 = vmatmul.msk.bf16.gmra.mxu1 %vm923_vm2, %v1823_v32  ;;  %4390 = vmatmul.msk.bf16.gmra.mxu3 %vm923_vm2, %v2425_v46 }
 0x134   : > { %3776 = vperm.xlu1 %4749, %v3726_v47   ;;  %3771 = vperm.xlu0 %4748, %v3725_v48   ;;  %v1587_v29 = vpop.permute.xlu2 %1586  ;;  %v2205_v48 = vpack.c.bf16 %v2179_v39, %v2178_v33 }
 0x135   : > { %v844_v50 = vpop.permute.xlu1 %843  ;;  %v5346_v11 = vpop.f32.mrf.mxu3  ;;  %v2648_v29 = vpack.c.bf16 %v5177_v35, %v2620_v44  ;;  %v5386_v35 = vld [vmem:[#allocation2 + $0x157] sm:$0xff]  ;;  %v2402_v44 = vld [vmem:[#allocation2 + $0x15f] sm:$0xff] }
 0x136   : > { %v839_v52 = vpop.permute.xlu0 %838  ;;  %v5334_v53 = vpop.f32.mrf.mxu2  ;;  %v3735_v50 = vld [vmem:[%s4866_s30 + $0x68] sm:$0xff] }
 0x137   : > { %v3734_v52 = vld [vmem:[%s4866_s30 + $0x60] sm:$0xff] }
 0x138   : > { %v5352_v4 = vpop.f32.mrf.mxu0 }
 0x13a   : > { %3796 = vperm.xlu2 %4750, %v3730_v61  }
 0x13b   : > { %4374 = vmatmul.msk.bf16.gmra.mxu2 %vm923_vm2, %v2204_v58  ;;  %4407 = vmatmul.msk.bf16.gmra.mxu0 %vm923_vm2, %v2647_v43  ;;  %v3739_v43 = vld [vmem:[%s4866_s30 + $0x88] sm:$0xff] }
 0x13c   : > { %3791 = vperm.xlu1 %4749, %v3729_v59   ;;  %3786 = vperm.xlu0 %4748, %v3728_v40   ;;  %v1602_v31 = vpop.permute.xlu2 %1601  ;;  %v2400_v59 = vld [vmem:[#allocation2 + $0x14f] sm:$0xff] }
 0x13d   : > { %v859_v9 = vpop.permute.xlu1 %858  ;;  %v5372_v32 = vpop.f32.mrf.mxu3  ;;  %v2427_v2 = vpack.c.bf16 %v5386_v35, %v2400_v59  ;;  %v3738_v31 = vld [vmem:[%s4866_s30 + $0x80] sm:$0xff] }
 0x13e   : > { %v854_v14 = vpop.permute.xlu0 %853  ;;  %v5354_v21 = vpop.f32.mrf.mxu2  ;;  %v3737_v9 = vld [vmem:[%s4866_s30 + $0x78] sm:$0xff] }
 0x140   : > { %v5374_v46 = vpop.f32.mrf.mxu0 }
 0x142   : > { %3811 = vperm.xlu2 %4750, %v3733_v1   ;;  %v2181_v1 = vld [vmem:[#allocation2 + $0x151] sm:$0xff] }
 0x143   : > { %4357 = vmatmul.msk.bf16.gmra.mxu1 %vm923_vm2, %v1824_v6  ;;  %4391 = vmatmul.msk.bf16.gmra.mxu3 %vm923_vm2, %v2426_v23  ;;  %v2180_v23 = vld [vmem:[#allocation2 + $0x149] sm:$0xff] }
 0x144   : > { %3806 = vperm.xlu1 %4749, %v3732_v24   ;;  %3801 = vperm.xlu0 %4748, %v3731_v25   ;;  %v1617_v28 = vpop.permute.xlu2 %1616  ;;  %v2622_v24 = vld [vmem:[#allocation2 + $0x150] sm:$0xff]  ;;  %v2206_v25 = vpack.c.bf16 %v2181_v1, %v2180_v23 }
 0x145   : > { %v5398_v14 = vpop.f32.mrf.mxu3  ;;  %v2649_v3 = vpack.c.bf16 %v5228_v26, %v2622_v24  ;;  %v5442_v23 = vld [vmem:[#allocation2 + $0x177] sm:$0xff] }
 0x146   : > { %v1567_v30 = vpop.permute.xlu1 %1566  ;;  %v869_v60 = vpop.permute.xlu0 %868 }
 0x147   : > { %v1724_v49 = vmul.f32 %v1567_v30, %v1500_v27  ;;  %v5377_v47 = vpop.f32.mrf.mxu2  ;;  %v3740_v27 = vld [vmem:[%s4866_s30 + $0x90] sm:$0xff] }
 0x148   : > { %v5384_v61 = vpop.f32.mrf.mxu1 }
 0x149   : > { %1756 = vst.msk [vmem:[#allocation2 + $0x200] sm:$0xff] %vm923_vm2, %v1724_v49  ;;  %v5421_v49 = vld [vmem:[#allocation2 + $0x167] sm:$0xff] }
 0x14a   : > { %3826 = vperm.xlu2 %4750, %v3736_v45   ;;  %v1826_v45 = vpack.c.bf16 %v2400_v59, %v5350_v16  ;;  %v2183_v59 = vld [vmem:[#allocation2 + $0x161] sm:$0xff] }
 0x14b   : > { %4375 = vmatmul.msk.bf16.gmra.mxu2 %vm923_vm2, %v2205_v48  ;;  %4408 = vmatmul.msk.bf16.gmra.mxu0 %vm923_vm2, %v2648_v29  ;;  %v2428_v48 = vpack.c.bf16 %v5421_v49, %v2402_v44  ;;  %v3744_v29 = vld [vmem:[%s4866_s30 + $0xb0] sm:$0xff] }
 0x14c   : > { %3821 = vperm.xlu1 %4749, %v3735_v50   ;;  %3816 = vperm.xlu0 %4748, %v3734_v52   ;;  %v1632_v55 = vpop.permute.xlu2 %1631  ;;  %v3743_v50 = vld [vmem:[%s4866_s30 + $0xa8] sm:$0xff] }
 0x14d   : > { %v5414_v60 = vpop.f32.mrf.mxu3 }
 0x14e   : > { %v1582_v56 = vpop.permute.xlu1 %1581  ;;  %v1577_v62 = vpop.permute.xlu0 %1576 }
 0x14f   : > { %v1727_v34 = vmul.f32 %v1582_v56, %v1503_v57  ;;  %v1726_v58 = vmul.f32 %v1577_v62, %v1502_v36  ;;  %v5400_v17 = vpop.f32.mrf.mxu2  ;;  %v2182_v56 = vld [vmem:[#allocation2 + $0x159] sm:$0xff] }
 0x150   : > { %v5390_v40 = vpop.f32.mrf.mxu0  ;;  %v5405_v6 = vpop.f32.mrf.mxu1  ;;  %v2624_v62 = vld [vmem:[#allocation2 + $0x160] sm:$0xff] }
 0x151   : > { %1759 = vst.msk [vmem:[#allocation2 + $0x218] sm:$0xff] %vm923_vm2, %v1727_v34 }
 0x152   : > { %1758 = vst.msk [vmem:[#allocation2 + $0x210] sm:$0xff] %vm923_vm2, %v1726_v58  ;;  %3841 = vperm.xlu2 %4750, %v3739_v43   ;;  %v3748_v58 = vld [vmem:[%s4866_s30 + $0xd0] sm:$0xff] }
 0x153   : > { %4358 = vmatmul.msk.bf16.gmra.mxu1 %vm923_vm2, %v1825_v51  ;;  %4392 = vmatmul.msk.bf16.gmra.mxu3 %vm923_vm2, %v2427_v2  ;;  %v2625_v51 = vld [vmem:[#allocation2 + $0x168] sm:$0xff]  ;;  %v2207_v2 = vpack.c.bf16 %v2183_v59, %v2182_v56 }
 0x154   : > { %3836 = vperm.xlu1 %4749, %v3738_v31   ;;  %3831 = vperm.xlu0 %4748, %v3737_v9   ;;  %v1647_v41 = vpop.permute.xlu2 %1646  ;;  %v2650_v31 = vpack.c.bf16 %v2625_v51, %v2624_v62  ;;  %v3747_v9 = vld [vmem:[%s4866_s30 + $0xc8] sm:$0xff]  ;;  %v2627_v62 = vld [vmem:[#allocation2 + $0x178] sm:$0xff] }
 0x155   : > { %v3746_v41 = vld [vmem:[%s4866_s30 + $0xc0] sm:$0xff]  ;;  %v3753_v51 = vld [vmem:[%s4866_s30 + $0xf8] sm:$0xff] }
 0x156   : > { %v1597_v15 = vpop.permute.xlu1 %1596  ;;  %v1592_v20 = vpop.permute.xlu0 %1591 }
 0x157   : > { %v5416_v33 = vpop.f32.mrf.mxu2 }
 0x158   : > { %v5410_v28 = vpop.f32.mrf.mxu0 }
 0x15a   : > { %3856 = vperm.xlu2 %4750, %v3742_v22   ;;  %v2404_v22 = vld [vmem:[#allocation2 + $0x16f] sm:$0xff] }
 0x15b   : > { %4376 = vmatmul.msk.bf16.gmra.mxu2 %vm923_vm2, %v2206_v25  ;;  %4409 = vmatmul.msk.bf16.gmra.mxu0 %vm923_vm2, %v2649_v3  ;;  %v3751_v3 = vld [vmem:[%s4866_s30 + $0xe8] sm:$0xff] }
 0x15c   : > { %3851 = vperm.xlu1 %4749, %v3741_v37   ;;  %3846 = vperm.xlu0 %4748, %v3740_v27   ;;  %v1662_v30 = vpop.permute.xlu2 %1661 }
 0x15d   : > { %v1827_v30 = vpack.c.bf16 %v2402_v44, %v5386_v35 }
 0x15e   : > { %v1612_v39 = vpop.permute.xlu1 %1611  ;;  %v1607_v26 = vpop.permute.xlu0 %1606 }
 0x15f   : > { %v5429_v57 = vpop.f32.mrf.mxu3  ;;  %v5433_v34 = vpop.f32.mrf.mxu2  ;;  %v2429_v39 = vpack.c.bf16 %v5442_v23, %v2404_v22  ;;  %v3750_v26 = vld [vmem:[%s4866_s30 + $0xe0] sm:$0xff] }
 0x160   : > { %v5419_v54 = vpop.f32.mrf.mxu1  ;;  %v5431_v36 = vpop.f32.mrf.mxu0 }
 0x162   : > { %3871 = vperm.xlu2 %4750, %v3745_v38   ;;  %v3749_v38 = vld [vmem:[%s4866_s30 + $0xd8] sm:$0xff] }
 0x163   : > { %4359 = vmatmul.msk.bf16.gmra.mxu1 %vm923_vm2, %v1826_v45  ;;  %4393 = vmatmul.msk.bf16.gmra.mxu3 %vm923_vm2, %v2428_v48 }
 0x164   : > { %3866 = vperm.xlu1 %4749, %v3744_v29   ;;  %3861 = vperm.xlu0 %4748, %v3743_v50   ;;  %v1677_v52 = vpop.permute.xlu2 %1676  ;;  %v2184_v50 = vld [vmem:[#allocation2 + $0x169] sm:$0xff] }
 0x165   : > { %v2185_v52 = vld [vmem:[#allocation2 + $0x171] sm:$0xff] }
 0x166   : > { %v1627_v16 = vpop.permute.xlu1 %1626  ;;  %v1622_v55 = vpop.permute.xlu0 %1621 }
 0x167   : > { %v5444_v24 = vpop.f32.mrf.mxu3  ;;  %v2626_v16 = vld [vmem:[#allocation2 + $0x170] sm:$0xff] }
 0x168   : > { %v5436_v43 = vpop.f32.mrf.mxu1  ;;  %v5449_v37 = vpop.f32.mrf.mxu0  ;;  %v2651_v59 = vpack.c.bf16 %v2627_v62, %v2626_v16  ;;  %v2629_v16 = vld [vmem:[#allocation2 + $0x188] sm:$0xff] }
 0x16a   : > { %3886 = vperm.xlu2 %4750, %v3748_v58   ;;  %v2208_v58 = vpack.c.bf16 %v2185_v52, %v2184_v50  ;;  %v2187_v52 = vld [vmem:[#allocation2 + $0x181] sm:$0xff] }
 0x16b   : > { %4377 = vmatmul.msk.bf16.gmra.mxu2 %vm923_vm2, %v2207_v2  ;;  %4410 = vmatmul.msk.bf16.gmra.mxu0 %vm923_vm2, %v2650_v31  ;;  %v3752_v2 = vld [vmem:[%s4866_s30 + $0xf0] sm:$0xff] }
 0x16c   : > { %3881 = vperm.xlu1 %4749, %v3747_v9   ;;  %3876 = vperm.xlu0 %4748, %v3746_v41   ;;  %v1692_v15 = vpop.permute.xlu2 %1691 }
 0x16d   : > { %v5471_v15 = vld [vmem:[#allocation2 + $0x187] sm:$0xff] }
 0x16e   : > { %v1642_v20 = vpop.permute.xlu1 %1641  ;;  %v1637_v1 = vpop.permute.xlu0 %1636 }
 0x16f   : > { %v5446_v25 = vpop.f32.mrf.mxu2 }
 0x170   : > { %v5451_v27 = vpop.f32.mrf.mxu1 }
 0x172   : > { %3901 = vperm.xlu2 %4750, %v3751_v3  }
 0x173   : > { %4360 = vmatmul.msk.bf16.gmra.mxu1 %vm923_vm2, %v1827_v30  ;;  %4394 = vmatmul.msk.bf16.gmra.mxu3 %vm923_vm2, %v2429_v39  ;;  %v5477_v39 = vld [vmem:[#allocation2 + $0x17f] sm:$0xff] }
 0x174   : > { %3896 = vperm.xlu1 %4749, %v3750_v26   ;;  %3891 = vperm.xlu0 %4748, %v3749_v38   ;;  %v1707_v45 = vpop.permute.xlu2 %1706  ;;  %v1828_v38 = vpack.c.bf16 %v2404_v22, %v5421_v49 }
 0x175   : > { %v2430_v45 = vpack.c.bf16 %v5471_v15, %v5477_v39 }
 0x176   : > { %v1657_v48 = vpop.permute.xlu1 %1656  ;;  %v1652_v29 = vpop.permute.xlu0 %1651 }
 0x177   : > { %v5459_v35 = vpop.f32.mrf.mxu2  ;;  %v5461_v44 = vpop.f32.mrf.mxu3 }
 0x178   : > { %v5463_v55 = vpop.f32.mrf.mxu0  ;;  %v5465_v56 = vpop.f32.mrf.mxu1 }
 0x17b   : > { %4378 = vmatmul.msk.bf16.gmra.mxu2 %vm923_vm2, %v2208_v58  ;;  %4411 = vmatmul.msk.bf16.gmra.mxu0 %vm923_vm2, %v2651_v59 }
 0x17c   : > { %3911 = vperm.xlu1 %4749, %v3753_v51   ;;  %3906 = vperm.xlu0 %4748, %v3752_v2   ;;  %v1722_v31 = vpop.permute.xlu2 %1721 }
 0x17d   : > { %v5485_v31 = vld [vmem:[#allocation2 + $0x180] sm:$0xff] }
 0x17e   : > { %v1672_v9 = vpop.permute.xlu1 %1671  ;;  %v1667_v41 = vpop.permute.xlu0 %1666 }
 0x17f   : > { %v5473_v20 = vpop.f32.mrf.mxu3  ;;  %v2278_v1 = vpop.f32.mrf.mxu2  ;;  %v2652_v9 = vpack.c.bf16 %v2629_v16, %v5485_v31 }
 0x180   : > { %v5475_v3 = vpop.f32.mrf.mxu0  ;;  %v2088_v30 = vpop.f32.mrf.mxu1 }
 0x181   : > { %v2089_v26 = vadd.f32 %v2088_v30, %v5352_v4  ;;  %v2186_v4 = vld [vmem:[#allocation2 + $0x179] sm:$0xff] }
 0x182   : > { %v5488_v22 = vpack.c.bf16 %v2187_v52, %v2186_v4  ;;  %v5498_v52 = vld [vmem:[#allocation2 + $0x18f] sm:$0xff] }
 0x183   : > { %4361 = vmatmul.msk.bf16.gmra.mxu1 %vm923_vm2, %v1828_v38  ;;  %4395 = vmatmul.msk.bf16.gmra.mxu3 %vm923_vm2, %v2430_v45  ;;  %v2358_v48 = vadd.f32 %v2278_v1, %v2089_v26  ;;  %v5496_v38 = vld [vmem:[#allocation2 + $0x197] sm:$0xff] }
 0x186   : > { %v1687_v29 = vpop.permute.xlu1 %1686  ;;  %v1682_v50 = vpop.permute.xlu0 %1681 }
 0x187   : > { %v2280_v62 = vpop.f32.mrf.mxu2  ;;  %v2500_v58 = vpop.f32.mrf.mxu3 }
 0x188   : > { %v2580_v59 = vadd.f32 %v2500_v58, %v2358_v48  ;;  %v2090_v51 = vpop.f32.mrf.mxu1  ;;  %v2722_v2 = vpop.f32.mrf.mxu0  ;;  %v1829_v58 = vpack.c.bf16 %v5477_v39, %v5442_v23  ;;  %v5511_v23 = vld [vmem:[#allocation2 + $0x190] sm:$0xff] }
 0x189   : > { %v2091_v49 = vadd.f32 %v2090_v51, %v5374_v46 }
 0x18a   : > { %v5491_v41 = vadd.f32 %v2722_v2, %v2580_v59  ;;  %v2431_v59 = vpack.c.bf16 %v5496_v38, %v5498_v52 }
 0x18b   : > { %4379 = vmatmul.msk.bf16.gmra.mxu2 %vm923_vm2, %v5488_v22  ;;  %4412 = vmatmul.msk.bf16.gmra.mxu0 %vm923_vm2, %v2652_v9  ;;  %v2359_v1 = vadd.f32 %v2280_v62, %v2091_v49  ;;  %v2189_v49 = vld [vmem:[#allocation2 + $0x191] sm:$0xff] }
 0x18e   : > { %v1702_v30 = vpop.permute.xlu1 %1701  ;;  %v1697_v26 = vpop.permute.xlu0 %1696 }
 0x18f   : > { %v2283_v45 = vpop.f32.mrf.mxu2  ;;  %v2502_v48 = vpop.f32.mrf.mxu3 }
 0x190   : > { %v2581_v29 = vadd.f32 %v2502_v48, %v2359_v1  ;;  %v2093_v46 = vpop.f32.mrf.mxu1  ;;  %v2724_v50 = vpop.f32.mrf.mxu0  ;;  %v5509_v48 = vld [vmem:[#allocation2 + $0x189] sm:$0xff] }
 0x191   : > { %v2094_v16 = vadd.f32 %v2093_v46, %v5390_v40  ;;  %v5515_v46 = vpack.c.bf16 %v2189_v49, %v5509_v48 }
 0x192   : > { %v5505_v62 = vadd.f32 %v2724_v50, %v2581_v29  ;;  %v4757_v50 = vld [vmem:[#allocation2 + $0x198] sm:$0xff] }
 0x193   : > { %4362 = vmatmul.msk.bf16.gmra.mxu1 %vm923_vm2, %v1829_v58  ;;  %4396 = vmatmul.msk.bf16.gmra.mxu3 %vm923_vm2, %v2431_v59  ;;  %v2360_v51 = vadd.f32 %v2283_v45, %v2094_v16  ;;  %v2653_v45 = vpack.c.bf16 %v4757_v50, %v5511_v23  ;;  %v2410_v59 = vld [vmem:[#allocation2 + $0x19f] sm:$0xff] }
 0x196   : > { %v1717_v2 = vpop.permute.xlu1 %1716  ;;  %v1712_v4 = vpop.permute.xlu0 %1711 }
 0x197   : > { %v2285_v9 = vpop.f32.mrf.mxu2  ;;  %v2505_v1 = vpop.f32.mrf.mxu3 }
 0x198   : > { %v2582_v30 = vadd.f32 %v2505_v1, %v2360_v51  ;;  %v2095_v40 = vpop.f32.mrf.mxu1  ;;  %v2727_v26 = vpop.f32.mrf.mxu0  ;;  %v5523_v51 = vld [vmem:[#allocation2 + $0x1a7] sm:$0xff] }
 0x199   : > { %v2096_v29 = vadd.f32 %v2095_v40, %v5410_v28 }
 0x19a   : > { %v5518_v16 = vadd.f32 %v2727_v26, %v2582_v30  ;;  %v1830_v30 = vpack.c.bf16 %v5498_v52, %v5471_v15  ;;  %v2432_v26 = vpack.c.bf16 %v5523_v51, %v2410_v59 }
 0x19b   : > { %4380 = vmatmul.msk.bf16.gmra.mxu2 %vm923_vm2, %v5515_v46  ;;  %4413 = vmatmul.msk.bf16.gmra.mxu0 %vm923_vm2, %v2653_v45  ;;  %v2361_v58 = vadd.f32 %v2285_v9, %v2096_v29  ;;  %v5533_v29 = vld [vmem:[#allocation2 + $0x199] sm:$0xff]  ;;  %v2191_v45 = vld [vmem:[#allocation2 + $0x1a1] sm:$0xff] }
 0x19c   : > { %v5537_v15 = vpack.c.bf16 %v2191_v45, %v5533_v29  ;;  %v2412_v45 = vld [vmem:[#allocation2 + $0x1af] sm:$0xff] }
 0x19f   : > { %v2288_v2 = vpop.f32.mrf.mxu2  ;;  %v2507_v4 = vpop.f32.mrf.mxu3 }
 0x1a0   : > { %v2583_v28 = vadd.f32 %v2507_v4, %v2361_v58  ;;  %v2098_v1 = vpop.f32.mrf.mxu1  ;;  %v2729_v49 = vpop.f32.mrf.mxu0 }
 0x1a1   : > { %v2099_v40 = vadd.f32 %v2098_v1, %v5431_v36 }
 0x1a2   : > { %v5529_v50 = vadd.f32 %v2729_v49, %v2583_v28  ;;  %v4758_v28 = vld [vmem:[#allocation2 + $0x1a8] sm:$0xff]  ;;  %v4759_v49 = vld [vmem:[#allocation2 + $0x1a0] sm:$0xff] }
 0x1a3   : > { %4363 = vmatmul.msk.bf16.gmra.mxu1 %vm923_vm2, %v1830_v30  ;;  %4397 = vmatmul.msk.bf16.gmra.mxu3 %vm923_vm2, %v2432_v26  ;;  %v2362_v9 = vadd.f32 %v2288_v2, %v2099_v40  ;;  %v2654_v12 = vpack.c.bf16 %v4758_v28, %v4759_v49  ;;  %v5544_v40 = vld [vmem:[#allocation2 + $0x1b7] sm:$0xff]  ;;  %v5548_v28 = vpack.c.bf16 %v2410_v59, %v5496_v38 }
 0x1a7   : > { %v2290_v58 = vpop.f32.mrf.mxu2  ;;  %v2510_v4 = vpop.f32.mrf.mxu3 }
 0x1a8   : > { %v2584_v13 = vadd.f32 %v2510_v4, %v2362_v9  ;;  %v2100_v10 = vpop.f32.mrf.mxu1  ;;  %v2732_v36 = vpop.f32.mrf.mxu0 }
 0x1a9   : > { %v2101_v1 = vadd.f32 %v2100_v10, %v5449_v37 }
 0x1aa   : > { %v5539_v30 = vadd.f32 %v2732_v36, %v2584_v13  ;;  %v2433_v13 = vpack.c.bf16 %v5544_v40, %v2412_v45 }
 0x1ab   : > { %4381 = vmatmul.msk.bf16.gmra.mxu2 %vm923_vm2, %v5537_v15  ;;  %4414 = vmatmul.msk.bf16.gmra.mxu0 %vm923_vm2, %v2654_v12  ;;  %v2363_v2 = vadd.f32 %v2290_v58, %v2101_v1  ;;  %v2193_v58 = vld [vmem:[#allocation2 + $0x1b1] sm:$0xff] }
 0x1ac   : > { %5990 = vst [vmem:[#allocation5_spill] sm:$0xff] %v5539_v30 }
 0x1af   : > { %v2293_v26 = vpop.f32.mrf.mxu2  ;;  %v2512_v9 = vpop.f32.mrf.mxu3 }
 0x1b0   : > { %v2585_v4 = vadd.f32 %v2512_v9, %v2363_v2  ;;  %v2103_v10 = vpop.f32.mrf.mxu1  ;;  %v2734_v37 = vpop.f32.mrf.mxu0 }
 0x1b1   : > { %v2104_v63 = vadd.f32 %v2103_v10, %v5463_v55  ;;  %v2192_v55 = vld [vmem:[#allocation2 + $0x1a9] sm:$0xff] }
 0x1b2   : > { %v5551_v36 = vadd.f32 %v2734_v37, %v2585_v4  ;;  %v5557_v59 = vpack.c.bf16 %v2193_v58, %v2192_v55  ;;  %v4760_v10 = vld [vmem:[#allocation2 + $0x1b0] sm:$0xff]  ;;  %v4761_v4 = vld [vmem:[#allocation2 + $0x1b8] sm:$0xff]  ;;  %v5568_v55 = vpack.c.bf16 %v2412_v45, %v5523_v51 }
 0x1b3   : > { %4364 = vmatmul.msk.bf16.gmra.mxu1 %vm923_vm2, %v5548_v28  ;;  %4398 = vmatmul.msk.bf16.gmra.mxu3 %vm923_vm2, %v2433_v13  ;;  %v2364_v12 = vadd.f32 %v2293_v26, %v2104_v63  ;;  %v2655_v37 = vpack.c.bf16 %v4761_v4, %v4760_v10  ;;  %v5564_v26 = vld [vmem:[#allocation2 + $0x1c7] sm:$0xff]  ;;  %v2414_v58 = vld [vmem:[#allocation2 + $0x1bf] sm:$0xff] }
 0x1b4   : > { %5991 = vst [vmem:[#allocation6_spill] sm:$0xff] %v5551_v36  ;;  %v2637_v10 = vld [vmem:[#allocation2 + $0x1c8] sm:$0xff] }
 0x1b5   : > { %5992 = vst [vmem:[#allocation7_spill] sm:$0xff] %v5557_v59 }
 0x1b7   : > { %v2295_v1 = vpop.f32.mrf.mxu2  ;;  %v2515_v49 = vpop.f32.mrf.mxu3 }
 0x1b8   : > { %v2586_v2 = vadd.f32 %v2515_v49, %v2364_v12  ;;  %v2105_v9 = vpop.f32.mrf.mxu1  ;;  %v2737_v8 = vpop.f32.mrf.mxu0 }
 0x1b9   : > { %v2106_v38 = vadd.f32 %v2105_v9, %v5475_v3 }
 0x1ba   : > { %v5559_v36 = vadd.f32 %v2737_v8, %v2586_v2  ;;  %v2434_v8 = vpack.c.bf16 %v5564_v26, %v2414_v58 }
 0x1bb   : > { %4382 = vmatmul.msk.bf16.gmra.mxu2 %vm923_vm2, %v5557_v59  ;;  %4415 = vmatmul.msk.bf16.gmra.mxu0 %vm923_vm2, %v2655_v37  ;;  %v2365_v63 = vadd.f32 %v2295_v1, %v2106_v38  ;;  %v2195_v38 = vld [vmem:[#allocation2 + $0x1c1] sm:$0xff] }
 0x1bc   : > { %5993 = vst [vmem:[#allocation8_spill] sm:$0xff] %v5559_v36 }
 0x1bf   : > { %v2298_v13 = vpop.f32.mrf.mxu2  ;;  %v2517_v12 = vpop.f32.mrf.mxu3 }
 0x1c0   : > { %v2587_v49 = vadd.f32 %v2517_v12, %v2365_v63  ;;  %v2108_v30 = vpop.f32.mrf.mxu1  ;;  %v2739_v3 = vpop.f32.mrf.mxu0 }
 0x1c1   : > { %v2109_v9 = vadd.f32 %v2108_v30, %v5340_v42  ;;  %v2194_v30 = vld [vmem:[#allocation2 + $0x1b9] sm:$0xff] }
 0x1c2   : > { %v5571_v2 = vadd.f32 %v2739_v3, %v2587_v49  ;;  %v5577_v45 = vpack.c.bf16 %v2195_v38, %v2194_v30  ;;  %v4762_v49 = vld [vmem:[#allocation2 + $0x1c0] sm:$0xff]  ;;  %v2197_v30 = vld [vmem:[#allocation2 + $0x1d1] sm:$0xff] }
 0x1c3   : > { %4365 = vmatmul.msk.bf16.gmra.mxu1 %vm923_vm2, %v5568_v55  ;;  %4399 = vmatmul.msk.bf16.gmra.mxu3 %vm923_vm2, %v2434_v8  ;;  %v2366_v1 = vadd.f32 %v2298_v13, %v2109_v9  ;;  %v2656_v3 = vpack.c.bf16 %v2637_v10, %v4762_v49  ;;  %v2416_v9 = vld [vmem:[#allocation2 + $0x1cf] sm:$0xff]  ;;  %v5584_v8 = vld [vmem:[#allocation2 + $0x1d7] sm:$0xff]  ;;  %v5588_v10 = vpack.c.bf16 %v2414_v58, %v5544_v40 }
 0x1c4   : > { %5994 = vst [vmem:[#allocation9_spill] sm:$0xff] %v5571_v2  ;;  %v2639_v58 = vld [vmem:[#allocation2 + $0x1d8] sm:$0xff] }
 0x1c5   : > { %5995 = vst [vmem:[#allocation10_spill] sm:$0xff] %v5577_v45 }
 0x1c7   : > { %v2300_v4 = vpop.f32.mrf.mxu2  ;;  %v2520_v37 = vpop.f32.mrf.mxu3 }
 0x1c8   : > { %v2588_v63 = vadd.f32 %v2520_v37, %v2366_v1  ;;  %v2110_v12 = vpop.f32.mrf.mxu1  ;;  %v2742_v42 = vpop.f32.mrf.mxu0 }
 0x1c9   : > { %v2111_v51 = vadd.f32 %v2110_v12, %v5367_v0 }
 0x1ca   : > { %v5579_v2 = vadd.f32 %v2742_v42, %v2588_v63  ;;  %v2435_v63 = vpack.c.bf16 %v5584_v8, %v2416_v9  ;;  %v2196_v42 = vld [vmem:[#allocation2 + $0x1c9] sm:$0xff] }
 0x1cb   : > { %4383 = vmatmul.msk.bf16.gmra.mxu2 %vm923_vm2, %v5577_v45  ;;  %4416 = vmatmul.msk.bf16.gmra.mxu0 %vm923_vm2, %v2656_v3  ;;  %v2367_v13 = vadd.f32 %v2300_v4, %v2111_v51  ;;  %v5596_v51 = vld [vmem:[#allocation2 + $0x1d0] sm:$0xff]  ;;  %v5604_v45 = vld [vmem:[#allocation2 + $0x1df] sm:$0xff] }
 0x1cc   : > { %5996 = vst [vmem:[#allocation11_spill] sm:$0xff] %v5579_v2 }
 0x1cf   : > { %v2303_v1 = vpop.f32.mrf.mxu2  ;;  %v2522_v37 = vpop.f32.mrf.mxu3 }
 0x1d0   : > { %v2589_v36 = vadd.f32 %v2522_v37, %v2367_v13  ;;  %v2113_v59 = vpop.f32.mrf.mxu1  ;;  %v2744_v0 = vpop.f32.mrf.mxu0  ;;  %v2657_v37 = vpack.c.bf16 %v2639_v58, %v5596_v51 }
 0x1d1   : > { %v2114_v38 = vadd.f32 %v2113_v59, %v5384_v61 }
 0x1d2   : > { %v5591_v12 = vadd.f32 %v2744_v0, %v2589_v36  ;;  %v2214_v36 = vpack.c.bf16 %v2197_v30, %v2196_v42  ;;  %v5608_v42 = vpack.c.bf16 %v2416_v9, %v5564_v26  ;;  %v5616_v26 = vld [vmem:[#allocation2 + $0x1e0] sm:$0xff] }
 0x1d3   : > { %4366 = vmatmul.msk.bf16.gmra.mxu1 %vm923_vm2, %v5588_v10  ;;  %4400 = vmatmul.msk.bf16.gmra.mxu3 %vm923_vm2, %v2435_v63  ;;  %v2368_v4 = vadd.f32 %v2303_v1, %v2114_v38  ;;  %v2419_v38 = vld [vmem:[#allocation2 + $0x1e7] sm:$0xff] }
 0x1d4   : > { %5997 = vst [vmem:[#allocation12_spill] sm:$0xff] %v5591_v12  ;;  %v2436_v30 = vpack.c.bf16 %v2419_v38, %v5604_v45 }
 0x1d7   : > { %v2305_v49 = vpop.f32.mrf.mxu2  ;;  %v2525_v3 = vpop.f32.mrf.mxu3 }
 0x1d8   : > { %v2590_v61 = vadd.f32 %v2525_v3, %v2368_v4  ;;  %v2115_v59 = vpop.f32.mrf.mxu1  ;;  %v2747_v40 = vpop.f32.mrf.mxu0 }
 0x1d9   : > { %v2116_v13 = vadd.f32 %v2115_v59, %v5405_v6  ;;  %v2641_v59 = vld [vmem:[#allocation2 + $0x1e8] sm:$0xff] }
 0x1da   : > { %v5600_v0 = vadd.f32 %v2747_v40, %v2590_v61 }
 0x1db   : > { %4384 = vmatmul.msk.bf16.gmra.mxu2 %vm923_vm2, %v2214_v36  ;;  %4417 = vmatmul.msk.bf16.gmra.mxu0 %vm923_vm2, %v2657_v37  ;;  %v2369_v1 = vadd.f32 %v2305_v49, %v2116_v13  ;;  %v2198_v37 = vld [vmem:[#allocation2 + $0x1d9] sm:$0xff] }
 0x1dc   : > { %5998 = vst [vmem:[#allocation13_spill] sm:$0xff] %v5600_v0 }
 0x1df   : > { %v2308_v63 = vpop.f32.mrf.mxu2  ;;  %v2527_v12 = vpop.f32.mrf.mxu3 }
 0x1e0   : > { %v2591_v2 = vadd.f32 %v2527_v12, %v2369_v1  ;;  %v2118_v4 = vpop.f32.mrf.mxu1  ;;  %v2749_v3 = vpop.f32.mrf.mxu0  ;;  %v2199_v12 = vld [vmem:[#allocation2 + $0x1e1] sm:$0xff]  ;;  %v2658_v1 = vpack.c.bf16 %v2641_v59, %v5616_v26 }
 0x1e1   : > { %v2119_v6 = vadd.f32 %v2118_v4, %v5419_v54  ;;  %v2421_v4 = vld [vmem:[#allocation2 + $0x1f7] sm:$0xff] }
 0x1e2   : > { %v5611_v61 = vadd.f32 %v2749_v3, %v2591_v2  ;;  %v2215_v2 = vpack.c.bf16 %v2199_v12, %v2198_v37  ;;  %v1835_v12 = vpack.c.bf16 %v5604_v45, %v5584_v8  ;;  %v3057_v37 = vld [vmem:[#allocation2 + $0x11f] sm:$0xff] }
 0x1e3   : > { %4367 = vmatmul.msk.bf16.gmra.mxu1 %vm923_vm2, %v5608_v42  ;;  %4401 = vmatmul.msk.bf16.gmra.mxu3 %vm923_vm2, %v2436_v30  ;;  %v2370_v49 = vadd.f32 %v2308_v63, %v2119_v6 }
 0x1e4   : > { %5999 = vst [vmem:[#allocation14_spill] sm:$0xff] %v5611_v61  ;;  %v5624_v61 = vld [vmem:[#allocation2 + $0x1ef] sm:$0xff] }
 0x1e5   : > { %v2437_v59 = vpack.c.bf16 %v2421_v4, %v5624_v61 }
 0x1e7   : > { %v2310_v40 = vpop.f32.mrf.mxu2  ;;  %v2530_v58 = vpop.f32.mrf.mxu3 }
 0x1e8   : > { %v2592_v13 = vadd.f32 %v2530_v58, %v2370_v49  ;;  %v2120_v36 = vpop.f32.mrf.mxu1  ;;  %v2752_v54 = vpop.f32.mrf.mxu0 }
 0x1e9   : > { %v2121_v9 = vadd.f32 %v2120_v36, %v5436_v43  ;;  %v2643_v36 = vld [vmem:[#allocation2 + $0x1f8] sm:$0xff] }
 0x1ea   : > { %v5620_v38 = vadd.f32 %v2752_v54, %v2592_v13  ;;  %v3056_v54 = vld [vmem:[#allocation2 + $0x117] sm:$0xff] }
 0x1eb   : > { %4385 = vmatmul.msk.bf16.gmra.mxu2 %vm923_vm2, %v2215_v2  ;;  %4418 = vmatmul.msk.bf16.gmra.mxu0 %vm923_vm2, %v2658_v1  ;;  %v2371_v63 = vadd.f32 %v2310_v40, %v2121_v9  ;;  %v3088_v4 = vpack.c.bf16 %v3057_v37, %v3056_v54 }
 0x1ec   : > { %6000 = vst [vmem:[#allocation15_spill] sm:$0xff] %v5620_v38 }
 0x1ef   : > { %v2313_v3 = vpop.f32.mrf.mxu2  ;;  %v2532_v6 = vpop.f32.mrf.mxu3 }
 0x1f0   : > { %v2593_v30 = vadd.f32 %v2532_v6, %v2371_v63  ;;  %v2123_v49 = vpop.f32.mrf.mxu1  ;;  %v2754_v58 = vpop.f32.mrf.mxu0  ;;  %v2642_v6 = vld [vmem:[#allocation2 + $0x1f0] sm:$0xff] }
 0x1f1   : > { %v2124_v43 = vadd.f32 %v2123_v49, %v5451_v27  ;;  %v2659_v49 = vpack.c.bf16 %v2643_v36, %v2642_v6 }
 0x1f2   : > { %v5630_v13 = vadd.f32 %v2754_v58, %v2593_v30  ;;  %v2834_v58 = vld [vmem:[#allocation2 + $0x101] sm:$0xff] }
 0x1f3   : > { %4368 = vmatmul.msk.bf16.gmra.mxu1 %vm923_vm2, %v1835_v12  ;;  %4402 = vmatmul.msk.bf16.gmra.mxu3 %vm923_vm2, %v2437_v59  ;;  %v2372_v40 = vadd.f32 %v2313_v3, %v2124_v43  ;;  %v2835_v43 = vld [vmem:[#allocation2 + $0x109] sm:$0xff]  ;;  %v3278_v12 = vld [vmem:[#allocation2 + $0x118] sm:$0xff]  ;;  %v3279_v59 = vld [vmem:[#allocation2 + $0x120] sm:$0xff] }
 0x1f4   : > { %6001 = vst [vmem:[#allocation16_spill] sm:$0xff] %v5630_v13  ;;  %v2866_v36 = vpack.c.bf16 %v2835_v43, %v2834_v58  ;;  %v3310_v54 = vpack.c.bf16 %v3279_v59, %v3278_v12  ;;  %v2836_v43 = vld [vmem:[#allocation2 + $0x111] sm:$0xff]  ;;  %v3280_v12 = vld [vmem:[#allocation2 + $0x128] sm:$0xff] }
 0x1f5   : > { %v3281_v59 = vld [vmem:[#allocation2 + $0x130] sm:$0xff] }
 0x1f7   : > { %v2315_v9 = vpop.f32.mrf.mxu2  ;;  %v2535_v2 = vpop.f32.mrf.mxu3 }
 0x1f8   : > { %v2594_v1 = vadd.f32 %v2535_v2, %v2372_v40  ;;  %v2125_v63 = vpop.f32.mrf.mxu1  ;;  %v2757_v27 = vpop.f32.mrf.mxu0 }
 0x1f9   : > { %v2126_v8 = vadd.f32 %v2125_v63, %v5465_v56  ;;  %v3500_v63 = vld [vmem:[#allocation2 + $0x119] sm:$0xff] }
 0x1fa   : > { %v5635_v30 = vadd.f32 %v2757_v27, %v2594_v1  ;;  %v3058_v1 = vld [vmem:[#allocation2 + $0x127] sm:$0xff] }
 0x1fb   : > { %4419 = vmatmul.msk.bf16.gmra.mxu0 %vm923_vm2, %v2659_v49  ;;  %4438 = vmatmul.msk.bf16.vlgmr.msra.gmra.mxu2 %vm923_vm2, %v3088_v4  ;;  %v2373_v3 = vadd.f32 %v2315_v9, %v2126_v8  ;;  %v3501_v27 = vld [vmem:[#allocation2 + $0x121] sm:$0xff] }
 0x1fc   : > { %v3532_v58 = vpack.c.bf16 %v3501_v27, %v3500_v63 }
 0x1ff   : > { %v2318_v13 = vpop.f32.mrf.mxu2  ;;  %v2537_v40 = vpop.f32.mrf.mxu3 }
 0x200   : > { %v2595_v2 = vadd.f32 %v2537_v40, %v2373_v3  ;;  %v2128_v38 = vpop.f32.mrf.mxu1  ;;  %v2759_v0 = vpop.f32.mrf.mxu0  ;;  %v3059_v40 = vld [vmem:[#allocation2 + $0x12f] sm:$0xff] }
 0x201   : > { %v2129_v56 = vadd.f32 %v2128_v38, %v5334_v53  ;;  %v3089_v38 = vpack.c.bf16 %v3059_v40, %v3058_v1  ;;  %v3311_v1 = vpack.c.bf16 %v3281_v59, %v3280_v12  ;;  %v3503_v40 = vld [vmem:[#allocation2 + $0x131] sm:$0xff] }
 0x202   : > { %v5640_v37 = vadd.f32 %v2759_v0, %v2595_v2 }
 0x203   : > { %4421 = vmatmul.msk.bf16.vlgmr.msra.gmra.mxu1 %vm923_vm2, %v2866_v36  ;;  %4455 = vmatmul.msk.bf16.vlgmr.msra.gmra.mxu3 %vm923_vm2, %v3310_v54  ;;  %v2374_v9 = vadd.f32 %v2318_v13, %v2129_v56 }
 0x207   : > { %v2320_v6 = vpop.f32.mrf.mxu2  ;;  %v2540_v8 = vpop.f32.mrf.mxu3 }
 0x208   : > { %v2596_v49 = vadd.f32 %v2540_v8, %v2374_v9  ;;  %v2130_v4 = vpop.f32.mrf.mxu1  ;;  %v2762_v3 = vpop.f32.mrf.mxu0 }
 0x209   : > { %v2131_v53 = vadd.f32 %v2130_v4, %v5354_v21  ;;  %v2867_v21 = vpack.c.bf16 %v3500_v63, %v2836_v43 }
 0x20a   : > { %v5645_v0 = vadd.f32 %v2762_v3, %v2596_v49  ;;  %v3061_v3 = vld [vmem:[#allocation2 + $0x13f] sm:$0xff] }
 0x20b   : > { %4439 = vmatmul.msk.bf16.gmra.mxu2 %vm923_vm2, %v3089_v38  ;;  %4472 = vmatmul.msk.bf16.vlgmr.msra.gmra.mxu0 %vm923_vm2, %v3532_v58  ;;  %v2375_v13 = vadd.f32 %v2320_v6, %v2131_v53  ;;  %v3060_v6 = vld [vmem:[#allocation2 + $0x137] sm:$0xff] }
 0x20c   : > { %6002 = vst [vmem:[#allocation17_spill] sm:$0xff] %v5645_v0  ;;  %v3502_v0 = vld [vmem:[#allocation2 + $0x129] sm:$0xff]  ;;  %v3090_v63 = vpack.c.bf16 %v3061_v3, %v3060_v6 }
 0x20d   : > { %v3533_v43 = vpack.c.bf16 %v3503_v40, %v3502_v0 }
 0x20f   : > { %v2323_v2 = vpop.f32.mrf.mxu2  ;;  %v2542_v56 = vpop.f32.mrf.mxu3 }
 0x210   : > { %v2597_v36 = vadd.f32 %v2542_v56, %v2375_v13  ;;  %v2133_v54 = vpop.f32.mrf.mxu1  ;;  %v2764_v9 = vpop.f32.mrf.mxu0 }
 0x211   : > { %v2134_v8 = vadd.f32 %v2133_v54, %v5377_v47 }
 0x212   : > { %v5650_v4 = vadd.f32 %v2764_v9, %v2597_v36  ;;  %v3283_v36 = vld [vmem:[#allocation2 + $0x140] sm:$0xff] }
 0x213   : > { %4422 = vmatmul.msk.bf16.gmra.mxu1 %vm923_vm2, %v2867_v21  ;;  %4456 = vmatmul.msk.bf16.gmra.mxu3 %vm923_vm2, %v3311_v1  ;;  %v2376_v49 = vadd.f32 %v2323_v2, %v2134_v8  ;;  %v3282_v2 = vld [vmem:[#allocation2 + $0x138] sm:$0xff] }
 0x217   : > { %v2325_v53 = vpop.f32.mrf.mxu2  ;;  %v2545_v38 = vpop.f32.mrf.mxu3 }
 0x218   : > { %v2598_v58 = vadd.f32 %v2545_v38, %v2376_v49  ;;  %v2135_v13 = vpop.f32.mrf.mxu1  ;;  %v2767_v56 = vpop.f32.mrf.mxu0  ;;  %v2868_v38 = vpack.c.bf16 %v3502_v0, %v3501_v27 }
 0x219   : > { %v2136_v47 = vadd.f32 %v2135_v13, %v5400_v17  ;;  %v3312_v17 = vpack.c.bf16 %v3283_v36, %v3282_v2  ;;  %v3505_v13 = vld [vmem:[#allocation2 + $0x141] sm:$0xff] }
 0x21a   : > { %v5655_v12 = vadd.f32 %v2767_v56, %v2598_v58  ;;  %v3063_v58 = vld [vmem:[#allocation2 + $0x14f] sm:$0xff] }
 0x21b   : > { %4440 = vmatmul.msk.bf16.gmra.mxu2 %vm923_vm2, %v3090_v63  ;;  %4473 = vmatmul.msk.bf16.gmra.mxu0 %vm923_vm2, %v3533_v43  ;;  %v2377_v59 = vadd.f32 %v2325_v53, %v2136_v47  ;;  %v3504_v53 = vld [vmem:[#allocation2 + $0x139] sm:$0xff] }
 0x21c   : > { %v3534_v0 = vpack.c.bf16 %v3505_v13, %v3504_v53 }
 0x21f   : > { %v2328_v54 = vpop.f32.mrf.mxu2  ;;  %v2547_v9 = vpop.f32.mrf.mxu3 }
 0x220   : > { %v2599_v8 = vadd.f32 %v2547_v9, %v2377_v59  ;;  %v2138_v21 = vpop.f32.mrf.mxu1  ;;  %v2769_v1 = vpop.f32.mrf.mxu0  ;;  %v3062_v9 = vld [vmem:[#allocation2 + $0x147] sm:$0xff] }
 0x221   : > { %v2139_v49 = vadd.f32 %v2138_v21, %v5416_v33  ;;  %v3091_v27 = vpack.c.bf16 %v3063_v58, %v3062_v9 }
 0x222   : > { %v5660_v6 = vadd.f32 %v2769_v1, %v2599_v8 }
 0x223   : > { %4423 = vmatmul.msk.bf16.gmra.mxu1 %vm923_vm2, %v2868_v38  ;;  %4457 = vmatmul.msk.bf16.gmra.mxu3 %vm923_vm2, %v3312_v17  ;;  %v2378_v3 = vadd.f32 %v2328_v54, %v2139_v49  ;;  %v3285_v54 = vld [vmem:[#allocation2 + $0x150] sm:$0xff]  ;;  %v3284_v17 = vld [vmem:[#allocation2 + $0x148] sm:$0xff] }
 0x227   : > { %v2330_v56 = vpop.f32.mrf.mxu2  ;;  %v2550_v47 = vpop.f32.mrf.mxu3 }
 0x228   : > { %v2600_v63 = vadd.f32 %v2550_v47, %v2378_v3  ;;  %v2140_v43 = vpop.f32.mrf.mxu1  ;;  %v2772_v59 = vpop.f32.mrf.mxu0  ;;  %v2869_v47 = vpack.c.bf16 %v3504_v53, %v3503_v40 }
 0x229   : > { %v2141_v33 = vadd.f32 %v2140_v43, %v5433_v34  ;;  %v3313_v34 = vpack.c.bf16 %v3285_v54, %v3284_v17  ;;  %v3064_v43 = vld [vmem:[#allocation2 + $0x157] sm:$0xff] }
 0x22a   : > { %v5665_v2 = vadd.f32 %v2772_v59, %v2600_v63  ;;  %v3507_v59 = vld [vmem:[#allocation2 + $0x151] sm:$0xff] }
 0x22b   : > { %4441 = vmatmul.msk.bf16.gmra.mxu2 %vm923_vm2, %v3091_v27  ;;  %4474 = vmatmul.msk.bf16.gmra.mxu0 %vm923_vm2, %v3534_v0  ;;  %v2379_v36 = vadd.f32 %v2330_v56, %v2141_v33  ;;  %v3065_v56 = vld [vmem:[#allocation2 + $0x15f] sm:$0xff] }
 0x22c   : > { %v3092_v40 = vpack.c.bf16 %v3065_v56, %v3064_v43 }
 0x22f   : > { %v2333_v8 = vpop.f32.mrf.mxu2  ;;  %v2552_v21 = vpop.f32.mrf.mxu3 }
 0x230   : > { %v2601_v1 = vadd.f32 %v2552_v21, %v2379_v36  ;;  %v2143_v49 = vpop.f32.mrf.mxu1  ;;  %v2774_v38 = vpop.f32.mrf.mxu0  ;;  %v3506_v21 = vld [vmem:[#allocation2 + $0x149] sm:$0xff] }
 0x231   : > { %v2144_v3 = vadd.f32 %v2143_v49, %v5446_v25  ;;  %v3535_v53 = vpack.c.bf16 %v3507_v59, %v3506_v21 }
 0x232   : > { %v5670_v58 = vadd.f32 %v2774_v38, %v2601_v1  ;;  %v3286_v1 = vld [vmem:[#allocation2 + $0x158] sm:$0xff] }
 0x233   : > { %4424 = vmatmul.msk.bf16.gmra.mxu1 %vm923_vm2, %v2869_v47  ;;  %4458 = vmatmul.msk.bf16.gmra.mxu3 %vm923_vm2, %v3313_v34  ;;  %v2380_v63 = vadd.f32 %v2333_v8, %v2144_v3  ;;  %v3287_v34 = vld [vmem:[#allocation2 + $0x160] sm:$0xff] }
 0x237   : > { %v2335_v9 = vpop.f32.mrf.mxu2  ;;  %v2555_v33 = vpop.f32.mrf.mxu3 }
 0x238   : > { %v2602_v27 = vadd.f32 %v2555_v33, %v2380_v63  ;;  %v2145_v0 = vpop.f32.mrf.mxu1  ;;  %v2777_v36 = vpop.f32.mrf.mxu0  ;;  %v2870_v33 = vpack.c.bf16 %v3506_v21, %v3505_v13 }
 0x239   : > { %v2146_v25 = vadd.f32 %v2145_v0, %v5459_v35  ;;  %v3314_v35 = vpack.c.bf16 %v3287_v34, %v3286_v1 }
 0x23a   : > { %v5675_v54 = vadd.f32 %v2777_v36, %v2602_v27  ;;  %v3066_v27 = vld [vmem:[#allocation2 + $0x167] sm:$0xff] }
 0x23b   : > { %4442 = vmatmul.msk.bf16.gmra.mxu2 %vm923_vm2, %v3092_v40  ;;  %4475 = vmatmul.msk.bf16.gmra.mxu0 %vm923_vm2, %v3535_v53  ;;  %v2381_v8 = vadd.f32 %v2335_v9, %v2146_v25  ;;  %v3508_v9 = vld [vmem:[#allocation2 + $0x159] sm:$0xff] }
 0x23f   : > { %v2338_v49 = vpop.f32.mrf.mxu2  ;;  %v2557_v38 = vpop.f32.mrf.mxu3 }
 0x240   : > { %v2603_v17 = vadd.f32 %v2557_v38, %v2381_v8  ;;  %v2148_v3 = vpop.f32.mrf.mxu1  ;;  %v2779_v47 = vpop.f32.mrf.mxu0  ;;  %v3067_v8 = vld [vmem:[#allocation2 + $0x16f] sm:$0xff]  ;;  %v3509_v38 = vld [vmem:[#allocation2 + $0x161] sm:$0xff] }
 0x241   : > { %v2149_v63 = vadd.f32 %v2148_v3, %v5346_v11  ;;  %v3093_v13 = vpack.c.bf16 %v3067_v8, %v3066_v27  ;;  %v3536_v21 = vpack.c.bf16 %v3509_v38, %v3508_v9 }
 0x242   : > { %v5680_v43 = vadd.f32 %v2779_v47, %v2603_v17  ;;  %v3289_v17 = vld [vmem:[#allocation2 + $0x170] sm:$0xff] }
 0x243   : > { %4425 = vmatmul.msk.bf16.gmra.mxu1 %vm923_vm2, %v2870_v33  ;;  %4459 = vmatmul.msk.bf16.gmra.mxu3 %vm923_vm2, %v3314_v35  ;;  %v2382_v56 = vadd.f32 %v2338_v49, %v2149_v63  ;;  %v3288_v35 = vld [vmem:[#allocation2 + $0x168] sm:$0xff] }
 0x247   : > { %v2340_v0 = vpop.f32.mrf.mxu2  ;;  %v2560_v36 = vpop.f32.mrf.mxu3 }
 0x248   : > { %v2604_v25 = vadd.f32 %v2560_v36, %v2382_v56  ;;  %v2150_v40 = vpop.f32.mrf.mxu1  ;;  %v2782_v53 = vpop.f32.mrf.mxu0  ;;  %v2871_v36 = vpack.c.bf16 %v3508_v9, %v3507_v59 }
 0x249   : > { %v2151_v11 = vadd.f32 %v2150_v40, %v5372_v32  ;;  %v3315_v32 = vpack.c.bf16 %v3289_v17, %v3288_v35  ;;  %v3510_v40 = vld [vmem:[#allocation2 + $0x169] sm:$0xff] }
 0x24a   : > { %v5685_v1 = vadd.f32 %v2782_v53, %v2604_v25 }
 0x24b   : > { %4443 = vmatmul.msk.bf16.gmra.mxu2 %vm923_vm2, %v3093_v13  ;;  %4476 = vmatmul.msk.bf16.gmra.mxu0 %vm923_vm2, %v3536_v21  ;;  %v2383_v49 = vadd.f32 %v2340_v0, %v2151_v11  ;;  %v3511_v0 = vld [vmem:[#allocation2 + $0x171] sm:$0xff] }
 0x24c   : > { %v3537_v59 = vpack.c.bf16 %v3511_v0, %v3510_v40 }
 0x24f   : > { %v2343_v3 = vpop.f32.mrf.mxu2  ;;  %v2562_v47 = vpop.f32.mrf.mxu3 }
 0x250   : > { %v2605_v34 = vadd.f32 %v2562_v47, %v2383_v49  ;;  %v2153_v63 = vpop.f32.mrf.mxu1  ;;  %v2784_v33 = vpop.f32.mrf.mxu0  ;;  %v3068_v49 = vld [vmem:[#allocation2 + $0x177] sm:$0xff] }
 0x251   : > { %v2154_v56 = vadd.f32 %v2153_v63, %v5398_v14  ;;  %v3094_v14 = vpack.c.bf16 %v5477_v39, %v3068_v49 }
 0x252   : > { %v5690_v27 = vadd.f32 %v2784_v33, %v2605_v34 }
 0x253   : > { %4426 = vmatmul.msk.bf16.gmra.mxu1 %vm923_vm2, %v2871_v36  ;;  %4460 = vmatmul.msk.bf16.gmra.mxu3 %vm923_vm2, %v3315_v32  ;;  %v2384_v25 = vadd.f32 %v2343_v3, %v2154_v56  ;;  %v3290_v56 = vld [vmem:[#allocation2 + $0x178] sm:$0xff]  ;;  %v2872_v32 = vpack.c.bf16 %v3510_v40, %v3509_v38 }
 0x254   : > { %v2849_v40 = vld [vmem:[#allocation2 + $0x179] sm:$0xff] }
 0x257   : > { %v2345_v53 = vpop.f32.mrf.mxu2  ;;  %v2565_v8 = vpop.f32.mrf.mxu3 }
 0x258   : > { %v2606_v11 = vadd.f32 %v2565_v8, %v2384_v25  ;;  %v2155_v13 = vpop.f32.mrf.mxu1  ;;  %v2787_v21 = vpop.f32.mrf.mxu0  ;;  %v3070_v8 = vld [vmem:[#allocation2 + $0x187] sm:$0xff] }
 0x259   : > { %v2156_v47 = vadd.f32 %v2155_v13, %v5414_v60  ;;  %v3316_v60 = vpack.c.bf16 %v5485_v31, %v3290_v56 }
 0x25a   : > { %v5696_v9 = vadd.f32 %v2787_v21, %v2606_v11 }
 0x25b   : > { %4444 = vmatmul.msk.bf16.gmra.mxu2 %vm923_vm2, %v3094_v14  ;;  %4477 = vmatmul.msk.bf16.gmra.mxu0 %vm923_vm2, %v3537_v59  ;;  %v2385_v17 = vadd.f32 %v2345_v53, %v2156_v47  ;;  %v3292_v14 = vld [vmem:[#allocation2 + $0x188] sm:$0xff] }
 0x25f   : > { %v2348_v3 = vpop.f32.mrf.mxu2  ;;  %v2567_v34 = vpop.f32.mrf.mxu3 }
 0x260   : > { %v2607_v63 = vadd.f32 %v2567_v34, %v2385_v17  ;;  %v2158_v33 = vpop.f32.mrf.mxu1  ;;  %v2789_v35 = vpop.f32.mrf.mxu0 }
 0x261   : > { %v2159_v36 = vadd.f32 %v2158_v33, %v5429_v57  ;;  %v3095_v57 = vpack.c.bf16 %v5498_v52, %v3070_v8  ;;  %v3317_v52 = vpack.c.bf16 %v5511_v23, %v3292_v14  ;;  %v2850_v23 = vld [vmem:[#allocation2 + $0x181] sm:$0xff] }
 0x262   : > { %v5702_v39 = vadd.f32 %v2789_v35, %v2607_v63 }
 0x263   : > { %4427 = vmatmul.msk.bf16.gmra.mxu1 %vm923_vm2, %v2872_v32  ;;  %4461 = vmatmul.msk.bf16.gmra.mxu3 %vm923_vm2, %v3316_v60  ;;  %v2386_v25 = vadd.f32 %v2348_v3, %v2159_v36 }
 0x267   : > { %v2350_v53 = vpop.f32.mrf.mxu2  ;;  %v2570_v11 = vpop.f32.mrf.mxu3 }
 0x268   : > { %v2608_v13 = vadd.f32 %v2570_v11, %v2386_v25  ;;  %v2160_v21 = vpop.f32.mrf.mxu1  ;;  %v2792_v49 = vpop.f32.mrf.mxu0 }
 0x269   : > { %v2161_v47 = vadd.f32 %v2160_v21, %v5444_v24  ;;  %v2873_v24 = vpack.c.bf16 %v2849_v40, %v3511_v0 }
 0x26a   : > { %v5708_v38 = vadd.f32 %v2792_v49, %v2608_v13 }
 0x26b   : > { %4445 = vmatmul.msk.bf16.gmra.mxu2 %vm923_vm2, %v3095_v57  ;;  %4478 = vmatmul.msk.bf16.gmra.mxu0 %vm923_vm2, %v5488_v22  ;;  %v2387_v31 = vadd.f32 %v2350_v53, %v2161_v47  ;;  %v2874_v47 = vpack.c.bf16 %v5509_v48, %v2850_v23 }
 0x26f   : > { %v2353_v59 = vpop.f32.mrf.mxu2  ;;  %v2572_v17 = vpop.f32.mrf.mxu3 }
 0x270   : > { %v2609_v3 = vadd.f32 %v2572_v17, %v2387_v31  ;;  %v2163_v34 = vpop.f32.mrf.mxu1  ;;  %v2794_v63 = vpop.f32.mrf.mxu0 }
 0x271   : > { %v2164_v33 = vadd.f32 %v2163_v34, %v5461_v44  ;;  %v2852_v34 = vld [vmem:[#allocation2 + $0x191] sm:$0xff] }
 0x272   : > { %v5715_v35 = vadd.f32 %v2794_v63, %v2609_v3 }
 0x273   : > { %4428 = vmatmul.msk.bf16.gmra.mxu1 %vm923_vm2, %v2873_v24  ;;  %4462 = vmatmul.msk.bf16.gmra.mxu3 %vm923_vm2, %v3317_v52  ;;  %v2388_v22 = vadd.f32 %v2353_v59, %v2164_v33 }
 0x277   : > { %v2355_v56 = vpop.f32.mrf.mxu2  ;;  %v2575_v36 = vpop.f32.mrf.mxu3 }
 0x278   : > { %v2610_v32 = vadd.f32 %v2575_v36, %v2388_v22  ;;  %v2165_v60 = vpop.f32.mrf.mxu1  ;;  %v2797_v25 = vpop.f32.mrf.mxu0 }
 0x279   : > { %v2166_v8 = vadd.f32 %v2165_v60, %v5473_v20 }
 0x27a   : > { %v5720_v53 = vadd.f32 %v2797_v25, %v2610_v32  ;;  %v3762_v32 = vpop.permute.xlu1 %3761 }
 0x27b   : > { %4446 = vmatmul.msk.bf16.gmra.mxu2 %vm923_vm2, %v5548_v28  ;;  %4479 = vmatmul.msk.bf16.gmra.mxu0 %vm923_vm2, %v5515_v46  ;;  %v2389_v44 = vadd.f32 %v2355_v56, %v2166_v8  ;;  %v6003_v28 = vpack.c.bf16 %v5218_v19, %v5216_v18  ;;  %v3757_v18 = vpop.permute.xlu0 %3756  ;;  %v2875_v56 = vpack.c.bf16 %v5533_v29, %v2852_v34 }
 0x27f   : > { %v2577_v0 = vpop.f32.mrf.mxu3  ;;  %v3166_v11 = vpop.f32.mrf.mxu2 }
 0x280   : > { %v2611_v13 = vadd.f32 %v2577_v0, %v2389_v44  ;;  %v2799_v21 = vpop.f32.mrf.mxu0  ;;  %v2944_v49 = vpop.f32.mrf.mxu1 }
 0x281   : > { %v3024_v20 = vadd.f32 %v2944_v49, %v5491_v41 }
 0x282   : > { %v5727_v57 = vadd.f32 %v2799_v21, %v2611_v13 }
 0x283   : > { %4429 = vmatmul.msk.bf16.gmra.mxu1 %vm923_vm2, %v2874_v47  ;;  %4463 = vmatmul.msk.bf16.gmra.mxu3 %vm923_vm2, %v6003_v28  ;;  %v3246_v46 = vadd.f32 %v3166_v11, %v3024_v20 }
 0x287   : > { %v3168_v31 = vpop.f32.mrf.mxu2  ;;  %v3388_v40 = vpop.f32.mrf.mxu3 }
 0x288   : > { %v3468_v14 = vadd.f32 %v3388_v40, %v3246_v46  ;;  %v2946_v59 = vpop.f32.mrf.mxu1  ;;  %v3610_v17 = vpop.f32.mrf.mxu0  ;;  %v6005_v40 = vld [vmem:[#allocation7_spill] sm:$0xff] }
 0x289   : > { %v3025_v48 = vadd.f32 %v2946_v59, %v5505_v62 }
 0x28a   : > { %v3690_v3 = vadd.f32 %v3610_v17, %v3468_v14 }
 0x28b   : > { %4447 = vmatmul.msk.bf16.gmra.mxu2 %vm923_vm2, %v5568_v55  ;;  %4480 = vmatmul.msk.bf16.gmra.mxu0 %vm923_vm2, %v5537_v15  ;;  %v3247_v19 = vadd.f32 %v3168_v31, %v3025_v48  ;;  %v6004_v15 = vpack.c.bf16 %v5073_v5, %v5079_v7  ;;  %v3767_v31 = vpop.permute.xlu2 %3766 }
 0x28c   : > { %v4123_v41 = vpack.c.bf16 %v3690_v3, %v3690_v3  ;;  %v3914_v24 = vmul.f32 %v3757_v18, %v3690_v3 }
 0x28e   : > { %4156 = vst.msk [vmem:[%s4876_s24] sm:$0xf] %vm4155_vm3, %v4123_v41  ;;  %v4020_v60 = vmul.f32 %v3914_v24, %v3690_v3  ;;  %v3947_v44 = vsel %vm923_vm2, %v3914_v24, 0.0  ;;  %v2854_v41 = vld [vmem:[#allocation2 + $0x1a1] sm:$0xff]  ;;  %v2855_v24 = vld [vmem:[#allocation2 + $0x1a9] sm:$0xff] }
 0x28f   : > { %v3171_v63 = vpop.f32.mrf.mxu2  ;;  %v3390_v33 = vpop.f32.mrf.mxu3 }
 0x290   : > { %v3469_v52 = vadd.f32 %v3390_v33, %v3247_v19  ;;  %v2949_v62 = vpop.f32.mrf.mxu1  ;;  %v3612_v22 = vpop.f32.mrf.mxu0  ;;  %v4052_v21 = vsel %vm923_vm2, %v4020_v60, 0.0 }
 0x291   : > { %v3026_v55 = vadd.f32 %v2949_v62, %v5518_v16  ;;  %v2876_v62 = vpack.c.bf16 %v2855_v24, %v2854_v41  ;;  %v2857_v41 = vld [vmem:[#allocation2 + $0x1b9] sm:$0xff] }
 0x292   : > { %v3691_v36 = vadd.f32 %v3612_v22, %v3469_v52  ;;  %v6006_v22 = vld [vmem:[#allocation5_spill] sm:$0xff] }
 0x293   : > { %4430 = vmatmul.msk.bf16.gmra.mxu1 %vm923_vm2, %v2875_v56  ;;  %4464 = vmatmul.msk.bf16.gmra.mxu3 %vm923_vm2, %v6004_v15  ;;  %v3248_v16 = vadd.f32 %v3171_v63, %v3026_v55  ;;  %v6008_v15 = vld [vmem:[#allocation3_spill] sm:$0xff] }
 0x294   : > { %v3915_v25 = vmul.f32 %v3762_v32, %v3691_v36  ;;  %v4124_v8 = vpack.c.bf16 %v3691_v36, %v3691_v36  ;;  %v6007_v32 = vld [vmem:[#allocation4_spill] sm:$0xff] }
 0x295   : > { %v6009_v60 = vpack.c.bf16 %v6007_v32, %v6008_v15 }
 0x296   : > { %v3948_v23 = vsel %vm923_vm2, %v3915_v25, 0.0  ;;  %v4021_v0 = vmul.f32 %v3915_v25, %v3691_v36  ;;  %4157 = vst.msk [vmem:[%s4876_s24 + $0x4] sm:$0xf] %vm4155_vm3, %v4124_v8  ;;  %v3772_v36 = vpop.permute.xlu0 %3771 }
 0x297   : > { %v3949_v29 = vadd.f32 %v3948_v23, %v3947_v44  ;;  %v3173_v11 = vpop.f32.mrf.mxu2  ;;  %v3393_v13 = vpop.f32.mrf.mxu3 }
 0x298   : > { %v4053_v5 = vsel %vm923_vm2, %v4021_v0, 0.0  ;;  %v3470_v7 = vadd.f32 %v3393_v13, %v3248_v16  ;;  %v2951_v49 = vpop.f32.mrf.mxu1  ;;  %v3615_v47 = vpop.f32.mrf.mxu0 }
 0x299   : > { %v4054_v20 = vadd.f32 %v4053_v5, %v4052_v21  ;;  %v3027_v28 = vadd.f32 %v2951_v49, %v5529_v50 }
 0x29a   : > { %v3692_v46 = vadd.f32 %v3615_v47, %v3470_v7  ;;  %v6010_v47 = vld [vmem:[#allocation6_spill] sm:$0xff] }
 0x29b   : > { %4448 = vmatmul.msk.bf16.gmra.mxu2 %vm923_vm2, %v5588_v10  ;;  %4481 = vmatmul.msk.bf16.gmra.mxu0 %vm923_vm2, %v6005_v40  ;;  %v3249_v3 = vadd.f32 %v3173_v11, %v3027_v28 }
 0x29c   : > { %v3916_v14 = vmul.f32 %v3767_v31, %v3692_v46  ;;  %v4125_v59 = vpack.c.bf16 %v3692_v46, %v3692_v46  ;;  %v6011_v31 = vld [vmem:[#allocation10_spill] sm:$0xff] }
 0x29e   : > { %v3950_v17 = vsel %vm923_vm2, %v3916_v14, 0.0  ;;  %v4022_v48 = vmul.f32 %v3916_v14, %v3692_v46  ;;  %4158 = vst.msk [vmem:[%s4876_s24 + $0x8] sm:$0xf] %vm4155_vm3, %v4125_v59  ;;  %v3777_v46 = vpop.permute.xlu1 %3776 }
 0x29f   : > { %v3951_v18 = vadd.f32 %v3950_v17, %v3949_v29  ;;  %v3176_v19 = vpop.f32.mrf.mxu2  ;;  %v3395_v50 = vpop.f32.mrf.mxu3 }
 0x2a0   : > { %v4055_v34 = vsel %vm923_vm2, %v4022_v48, 0.0  ;;  %v3471_v63 = vadd.f32 %v3395_v50, %v3249_v3  ;;  %v2954_v10 = vpop.f32.mrf.mxu1  ;;  %v3617_v33 = vpop.f32.mrf.mxu0  ;;  %v2856_v3 = vld [vmem:[#allocation2 + $0x1b1] sm:$0xff] }
 0x2a1   : > { %v4056_v52 = vadd.f32 %v4055_v34, %v4054_v20  ;;  %v3028_v56 = vadd.f32 %v2954_v10, %v6006_v22  ;;  %v6012_v22 = vld [vmem:[#allocation8_spill] sm:$0xff] }
 0x2a2   : > { %v3693_v55 = vadd.f32 %v3617_v33, %v3471_v63 }
 0x2a3   : > { %4431 = vmatmul.msk.bf16.gmra.mxu1 %vm923_vm2, %v2876_v62  ;;  %4465 = vmatmul.msk.bf16.gmra.mxu3 %vm923_vm2, %v6009_v60  ;;  %v3250_v0 = vadd.f32 %v3176_v19, %v3028_v56 }
 0x2a4   : > { %v3917_v25 = vmul.f32 %v3772_v36, %v3693_v55  ;;  %v4126_v8 = vpack.c.bf16 %v3693_v55, %v3693_v55  ;;  %v3782_v36 = vpop.permute.xlu2 %3781 }
 0x2a6   : > { %v3952_v44 = vsel %vm923_vm2, %v3917_v25, 0.0  ;;  %v4023_v23 = vmul.f32 %v3917_v25, %v3693_v55  ;;  %4159 = vst.msk [vmem:[%s4876_s24 + $0xc] sm:$0xf] %vm4155_vm3, %v4126_v8 }
 0x2a7   : > { %v3953_v16 = vadd.f32 %v3952_v44, %v3951_v18  ;;  %v3178_v29 = vpop.f32.mrf.mxu2  ;;  %v3398_v11 = vpop.f32.mrf.mxu3  ;;  %v3300_v18 = vld [vmem:[#allocation2 + $0x1c8] sm:$0xff] }
 0x2a8   : > { %v4057_v13 = vsel %vm923_vm2, %v4023_v23, 0.0  ;;  %v3472_v21 = vadd.f32 %v3398_v11, %v3250_v0  ;;  %v2956_v5 = vpop.f32.mrf.mxu1  ;;  %v3620_v7 = vpop.f32.mrf.mxu0  ;;  %v3321_v62 = vpack.c.bf16 %v5596_v51, %v3300_v18  ;;  %v3522_v44 = vld [vmem:[#allocation2 + $0x1c9] sm:$0xff]  ;;  %v5790_v23 = vld [vmem:[#allocation2 + $0x1d1] sm:$0xff] }
 0x2a9   : > { %v4058_v49 = vadd.f32 %v4057_v13, %v4056_v52  ;;  %v3029_v20 = vadd.f32 %v2956_v5, %v6010_v47  ;;  %v2877_v52 = vpack.c.bf16 %v2857_v41, %v2856_v3  ;;  %v3080_v5 = vld [vmem:[#allocation2 + $0x1d7] sm:$0xff]  ;;  %v3543_v47 = vpack.c.bf16 %v5790_v23, %v3522_v44  ;;  %v2858_v3 = vld [vmem:[#allocation2 + $0x1c1] sm:$0xff] }
 0x2aa   : > { %v3694_v28 = vadd.f32 %v3620_v7, %v3472_v21 }
 0x2ab   : > { %4449 = vmatmul.msk.bf16.gmra.mxu2 %vm923_vm2, %v5608_v42  ;;  %4482 = vmatmul.msk.bf16.gmra.mxu0 %vm923_vm2, %v6011_v31  ;;  %v3251_v48 = vadd.f32 %v3178_v29, %v3029_v20  ;;  %v6013_v20 = vld [vmem:[#allocation9_spill] sm:$0xff]  ;;  %v3787_v31 = vpop.permute.xlu0 %3786 }
 0x2ac   : > { %v3918_v40 = vmul.f32 %v3777_v46, %v3694_v28  ;;  %v4127_v14 = vpack.c.bf16 %v3694_v28, %v3694_v28 }
 0x2ae   : > { %v3954_v59 = vsel %vm923_vm2, %v3918_v40, 0.0  ;;  %v4024_v17 = vmul.f32 %v3918_v40, %v3694_v28  ;;  %4160 = vst.msk [vmem:[%s4876_s24 + $0x10] sm:$0xf] %vm4155_vm3, %v4127_v14 }
 0x2af   : > { %v3955_v19 = vadd.f32 %v3954_v59, %v3953_v16  ;;  %v3181_v50 = vpop.f32.mrf.mxu2  ;;  %v3400_v34 = vpop.f32.mrf.mxu3 }
 0x2b0   : > { %v4059_v63 = vsel %vm923_vm2, %v4024_v17, 0.0  ;;  %v3473_v42 = vadd.f32 %v3400_v34, %v3251_v48  ;;  %v2959_v10 = vpop.f32.mrf.mxu1  ;;  %v3622_v33 = vpop.f32.mrf.mxu0 }
 0x2b1   : > { %v4060_v24 = vadd.f32 %v4059_v63, %v4058_v49  ;;  %v3030_v56 = vadd.f32 %v2959_v10, %v6012_v22  ;;  %v3100_v49 = vpack.c.bf16 %v5604_v45, %v3080_v5 }
 0x2b2   : > { %v3695_v55 = vadd.f32 %v3622_v33, %v3473_v42  ;;  %v3302_v42 = vld [vmem:[#allocation2 + $0x1d8] sm:$0xff]  ;;  %v2878_v33 = vpack.c.bf16 %v3522_v44, %v2858_v3 }
 0x2b3   : > { %4432 = vmatmul.msk.bf16.gmra.mxu1 %vm923_vm2, %v2877_v52  ;;  %4466 = vmatmul.msk.bf16.gmra.mxu3 %vm923_vm2, %v3321_v62  ;;  %v3252_v8 = vadd.f32 %v3181_v50, %v3030_v56  ;;  %v6014_v52 = vld [vmem:[#allocation11_spill] sm:$0xff]  ;;  %v3792_v56 = vpop.permute.xlu1 %3791 }
 0x2b4   : > { %v3919_v32 = vmul.f32 %v3782_v36, %v3695_v55  ;;  %v4128_v15 = vpack.c.bf16 %v3695_v55, %v3695_v55 }
 0x2b6   : > { %v3956_v60 = vsel %vm923_vm2, %v3919_v32, 0.0  ;;  %v4025_v25 = vmul.f32 %v3919_v32, %v3695_v55  ;;  %4161 = vst.msk [vmem:[%s4876_s24 + $0x14] sm:$0xf] %vm4155_vm3, %v4128_v15 }
 0x2b7   : > { %v3957_v51 = vadd.f32 %v3956_v60, %v3955_v19  ;;  %v3183_v0 = vpop.f32.mrf.mxu2  ;;  %v3403_v16 = vpop.f32.mrf.mxu3 }
 0x2b8   : > { %v4061_v29 = vsel %vm923_vm2, %v4025_v25, 0.0  ;;  %v3474_v11 = vadd.f32 %v3403_v16, %v3252_v8  ;;  %v2961_v13 = vpop.f32.mrf.mxu1  ;;  %v3625_v21 = vpop.f32.mrf.mxu0  ;;  %v5809_v25 = vld [vmem:[#allocation2 + $0x1e1] sm:$0xff] }
 0x2b9   : > { %v4062_v7 = vadd.f32 %v4061_v29, %v4060_v24  ;;  %v3031_v28 = vadd.f32 %v2961_v13, %v6013_v20  ;;  %v3322_v24 = vpack.c.bf16 %v5616_v26, %v3302_v42  ;;  %v3524_v13 = vld [vmem:[#allocation2 + $0x1d9] sm:$0xff] }
 0x2ba   : > { %v3696_v46 = vadd.f32 %v3625_v21, %v3474_v11  ;;  %v3082_v11 = vld [vmem:[#allocation2 + $0x1e7] sm:$0xff] }
 0x2bb   : > { %4450 = vmatmul.msk.bf16.gmra.mxu2 %vm923_vm2, %v3100_v49  ;;  %4483 = vmatmul.msk.bf16.gmra.mxu0 %vm923_vm2, %v3543_v47  ;;  %v3253_v48 = vadd.f32 %v3183_v0, %v3031_v28  ;;  %v3101_v5 = vpack.c.bf16 %v5624_v61, %v3082_v11  ;;  %v6015_v49 = vld [vmem:[#allocation12_spill] sm:$0xff]  ;;  %v3797_v28 = vpop.permute.xlu2 %3796 }
 0x2bc   : > { %v3920_v40 = vmul.f32 %v3787_v31, %v3696_v46  ;;  %v4129_v14 = vpack.c.bf16 %v3696_v46, %v3696_v46 }
 0x2be   : > { %v3958_v59 = vsel %vm923_vm2, %v3920_v40, 0.0  ;;  %v4026_v17 = vmul.f32 %v3920_v40, %v3696_v46  ;;  %4162 = vst.msk [vmem:[%s4876_s24 + $0x18] sm:$0xf] %vm4155_vm3, %v4129_v14 }
 0x2bf   : > { %v3959_v45 = vadd.f32 %v3958_v59, %v3957_v51  ;;  %v3186_v41 = vpop.f32.mrf.mxu2  ;;  %v3405_v18 = vpop.f32.mrf.mxu3 }
 0x2c0   : > { %v4063_v19 = vsel %vm923_vm2, %v4026_v17, 0.0  ;;  %v3475_v50 = vadd.f32 %v3405_v18, %v3253_v48  ;;  %v2964_v34 = vpop.f32.mrf.mxu1  ;;  %v3627_v63 = vpop.f32.mrf.mxu0  ;;  %v3305_v17 = vld [vmem:[#allocation2 + $0x1f0] sm:$0xff] }
 0x2c1   : > { %v4064_v10 = vadd.f32 %v4063_v19, %v4062_v7  ;;  %v3032_v62 = vadd.f32 %v2964_v34, %v6014_v52  ;;  %v3544_v7 = vpack.c.bf16 %v5809_v25, %v3524_v13  ;;  %v3802_v52 = vpop.permute.xlu0 %3801 }
 0x2c2   : > { %v3697_v22 = vadd.f32 %v3627_v63, %v3475_v50  ;;  %v3304_v50 = vld [vmem:[#allocation2 + $0x1e8] sm:$0xff]  ;;  %v2879_v63 = vpack.c.bf16 %v3524_v13, %v5790_v23 }
 0x2c3   : > { %4433 = vmatmul.msk.bf16.gmra.mxu1 %vm923_vm2, %v2878_v33  ;;  %4467 = vmatmul.msk.bf16.gmra.mxu3 %vm923_vm2, %v3322_v24  ;;  %v3254_v60 = vadd.f32 %v3186_v41, %v3032_v62  ;;  %v3323_v42 = vpack.c.bf16 %v3305_v17, %v3304_v50 }
 0x2c4   : > { %v3921_v55 = vmul.f32 %v3792_v56, %v3697_v22  ;;  %v4130_v36 = vpack.c.bf16 %v3697_v22, %v3697_v22 }
 0x2c6   : > { %v3960_v32 = vsel %vm923_vm2, %v3921_v55, 0.0  ;;  %v4027_v15 = vmul.f32 %v3921_v55, %v3697_v22  ;;  %4163 = vst.msk [vmem:[%s4876_s24 + $0x1c] sm:$0xf] %vm4155_vm3, %v4130_v36 }
 0x2c7   : > { %v3961_v8 = vadd.f32 %v3960_v32, %v3959_v45  ;;  %v3188_v26 = vpop.f32.mrf.mxu2  ;;  %v3408_v44 = vpop.f32.mrf.mxu3  ;;  %v3085_v32 = vld [vmem:[#allocation2 + $0x1ff] sm:$0xff] }
 0x2c8   : > { %v4065_v51 = vsel %vm923_vm2, %v4027_v15, 0.0  ;;  %v3476_v0 = vadd.f32 %v3408_v44, %v3254_v60  ;;  %v2966_v16 = vpop.f32.mrf.mxu1  ;;  %v3630_v29 = vpop.f32.mrf.mxu0  ;;  %v5828_v15 = vld [vmem:[#allocation2 + $0x1f1] sm:$0xff] }
 0x2c9   : > { %v4066_v21 = vadd.f32 %v4065_v51, %v4064_v10  ;;  %v3033_v47 = vadd.f32 %v2966_v16, %v6015_v49  ;;  %v6016_v10 = vld [vmem:[#allocation13_spill] sm:$0xff] }
 0x2ca   : > { %v3698_v20 = vadd.f32 %v3630_v29, %v3476_v0  ;;  %v3084_v16 = vld [vmem:[#allocation2 + $0x1f7] sm:$0xff]  ;;  %v3526_v29 = vld [vmem:[#allocation2 + $0x1e9] sm:$0xff] }
 0x2cb   : > { %4451 = vmatmul.msk.bf16.gmra.mxu2 %vm923_vm2, %v3101_v5  ;;  %4484 = vmatmul.msk.bf16.gmra.mxu0 %vm923_vm2, %v3544_v7  ;;  %v3255_v59 = vadd.f32 %v3188_v26, %v3033_v47  ;;  %v3102_v13 = vpack.c.bf16 %v3085_v32, %v3084_v16  ;;  %v6017_v5 = vld [vmem:[#allocation14_spill] sm:$0xff]  ;;  %v3807_v47 = vpop.permute.xlu1 %3806  ;;  %v2880_v50 = vpack.c.bf16 %v3526_v29, %v5809_v25  ;;  %v3529_v25 = vld [vmem:[#allocation2 + $0x201] sm:$0xff] }
 0x2cc   : > { %v3922_v46 = vmul.f32 %v3797_v28, %v3698_v20  ;;  %v4131_v31 = vpack.c.bf16 %v3698_v20, %v3698_v20 }
 0x2ce   : > { %v3962_v40 = vsel %vm923_vm2, %v3922_v46, 0.0  ;;  %v4028_v14 = vmul.f32 %v3922_v46, %v3698_v20  ;;  %4164 = vst.msk [vmem:[%s4876_s24 + $0x20] sm:$0xf] %vm4155_vm3, %v4131_v31 }
 0x2cf   : > { %v3963_v61 = vadd.f32 %v3962_v40, %v3961_v8  ;;  %v3191_v48 = vpop.f32.mrf.mxu2  ;;  %v3410_v3 = vpop.f32.mrf.mxu3 }
 0x2d0   : > { %v4067_v45 = vsel %vm923_vm2, %v4028_v14, 0.0  ;;  %v3477_v41 = vadd.f32 %v3410_v3, %v3255_v59  ;;  %v2969_v18 = vpop.f32.mrf.mxu1  ;;  %v3632_v19 = vpop.f32.mrf.mxu0  ;;  %v3307_v14 = vld [vmem:[#allocation2 + $0x200] sm:$0xff] }
 0x2d1   : > { %v4068_v34 = vadd.f32 %v4067_v45, %v4066_v21  ;;  %v3034_v33 = vadd.f32 %v2969_v18, %v6016_v10  ;;  %v3545_v21 = vpack.c.bf16 %v5828_v15, %v3526_v29  ;;  %v3306_v18 = vld [vmem:[#allocation2 + $0x1f8] sm:$0xff] }
 0x2d2   : > { %v3699_v24 = vadd.f32 %v3632_v19, %v3477_v41 }
 0x2d3   : > { %4434 = vmatmul.msk.bf16.gmra.mxu1 %vm923_vm2, %v2879_v63  ;;  %4468 = vmatmul.msk.bf16.gmra.mxu3 %vm923_vm2, %v3323_v42  ;;  %v3256_v36 = vadd.f32 %v3191_v48, %v3034_v33  ;;  %v6018_v63 = vld [vmem:[#allocation15_spill] sm:$0xff]  ;;  %v3812_v33 = vpop.permute.xlu2 %3811 }
 0x2d4   : > { %v3923_v62 = vmul.f32 %v3802_v52, %v3699_v24  ;;  %v4132_v22 = vpack.c.bf16 %v3699_v24, %v3699_v24 }
 0x2d6   : > { %v3964_v56 = vsel %vm923_vm2, %v3923_v62, 0.0  ;;  %v4029_v55 = vmul.f32 %v3923_v62, %v3699_v24  ;;  %4165 = vst.msk [vmem:[%s4876_s24 + $0x24] sm:$0xf] %vm4155_vm3, %v4132_v22 }
 0x2d7   : > { %v3965_v23 = vadd.f32 %v3964_v56, %v3963_v61  ;;  %v3193_v60 = vpop.f32.mrf.mxu2  ;;  %v3413_v8 = vpop.f32.mrf.mxu3 }
 0x2d8   : > { %v4069_v26 = vsel %vm923_vm2, %v4029_v55, 0.0  ;;  %v3478_v44 = vadd.f32 %v3413_v8, %v3256_v36  ;;  %v2971_v51 = vpop.f32.mrf.mxu1  ;;  %v3635_v0 = vpop.f32.mrf.mxu0  ;;  %v3087_v55 = vld [vmem:[#allocation2 + $0x20f] sm:$0xff]  ;;  %v3528_v36 = vld [vmem:[#allocation2 + $0x1f9] sm:$0xff] }
 0x2d9   : > { %v4070_v11 = vadd.f32 %v4069_v26, %v4068_v34  ;;  %v3035_v7 = vadd.f32 %v2971_v51, %v6017_v5  ;;  %v3324_v34 = vpack.c.bf16 %v3307_v14, %v3306_v18  ;;  %v2881_v18 = vpack.c.bf16 %v3528_v36, %v5828_v15 }
 0x2da   : > { %v3700_v49 = vadd.f32 %v3635_v0, %v3478_v44  ;;  %v3086_v0 = vld [vmem:[#allocation2 + $0x207] sm:$0xff] }
 0x2db   : > { %4452 = vmatmul.msk.bf16.gmra.mxu2 %vm923_vm2, %v3102_v13  ;;  %4485 = vmatmul.msk.bf16.gmra.mxu0 %vm923_vm2, %v3545_v21  ;;  %v3257_v40 = vadd.f32 %v3193_v60, %v3035_v7  ;;  %v3103_v29 = vpack.c.bf16 %v3087_v55, %v3086_v0  ;;  %v6019_v13 = vld [vmem:[#allocation16_spill] sm:$0xff]  ;;  %v3817_v7 = vpop.permute.xlu0 %3816 }
 0x2dc   : > { %v3924_v20 = vmul.f32 %v3807_v47, %v3700_v49  ;;  %v4133_v28 = vpack.c.bf16 %v3700_v49, %v3700_v49 }
 0x2de   : > { %v3966_v46 = vsel %vm923_vm2, %v3924_v20, 0.0  ;;  %v4030_v31 = vmul.f32 %v3924_v20, %v3700_v49  ;;  %4166 = vst.msk [vmem:[%s4876_s24 + $0x28] sm:$0xf] %vm4155_vm3, %v4133_v28 }
 0x2df   : > { %v3967_v59 = vadd.f32 %v3966_v46, %v3965_v23  ;;  %v3196_v17 = vpop.f32.mrf.mxu2  ;;  %v3415_v61 = vpop.f32.mrf.mxu3 }
 0x2e0   : > { %v4071_v48 = vsel %vm923_vm2, %v4030_v31, 0.0  ;;  %v3479_v3 = vadd.f32 %v3415_v61, %v3257_v40  ;;  %v2974_v45 = vpop.f32.mrf.mxu1  ;;  %v3637_v41 = vpop.f32.mrf.mxu0  ;;  %v3309_v31 = vld [vmem:[#allocation2 + $0x210] sm:$0xff] }
 0x2e1   : > { %v4072_v19 = vadd.f32 %v4071_v48, %v4070_v11  ;;  %v3036_v42 = vadd.f32 %v2974_v45, %v6018_v63  ;;  %v3546_v11 = vpack.c.bf16 %v3529_v25, %v3528_v36  ;;  %v3308_v45 = vld [vmem:[#allocation2 + $0x208] sm:$0xff]  ;;  %v3822_v63 = vpop.permute.xlu1 %3821 }
 0x2e2   : > { %v3701_v10 = vadd.f32 %v3637_v41, %v3479_v3 }
 0x2e3   : > { %4435 = vmatmul.msk.bf16.gmra.mxu1 %vm923_vm2, %v2880_v50  ;;  %4469 = vmatmul.msk.bf16.gmra.mxu3 %vm923_vm2, %v3324_v34  ;;  %v3258_v56 = vadd.f32 %v3196_v17, %v3036_v42 }
 0x2e4   : > { %v3925_v24 = vmul.f32 %v3812_v33, %v3701_v10  ;;  %v4134_v52 = vpack.c.bf16 %v3701_v10, %v3701_v10 }
 0x2e6   : > { %v3968_v62 = vsel %vm923_vm2, %v3925_v24, 0.0  ;;  %v4031_v22 = vmul.f32 %v3925_v24, %v3701_v10  ;;  %4167 = vst.msk [vmem:[%s4876_s24 + $0x2c] sm:$0xf] %vm4155_vm3, %v4134_v52 }
 0x2e7   : > { %v3969_v32 = vadd.f32 %v3968_v62, %v3967_v59  ;;  %v3198_v23 = vpop.f32.mrf.mxu2  ;;  %v3418_v60 = vpop.f32.mrf.mxu3  ;;  %v3530_v62 = vld [vmem:[#allocation2 + $0x209] sm:$0xff] }
 0x2e8   : > { %v4073_v8 = vsel %vm923_vm2, %v4031_v22, 0.0  ;;  %v3480_v26 = vadd.f32 %v3418_v60, %v3258_v56  ;;  %v2976_v44 = vpop.f32.mrf.mxu1  ;;  %v3640_v51 = vpop.f32.mrf.mxu0  ;;  %v3531_v22 = vld [vmem:[#allocation2 + $0x211] sm:$0xff] }
 0x2e9   : > { %v4074_v16 = vadd.f32 %v4073_v8, %v4072_v19  ;;  %v3037_v21 = vadd.f32 %v2976_v44, %v6019_v13  ;;  %v3325_v19 = vpack.c.bf16 %v3309_v31, %v3308_v45  ;;  %v3547_v60 = vpack.c.bf16 %v3531_v22, %v3530_v62  ;;  %v3827_v44 = vpop.permute.xlu2 %3826 }
 0x2ea   : > { %v3702_v5 = vadd.f32 %v3640_v51, %v3480_v26 }
 0x2eb   : > { %4453 = vmatmul.msk.bf16.gmra.mxu2 %vm923_vm2, %v3103_v29  ;;  %4486 = vmatmul.msk.bf16.gmra.mxu0 %vm923_vm2, %v3546_v11  ;;  %v3259_v46 = vadd.f32 %v3198_v23, %v3037_v21 }
 0x2ec   : > { %v3926_v49 = vmul.f32 %v3817_v7, %v3702_v5  ;;  %v4135_v47 = vpack.c.bf16 %v3702_v5, %v3702_v5 }
 0x2ee   : > { %v3970_v20 = vsel %vm923_vm2, %v3926_v49, 0.0  ;;  %v4032_v28 = vmul.f32 %v3926_v49, %v3702_v5  ;;  %4168 = vst.msk [vmem:[%s4876_s24 + $0x30] sm:$0xf] %vm4155_vm3, %v4135_v47 }
 0x2ef   : > { %v3971_v40 = vadd.f32 %v3970_v20, %v3969_v32  ;;  %v3201_v14 = vpop.f32.mrf.mxu2  ;;  %v3420_v59 = vpop.f32.mrf.mxu3 }
 0x2f0   : > { %v4075_v17 = vsel %vm923_vm2, %v4032_v28, 0.0  ;;  %v3481_v61 = vadd.f32 %v3420_v59, %v3259_v46  ;;  %v2979_v48 = vpop.f32.mrf.mxu1  ;;  %v3642_v3 = vpop.f32.mrf.mxu0  ;;  %v6020_v28 = vld [vmem:[#allocation17_spill] sm:$0xff] }
 0x2f1   : > { %v4076_v41 = vadd.f32 %v4075_v17, %v4074_v16  ;;  %v3038_v50 = vadd.f32 %v2979_v48, %v5635_v30 }
 0x2f2   : > { %v3703_v34 = vadd.f32 %v3642_v3, %v3481_v61 }
 0x2f3   : > { %4436 = vmatmul.msk.bf16.gmra.mxu1 %vm923_vm2, %v2881_v18  ;;  %4470 = vmatmul.msk.bf16.gmra.mxu3 %vm923_vm2, %v3325_v19  ;;  %v3260_v52 = vadd.f32 %v3201_v14, %v3038_v50 }
 0x2f4   : > { %v3927_v42 = vmul.f32 %v3822_v63, %v3703_v34  ;;  %v4136_v10 = vpack.c.bf16 %v3703_v34, %v3703_v34 }
 0x2f6   : > { %v3972_v33 = vsel %vm923_vm2, %v3927_v42, 0.0  ;;  %v4033_v24 = vmul.f32 %v3927_v42, %v3703_v34  ;;  %4169 = vst.msk [vmem:[%s4876_s24 + $0x34] sm:$0xf] %vm4155_vm3, %v4136_v10 }
 0x2f7   : > { %v3973_v15 = vadd.f32 %v3972_v33, %v3971_v40  ;;  %v3203_v56 = vpop.f32.mrf.mxu2  ;;  %v3423_v30 = vpop.f32.mrf.mxu3 }
 0x2f8   : > { %v4077_v55 = vsel %vm923_vm2, %v4033_v24, 0.0  ;;  %v3482_v36 = vadd.f32 %v3423_v30, %v3260_v52  ;;  %v2981_v25 = vpop.f32.mrf.mxu1  ;;  %v3645_v32 = vpop.f32.mrf.mxu0 }
 0x2f9   : > { %v4078_v23 = vadd.f32 %v4077_v55, %v4076_v41  ;;  %v3039_v8 = vadd.f32 %v2981_v25, %v5640_v37  ;;  %v3832_v40 = vpop.permute.xlu0 %3831  ;;  %v3837_v33 = vpop.permute.xlu1 %3836 }
 0x2fa   : > { %v3704_v26 = vadd.f32 %v3645_v32, %v3482_v36 }
 0x2fb   : > { %4487 = vmatmul.msk.bf16.gmra.mxu0 %vm923_vm2, %v3547_v60  ;;  %v3261_v11 = vadd.f32 %v3203_v56, %v3039_v8 }
 0x2fc   : > { %v3928_v51 = vmul.f32 %v3827_v44, %v3704_v26  ;;  %v4137_v0 = vpack.c.bf16 %v3704_v26, %v3704_v26 }
 0x2fe   : > { %v3974_v16 = vsel %vm923_vm2, %v3928_v51, 0.0  ;;  %v4034_v29 = vmul.f32 %v3928_v51, %v3704_v26  ;;  %4170 = vst.msk [vmem:[%s4876_s24 + $0x38] sm:$0xf] %vm4155_vm3, %v4137_v0  ;;  %v3842_v26 = vpop.permute.xlu2 %3841 }
 0x2ff   : > { %v3975_v13 = vadd.f32 %v3974_v16, %v3973_v15  ;;  %v3206_v21 = vpop.f32.mrf.mxu2  ;;  %v3425_v5 = vpop.f32.mrf.mxu3 }
 0x300   : > { %v4079_v7 = vsel %vm923_vm2, %v4034_v29, 0.0  ;;  %v3483_v49 = vadd.f32 %v3425_v5, %v3261_v11  ;;  %v2984_v37 = vpop.f32.mrf.mxu1  ;;  %v3647_v47 = vpop.f32.mrf.mxu0 }
 0x301   : > { %v4080_v20 = vadd.f32 %v4079_v7, %v4078_v23  ;;  %v3040_v46 = vadd.f32 %v2984_v37, %v6020_v28  ;;  %v3847_v28 = vpop.permute.xlu0 %3846 }
 0x302   : > { %v3705_v31 = vadd.f32 %v3647_v47, %v3483_v49 }
 0x303   : > { %v3262_v48 = vadd.f32 %v3206_v21, %v3040_v46 }
 0x304   : > { %v3929_v14 = vmul.f32 %v3832_v40, %v3705_v31  ;;  %v4138_v59 = vpack.c.bf16 %v3705_v31, %v3705_v31 }
 0x306   : > { %v3976_v17 = vsel %vm923_vm2, %v3929_v14, 0.0  ;;  %v4035_v61 = vmul.f32 %v3929_v14, %v3705_v31  ;;  %4171 = vst.msk [vmem:[%s4876_s24 + $0x3c] sm:$0xf] %vm4155_vm3, %v4138_v59 }
 0x307   : > { %v3977_v3 = vadd.f32 %v3976_v17, %v3975_v13  ;;  %v3208_v45 = vpop.f32.mrf.mxu2  ;;  %v3428_v41 = vpop.f32.mrf.mxu3 }
 0x308   : > { %v4081_v18 = vsel %vm923_vm2, %v4035_v61, 0.0  ;;  %v3484_v19 = vadd.f32 %v3428_v41, %v3262_v48  ;;  %v2986_v50 = vpop.f32.mrf.mxu1  ;;  %v3650_v34 = vpop.f32.mrf.mxu0 }
 0x309   : > { %v4082_v63 = vadd.f32 %v4081_v18, %v4080_v20  ;;  %v3041_v42 = vadd.f32 %v2986_v50, %v5650_v4 }
 0x30a   : > { %v3706_v10 = vadd.f32 %v3650_v34, %v3484_v19  ;;  %v3852_v34 = vpop.permute.xlu1 %3851 }
 0x30b   : > { %v3263_v15 = vadd.f32 %v3208_v45, %v3041_v42 }
 0x30c   : > { %v3930_v24 = vmul.f32 %v3837_v33, %v3706_v10  ;;  %v4139_v52 = vpack.c.bf16 %v3706_v10, %v3706_v10 }
 0x30e   : > { %v3978_v62 = vsel %vm923_vm2, %v3930_v24, 0.0  ;;  %v4036_v22 = vmul.f32 %v3930_v24, %v3706_v10  ;;  %4172 = vst.msk [vmem:[%s4876_s24 + $0x40] sm:$0xf] %vm4155_vm3, %v4139_v52 }
 0x30f   : > { %v3979_v56 = vadd.f32 %v3978_v62, %v3977_v3  ;;  %v3211_v30 = vpop.f32.mrf.mxu2  ;;  %v3430_v55 = vpop.f32.mrf.mxu3 }
 0x310   : > { %v4083_v36 = vsel %vm923_vm2, %v4036_v22, 0.0  ;;  %v3485_v25 = vadd.f32 %v3430_v55, %v3263_v15  ;;  %v2989_v32 = vpop.f32.mrf.mxu1  ;;  %v3652_v23 = vpop.f32.mrf.mxu0 }
 0x311   : > { %v4084_v4 = vadd.f32 %v4083_v36, %v4082_v63  ;;  %v3042_v60 = vadd.f32 %v2989_v32, %v5655_v12  ;;  %v3857_v32 = vpop.permute.xlu2 %3856 }
 0x312   : > { %v3707_v8 = vadd.f32 %v3652_v23, %v3485_v25 }
 0x313   : > { %v3264_v29 = vadd.f32 %v3211_v30, %v3042_v60 }
 0x314   : > { %v3931_v44 = vmul.f32 %v3842_v26, %v3707_v8  ;;  %v4140_v51 = vpack.c.bf16 %v3707_v8, %v3707_v8 }
 0x316   : > { %v3980_v0 = vsel %vm923_vm2, %v3931_v44, 0.0  ;;  %v4037_v16 = vmul.f32 %v3931_v44, %v3707_v8  ;;  %4173 = vst.msk [vmem:[%s4876_s24 + $0x44] sm:$0xf] %vm4155_vm3, %v4140_v51 }
 0x317   : > { %v3981_v11 = vadd.f32 %v3980_v0, %v3979_v56  ;;  %v3213_v13 = vpop.f32.mrf.mxu2  ;;  %v3433_v21 = vpop.f32.mrf.mxu3 }
 0x318   : > { %v4085_v5 = vsel %vm923_vm2, %v4037_v16, 0.0  ;;  %v3486_v7 = vadd.f32 %v3433_v21, %v3264_v29  ;;  %v2991_v49 = vpop.f32.mrf.mxu1  ;;  %v3655_v37 = vpop.f32.mrf.mxu0 }
 0x319   : > { %v4086_v12 = vadd.f32 %v4085_v5, %v4084_v4  ;;  %v3043_v47 = vadd.f32 %v2991_v49, %v5660_v6 }
 0x31a   : > { %v3708_v20 = vadd.f32 %v3655_v37, %v3486_v7  ;;  %v3862_v7 = vpop.permute.xlu0 %3861 }
 0x31b   : > { %v3265_v59 = vadd.f32 %v3213_v13, %v3043_v47 }
 0x31c   : > { %v3932_v46 = vmul.f32 %v3847_v28, %v3708_v20  ;;  %v4141_v31 = vpack.c.bf16 %v3708_v20, %v3708_v20 }
 0x31e   : > { %v3982_v40 = vsel %vm923_vm2, %v3932_v46, 0.0  ;;  %v4038_v14 = vmul.f32 %v3932_v46, %v3708_v20  ;;  %4174 = vst.msk [vmem:[%s4876_s24 + $0x48] sm:$0xf] %vm4155_vm3, %v4141_v31 }
 0x31f   : > { %v3983_v17 = vadd.f32 %v3982_v40, %v3981_v11  ;;  %v3216_v61 = vpop.f32.mrf.mxu2  ;;  %v3435_v48 = vpop.f32.mrf.mxu3 }
 0x320   : > { %v4087_v3 = vsel %vm923_vm2, %v4038_v14, 0.0  ;;  %v3487_v45 = vadd.f32 %v3435_v48, %v3265_v59  ;;  %v2994_v41 = vpop.f32.mrf.mxu1  ;;  %v3657_v18 = vpop.f32.mrf.mxu0 }
 0x321   : > { %v4088_v6 = vadd.f32 %v4087_v3, %v4086_v12  ;;  %v3044_v19 = vadd.f32 %v2994_v41, %v5665_v2  ;;  %v3867_v3 = vpop.permute.xlu1 %3866 }
 0x322   : > { %v3709_v50 = vadd.f32 %v3657_v18, %v3487_v45 }
 0x323   : > { %v3266_v24 = vadd.f32 %v3216_v61, %v3044_v19 }
 0x324   : > { %v3933_v63 = vmul.f32 %v3852_v34, %v3709_v50  ;;  %v4142_v42 = vpack.c.bf16 %v3709_v50, %v3709_v50 }
 0x326   : > { %v3984_v10 = vsel %vm923_vm2, %v3933_v63, 0.0  ;;  %v4039_v33 = vmul.f32 %v3933_v63, %v3709_v50  ;;  %4175 = vst.msk [vmem:[%s4876_s24 + $0x4c] sm:$0xf] %vm4155_vm3, %v4142_v42 }
 0x327   : > { %v3985_v52 = vadd.f32 %v3984_v10, %v3983_v17  ;;  %v3218_v62 = vpop.f32.mrf.mxu2  ;;  %v3438_v22 = vpop.f32.mrf.mxu3 }
 0x328   : > { %v4089_v15 = vsel %vm923_vm2, %v4039_v33, 0.0  ;;  %v3488_v56 = vadd.f32 %v3438_v22, %v3266_v24  ;;  %v2996_v30 = vpop.f32.mrf.mxu1  ;;  %v3660_v55 = vpop.f32.mrf.mxu0 }
 0x329   : > { %v4090_v2 = vadd.f32 %v4089_v15, %v4088_v6  ;;  %v3045_v36 = vadd.f32 %v2996_v30, %v5670_v58  ;;  %v3872_v22 = vpop.permute.xlu2 %3871 }
 0x32a   : > { %v3710_v25 = vadd.f32 %v3660_v55, %v3488_v56 }
 0x32b   : > { %v3267_v26 = vadd.f32 %v3218_v62, %v3045_v36 }
 0x32c   : > { %v3934_v23 = vmul.f32 %v3857_v32, %v3710_v25  ;;  %v4143_v4 = vpack.c.bf16 %v3710_v25, %v3710_v25 }
 0x32e   : > { %v3986_v60 = vsel %vm923_vm2, %v3934_v23, 0.0  ;;  %v4040_v8 = vmul.f32 %v3934_v23, %v3710_v25  ;;  %4176 = vst.msk [vmem:[%s4876_s24 + $0x50] sm:$0xf] %vm4155_vm3, %v4143_v4 }
 0x32f   : > { %v3987_v44 = vadd.f32 %v3986_v60, %v3985_v52  ;;  %v3221_v51 = vpop.f32.mrf.mxu2  ;;  %v3440_v0 = vpop.f32.mrf.mxu3 }
 0x330   : > { %v4091_v16 = vsel %vm923_vm2, %v4040_v8, 0.0  ;;  %v3489_v29 = vadd.f32 %v3440_v0, %v3267_v26  ;;  %v2999_v11 = vpop.f32.mrf.mxu1  ;;  %v3662_v13 = vpop.f32.mrf.mxu0 }
 0x331   : > { %v4092_v58 = vadd.f32 %v4091_v16, %v4090_v2  ;;  %v3046_v21 = vadd.f32 %v2999_v11, %v5675_v54 }
 0x332   : > { %v3711_v5 = vadd.f32 %v3662_v13, %v3489_v29 }
 0x333   : > { %v3268_v20 = vadd.f32 %v3221_v51, %v3046_v21  ;;  %v3877_v51 = vpop.permute.xlu0 %3876 }
 0x334   : > { %v3935_v49 = vmul.f32 %v3862_v7, %v3711_v5  ;;  %v4144_v37 = vpack.c.bf16 %v3711_v5, %v3711_v5 }
 0x336   : > { %v3988_v12 = vsel %vm923_vm2, %v3935_v49, 0.0  ;;  %v4041_v47 = vmul.f32 %v3935_v49, %v3711_v5  ;;  %4177 = vst.msk [vmem:[%s4876_s24 + $0x54] sm:$0xf] %vm4155_vm3, %v4144_v37 }
 0x337   : > { %v3989_v28 = vadd.f32 %v3988_v12, %v3987_v44  ;;  %v3223_v46 = vpop.f32.mrf.mxu2  ;;  %v3443_v31 = vpop.f32.mrf.mxu3 }
 0x338   : > { %v4093_v40 = vsel %vm923_vm2, %v4041_v47, 0.0  ;;  %v3490_v14 = vadd.f32 %v3443_v31, %v3268_v20  ;;  %v3001_v59 = vpop.f32.mrf.mxu1  ;;  %v3665_v17 = vpop.f32.mrf.mxu0 }
 0x339   : > { %v4094_v54 = vadd.f32 %v4093_v40, %v4092_v58  ;;  %v3047_v61 = vadd.f32 %v3001_v59, %v5680_v43 }
 0x33a   : > { %v3712_v48 = vadd.f32 %v3665_v17, %v3490_v14 }
 0x33b   : > { %v3269_v19 = vadd.f32 %v3223_v46, %v3047_v61 }
 0x33c   : > { %v3936_v45 = vmul.f32 %v3867_v3, %v3712_v48  ;;  %v4145_v41 = vpack.c.bf16 %v3712_v48, %v3712_v48 }
 0x33e   : > { %v3990_v18 = vsel %vm923_vm2, %v3936_v45, 0.0  ;;  %v4042_v6 = vmul.f32 %v3936_v45, %v3712_v48  ;;  %4178 = vst.msk [vmem:[%s4876_s24 + $0x58] sm:$0xf] %vm4155_vm3, %v4145_v41 }
 0x33f   : > { %v3991_v50 = vadd.f32 %v3990_v18, %v3989_v28  ;;  %v3226_v34 = vpop.f32.mrf.mxu2  ;;  %v3445_v63 = vpop.f32.mrf.mxu3 }
 0x340   : > { %v4095_v42 = vsel %vm923_vm2, %v4042_v6, 0.0  ;;  %v3491_v10 = vadd.f32 %v3445_v63, %v3269_v19  ;;  %v3004_v33 = vpop.f32.mrf.mxu1  ;;  %v3667_v24 = vpop.f32.mrf.mxu0 }
 0x341   : > { %v4096_v43 = vadd.f32 %v4095_v42, %v4094_v54  ;;  %v3048_v52 = vadd.f32 %v3004_v33, %v5685_v1  ;;  %v3882_v28 = vpop.permute.xlu1 %3881  ;;  %v3887_v19 = vpop.permute.xlu2 %3886 }
 0x342   : > { %v3713_v62 = vadd.f32 %v3667_v24, %v3491_v10 }
 0x343   : > { %v3270_v2 = vadd.f32 %v3226_v34, %v3048_v52 }
 0x344   : > { %v3937_v15 = vmul.f32 %v3872_v22, %v3713_v62  ;;  %v4146_v56 = vpack.c.bf16 %v3713_v62, %v3713_v62 }
 0x346   : > { %v3992_v30 = vsel %vm923_vm2, %v3937_v15, 0.0  ;;  %v4043_v55 = vmul.f32 %v3937_v15, %v3713_v62  ;;  %4179 = vst.msk [vmem:[%s4876_s24 + $0x5c] sm:$0xf] %vm4155_vm3, %v4146_v56 }
 0x347   : > { %v3993_v36 = vadd.f32 %v3992_v30, %v3991_v50  ;;  %v3228_v25 = vpop.f32.mrf.mxu2  ;;  %v3448_v32 = vpop.f32.mrf.mxu3 }
 0x348   : > { %v4097_v23 = vsel %vm923_vm2, %v4043_v55, 0.0  ;;  %v3492_v4 = vadd.f32 %v3448_v32, %v3270_v2  ;;  %v3006_v60 = vpop.f32.mrf.mxu1  ;;  %v3670_v8 = vpop.f32.mrf.mxu0 }
 0x349   : > { %v4098_v1 = vadd.f32 %v4097_v23, %v4096_v43  ;;  %v3049_v26 = vadd.f32 %v3006_v60, %v5690_v27  ;;  %v3892_v55 = vpop.permute.xlu0 %3891 }
 0x34a   : > { %v3714_v44 = vadd.f32 %v3670_v8, %v3492_v4 }
 0x34b   : > { %v3271_v13 = vadd.f32 %v3228_v25, %v3049_v26 }
 0x34c   : > { %v3938_v0 = vmul.f32 %v3877_v51, %v3714_v44  ;;  %v4147_v16 = vpack.c.bf16 %v3714_v44, %v3714_v44 }
 0x34e   : > { %v3994_v29 = vsel %vm923_vm2, %v3938_v0, 0.0  ;;  %v4044_v11 = vmul.f32 %v3938_v0, %v3714_v44  ;;  %4180 = vst.msk [vmem:[%s4876_s24 + $0x60] sm:$0xf] %vm4155_vm3, %v4147_v16 }
 0x34f   : > { %v3995_v58 = vadd.f32 %v3994_v29, %v3993_v36  ;;  %v3231_v21 = vpop.f32.mrf.mxu2  ;;  %v3450_v5 = vpop.f32.mrf.mxu3 }
 0x350   : > { %v4099_v7 = vsel %vm923_vm2, %v4044_v11, 0.0  ;;  %v3493_v49 = vadd.f32 %v3450_v5, %v3271_v13  ;;  %v3009_v37 = vpop.f32.mrf.mxu1  ;;  %v3672_v12 = vpop.f32.mrf.mxu0 }
 0x351   : > { %v4100_v27 = vadd.f32 %v4099_v7, %v4098_v1  ;;  %v3050_v47 = vadd.f32 %v3009_v37, %v5696_v9  ;;  %v3897_v29 = vpop.permute.xlu1 %3896 }
 0x352   : > { %v3715_v20 = vadd.f32 %v3672_v12, %v3493_v49 }
 0x353   : > { %v3272_v59 = vadd.f32 %v3231_v21, %v3050_v47 }
 0x354   : > { %v3939_v46 = vmul.f32 %v3882_v28, %v3715_v20  ;;  %v4148_v31 = vpack.c.bf16 %v3715_v20, %v3715_v20 }
 0x356   : > { %v3996_v40 = vsel %vm923_vm2, %v3939_v46, 0.0  ;;  %v4045_v14 = vmul.f32 %v3939_v46, %v3715_v20  ;;  %4181 = vst.msk [vmem:[%s4876_s24 + $0x64] sm:$0xf] %vm4155_vm3, %v4148_v31  ;;  %v3902_v46 = vpop.permute.xlu2 %3901 }
 0x357   : > { %v3997_v17 = vadd.f32 %v3996_v40, %v3995_v58  ;;  %v3233_v54 = vpop.f32.mrf.mxu2  ;;  %v3453_v61 = vpop.f32.mrf.mxu3 }
 0x358   : > { %v4101_v48 = vsel %vm923_vm2, %v4045_v14, 0.0  ;;  %v3494_v3 = vadd.f32 %v3453_v61, %v3272_v59  ;;  %v3011_v45 = vpop.f32.mrf.mxu1  ;;  %v3675_v41 = vpop.f32.mrf.mxu0 }
 0x359   : > { %v4102_v9 = vadd.f32 %v4101_v48, %v4100_v27  ;;  %v3051_v18 = vadd.f32 %v3011_v45, %v5702_v39 }
 0x35a   : > { %v3716_v6 = vadd.f32 %v3675_v41, %v3494_v3 }
 0x35b   : > { %v3273_v10 = vadd.f32 %v3233_v54, %v3051_v18 }
 0x35c   : > { %v3940_v50 = vmul.f32 %v3887_v19, %v3716_v6  ;;  %v4149_v34 = vpack.c.bf16 %v3716_v6, %v3716_v6  ;;  %v3907_v19 = vpop.permute.xlu0 %3906 }
 0x35e   : > { %v3998_v63 = vsel %vm923_vm2, %v3940_v50, 0.0  ;;  %v4046_v42 = vmul.f32 %v3940_v50, %v3716_v6  ;;  %4182 = vst.msk [vmem:[%s4876_s24 + $0x68] sm:$0xf] %vm4155_vm3, %v4149_v34 }
 0x35f   : > { %v3999_v33 = vadd.f32 %v3998_v63, %v3997_v17  ;;  %v3236_v24 = vpop.f32.mrf.mxu2  ;;  %v3455_v43 = vpop.f32.mrf.mxu3 }
 0x360   : > { %v4103_v52 = vsel %vm923_vm2, %v4046_v42, 0.0  ;;  %v3495_v62 = vadd.f32 %v3455_v43, %v3273_v10  ;;  %v3014_v22 = vpop.f32.mrf.mxu1  ;;  %v3677_v15 = vpop.f32.mrf.mxu0 }
 0x361   : > { %v4104_v39 = vadd.f32 %v4103_v52, %v4102_v9  ;;  %v3052_v56 = vadd.f32 %v3014_v22, %v5708_v38 }
 0x362   : > { %v3717_v30 = vadd.f32 %v3677_v15, %v3495_v62 }
 0x363   : > { %v3274_v23 = vadd.f32 %v3236_v24, %v3052_v56 }
 0x364   : > { %v3941_v2 = vmul.f32 %v3892_v55, %v3717_v30  ;;  %v4150_v36 = vpack.c.bf16 %v3717_v30, %v3717_v30 }
 0x366   : > { %v4000_v25 = vsel %vm923_vm2, %v3941_v2, 0.0  ;;  %v4047_v32 = vmul.f32 %v3941_v2, %v3717_v30  ;;  %4183 = vst.msk [vmem:[%s4876_s24 + $0x6c] sm:$0xf] %vm4155_vm3, %v4150_v36 }
 0x367   : > { %v4001_v4 = vadd.f32 %v4000_v25, %v3999_v33  ;;  %v3458_v60 = vpop.f32.mrf.mxu3  ;;  %v3238_v38 = vpop.f32.mrf.mxu2 }
 0x368   : > { %v4105_v8 = vsel %vm923_vm2, %v4047_v32, 0.0  ;;  %v3496_v1 = vadd.f32 %v3458_v60, %v3274_v23  ;;  %v3016_v26 = vpop.f32.mrf.mxu1  ;;  %v3680_v44 = vpop.f32.mrf.mxu0 }
 0x369   : > { %v4106_v51 = vadd.f32 %v4105_v8, %v4104_v39  ;;  %v3053_v0 = vadd.f32 %v3016_v26, %v5715_v35  ;;  %v3912_v39 = vpop.permute.xlu1 %3911 }
 0x36a   : > { %v3718_v16 = vadd.f32 %v3680_v44, %v3496_v1 }
 0x36b   : > { %v3275_v5 = vadd.f32 %v3238_v38, %v3053_v0  ;;  %v3946_v0 = vld [vmem:[%s5977_s10] sm:$0x1] }
 0x36c   : > { %v3942_v11 = vmul.f32 %v3897_v29, %v3718_v16  ;;  %v4151_v13 = vpack.c.bf16 %v3718_v16, %v3718_v16 }
 0x36e   : > { %v4002_v58 = vsel %vm923_vm2, %v3942_v11, 0.0  ;;  %v4048_v21 = vmul.f32 %v3942_v11, %v3718_v16  ;;  %4184 = vst.msk [vmem:[%s4876_s24 + $0x70] sm:$0xf] %vm4155_vm3, %v4151_v13  ;;  %v4019_v11 = vld [vmem:[%s5978_s11] sm:$0x1] }
 0x36f   : > { %v4003_v7 = vadd.f32 %v4002_v58, %v4001_v4  ;;  %v3460_v49 = vpop.f32.mrf.mxu3  ;;  %v3241_v31 = vpop.f32.mrf.mxu2 }
 0x370   : > { %v4107_v37 = vsel %vm923_vm2, %v4048_v21, 0.0  ;;  %v3497_v12 = vadd.f32 %v3460_v49, %v3275_v5  ;;  %v3019_v27 = vpop.f32.mrf.mxu1  ;;  %v3682_v47 = vpop.f32.mrf.mxu0 }
 0x371   : > { %v4108_v20 = vadd.f32 %v4107_v37, %v4106_v51  ;;  %v3054_v35 = vadd.f32 %v3019_v27, %v5720_v53 }
 0x372   : > { %v3719_v28 = vadd.f32 %v3682_v47, %v3497_v12 }
 0x373   : > { %v3276_v54 = vadd.f32 %v3241_v31, %v3054_v35 }
 0x374   : > { %v3943_v40 = vmul.f32 %v3902_v46, %v3719_v28  ;;  %v4152_v14 = vpack.c.bf16 %v3719_v28, %v3719_v28 }
 0x376   : > { %v4004_v59 = vsel %vm923_vm2, %v3943_v40, 0.0  ;;  %v4049_v17 = vmul.f32 %v3943_v40, %v3719_v28  ;;  %4185 = vst.msk [vmem:[%s4876_s24 + $0x74] sm:$0xf] %vm4155_vm3, %v4152_v14 }
 0x377   : > { %v4005_v61 = vadd.f32 %v4004_v59, %v4003_v7  ;;  %v3463_v48 = vpop.f32.mrf.mxu3  ;;  %v3243_v63 = vpop.f32.mrf.mxu2 }
 0x378   : > { %v4109_v3 = vsel %vm923_vm2, %v4049_v17, 0.0  ;;  %v3498_v45 = vadd.f32 %v3463_v48, %v3276_v54  ;;  %v3021_v41 = vpop.f32.mrf.mxu1  ;;  %v3685_v9 = vpop.f32.mrf.mxu0 }
 0x379   : > { %v4110_v53 = vadd.f32 %v4109_v3, %v4108_v20  ;;  %v3055_v18 = vadd.f32 %v3021_v41, %v5727_v57 }
 0x37a   : > { %v3720_v6 = vadd.f32 %v3685_v9, %v3498_v45 }
 0x37b   : > { %v3277_v33 = vadd.f32 %v3243_v63, %v3055_v18 }
 0x37c   : > { %v3944_v50 = vmul.f32 %v3907_v19, %v3720_v6  ;;  %v4153_v34 = vpack.c.bf16 %v3720_v6, %v3720_v6 }
 0x37e   : > { %v4006_v42 = vsel %vm923_vm2, %v3944_v50, 0.0  ;;  %v4050_v10 = vmul.f32 %v3944_v50, %v3720_v6  ;;  %4186 = vst.msk [vmem:[%s4876_s24 + $0x78] sm:$0xf] %vm4155_vm3, %v4153_v34 }
 0x37f   : > { %v4007_v24 = vadd.f32 %v4006_v42, %v4005_v61  ;;  %v3465_v43 = vpop.f32.mrf.mxu3 }
 0x380   : > { %v4111_v52 = vsel %vm923_vm2, %v4050_v10, 0.0  ;;  %v3499_v62 = vadd.f32 %v3465_v43, %v3277_v33  ;;  %v3687_v22 = vpop.f32.mrf.mxu0 }
 0x381   : > { %v4112_v15 = vadd.f32 %v4111_v52, %v4110_v53 }
 0x382   : > { %v3721_v57 = vadd.f32 %v3687_v22, %v3499_v62 }
 0x384   : > { %v3945_v56 = vmul.f32 %v3912_v39, %v3721_v57  ;;  %v4154_v30 = vpack.c.bf16 %v3721_v57, %v3721_v57 }
 0x386   : > { %v4008_v55 = vsel %vm923_vm2, %v3945_v56, 0.0  ;;  %v4051_v2 = vmul.f32 %v3945_v56, %v3721_v57  ;;  %4187 = vst.msk [vmem:[%s4876_s24 + $0x7c] sm:$0xf] %vm4155_vm3, %v4154_v30 }
 0x387   : > { %v4009_v36 = vadd.f32 %v4008_v55, %v4007_v24 }
 0x388   : > { %v4113_v25 = vsel %vm923_vm2, %v4051_v2, 0.0 }
 0x389   : > { %v4010_v32 = vrot.slane %v4009_v36, 4  ;;  %v4114_v23 = vadd.f32 %v4113_v25, %v4112_v15 }
 0x38b   : > { %v4011_v4 = vadd.f32 %v4010_v32, %v4009_v36  ;;  %v4115_v60 = vrot.slane %v4114_v23, 4 }
 0x38d   : > { %v4012_v8 = vrot.slane %v4011_v4, 2  ;;  %v4116_v1 = vadd.f32 %v4115_v60, %v4114_v23 }
 0x38f   : > { %v4013_v26 = vadd.f32 %v4012_v8, %v4011_v4  ;;  %v4117_v44 = vrot.slane %v4116_v1, 2 }
 0x391   : > { %v4014_v51 = vrot.slane %v4013_v26, 1  ;;  %v4118_v38 = vadd.f32 %v4117_v44, %v4116_v1 }
 0x393   : > { %v4015_v16 = vadd.f32 %v4014_v51, %v4013_v26  ;;  %v4119_v29 = vrot.slane %v4118_v38, 1 }
 0x395   : > { %v4016_v13 = vadd.f32 %v4015_v16, %v3946_v0  ;;  %v4120_v58 = vadd.f32 %v4119_v29, %v4118_v38 }
 0x397   : > { %4018 = vst.msk [vmem:[%s5977_s10] sm:$0x1] %vm4017_vm4, %v4016_v13  ;;  %v4121_v21 = vadd.f32 %v4120_v58, %v4019_v11 }
 0x399   : > { %4122 = vst.msk [vmem:[%s5978_s11] sm:$0x1] %vm4017_vm4, %v4121_v21 }
 0x39a PF: > { %s22_s17 = sadd.s32 1, %s4769_s17  }
 0x39b   : > { %p19_p11 = scmp.ge.s32.totalorder %s22_s17, 6  }
 0x39d   :  { %21 = sbr.rel (!%p19_p11) target bundleno = 2 (0x2), region = 129 }

</bundles_post_ra>
